<compile_context>
chip_gen: v5e
topology: v5e:2x2
jax: 0.10.0
libtpu: 0.0.40
codegen_flags: <defaults>
</compile_context>

<pallas_src>
import math
from functools import partial

import jax
import jax.numpy as jnp
from jax import lax
from jax.experimental import pallas as pl
from jax.experimental.pallas import tpu as pltpu


def _gru_kernel(x_ref, w0_ref, w1_ref, uh_ref, b_ref, out_ref, *, act_dtype, unroll):
    """Grid = (row_tiles,).  The whole T recurrence runs inside the kernel, the hidden
    state is carried as a fori_loop value (stays in vregs), and each fresh h is stored
    straight to out_ref[t]."""
    d = x_ref.shape[-1]
    t_total = out_ref.shape[0]
    bias = b_ref[...]                                    # (1, 3D) f32 fused bias

    # t == 0 : h == 0, so all U-terms (and (r*h)@Uh) vanish -> one fused matmul on x.
    g0 = jnp.dot(x_ref[...], w0_ref[...], preferred_element_type=jnp.float32) + bias
    g0a = g0.astype(act_dtype)
    z0 = jax.nn.sigmoid(g0a[:, :d]).astype(jnp.float32)
    hhat0 = jnp.tanh(g0a[:, 2 * d:]).astype(jnp.float32)
    h0 = z0 * hhat0                                      # (1 - z) * h == 0 at t == 0
    out_ref[0] = h0.astype(out_ref.dtype)

    def step(t, h):
        # The module feeds y_{t-1} back as BOTH input and hidden state, so
        # x@Wg + h@Ug == h@(Wg + Ug) for the z / r gates (folded in the wrapper).
        hc = h.astype(w1_ref.dtype)
        g = jnp.dot(hc, w1_ref[...], preferred_element_type=jnp.float32) + bias
        ga = g.astype(act_dtype)
        z = jax.nn.sigmoid(ga[:, :d]).astype(jnp.float32)
        r = jax.nn.sigmoid(ga[:, d:2 * d]).astype(jnp.float32)
        rh = (r * h).astype(uh_ref.dtype)
        hpre = g[:, 2 * d:] + jnp.dot(rh, uh_ref[...],
                                      preferred_element_type=jnp.float32)
        h_hat = jnp.tanh(hpre.astype(act_dtype)).astype(jnp.float32)
        h_new = (1.0 - z) * h + z * h_hat                # blend / carry stay f32
        out_ref[t] = h_new.astype(out_ref.dtype)         # store straight from live vregs
        return h_new

    lax.fori_loop(1, t_total, step, h0, unroll=unroll)


def _vmem_capacity_bytes():
    """Physical per-core VMEM; conservative 64 MiB (v7x) fallback."""
    try:
        cap = int(getattr(pltpu.get_tpu_info(), "vmem_capacity_bytes", 0))
        if cap > 0:
            return cap
    except Exception:
        pass
    return 64 << 20


def _default_act_dtype():
    """bf16 transcendentals only where the EUP supports them (v6e / v7x)."""
    try:
        kind = jax.devices()[0].device_kind.lower()
    except Exception:
        return jnp.float32
    if any(tag in kind for tag in ("v6", "v7", "tpu7")):
        return jnp.bfloat16
    return jnp.float32


def init_params(key, d, bias=False):
    """Deterministic parameters matching the torch module's __init__ shapes.

    Each nn.Linear(d, d) has weight (d, d) and bias (d,), init U(-k, k), k=1/sqrt(d).
    The extra gate biases b_z/b_r/b_h are zeros when bias=False (oneToManyGRU default).
    """
    k = 1.0 / math.sqrt(d)
    names = ["wz", "uz", "wr", "ur", "wh", "uh"]
    keys = jax.random.split(key, 2 * len(names))
    p = {}
    for i, n in enumerate(names):
        p[n] = jax.random.uniform(keys[2 * i], (d, d), jnp.float32, -k, k)
        p["b" + n] = jax.random.uniform(keys[2 * i + 1], (1, d), jnp.float32, -k, k)
    for n in ["b_z", "b_r", "b_h"]:
        p[n] = (jax.random.uniform(key, (1, d), jnp.float32)
                if bias else jnp.zeros((1, d), jnp.float32))
    return p


def one_to_many_gru(x, params, output_times, *, row_tile=None,
                    mxu_dtype=jnp.bfloat16, act_dtype=None,
                    out_dtype=jnp.float32):
    B, S, D = x.shape
    if S != D:
        raise ValueError("module requires x.shape[1] == input_size (== output_size)")
    T = int(output_times)
    M = B * S
    if act_dtype is None:
        act_dtype = (_default_act_dtype()
                     if jnp.dtype(mxu_dtype) == jnp.dtype(jnp.bfloat16)
                     else jnp.float32)

    # Lane alignment: pad D to a multiple of 128 so the g[:, :d]/[d:2d]/[2d:] gate
    # slices and the output stores stay lane-dense (no XLU relayout / masked stores).
    # Zero padding keeps padded lanes of h identically 0, so results are unchanged.
    Dp = pl.cdiv(D, 128) * 128
    pad_d = Dp - D

    def pad_w(w):   # (D, D) -> (Dp, Dp)
        return jnp.pad(w, ((0, pad_d), (0, pad_d))) if pad_d else w

    def pad_b(b):   # (1, D) -> (1, Dp)
        return jnp.pad(b, ((0, 0), (0, pad_d))) if pad_d else b

    # Fused / folded weights, pre-transposed so `v @ W_T + b` == torch's `v @ W.T + b`.
    # Folded in f32, cast ONCE to the MXU dtype.
    w0 = jnp.concatenate(
        [pad_w(params["wz"]).T, pad_w(params["wr"]).T, pad_w(params["wh"]).T],
        axis=1).astype(mxu_dtype)
    w1 = jnp.concatenate(
        [pad_w(params["wz"] + params["uz"]).T,
         pad_w(params["wr"] + params["ur"]).T,
         pad_w(params["wh"]).T], axis=1).astype(mxu_dtype)
    uh = pad_w(params["uh"]).T.astype(mxu_dtype)
    # Fused bias: both linear biases plus the explicit gate bias.  u_g(0) still
    # contributes its linear bias at t == 0, so the same fused bias is valid every step.
    bias = jnp.concatenate(
        [pad_b(params["bwz"] + params["buz"] + params["b_z"]),
         pad_b(params["bwr"] + params["bur"] + params["b_r"]),
         pad_b(params["bwh"] + params["buh"] + params["b_h"])],
        axis=1).astype(jnp.float32)

    # --- VMEM budget (generation-aware) --------------------------------------
    wbytes = jnp.dtype(mxu_dtype).itemsize
    obytes = jnp.dtype(out_dtype).itemsize
    vmem_cap = _vmem_capacity_bytes()
    weight_bytes = 7 * Dp * Dp * wbytes + 3 * Dp * 4       # single-buffered residents
    per_row = (2 * T * Dp * obytes        # output block (T, row_tile, Dp), double-buffered
               + 2 * Dp * wbytes          # x tile, double-buffered
               + 8 * Dp * 4)              # in-flight gate / blend temporaries (f32)
    budget = vmem_cap - weight_bytes - (8 << 20)            # compiler-scratch headroom
    # TODO(synk): if weight_bytes alone exceeds the budget (very large D, esp. v7x's
    # 64 MiB/TC), the fused weight matmuls would need K/N tiling (extra grid axis or
    # pltpu.emit_pipeline over the gate axis); not implemented here.

    if row_tile is None:
        budget_rows = (budget // per_row) // 8 * 8 if budget > 8 * per_row else 8
        # Keep >= 2 row tiles so both v7x TensorCores get work on the parallel axis.
        two_tiles = max(8, pl.cdiv(pl.cdiv(M, 2), 8) * 8)
        row_tile = int(max(8, min(1024, budget_rows, two_tiles)))
    row_tile = max(8, (int(row_tile) // 8) * 8)
    Mp = pl.cdiv(M, row_tile) * row_tile

    # Always set the scoped limit (v5e's default is only 16 MiB) but never exceed the
    # physical per-core capacity (v7x = 64 MiB).
    est = 2 * weight_bytes + row_tile * per_row              # 2x covers the fallback path
    vmem_limit = int(min(max(est + (16 << 20), 32 << 20), vmem_cap))

    # x is only ever consumed as an MXU operand at t == 0 -> ship it in the MXU dtype.
    x2 = x.reshape(M, D).astype(mxu_dtype)
    if Mp != M or pad_d:
        x2 = jnp.pad(x2, ((0, Mp - M), (0, pad_d)))          # padding cropped after the call

    const = lambda i: (0, 0)

    def build_specs(single_buffer_weights):
        if single_buffer_weights:
            wspec = lambda shape: pl.BlockSpec(shape, const,
                                               pipeline_mode=pl.Buffered(1))
        else:
            wspec = lambda shape: pl.BlockSpec(shape, const)
        return [
            pl.BlockSpec((row_tile, Dp), lambda i: (i, 0)),   # x rows (read once, at t==0)
            wspec((Dp, 3 * Dp)),                              # [Wz|Wr|Wh]^T
            wspec((Dp, 3 * Dp)),                              # [Wz+Uz|Wr+Ur|Wh]^T
            wspec((Dp, Dp)),                                  # Uh^T
            wspec((1, 3 * Dp)),                               # fused bias
        ]

    def call(in_specs):
        return pl.pallas_call(
            partial(_gru_kernel, act_dtype=act_dtype, unroll=(T <= 16)),
            out_shape=jax.ShapeDtypeStruct((T, Mp, Dp), out_dtype),
            grid_spec=pltpu.PrefetchScalarGridSpec(
                num_scalar_prefetch=0,
                grid=(Mp // row_tile,),
                in_specs=in_specs,
                out_specs=pl.BlockSpec((T, row_tile, Dp), lambda i: (0, i, 0)),
            ),
            compiler_params=pltpu.CompilerParams(
                dimension_semantics=("parallel",),
                vmem_limit_bytes=vmem_limit),
        )(x2, w0, w1, uh, bias)

    try:
        # Grid-invariant operands single-buffered: halves resident weight VMEM.
        out = call(build_specs(True))
    except Exception:
        # TODO(synk): pipeline_mode=pl.Buffered unavailable on this jax build; fall back
        # to default double-buffering (costs 2x weight VMEM).
        out = call(build_specs(False))

    out = out[:, :M, :D]                        # drop row / lane padding
    result = out.reshape(T * B, S, D)           # torch: cat([y_0, ..., y_{T-1}], dim=0)

    # TODO(synk): the original module ends with torch.reshape(result, (B, T, D)),
    # which is element-count-consistent only when S == D == 1; we apply it only in
    # that degenerate case and otherwise return the pre-reshape concatenated result.
    if result.size == B * T * D:
        return result.reshape(B, T, D)
    return result


def _reference(x, p, T):
    """Pure-JAX f32 transcription of the torch forward, for verification."""
    B, S, D = x.shape
    lin = lambda v, w, b: v @ w.T + b
    h = jnp.zeros((1, D), jnp.float32)
    xin = x
    outs = []
    for _ in range(T):
        z = jax.nn.sigmoid(lin(xin, p["wz"], p["bwz"]) + lin(h, p["uz"], p["buz"]) + p["b_z"])
        r = jax.nn.sigmoid(lin(xin, p["wr"], p["bwr"]) + lin(h, p["ur"], p["bur"]) + p["b_r"])
        hh = jnp.tanh(lin(xin, p["wh"], p["bwh"]) + lin(r * h, p["uh"], p["buh"]) + p["b_h"])
        h = (1.0 - z) * h + z * hh
        outs.append(h)
        xin = h
    return jnp.concatenate(outs, axis=0)


if __name__ == "__main__":
    B, D, T = 2, 128, 4          # batch, input_size == output_size, output_times
    S = D                        # module requires x.shape[1] == input_size

    key = jax.random.PRNGKey(0)
    k_x, k_p = jax.random.split(key)
    x = jax.random.normal(k_x, (B, S, D), jnp.float32)
    params = init_params(k_p, D, bias=False)   # oneToManyGRU default: bias=False

    # Fast path: bf16 MXU operands (+ bf16 gate nonlinearities on v6e/v7x).
    y_fast = one_to_many_gru(x, params, T)
    # Exact path: f32 MXU operands and f32 activations -> validates the fused/folded algebra.
    y_f32 = one_to_many_gru(x, params, T, mxu_dtype=jnp.float32, act_dtype=jnp.float32)
    jax.block_until_ready((y_fast, y_f32))

    y_ref = _reference(x, params, T)
    assert y_f32.shape == y_ref.shape, (y_f32.shape, y_ref.shape)
    assert y_fast.shape == y_ref.shape, (y_fast.shape, y_ref.shape)
    assert jnp.allclose(y_f32, y_ref, atol=2e-3, rtol=2e-3), "f32 mismatch vs reference"
    # bf16 rounding feeds back through the recurrence, so error grows with T (validated at T=4).
    assert jnp.allclose(y_fast, y_ref, atol=6e-2, rtol=6e-2), "bf16 mismatch vs reference"

    print("KERNEL_OK")
</pallas_src>

<mosaic_0001>
module attributes {stable_mosaic.version = 11 : i64} {
  func.func @_gru_kernel(%arg0: i32, %arg1: memref<128x128xbf16, #tpu.memory_space<vmem>>, %arg2: memref<128x384xbf16, #tpu.memory_space<vmem>>, %arg3: memref<128x384xbf16, #tpu.memory_space<vmem>>, %arg4: memref<128x128xbf16, #tpu.memory_space<vmem>>, %arg5: memref<1x384xf32, #tpu.memory_space<vmem>>, %arg6: memref<4x128x128xf32, #tpu.memory_space<vmem>>) attributes {dimension_semantics = [#tpu.dimension_semantics<parallel>], iteration_bounds = array<i64: 2>, scalar_prefetch = 0 : i64, scratch_operands = 0 : i64, tpu.core_type = #tpu.core_type<tc>, window_params = [{transform_indices = @transform_0, window_bounds = array<i64: 128, 128>}, {pipeline_mode = #tpu.pipeline_mode<synchronous>, transform_indices = @transform_1, window_bounds = array<i64: 128, 384>}, {pipeline_mode = #tpu.pipeline_mode<synchronous>, transform_indices = @transform_2, window_bounds = array<i64: 128, 384>}, {pipeline_mode = #tpu.pipeline_mode<synchronous>, transform_indices = @transform_3, window_bounds = array<i64: 128, 128>}, {pipeline_mode = #tpu.pipeline_mode<synchronous>, transform_indices = @transform_4, window_bounds = array<i64: 1, 384>}, {transform_indices = @transform_5, window_bounds = array<i64: 4, 128, 128>}]} {
    %c0 = arith.constant 0 : index
    %c0_0 = arith.constant 0 : index
    %0 = vector.load %arg5[%c0, %c0_0] : memref<1x384xf32, #tpu.memory_space<vmem>>, vector<1x384xf32>
    %c0_1 = arith.constant 0 : index
    %c0_2 = arith.constant 0 : index
    %1 = vector.load %arg1[%c0_1, %c0_2] : memref<128x128xbf16, #tpu.memory_space<vmem>>, vector<128x128xbf16>
    %c0_3 = arith.constant 0 : index
    %c0_4 = arith.constant 0 : index
    %2 = vector.load %arg2[%c0_3, %c0_4] : memref<128x384xbf16, #tpu.memory_space<vmem>>, vector<128x384xbf16>
    %cst = arith.constant dense<0.000000e+00> : vector<128x384xf32>
    %3 = tpu.matmul %1, %2, %cst {dimension_numbers = #tpu.dot_dimension_numbers<[1], [0], [0], [1], [0, 0, 1, 1], [], []>} : vector<128x128xbf16>, vector<128x384xbf16>, vector<128x384xf32> -> vector<128x384xf32>
    %4 = vector.broadcast %0 : vector<1x384xf32> to vector<128x384xf32>
    %5 = arith.addf %3, %4 : vector<128x384xf32>
    %6 = vector.extract_strided_slice %5 {offsets = [0, 0], sizes = [128, 128], strides = [1, 1]} : vector<128x384xf32> to vector<128x128xf32>
    %7 = arith.negf %6 : vector<128x128xf32>
    %8 = math.exp %7 : vector<128x128xf32>
    %cst_5 = arith.constant 1.000000e+00 : f32
    %9 = vector.broadcast %cst_5 : f32 to vector<128x128xf32>
    %10 = arith.addf %9, %8 : vector<128x128xf32>
    %11 = arith.divf %9, %10 : vector<128x128xf32>
    %12 = vector.extract_strided_slice %5 {offsets = [0, 256], sizes = [128, 128], strides = [1, 1]} : vector<128x384xf32> to vector<128x128xf32>
    %13 = math.tanh %12 : vector<128x128xf32>
    %14 = arith.mulf %11, %13 : vector<128x128xf32>
    %c0_6 = arith.constant 0 : index
    %c0_7 = arith.constant 0 : index
    %c0_8 = arith.constant 0 : index
    %15 = vector.load %arg6[%c0_6, %c0_7, %c0_8] : memref<4x128x128xf32, #tpu.memory_space<vmem>>, vector<1x128x128xf32>
    %16 = vector.shape_cast %15 : vector<1x128x128xf32> to vector<128x128xf32>
    %17 = vector.shape_cast %14 : vector<128x128xf32> to vector<1x128x128xf32>
    tpu.vector_store %arg6[%c0_6, %c0_7, %c0_8], %17 {strides = array<i32>} : memref<4x128x128xf32, #tpu.memory_space<vmem>>, vector<1x128x128xf32>,
    %c1_i32 = arith.constant 1 : i32
    %18 = arith.truncf %14 : vector<128x128xf32> to vector<128x128xbf16>
    %c0_9 = arith.constant 0 : index
    %c0_10 = arith.constant 0 : index
    %19 = vector.load %arg3[%c0_9, %c0_10] : memref<128x384xbf16, #tpu.memory_space<vmem>>, vector<128x384xbf16>
    %cst_11 = arith.constant dense<0.000000e+00> : vector<128x384xf32>
    %20 = tpu.matmul %18, %19, %cst_11 {dimension_numbers = #tpu.dot_dimension_numbers<[1], [0], [0], [1], [0, 0, 1, 1], [], []>} : vector<128x128xbf16>, vector<128x384xbf16>, vector<128x384xf32> -> vector<128x384xf32>
    %21 = vector.broadcast %0 : vector<1x384xf32> to vector<128x384xf32>
    %22 = arith.addf %20, %21 : vector<128x384xf32>
    %23 = vector.extract_strided_slice %22 {offsets = [0, 0], sizes = [128, 128], strides = [1, 1]} : vector<128x384xf32> to vector<128x128xf32>
    %24 = arith.negf %23 : vector<128x128xf32>
    %25 = math.exp %24 : vector<128x128xf32>
    %cst_12 = arith.constant 1.000000e+00 : f32
    %26 = vector.broadcast %cst_12 : f32 to vector<128x128xf32>
    %27 = arith.addf %26, %25 : vector<128x128xf32>
    %28 = arith.divf %26, %27 : vector<128x128xf32>
    %29 = vector.extract_strided_slice %22 {offsets = [0, 128], sizes = [128, 128], strides = [1, 1]} : vector<128x384xf32> to vector<128x128xf32>
    %30 = arith.negf %29 : vector<128x128xf32>
    %31 = math.exp %30 : vector<128x128xf32>
    %cst_13 = arith.constant 1.000000e+00 : f32
    %32 = vector.broadcast %cst_13 : f32 to vector<128x128xf32>
    %33 = arith.addf %32, %31 : vector<128x128xf32>
    %34 = arith.divf %32, %33 : vector<128x128xf32>
    %35 = arith.mulf %34, %14 : vector<128x128xf32>
    %36 = arith.truncf %35 : vector<128x128xf32> to vector<128x128xbf16>
    %37 = vector.extract_strided_slice %22 {offsets = [0, 256], sizes = [128, 128], strides = [1, 1]} : vector<128x384xf32> to vector<128x128xf32>
    %c0_14 = arith.constant 0 : index
    %c0_15 = arith.constant 0 : index
    %38 = vector.load %arg4[%c0_14, %c0_15] : memref<128x128xbf16, #tpu.memory_space<vmem>>, vector<128x128xbf16>
    %cst_16 = arith.constant dense<0.000000e+00> : vector<128x128xf32>
    %39 = tpu.matmul %36, %38, %cst_16 {dimension_numbers = #tpu.dot_dimension_numbers<[1], [0], [0], [1], [0, 0, 1, 1], [], []>} : vector<128x128xbf16>, vector<128x128xbf16>, vector<128x128xf32> -> vector<128x128xf32>
    %40 = arith.addf %37, %39 : vector<128x128xf32>
    %41 = math.tanh %40 : vector<128x128xf32>
    %cst_17 = arith.constant 1.000000e+00 : f32
    %42 = vector.broadcast %cst_17 : f32 to vector<128x128xf32>
    %43 = arith.subf %42, %28 : vector<128x128xf32>
    %44 = arith.mulf %43, %14 : vector<128x128xf32>
    %45 = arith.mulf %28, %41 : vector<128x128xf32>
    %46 = arith.addf %44, %45 : vector<128x128xf32>
    %47 = arith.index_cast %c1_i32 : i32 to index
    %c0_18 = arith.constant 0 : index
    %c0_19 = arith.constant 0 : index
    %48 = vector.load %arg6[%47, %c0_18, %c0_19] : memref<4x128x128xf32, #tpu.memory_space<vmem>>, vector<1x128x128xf32>
    %49 = vector.shape_cast %48 : vector<1x128x128xf32> to vector<128x128xf32>
    %50 = vector.shape_cast %46 : vector<128x128xf32> to vector<1x128x128xf32>
    tpu.vector_store %arg6[%47, %c0_18, %c0_19], %50 {strides = array<i32>} : memref<4x128x128xf32, #tpu.memory_space<vmem>>, vector<1x128x128xf32>,
    %c2_i32 = arith.constant 2 : i32
    %51 = arith.truncf %46 : vector<128x128xf32> to vector<128x128xbf16>
    %c0_20 = arith.constant 0 : index
    %c0_21 = arith.constant 0 : index
    %52 = vector.load %arg3[%c0_20, %c0_21] : memref<128x384xbf16, #tpu.memory_space<vmem>>, vector<128x384xbf16>
    %cst_22 = arith.constant dense<0.000000e+00> : vector<128x384xf32>
    %53 = tpu.matmul %51, %52, %cst_22 {dimension_numbers = #tpu.dot_dimension_numbers<[1], [0], [0], [1], [0, 0, 1, 1], [], []>} : vector<128x128xbf16>, vector<128x384xbf16>, vector<128x384xf32> -> vector<128x384xf32>
    %54 = vector.broadcast %0 : vector<1x384xf32> to vector<128x384xf32>
    %55 = arith.addf %53, %54 : vector<128x384xf32>
    %56 = vector.extract_strided_slice %55 {offsets = [0, 0], sizes = [128, 128], strides = [1, 1]} : vector<128x384xf32> to vector<128x128xf32>
    %57 = arith.negf %56 : vector<128x128xf32>
    %58 = math.exp %57 : vector<128x128xf32>
    %cst_23 = arith.constant 1.000000e+00 : f32
    %59 = vector.broadcast %cst_23 : f32 to vector<128x128xf32>
    %60 = arith.addf %59, %58 : vector<128x128xf32>
    %61 = arith.divf %59, %60 : vector<128x128xf32>
    %62 = vector.extract_strided_slice %55 {offsets = [0, 128], sizes = [128, 128], strides = [1, 1]} : vector<128x384xf32> to vector<128x128xf32>
    %63 = arith.negf %62 : vector<128x128xf32>
    %64 = math.exp %63 : vector<128x128xf32>
    %cst_24 = arith.constant 1.000000e+00 : f32
    %65 = vector.broadcast %cst_24 : f32 to vector<128x128xf32>
    %66 = arith.addf %65, %64 : vector<128x128xf32>
    %67 = arith.divf %65, %66 : vector<128x128xf32>
    %68 = arith.mulf %67, %46 : vector<128x128xf32>
    %69 = arith.truncf %68 : vector<128x128xf32> to vector<128x128xbf16>
    %70 = vector.extract_strided_slice %55 {offsets = [0, 256], sizes = [128, 128], strides = [1, 1]} : vector<128x384xf32> to vector<128x128xf32>
    %c0_25 = arith.constant 0 : index
    %c0_26 = arith.constant 0 : index
    %71 = vector.load %arg4[%c0_25, %c0_26] : memref<128x128xbf16, #tpu.memory_space<vmem>>, vector<128x128xbf16>
    %cst_27 = arith.constant dense<0.000000e+00> : vector<128x128xf32>
    %72 = tpu.matmul %69, %71, %cst_27 {dimension_numbers = #tpu.dot_dimension_numbers<[1], [0], [0], [1], [0, 0, 1, 1], [], []>} : vector<128x128xbf16>, vector<128x128xbf16>, vector<128x128xf32> -> vector<128x128xf32>
    %73 = arith.addf %70, %72 : vector<128x128xf32>
    %74 = math.tanh %73 : vector<128x128xf32>
    %cst_28 = arith.constant 1.000000e+00 : f32
    %75 = vector.broadcast %cst_28 : f32 to vector<128x128xf32>
    %76 = arith.subf %75, %61 : vector<128x128xf32>
    %77 = arith.mulf %76, %46 : vector<128x128xf32>
    %78 = arith.mulf %61, %74 : vector<128x128xf32>
    %79 = arith.addf %77, %78 : vector<128x128xf32>
    %80 = arith.index_cast %c2_i32 : i32 to index
    %c0_29 = arith.constant 0 : index
    %c0_30 = arith.constant 0 : index
    %81 = vector.load %arg6[%80, %c0_29, %c0_30] : memref<4x128x128xf32, #tpu.memory_space<vmem>>, vector<1x128x128xf32>
    %82 = vector.shape_cast %81 : vector<1x128x128xf32> to vector<128x128xf32>
    %83 = vector.shape_cast %79 : vector<128x128xf32> to vector<1x128x128xf32>
    tpu.vector_store %arg6[%80, %c0_29, %c0_30], %83 {strides = array<i32>} : memref<4x128x128xf32, #tpu.memory_space<vmem>>, vector<1x128x128xf32>,
    %c3_i32 = arith.constant 3 : i32
    %84 = arith.truncf %79 : vector<128x128xf32> to vector<128x128xbf16>
    %c0_31 = arith.constant 0 : index
    %c0_32 = arith.constant 0 : index
    %85 = vector.load %arg3[%c0_31, %c0_32] : memref<128x384xbf16, #tpu.memory_space<vmem>>, vector<128x384xbf16>
    %cst_33 = arith.constant dense<0.000000e+00> : vector<128x384xf32>
    %86 = tpu.matmul %84, %85, %cst_33 {dimension_numbers = #tpu.dot_dimension_numbers<[1], [0], [0], [1], [0, 0, 1, 1], [], []>} : vector<128x128xbf16>, vector<128x384xbf16>, vector<128x384xf32> -> vector<128x384xf32>
    %87 = vector.broadcast %0 : vector<1x384xf32> to vector<128x384xf32>
    %88 = arith.addf %86, %87 : vector<128x384xf32>
    %89 = vector.extract_strided_slice %88 {offsets = [0, 0], sizes = [128, 128], strides = [1, 1]} : vector<128x384xf32> to vector<128x128xf32>
    %90 = arith.negf %89 : vector<128x128xf32>
    %91 = math.exp %90 : vector<128x128xf32>
    %cst_34 = arith.constant 1.000000e+00 : f32
    %92 = vector.broadcast %cst_34 : f32 to vector<128x128xf32>
    %93 = arith.addf %92, %91 : vector<128x128xf32>
    %94 = arith.divf %92, %93 : vector<128x128xf32>
    %95 = vector.extract_strided_slice %88 {offsets = [0, 128], sizes = [128, 128], strides = [1, 1]} : vector<128x384xf32> to vector<128x128xf32>
    %96 = arith.negf %95 : vector<128x128xf32>
    %97 = math.exp %96 : vector<128x128xf32>
    %cst_35 = arith.constant 1.000000e+00 : f32
    %98 = vector.broadcast %cst_35 : f32 to vector<128x128xf32>
    %99 = arith.addf %98, %97 : vector<128x128xf32>
    %100 = arith.divf %98, %99 : vector<128x128xf32>
    %101 = arith.mulf %100, %79 : vector<128x128xf32>
    %102 = arith.truncf %101 : vector<128x128xf32> to vector<128x128xbf16>
    %103 = vector.extract_strided_slice %88 {offsets = [0, 256], sizes = [128, 128], strides = [1, 1]} : vector<128x384xf32> to vector<128x128xf32>
    %c0_36 = arith.constant 0 : index
    %c0_37 = arith.constant 0 : index
    %104 = vector.load %arg4[%c0_36, %c0_37] : memref<128x128xbf16, #tpu.memory_space<vmem>>, vector<128x128xbf16>
    %cst_38 = arith.constant dense<0.000000e+00> : vector<128x128xf32>
    %105 = tpu.matmul %102, %104, %cst_38 {dimension_numbers = #tpu.dot_dimension_numbers<[1], [0], [0], [1], [0, 0, 1, 1], [], []>} : vector<128x128xbf16>, vector<128x128xbf16>, vector<128x128xf32> -> vector<128x128xf32>
    %106 = arith.addf %103, %105 : vector<128x128xf32>
    %107 = math.tanh %106 : vector<128x128xf32>
    %cst_39 = arith.constant 1.000000e+00 : f32
    %108 = vector.broadcast %cst_39 : f32 to vector<128x128xf32>
    %109 = arith.subf %108, %94 : vector<128x128xf32>
    %110 = arith.mulf %109, %79 : vector<128x128xf32>
    %111 = arith.mulf %94, %107 : vector<128x128xf32>
    %112 = arith.addf %110, %111 : vector<128x128xf32>
    %113 = arith.index_cast %c3_i32 : i32 to index
    %c0_40 = arith.constant 0 : index
    %c0_41 = arith.constant 0 : index
    %114 = vector.load %arg6[%113, %c0_40, %c0_41] : memref<4x128x128xf32, #tpu.memory_space<vmem>>, vector<1x128x128xf32>
    %115 = vector.shape_cast %114 : vector<1x128x128xf32> to vector<128x128xf32>
    %116 = vector.shape_cast %112 : vector<128x128xf32> to vector<1x128x128xf32>
    tpu.vector_store %arg6[%113, %c0_40, %c0_41], %116 {strides = array<i32>} : memref<4x128x128xf32, #tpu.memory_space<vmem>>, vector<1x128x128xf32>,
    %c3_i32_42 = arith.constant 3 : i32
    return
  }
  func.func @transform_0(%arg0: i32) -> (i32, i32) {
    %c0_i32 = arith.constant 0 : i32
    %c0_i32_0 = arith.constant 0 : i32
    return %arg0, %c0_i32 : i32, i32
  }
  func.func @transform_1(%arg0: i32) -> (i32, i32) {
    %c0_i32 = arith.constant 0 : i32
    %c0_i32_0 = arith.constant 0 : i32
    %c0_i32_1 = arith.constant 0 : i32
    return %c0_i32, %c0_i32_0 : i32, i32
  }
  func.func @transform_2(%arg0: i32) -> (i32, i32) {
    %c0_i32 = arith.constant 0 : i32
    %c0_i32_0 = arith.constant 0 : i32
    %c0_i32_1 = arith.constant 0 : i32
    return %c0_i32, %c0_i32_0 : i32, i32
  }
  func.func @transform_3(%arg0: i32) -> (i32, i32) {
    %c0_i32 = arith.constant 0 : i32
    %c0_i32_0 = arith.constant 0 : i32
    %c0_i32_1 = arith.constant 0 : i32
    return %c0_i32, %c0_i32_0 : i32, i32
  }
  func.func @transform_4(%arg0: i32) -> (i32, i32) {
    %c0_i32 = arith.constant 0 : i32
    %c0_i32_0 = arith.constant 0 : i32
    %c0_i32_1 = arith.constant 0 : i32
    return %c0_i32, %c0_i32_0 : i32, i32
  }
  func.func @transform_5(%arg0: i32) -> (i32, i32, i32) {
    %c0_i32 = arith.constant 0 : i32
    %c0_i32_0 = arith.constant 0 : i32
    %c0_i32_1 = arith.constant 0 : i32
    return %c0_i32, %arg0, %c0_i32_0 : i32, i32, i32
  }
}

module attributes {stable_mosaic.version = 11 : i64} {
  func.func @_gru_kernel(%arg0: i32, %arg1: memref<128x128xbf16, #tpu.memory_space<vmem>>, %arg2: memref<128x384xbf16, #tpu.memory_space<vmem>>, %arg3: memref<128x384xbf16, #tpu.memory_space<vmem>>, %arg4: memref<128x128xbf16, #tpu.memory_space<vmem>>, %arg5: memref<1x384xf32, #tpu.memory_space<vmem>>, %arg6: memref<4x128x128xf32, #tpu.memory_space<vmem>>) attributes {dimension_semantics = [#tpu.dimension_semantics<parallel>], iteration_bounds = array<i64: 2>, scalar_prefetch = 0 : i64, scratch_operands = 0 : i64, tpu.core_type = #tpu.core_type<tc>, window_params = [{transform_indices = @transform_0, window_bounds = array<i64: 128, 128>}, {pipeline_mode = #tpu.pipeline_mode<synchronous>, transform_indices = @transform_1, window_bounds = array<i64: 128, 384>}, {pipeline_mode = #tpu.pipeline_mode<synchronous>, transform_indices = @transform_2, window_bounds = array<i64: 128, 384>}, {pipeline_mode = #tpu.pipeline_mode<synchronous>, transform_indices = @transform_3, window_bounds = array<i64: 128, 128>}, {pipeline_mode = #tpu.pipeline_mode<synchronous>, transform_indices = @transform_4, window_bounds = array<i64: 1, 384>}, {transform_indices = @transform_5, window_bounds = array<i64: 4, 128, 128>}]} {
    %c0 = arith.constant 0 : index
    %c0_0 = arith.constant 0 : index
    %0 = vector.load %arg5[%c0, %c0_0] : memref<1x384xf32, #tpu.memory_space<vmem>>, vector<1x384xf32>
    %c0_1 = arith.constant 0 : index
    %c0_2 = arith.constant 0 : index
    %1 = vector.load %arg1[%c0_1, %c0_2] : memref<128x128xbf16, #tpu.memory_space<vmem>>, vector<128x128xbf16>
    %c0_3 = arith.constant 0 : index
    %c0_4 = arith.constant 0 : index
    %2 = vector.load %arg2[%c0_3, %c0_4] : memref<128x384xbf16, #tpu.memory_space<vmem>>, vector<128x384xbf16>
    %cst = arith.constant dense<0.000000e+00> : vector<128x384xf32>
    %3 = tpu.matmul %1, %2, %cst {dimension_numbers = #tpu.dot_dimension_numbers<[1], [0], [0], [1], [0, 0, 1, 1], [], []>} : vector<128x128xbf16>, vector<128x384xbf16>, vector<128x384xf32> -> vector<128x384xf32>
    %4 = vector.broadcast %0 : vector<1x384xf32> to vector<128x384xf32>
    %5 = arith.addf %3, %4 : vector<128x384xf32>
    %6 = vector.extract_strided_slice %5 {offsets = [0, 0], sizes = [128, 128], strides = [1, 1]} : vector<128x384xf32> to vector<128x128xf32>
    %7 = arith.negf %6 : vector<128x128xf32>
    %8 = math.exp %7 : vector<128x128xf32>
    %cst_5 = arith.constant 1.000000e+00 : f32
    %9 = vector.broadcast %cst_5 : f32 to vector<128x128xf32>
    %10 = arith.addf %9, %8 : vector<128x128xf32>
    %11 = arith.divf %9, %10 : vector<128x128xf32>
    %12 = vector.extract_strided_slice %5 {offsets = [0, 256], sizes = [128, 128], strides = [1, 1]} : vector<128x384xf32> to vector<128x128xf32>
    %13 = math.tanh %12 : vector<128x128xf32>
    %14 = arith.mulf %11, %13 : vector<128x128xf32>
    %c0_6 = arith.constant 0 : index
    %c0_7 = arith.constant 0 : index
    %c0_8 = arith.constant 0 : index
    %15 = vector.load %arg6[%c0_6, %c0_7, %c0_8] : memref<4x128x128xf32, #tpu.memory_space<vmem>>, vector<1x128x128xf32>
    %16 = vector.shape_cast %15 : vector<1x128x128xf32> to vector<128x128xf32>
    %17 = vector.shape_cast %14 : vector<128x128xf32> to vector<1x128x128xf32>
    tpu.vector_store %arg6[%c0_6, %c0_7, %c0_8], %17 {strides = array<i32>} : memref<4x128x128xf32, #tpu.memory_space<vmem>>, vector<1x128x128xf32>,
    %c1_i32 = arith.constant 1 : i32
    %18 = arith.truncf %14 : vector<128x128xf32> to vector<128x128xbf16>
    %c0_9 = arith.constant 0 : index
    %c0_10 = arith.constant 0 : index
    %19 = vector.load %arg3[%c0_9, %c0_10] : memref<128x384xbf16, #tpu.memory_space<vmem>>, vector<128x384xbf16>
    %cst_11 = arith.constant dense<0.000000e+00> : vector<128x384xf32>
    %20 = tpu.matmul %18, %19, %cst_11 {dimension_numbers = #tpu.dot_dimension_numbers<[1], [0], [0], [1], [0, 0, 1, 1], [], []>} : vector<128x128xbf16>, vector<128x384xbf16>, vector<128x384xf32> -> vector<128x384xf32>
    %21 = vector.broadcast %0 : vector<1x384xf32> to vector<128x384xf32>
    %22 = arith.addf %20, %21 : vector<128x384xf32>
    %23 = vector.extract_strided_slice %22 {offsets = [0, 0], sizes = [128, 128], strides = [1, 1]} : vector<128x384xf32> to vector<128x128xf32>
    %24 = arith.negf %23 : vector<128x128xf32>
    %25 = math.exp %24 : vector<128x128xf32>
    %cst_12 = arith.constant 1.000000e+00 : f32
    %26 = vector.broadcast %cst_12 : f32 to vector<128x128xf32>
    %27 = arith.addf %26, %25 : vector<128x128xf32>
    %28 = arith.divf %26, %27 : vector<128x128xf32>
    %29 = vector.extract_strided_slice %22 {offsets = [0, 128], sizes = [128, 128], strides = [1, 1]} : vector<128x384xf32> to vector<128x128xf32>
    %30 = arith.negf %29 : vector<128x128xf32>
    %31 = math.exp %30 : vector<128x128xf32>
    %cst_13 = arith.constant 1.000000e+00 : f32
    %32 = vector.broadcast %cst_13 : f32 to vector<128x128xf32>
    %33 = arith.addf %32, %31 : vector<128x128xf32>
    %34 = arith.divf %32, %33 : vector<128x128xf32>
    %35 = arith.mulf %34, %14 : vector<128x128xf32>
    %36 = arith.truncf %35 : vector<128x128xf32> to vector<128x128xbf16>
    %37 = vector.extract_strided_slice %22 {offsets = [0, 256], sizes = [128, 128], strides = [1, 1]} : vector<128x384xf32> to vector<128x128xf32>
    %c0_14 = arith.constant 0 : index
    %c0_15 = arith.constant 0 : index
    %38 = vector.load %arg4[%c0_14, %c0_15] : memref<128x128xbf16, #tpu.memory_space<vmem>>, vector<128x128xbf16>
    %cst_16 = arith.constant dense<0.000000e+00> : vector<128x128xf32>
    %39 = tpu.matmul %36, %38, %cst_16 {dimension_numbers = #tpu.dot_dimension_numbers<[1], [0], [0], [1], [0, 0, 1, 1], [], []>} : vector<128x128xbf16>, vector<128x128xbf16>, vector<128x128xf32> -> vector<128x128xf32>
    %40 = arith.addf %37, %39 : vector<128x128xf32>
    %41 = math.tanh %40 : vector<128x128xf32>
    %cst_17 = arith.constant 1.000000e+00 : f32
    %42 = vector.broadcast %cst_17 : f32 to vector<128x128xf32>
    %43 = arith.subf %42, %28 : vector<128x128xf32>
    %44 = arith.mulf %43, %14 : vector<128x128xf32>
    %45 = arith.mulf %28, %41 : vector<128x128xf32>
    %46 = arith.addf %44, %45 : vector<128x128xf32>
    %47 = arith.index_cast %c1_i32 : i32 to index
    %c0_18 = arith.constant 0 : index
    %c0_19 = arith.constant 0 : index
    %48 = vector.load %arg6[%47, %c0_18, %c0_19] : memref<4x128x128xf32, #tpu.memory_space<vmem>>, vector<1x128x128xf32>
    %49 = vector.shape_cast %48 : vector<1x128x128xf32> to vector<128x128xf32>
    %50 = vector.shape_cast %46 : vector<128x128xf32> to vector<1x128x128xf32>
    tpu.vector_store %arg6[%47, %c0_18, %c0_19], %50 {strides = array<i32>} : memref<4x128x128xf32, #tpu.memory_space<vmem>>, vector<1x128x128xf32>,
    %c2_i32 = arith.constant 2 : i32
    %51 = arith.truncf %46 : vector<128x128xf32> to vector<128x128xbf16>
    %c0_20 = arith.constant 0 : index
    %c0_21 = arith.constant 0 : index
    %52 = vector.load %arg3[%c0_20, %c0_21] : memref<128x384xbf16, #tpu.memory_space<vmem>>, vector<128x384xbf16>
    %cst_22 = arith.constant dense<0.000000e+00> : vector<128x384xf32>
    %53 = tpu.matmul %51, %52, %cst_22 {dimension_numbers = #tpu.dot_dimension_numbers<[1], [0], [0], [1], [0, 0, 1, 1], [], []>} : vector<128x128xbf16>, vector<128x384xbf16>, vector<128x384xf32> -> vector<128x384xf32>
    %54 = vector.broadcast %0 : vector<1x384xf32> to vector<128x384xf32>
    %55 = arith.addf %53, %54 : vector<128x384xf32>
    %56 = vector.extract_strided_slice %55 {offsets = [0, 0], sizes = [128, 128], strides = [1, 1]} : vector<128x384xf32> to vector<128x128xf32>
    %57 = arith.negf %56 : vector<128x128xf32>
    %58 = math.exp %57 : vector<128x128xf32>
    %cst_23 = arith.constant 1.000000e+00 : f32
    %59 = vector.broadcast %cst_23 : f32 to vector<128x128xf32>
    %60 = arith.addf %59, %58 : vector<128x128xf32>
    %61 = arith.divf %59, %60 : vector<128x128xf32>
    %62 = vector.extract_strided_slice %55 {offsets = [0, 128], sizes = [128, 128], strides = [1, 1]} : vector<128x384xf32> to vector<128x128xf32>
    %63 = arith.negf %62 : vector<128x128xf32>
    %64 = math.exp %63 : vector<128x128xf32>
    %cst_24 = arith.constant 1.000000e+00 : f32
    %65 = vector.broadcast %cst_24 : f32 to vector<128x128xf32>
    %66 = arith.addf %65, %64 : vector<128x128xf32>
    %67 = arith.divf %65, %66 : vector<128x128xf32>
    %68 = arith.mulf %67, %46 : vector<128x128xf32>
    %69 = arith.truncf %68 : vector<128x128xf32> to vector<128x128xbf16>
    %70 = vector.extract_strided_slice %55 {offsets = [0, 256], sizes = [128, 128], strides = [1, 1]} : vector<128x384xf32> to vector<128x128xf32>
    %c0_25 = arith.constant 0 : index
    %c0_26 = arith.constant 0 : index
    %71 = vector.load %arg4[%c0_25, %c0_26] : memref<128x128xbf16, #tpu.memory_space<vmem>>, vector<128x128xbf16>
    %cst_27 = arith.constant dense<0.000000e+00> : vector<128x128xf32>
    %72 = tpu.matmul %69, %71, %cst_27 {dimension_numbers = #tpu.dot_dimension_numbers<[1], [0], [0], [1], [0, 0, 1, 1], [], []>} : vector<128x128xbf16>, vector<128x128xbf16>, vector<128x128xf32> -> vector<128x128xf32>
    %73 = arith.addf %70, %72 : vector<128x128xf32>
    %74 = math.tanh %73 : vector<128x128xf32>
    %cst_28 = arith.constant 1.000000e+00 : f32
    %75 = vector.broadcast %cst_28 : f32 to vector<128x128xf32>
    %76 = arith.subf %75, %61 : vector<128x128xf32>
    %77 = arith.mulf %76, %46 : vector<128x128xf32>
    %78 = arith.mulf %61, %74 : vector<128x128xf32>
    %79 = arith.addf %77, %78 : vector<128x128xf32>
    %80 = arith.index_cast %c2_i32 : i32 to index
    %c0_29 = arith.constant 0 : index
    %c0_30 = arith.constant 0 : index
    %81 = vector.load %arg6[%80, %c0_29, %c0_30] : memref<4x128x128xf32, #tpu.memory_space<vmem>>, vector<1x128x128xf32>
    %82 = vector.shape_cast %81 : vector<1x128x128xf32> to vector<128x128xf32>
    %83 = vector.shape_cast %79 : vector<128x128xf32> to vector<1x128x128xf32>
    tpu.vector_store %arg6[%80, %c0_29, %c0_30], %83 {strides = array<i32>} : memref<4x128x128xf32, #tpu.memory_space<vmem>>, vector<1x128x128xf32>,
    %c3_i32 = arith.constant 3 : i32
    %84 = arith.truncf %79 : vector<128x128xf32> to vector<128x128xbf16>
    %c0_31 = arith.constant 0 : index
    %c0_32 = arith.constant 0 : index
    %85 = vector.load %arg3[%c0_31, %c0_32] : memref<128x384xbf16, #tpu.memory_space<vmem>>, vector<128x384xbf16>
    %cst_33 = arith.constant dense<0.000000e+00> : vector<128x384xf32>
    %86 = tpu.matmul %84, %85, %cst_33 {dimension_numbers = #tpu.dot_dimension_numbers<[1], [0], [0], [1], [0, 0, 1, 1], [], []>} : vector<128x128xbf16>, vector<128x384xbf16>, vector<128x384xf32> -> vector<128x384xf32>
    %87 = vector.broadcast %0 : vector<1x384xf32> to vector<128x384xf32>
    %88 = arith.addf %86, %87 : vector<128x384xf32>
    %89 = vector.extract_strided_slice %88 {offsets = [0, 0], sizes = [128, 128], strides = [1, 1]} : vector<128x384xf32> to vector<128x128xf32>
    %90 = arith.negf %89 : vector<128x128xf32>
    %91 = math.exp %90 : vector<128x128xf32>
    %cst_34 = arith.constant 1.000000e+00 : f32
    %92 = vector.broadcast %cst_34 : f32 to vector<128x128xf32>
    %93 = arith.addf %92, %91 : vector<128x128xf32>
    %94 = arith.divf %92, %93 : vector<128x128xf32>
    %95 = vector.extract_strided_slice %88 {offsets = [0, 128], sizes = [128, 128], strides = [1, 1]} : vector<128x384xf32> to vector<128x128xf32>
    %96 = arith.negf %95 : vector<128x128xf32>
    %97 = math.exp %96 : vector<128x128xf32>
    %cst_35 = arith.constant 1.000000e+00 : f32
    %98 = vector.broadcast %cst_35 : f32 to vector<128x128xf32>
    %99 = arith.addf %98, %97 : vector<128x128xf32>
    %100 = arith.divf %98, %99 : vector<128x128xf32>
    %101 = arith.mulf %100, %79 : vector<128x128xf32>
    %102 = arith.truncf %101 : vector<128x128xf32> to vector<128x128xbf16>
    %103 = vector.extract_strided_slice %88 {offsets = [0, 256], sizes = [128, 128], strides = [1, 1]} : vector<128x384xf32> to vector<128x128xf32>
    %c0_36 = arith.constant 0 : index
    %c0_37 = arith.constant 0 : index
    %104 = vector.load %arg4[%c0_36, %c0_37] : memref<128x128xbf16, #tpu.memory_space<vmem>>, vector<128x128xbf16>
    %cst_38 = arith.constant dense<0.000000e+00> : vector<128x128xf32>
    %105 = tpu.matmul %102, %104, %cst_38 {dimension_numbers = #tpu.dot_dimension_numbers<[1], [0], [0], [1], [0, 0, 1, 1], [], []>} : vector<128x128xbf16>, vector<128x128xbf16>, vector<128x128xf32> -> vector<128x128xf32>
    %106 = arith.addf %103, %105 : vector<128x128xf32>
    %107 = math.tanh %106 : vector<128x128xf32>
    %cst_39 = arith.constant 1.000000e+00 : f32
    %108 = vector.broadcast %cst_39 : f32 to vector<128x128xf32>
    %109 = arith.subf %108, %94 : vector<128x128xf32>
    %110 = arith.mulf %109, %79 : vector<128x128xf32>
    %111 = arith.mulf %94, %107 : vector<128x128xf32>
    %112 = arith.addf %110, %111 : vector<128x128xf32>
    %113 = arith.index_cast %c3_i32 : i32 to index
    %c0_40 = arith.constant 0 : index
    %c0_41 = arith.constant 0 : index
    %114 = vector.load %arg6[%113, %c0_40, %c0_41] : memref<4x128x128xf32, #tpu.memory_space<vmem>>, vector<1x128x128xf32>
    %115 = vector.shape_cast %114 : vector<1x128x128xf32> to vector<128x128xf32>
    %116 = vector.shape_cast %112 : vector<128x128xf32> to vector<1x128x128xf32>
    tpu.vector_store %arg6[%113, %c0_40, %c0_41], %116 {strides = array<i32>} : memref<4x128x128xf32, #tpu.memory_space<vmem>>, vector<1x128x128xf32>,
    %c3_i32_42 = arith.constant 3 : i32
    return
  }
  func.func @transform_0(%arg0: i32) -> (i32, i32) {
    %c0_i32 = arith.constant 0 : i32
    %c0_i32_0 = arith.constant 0 : i32
    return %arg0, %c0_i32 : i32, i32
  }
  func.func @transform_1(%arg0: i32) -> (i32, i32) {
    %c0_i32 = arith.constant 0 : i32
    %c0_i32_0 = arith.constant 0 : i32
    %c0_i32_1 = arith.constant 0 : i32
    return %c0_i32, %c0_i32_0 : i32, i32
  }
  func.func @transform_2(%arg0: i32) -> (i32, i32) {
    %c0_i32 = arith.constant 0 : i32
    %c0_i32_0 = arith.constant 0 : i32
    %c0_i32_1 = arith.constant 0 : i32
    return %c0_i32, %c0_i32_0 : i32, i32
  }
  func.func @transform_3(%arg0: i32) -> (i32, i32) {
    %c0_i32 = arith.constant 0 : i32
    %c0_i32_0 = arith.constant 0 : i32
    %c0_i32_1 = arith.constant 0 : i32
    return %c0_i32, %c0_i32_0 : i32, i32
  }
  func.func @transform_4(%arg0: i32) -> (i32, i32) {
    %c0_i32 = arith.constant 0 : i32
    %c0_i32_0 = arith.constant 0 : i32
    %c0_i32_1 = arith.constant 0 : i32
    return %c0_i32, %c0_i32_0 : i32, i32
  }
  func.func @transform_5(%arg0: i32) -> (i32, i32, i32) {
    %c0_i32 = arith.constant 0 : i32
    %c0_i32_0 = arith.constant 0 : i32
    %c0_i32_1 = arith.constant 0 : i32
    return %c0_i32, %arg0, %c0_i32_0 : i32, i32, i32
  }
}

</mosaic_0001>

<bundles_post_ra>
// kernel: tpu_custom_call.1
= control target key start
LH: loop header
LB: loop body
LE: loop exit
PB: predicated region body
PF: predicated region fallthrough
CT: control target
= control target key end

     0   :  { %10 = vsyncpa [#allocation3], 0  ;;  %s8824_s0 = inlined_call_operand.hbm [shape: bf16[256,128], index: 0, kind: input, shape index: {}]   ;;  %s8825_s1 = inlined_call_operand.hbm [shape: bf16[128,384], index: 1, kind: input, shape index: {}]   ;;  %s8826_s2 = inlined_call_operand.hbm [shape: bf16[128,384], index: 2, kind: input, shape index: {}]   ;;  %s8827_s3 = inlined_call_operand.hbm [shape: bf16[128,128], index: 3, kind: input, shape index: {}]   ;;  %s8828_s4 = inlined_call_operand.vmem [shape: f32[1,384], index: 4, kind: input, shape index: {}]   ;;  %s8829_s5 = inlined_call_operand.hbm [shape: f32[4,256,128], index: 5, kind: output, shape index: {}]  }
   0x1   :  { %12 = vsyncpa [#allocation3 + $0x1], 0 }
   0x2   :  { %13 = vsyncpa [#allocation6], 0 }
   0x3   :  { %14 = vsyncpa [#allocation9], 0 }
   0x4   :  { %15 = vsyncpa [#allocation4], 0 }
   0x5   :  { %17 = vsyncpa [#allocation4 + $0x1], 0  ;;  %s6337_s18 = smov 0   ;;  %s6339_s19 = smov 0  }
   0x6   :  { %s6341_s20 = smov 0   ;;  %s6343_s21 = smov 0  }
   0x7 LB: > { %s6358_s22 = sadd.s32 4294967295, %s6291_s21   ;;  %s4607_s23 = sadd.s32 4294967294, %s6291_s21   ;;  %s6291_s21 = sphi %s6343_s21, %s8984_s21   ;;  %s6287_s20 = sphi %s6341_s20, %s8983_s20   ;;  %s6283_s19 = sphi %s6339_s19, %s8982_s19   ;;  %s6279_s18 = sphi %s6337_s18, %s8981_s18  }
   0x8   : > { %p43_p0 = scmp.ne.s32.totalorder %s6283_s19, %s6279_s18  ;;  %p44_p1 = scmp.eq.s32.totalorder %s6358_s22, 0 }
   0x9   : > { %p151_p2 = scmp.eq.s32.totalorder %s6358_s22, 1  ;;  %p157_p3 = scmp.eq.s32.totalorder %s4607_s23, 1 }
   0xa   : > { %p6367_p4 = por %p44_p1, %p43_p0  ;;  %p4608_p5 = scmp.ge.s32.totalorder %s6291_s21, 1 }
   0xb   : > { %p6372_p6 = por %p157_p3, %p43_p0  ;;  %p164_p7 = scmp.lt.s32.totalorder %s6291_s21, 3 }
   0xc   : > { %s175_s28 = sshll.u32 %s8825_s1, 4  ;;  %s6293_s30 = smov [#allocation5]   ;;  %s176_s28 = int_to_ptr.hbm [resolvable:$true] %s175_s28 }
   0xd   : > { %p6380_p8 = pnand %p4608_p5, %p164_p7  ;;  %s177_s6 = sshll.u32 %s6293_s30, 4  ;;  %s178_s6 = int_to_ptr.vmem [resolvable:$true] %s177_s6 }
   0xe   : > { %s189_s10 = sshll.u32 %s8826_s2, 4  ;;  %s6294_s11 = smov 192   ;;  %s190_s10 = int_to_ptr.hbm [resolvable:$true] %s189_s10 }
   0xf   : > { %p5427_p9 = pneg %p6380_p8  ;;  %s6295_s12 = smov 12  }
  0x10   : > { %s6296_s13 = smov [#allocation7]   ;;  %s203_s17 = sshll.u32 %s8827_s3, 4  ;;  %s204_s17 = int_to_ptr.hbm [resolvable:$true] %s203_s17 }
  0x11   : > { %p6388_p10 = pnand %p5427_p9, %p44_p1  ;;  %s191_s14 = sshll.u32 %s6296_s13, 4  ;;  %s192_s14 = int_to_ptr.vmem [resolvable:$true] %s191_s14 }
  0x12   : > { %s6297_s23 = smov [#allocation8]   ;;  %s8830_s27 = smov 64  }
  0x13   : > { %5430 = dma.hbm_to_vmem [thread:$0]  (!%p6388_p10), %s176_s28, 3072, %s178_s6, [#allocation6], %s6294_s11, %s6294_s11, %s6295_s12  }
  0x14   : > { %5433 = dma.hbm_to_vmem [thread:$0]  (!%p6388_p10), %s190_s10, 3072, %s192_s14, [#allocation6], %s6294_s11, %s6294_s11, %s6295_s12  }
  0x15   : > { %s205_s26 = sshll.u32 %s6297_s23, 4  ;;  %s6299_s28 = smov 4   ;;  %s206_s26 = int_to_ptr.vmem [resolvable:$true] %s205_s26 }
  0x16   : > { %5436 = dma.hbm_to_vmem [thread:$0]  (!%p6388_p10), %s204_s17, 1024, %s206_s26, [#allocation9], %s8830_s27, %s8830_s27, %s6299_s28  }
  0x17   : > { %s6409_s30 = sadd.s32 1, %s6291_s21   ;;  %s30_s8 = sadd.s32 1, %s6287_s20 }
  0x18   : > { %s27_s6 = ssub.s32 %s6291_s21, %s6409_s30  ;;  %p37_p13 = scmp.ne.s32.totalorder %s6287_s20, %s6283_s19 }
  0x19   : > { %p28_p12 = scmp.eq.s32.totalorder %s27_s6, 0  ;;  %p38_p0 = scmp.eq.s32.totalorder %s6291_s21, 0 }
  0x1a   : > { %p6422_p3 = por %p151_p2, %p37_p13  ;;  %p5448_p5 = scmp.lt.s32.totalorder %s6291_s21, 2 }
  0x1b   : > { %s6418_s9 = scalar_select %p28_p12, %s6287_s20, %s30_s8  }
  0x1c   : > { %s222_s7 = sand.u32 1, %s6287_s20   ;;  %s5267_s11 = sshll.u32 %s6291_s21, 6 }
  0x1d   : > { %p39_p7 = por %p38_p0, %p37_p13  ;;  %s4613_s12 = sshll.u32 %s222_s7, 6 }
  0x1e   : > { %s231_s15 = scalar_lea.hbm %s8824_s0, %s5267_s11  ;;  %s226_s17 = scalar_lea.vmem [#allocation2], %s4613_s12 }
  0x1f   : > { %s232_s16 = sshll.u32 %s231_s15, 4  ;;  %s234_s23 = sshll.u32 %s226_s17, 4  ;;  %s233_s16 = int_to_ptr.hbm [resolvable:$true] %s232_s16  ;;  %s235_s23 = int_to_ptr.vmem [resolvable:$true] %s234_s23 }
  0x20   : > { %p6432_p9 = pnand %p5448_p5, %p39_p7  ;;  %s223_s6 = scalar_lea.sflag [#allocation3], %s222_s7 }
  0x21   : > { %s6215_s8 = sshra.s32 %s233_s16, 4  ;;  %s6222_s12 = scalar_lea.hbm %s8824_s0, 128  ;;  %s6216_s8 = int_to_ptr.hbm [resolvable:$true] %s6215_s8 }
  0x22   : > { %s6217_s27 = scalar_lea.hbm %s6216_s8, 64  ;;  %p6219_p10 = pneg %p6432_p9 }
  0x23   : > { %p6218_p2 = scmp.ne.s32.totalorder %s6216_s8, %s6217_s27  ;;  %p6223_p0 = scmp.lt.s32.totalorder %s6216_s8, %s8824_s0 }
  0x24   : > { %p6224_p5 = scmp.lt.s32.totalorder %s6222_s12, %s6217_s27 }
  0x25   : > { %p6220_p12 = pnand %p6219_p10, %p6218_p2 }
  0x26   : > { %p6225_p7 = por %p6224_p5, %p6223_p0 }
  0x27   : > { %p6221_p13 = pneg %p6220_p12 }
  0x29   : > { %p6226_p11 = pnand %p6225_p7, %p6221_p13 }
  0x2b   : > { %6229 = shalt.err (!%p6226_p11)
}
  0x2c   : > { %s8837_s7 = smov 64   ;;  %246 = sbr.rel (%p6380_p8) target bundleno = 1352 (0x548), region = 40 }
  0x2d   : > { %5440 = dma.hbm_to_vmem [thread:$0]  (!%p6432_p9), %s233_s16, 1024, %s235_s23, %s223_s6, %s8837_s7, %s8837_s7, %s6299_s28  }
  0x2e   : > { %s6452_s17 = sand.u32 (!%p6380_p8), 1, %s6283_s19  }
  0x2f   : > { %s4617_s8 = sshll.u32 (!%p6380_p8), %s6452_s17, 6  ;;  %s249_s27 = scalar_lea.sflag (!%p6380_p8), [#allocation3], %s6452_s17 }
  0x30   : > { %s6456_s11 = scalar_lea.vmem (!%p6380_p8), [#allocation2], %s4617_s8 }
  0x31   : > { %6262 = dma.done.wait (%p6367_p4), %s249_s27, 1024  }
  0x32   : > { %6264 = vsyncadd (%p6367_p4), %s249_s27, 4294966272 }
  0x33   : > { %6266 = dma.done.wait (%p44_p1), [#allocation6], 6144  }
  0x34   : > { %6268 = vsyncadd (%p44_p1), [#allocation6], 4294961152 }
  0x35   : > { %6270 = dma.done.wait (%p44_p1), [#allocation9], 1024  }
  0x36   : > { %6272 = vsyncadd (%p44_p1), [#allocation9], 4294966272  ;;  %v4712_v0 = vld [vmem:[#allocation5 + $0xa8] sm:$0xf]  ;;  %v5290_v1 = vld [vmem:[#allocation5 + $0xb0] sm:$0xf0] }
  0x37   : > { %v4704_v2 = vld [vmem:[#allocation5 + $0x90] sm:$0xf]  ;;  %v4713_v3 = vor.u32 %v5290_v1, %v4712_v0  ;;  %v5288_v4 = vld [vmem:[#allocation5 + $0x98] sm:$0xf0]  ;;  %v4696_v7 = vld [vmem:[#allocation5 + $0x78] sm:$0xf] }
  0x38   : > { %v4716_v5 = vld [vmem:[#allocation5 + $0xb0] sm:$0xf]  ;;  %v4705_v6 = vor.u32 %v5288_v4, %v4704_v2  ;;  %v5291_v8 = vld [vmem:[#allocation5 + $0xb8] sm:$0xf0]  ;;  %v5286_v9 = vld [vmem:[#allocation5 + $0x80] sm:$0xf0] }
  0x39   : > { %497 = vmatpush.bf16.msra.mxu0 %v4713_v3  ;;  %5389 = vmatpush.bf16.msra.mxu2 %v4713_v3  ;;  %v4717_v10 = vor.u32 %v5291_v8, %v4716_v5  ;;  %v4708_v11 = vld [vmem:[#allocation5 + $0x98] sm:$0xf]  ;;  %v5289_v12 = vld [vmem:[#allocation5 + $0xa0] sm:$0xf0]  ;;  %v4697_v14 = vor.u32 %v5286_v9, %v4696_v7  ;;  %v4700_v15 = vld [vmem:[#allocation5 + $0x80] sm:$0xf] }
  0x3a   : > { %v4709_v13 = vor.u32 %v5289_v12, %v4708_v11  ;;  %v5287_v16 = vld [vmem:[#allocation5 + $0x88] sm:$0xf0]  ;;  %v4688_v17 = vld [vmem:[#allocation5 + $0x60] sm:$0xf]  ;;  %v4692_v21 = vld [vmem:[#allocation5 + $0x68] sm:$0xf] }
  0x3b   : > { %546 = vmatpush.bf16.msra.mxu1 %v4717_v10  ;;  %5397 = vmatpush.bf16.msra.mxu3 %v4717_v10  ;;  %v5284_v18 = vld [vmem:[#allocation5 + $0x68] sm:$0xf0]  ;;  %v4701_v19 = vor.u32 %v5287_v16, %v4700_v15  ;;  %v5285_v22 = vld [vmem:[#allocation5 + $0x70] sm:$0xf0]  ;;  %v4680_v23 = vld [vmem:[#allocation5 + $0x48] sm:$0xf] }
  0x3c   : > { %v4689_v20 = vor.u32 %v5284_v18, %v4688_v17  ;;  %v5282_v24 = vld [vmem:[#allocation5 + $0x50] sm:$0xf0]  ;;  %v4693_v25 = vor.u32 %v5285_v22, %v4692_v21  ;;  %v4684_v27 = vld [vmem:[#allocation5 + $0x50] sm:$0xf]  ;;  %v5283_v28 = vld [vmem:[#allocation5 + $0x58] sm:$0xf0] }
  0x3d   : > { %498 = vmatpush.bf16.msra.mxu0 %v4705_v6  ;;  %5390 = vmatpush.bf16.msra.mxu2 %v4705_v6  ;;  %v4681_v26 = vor.u32 %v5282_v24, %v4680_v23  ;;  %v4672_v29 = vld [vmem:[#allocation5 + $0x30] sm:$0xf]  ;;  %v5280_v30 = vld [vmem:[#allocation5 + $0x38] sm:$0xf0]  ;;  %v4685_v31 = vor.u32 %v5283_v28, %v4684_v27  ;;  %v4676_v33 = vld [vmem:[#allocation5 + $0x38] sm:$0xf] }
  0x3e   : > { %v4673_v32 = vor.u32 %v5280_v30, %v4672_v29  ;;  %v5281_v34 = vld [vmem:[#allocation5 + $0x40] sm:$0xf0]  ;;  %v4664_v35 = vld [vmem:[#allocation5 + $0x18] sm:$0xf]  ;;  %v4668_v39 = vld [vmem:[#allocation5 + $0x20] sm:$0xf] }
  0x3f   : > { %547 = vmatpush.bf16.msra.mxu1 %v4709_v13  ;;  %5398 = vmatpush.bf16.msra.mxu3 %v4709_v13  ;;  %v5278_v36 = vld [vmem:[#allocation5 + $0x20] sm:$0xf0]  ;;  %v4677_v37 = vor.u32 %v5281_v34, %v4676_v33  ;;  %v5279_v40 = vld [vmem:[#allocation5 + $0x28] sm:$0xf0]  ;;  %v4656_v41 = vld [vmem:[#allocation5] sm:$0xf] }
  0x40   : > { %v4665_v38 = vor.u32 %v5278_v36, %v4664_v35  ;;  %v5276_v42 = vld [vmem:[#allocation5 + $0x8] sm:$0xf0]  ;;  %v4669_v43 = vor.u32 %v5279_v40, %v4668_v39  ;;  %v4660_v45 = vld [vmem:[#allocation5 + $0x8] sm:$0xf]  ;;  %v5277_v46 = vld [vmem:[#allocation5 + $0x10] sm:$0xf0] }
  0x41   : > { %499 = vmatpush.bf16.msra.mxu0 %v4697_v14  ;;  %5391 = vmatpush.bf16.msra.mxu2 %v4697_v14  ;;  %v4657_v44 = vor.u32 %v5276_v42, %v4656_v41  ;;  %v5268_v47 = vld [vmem:[%s6456_s11] sm:$0xff]  ;;  %v4661_v48 = vor.u32 %v5277_v46, %v4660_v45  ;;  %v5269_v50 = vld [vmem:[%s6456_s11 + $0x8] sm:$0xff]  ;;  %v4822_v53 = vld [vmem:[#allocation7 + $0xb4] sm:$0xf0]  ;;  %s4621_s28 = sshll.u32 %s6452_s17, 9  ;;  %s4467_s6 = scalar_lea.sflag [#allocation4], %s6452_s17 }
  0x42   : > { %v5272_v49 = vld [vmem:[%s6456_s11 + $0x20] sm:$0xff]  ;;  %v5273_v51 = vld [vmem:[%s6456_s11 + $0x28] sm:$0xff]  ;;  %v5310_v54 = vld [vmem:[#allocation7 + $0x94] sm:$0xf]  ;;  %s6512_s16 = scalar_lea.vmem [#allocation10], %s4621_s28 }
  0x43   : > { %548 = vmatpush.bf16.msra.mxu1 %v4701_v19  ;;  %5399 = vmatpush.bf16.msra.mxu3 %v4701_v19  ;;  %v5313_v52 = vld [vmem:[#allocation7 + $0xac] sm:$0xf]  ;;  %v4810_v55 = vld [vmem:[#allocation7 + $0x9c] sm:$0xf0]  ;;  %v5307_v58 = vld [vmem:[#allocation7 + $0x7c] sm:$0xf] }
  0x44   : > { %v4825_v56 = vor.u32 %v5313_v52, %v4822_v53  ;;  %v4813_v57 = vor.u32 %v5310_v54, %v4810_v55  ;;  %v4798_v59 = vld [vmem:[#allocation7 + $0x84] sm:$0xf0]  ;;  %v5270_v61 = vld [vmem:[%s6456_s11 + $0x10] sm:$0xff]  ;;  %v5271_v63 = vld [vmem:[%s6456_s11 + $0x18] sm:$0xff] }
  0x45   : > { %500 = vmatpush.bf16.msra.mxu0 %v4689_v20  ;;  %5392 = vmatpush.bf16.msra.mxu2 %v4689_v20  ;;  %v4801_v60 = vor.u32 %v5307_v58, %v4798_v59  ;;  %v5274_v62 = vld [vmem:[%s6456_s11 + $0x30] sm:$0xff]  ;;  %v5275_v0 = vld [vmem:[%s6456_s11 + $0x38] sm:$0xff]  ;;  %v4820_v1 = vld [vmem:[#allocation7 + $0xa8] sm:$0xf] }
  0x46   : > { %v5314_v2 = vld [vmem:[#allocation7 + $0xb0] sm:$0xf0]  ;;  %v4828_v3 = vld [vmem:[#allocation7 + $0xb0] sm:$0xf]  ;;  %v5315_v5 = vld [vmem:[#allocation7 + $0xb8] sm:$0xf0] }
  0x47   : > { %549 = vmatpush.bf16.msra.mxu1 %v4693_v25  ;;  %5400 = vmatpush.bf16.msra.mxu3 %v4693_v25  ;;  %v4821_v4 = vor.u32 %v5314_v2, %v4820_v1  ;;  %v4829_v6 = vor.u32 %v5315_v5, %v4828_v3  ;;  %v4808_v7 = vld [vmem:[#allocation7 + $0x90] sm:$0xf]  ;;  %v5311_v8 = vld [vmem:[#allocation7 + $0x98] sm:$0xf0]  ;;  %v4816_v9 = vld [vmem:[#allocation7 + $0x98] sm:$0xf] }
  0x48   : > { %v4809_v10 = vor.u32 %v5311_v8, %v4808_v7  ;;  %v5312_v11 = vld [vmem:[#allocation7 + $0xa0] sm:$0xf0]  ;;  %v4796_v13 = vld [vmem:[#allocation7 + $0x78] sm:$0xf]  ;;  %v4804_v15 = vld [vmem:[#allocation7 + $0x80] sm:$0xf] }
  0x49   : > { %501 = vmatpush.bf16.msra.mxu0 %v4681_v26  ;;  %5393 = vmatpush.bf16.msra.mxu2 %v4681_v26  ;;  %v4817_v12 = vor.u32 %v5312_v11, %v4816_v9  ;;  %v5308_v14 = vld [vmem:[#allocation7 + $0x80] sm:$0xf0]  ;;  %v5309_v17 = vld [vmem:[#allocation7 + $0x88] sm:$0xf0]  ;;  %v4786_v20 = vld [vmem:[#allocation7 + $0x6c] sm:$0xf0] }
  0x4a   : > { %v4797_v16 = vor.u32 %v5308_v14, %v4796_v13  ;;  %v4805_v18 = vor.u32 %v5309_v17, %v4804_v15  ;;  %v5304_v19 = vld [vmem:[#allocation7 + $0x64] sm:$0xf]  ;;  %v4784_v21 = vld [vmem:[#allocation7 + $0x60] sm:$0xf]  ;;  %v5305_v23 = vld [vmem:[#allocation7 + $0x68] sm:$0xf0] }
  0x4b   : > { %550 = vmatpush.bf16.msra.mxu1 %v4685_v31  ;;  %5401 = vmatpush.bf16.msra.mxu3 %v4685_v31  ;;  %v4789_v22 = vor.u32 %v5304_v19, %v4786_v20  ;;  %v4792_v24 = vld [vmem:[#allocation7 + $0x68] sm:$0xf]  ;;  %v5306_v25 = vld [vmem:[#allocation7 + $0x70] sm:$0xf0]  ;;  %v4785_v26 = vor.u32 %v5305_v23, %v4784_v21  ;;  %v6481_v28 = vld [vmem:[%s8828_s4] sm:$0x7] }
  0x4c   : > { %v4793_v27 = vor.u32 %v5306_v25, %v4792_v24  ;;  %v5301_v29 = vld [vmem:[#allocation7 + $0x4c] sm:$0xf]  ;;  %v4774_v30 = vld [vmem:[#allocation7 + $0x54] sm:$0xf0]  ;;  %v4772_v31 = vld [vmem:[#allocation7 + $0x48] sm:$0xf] }
  0x4d   : > { %502 = vmatpush.bf16.msra.mxu0 %v4673_v32  ;;  %5394 = vmatpush.bf16.msra.mxu2 %v4673_v32  ;;  %v4777_v32 = vor.u32 %v5301_v29, %v4774_v30  ;;  %v5302_v33 = vld [vmem:[#allocation7 + $0x50] sm:$0xf0]  ;;  %v4780_v34 = vld [vmem:[#allocation7 + $0x50] sm:$0xf]  ;;  %v5303_v35 = vld [vmem:[#allocation7 + $0x58] sm:$0xf0] }
  0x4e   : > { %v4773_v36 = vor.u32 %v5302_v33, %v4772_v31  ;;  %v5298_v39 = vld [vmem:[#allocation7 + $0x34] sm:$0xf]  ;;  %v4762_v40 = vld [vmem:[#allocation7 + $0x3c] sm:$0xf0]  ;;  %v4760_v42 = vld [vmem:[#allocation7 + $0x30] sm:$0xf] }
  0x4f   : > { %551 = vmatpush.bf16.msra.mxu1 %v4677_v37  ;;  %5402 = vmatpush.bf16.msra.mxu3 %v4677_v37  ;;  %v4781_v37 = vor.u32 %v5303_v35, %v4780_v34  ;;  %v4765_v41 = vor.u32 %v5298_v39, %v4762_v40  ;;  %v5300_v46 = vld [vmem:[#allocation7 + $0x40] sm:$0xf0]  ;;  %v4748_v53 = vld [vmem:[#allocation7 + $0x18] sm:$0xf]  ;;  %v4756_v55 = vld [vmem:[#allocation7 + $0x20] sm:$0xf] }
  0x50   : > { %v5296_v54 = vld [vmem:[#allocation7 + $0x20] sm:$0xf0]  ;;  %v5297_v59 = vld [vmem:[#allocation7 + $0x28] sm:$0xf0]  ;;  %v4744_v2 = vld [vmem:[#allocation7 + $0x8] sm:$0xf] }
  0x51   : > { %503 = vmatpush.bf16.msra.mxu0 %v4665_v38  ;;  %5395 = vmatpush.bf16.msra.mxu2 %v4665_v38  ;;  %v6484_v38 = vperm.slane %v6481_v28, 0  ;;  %v4749_v58 = vor.u32 %v5296_v54, %v4748_v53  ;;  %v5293_v1 = vld [vmem:[#allocation7 + $0x8] sm:$0xf0]  ;;  %v5294_v3 = vld [vmem:[#allocation7 + $0x10] sm:$0xf0] }
  0x53   : > { %552 = vmatpush.bf16.msra.mxu1 %v4669_v43  ;;  %5403 = vmatpush.bf16.msra.mxu3 %v4669_v43  ;;  %v5299_v43 = vld [vmem:[#allocation7 + $0x38] sm:$0xf0] }
  0x54   : > { %v4761_v45 = vor.u32 %v5299_v43, %v4760_v42 }
  0x55   : > { %504 = vmatpush.bf16.msra.mxu0 %v4657_v44  ;;  %5396 = vmatpush.bf16.msra.mxu2 %v4657_v44  ;;  %v4768_v44 = vld [vmem:[#allocation7 + $0x38] sm:$0xf] }
  0x57   : > { %553 = vmatpush.bf16.msra.mxu1 %v4661_v48  ;;  %5404 = vmatpush.bf16.msra.mxu3 %v4661_v48  ;;  %v4769_v48 = vor.u32 %v5300_v46, %v4768_v44 }
  0x58   : > { %505 = vmatmul.bf16.vlgmr.msra.gmra.mxu0 %v5268_v47  ;;  %525 = vmatmul.bf16.vlgmr.msra.gmra.mxu2 %v5272_v49 }
  0x59   : > { %1115 = vmatpush.bf16.msrb.mxu2 %v4821_v4  ;;  %1213 = vmatpush.bf16.msrb.mxu0 %v4829_v6  ;;  %v4745_v6 = vor.u32 %v5294_v3, %v4744_v2 }
  0x5a   : > { %554 = vmatmul.bf16.vlgmr.msra.gmra.mxu1 %v5268_v47  ;;  %574 = vmatmul.bf16.vlgmr.msra.gmra.mxu3 %v5272_v49 }
  0x5b   : > { %1164 = vmatpush.bf16.msrb.mxu3 %v4825_v56 }
  0x5d   : > { %1116 = vmatpush.bf16.msrb.mxu2 %v4809_v10  ;;  %1214 = vmatpush.bf16.msrb.mxu0 %v4817_v12  ;;  %v6489_v12 = vperm.slane %v6481_v28, 2 }
  0x5f   : > { %1165 = vmatpush.bf16.msrb.mxu3 %v4813_v57 }
  0x61   : > { %1117 = vmatpush.bf16.msrb.mxu2 %v4797_v16  ;;  %1215 = vmatpush.bf16.msrb.mxu0 %v4805_v18 }
  0x63   : > { %1166 = vmatpush.bf16.msrb.mxu3 %v4801_v60  ;;  %v4757_v60 = vor.u32 %v5297_v59, %v4756_v55 }
  0x65   : > { %1118 = vmatpush.bf16.msrb.mxu2 %v4785_v26  ;;  %1216 = vmatpush.bf16.msrb.mxu0 %v4793_v27 }
  0x67   : > { %1167 = vmatpush.bf16.msrb.mxu3 %v4789_v22 }
  0x68   : > { %510 = vmatmul.bf16.gmra.mxu0 %v5269_v50  ;;  %530 = vmatmul.bf16.gmra.mxu2 %v5273_v51 }
  0x69   : > { %1119 = vmatpush.bf16.msrb.mxu2 %v4773_v36  ;;  %1217 = vmatpush.bf16.msrb.mxu0 %v4781_v37 }
  0x6a   : > { %559 = vmatmul.bf16.gmra.mxu1 %v5269_v50  ;;  %579 = vmatmul.bf16.gmra.mxu3 %v5273_v51  ;;  %v5295_v50 = vld [vmem:[#allocation7 + $0x1c] sm:$0xf]  ;;  %v4750_v51 = vld [vmem:[#allocation7 + $0x24] sm:$0xf0] }
  0x6b   : > { %1168 = vmatpush.bf16.msrb.mxu3 %v4777_v32  ;;  %v4753_v52 = vor.u32 %v5295_v50, %v4750_v51 }
  0x6d   : > { %1120 = vmatpush.bf16.msrb.mxu2 %v4761_v45  ;;  %1218 = vmatpush.bf16.msrb.mxu0 %v4769_v48 }
  0x6f   : > { %1169 = vmatpush.bf16.msrb.mxu3 %v4765_v41 }
  0x71   : > { %1121 = vmatpush.bf16.msrb.mxu2 %v4749_v58  ;;  %1219 = vmatpush.bf16.msrb.mxu0 %v4757_v60 }
  0x73   : > { %1170 = vmatpush.bf16.msrb.mxu3 %v4753_v52 }
  0x75   : > { %1220 = vmatpush.bf16.msrb.mxu0 %v4745_v6 }
  0x78   : > { %515 = vmatmul.bf16.gmra.mxu0 %v5270_v61  ;;  %535 = vmatmul.bf16.gmra.mxu2 %v5274_v62 }
  0x7a   : > { %564 = vmatmul.bf16.gmra.mxu1 %v5270_v61  ;;  %584 = vmatmul.bf16.gmra.mxu3 %v5274_v62  ;;  %v5292_v61 = vld [vmem:[#allocation7 + $0x4] sm:$0xf]  ;;  %v4738_v62 = vld [vmem:[#allocation7 + $0xc] sm:$0xf0] }
  0x88   : > { %520 = vmatmul.bf16.gmra.mxu0 %v5271_v63  ;;  %540 = vmatmul.bf16.gmra.mxu2 %v5275_v0 }
  0x8a   : > { %569 = vmatmul.bf16.gmra.mxu1 %v5271_v63  ;;  %589 = vmatmul.bf16.gmra.mxu3 %v5275_v0  ;;  %v4736_v63 = vld [vmem:[#allocation7] sm:$0xf]  ;;  %v4741_v0 = vor.u32 %v5292_v61, %v4738_v62 }
  0x8b   : > { %v4737_v5 = vor.u32 %v5293_v1, %v4736_v63 }
  0x8c   : > { %1171 = vmatpush.bf16.msrb.mxu3 %v4741_v0 }
  0x8d   : > { %1122 = vmatpush.bf16.msrb.mxu2 %v4737_v5 }
  0xd5   : > { %v506_v47 = vpop.f32.mrf.mxu0 }
  0xd6   : > { %v507_v49 = vadd.f32 %v506_v47, %v6484_v38 }
  0xd7   : > { %v555_v57 = vpop.f32.mrf.mxu1 }
  0xd8   : > { %v4718_v56 = vmul.f32 -1.442695, %v507_v49  ;;  %v556_v14 = vadd.f32 %v555_v57, %v6489_v12 }
  0xda   : > { %5499 = vpow2.f32 %v4718_v56 }
  0xdb   : > { %v526_v13 = vpop.f32.mrf.mxu2 }
  0xdc   : > { %v527_v23 = vadd.f32 %v526_v13, %v6484_v38 }
  0xdd   : > { %v508_v4 = vpop.f32.mrf.mxu0  ;;  %v6520_v59 = vpop.f32.mrf.mxu3 }
  0xde   : > { %v509_v7 = vadd.f32 %v508_v4, %v6484_v38  ;;  %v4726_v26 = vmul.f32 -1.442695, %v527_v23 }
  0xdf   : > { %v557_v10 = vpop.f32.mrf.mxu1 }
  0xe0   : > { %v5500_v8 = vpop.eup %5499  ;;  %v4719_v9 = vmul.f32 -1.442695, %v509_v7  ;;  %v558_v43 = vadd.f32 %v557_v10, %v6489_v12 }
  0xe1   : > { %v643_v11 = vadd.f32 1.0, %v5500_v8 }
  0xe2   : > { %5501 = vpow2.f32 %v4719_v9 }
  0xe3   : > { %5503 = vrcp.f32 %v643_v11  ;;  %v528_v24 = vpop.f32.mrf.mxu2  ;;  %v668_v28 = vand.u32 2147483647, %v643_v11  ;;  %v670_v29 = vand.u32 2147483648, %v643_v11  ;;  %vm664_vm1 = vweird.f32 %v643_v11 }
  0xe4   : > { %5505 = vtanh.f32 %v556_v14  ;;  %v529_v27 = vadd.f32 %v528_v24, %v6484_v38 }
  0xe5   : > { %v511_v15 = vpop.f32.mrf.mxu0  ;;  %v671_v41 = vor.u32 1.1754944e-38, %v670_v29  ;;  %vm669_vm3 = vcmp.eq.f32.partialorder %v668_v28, 8.507059e+37  ;;  %v6552_v28 = vpop.f32.mrf.mxu3 }
  0xe6   : > { %v512_v16 = vadd.f32 %v511_v15, %v6484_v38  ;;  %v4727_v33 = vmul.f32 -1.442695, %v529_v27 }
  0xe7   : > { %v560_v19 = vpop.f32.mrf.mxu1 }
  0xe8   : > { %v5502_v17 = vpop.eup %5501  ;;  %v4720_v18 = vmul.f32 -1.442695, %v512_v16  ;;  %v561_v51 = vadd.f32 %v560_v19, %v6489_v12 }
  0xe9   : > { %v5504_v20 = vpop.eup %5503  ;;  %v6493_v21 = vadd.f32 1.0, %v5502_v17 }
  0xea   : > { %v660_v22 = vmul.f32 %v5504_v20, %v643_v11  ;;  %5507 = vpow2.f32 %v4720_v18  ;;  %vm665_vm0 = vweird.f32 %v5504_v20  ;;  %v5506_v34 = vpop.eup %5505 }
  0xeb   : > { %5509 = vrcp.f32 %v6493_v21  ;;  %vm666_vm2 = vmor %vm664_vm1, %vm665_vm0  ;;  %v531_v47 = vpop.f32.mrf.mxu2  ;;  %v685_v52 = vand.u32 2147483648, %v6493_v21  ;;  %v683_v57 = vand.u32 2147483647, %v6493_v21  ;;  %vm679_vm5 = vweird.f32 %v6493_v21 }
  0xec   : > { %v661_v25 = vsub.f32 1.0, %v660_v22  ;;  %5511 = vpow2.f32 %v4726_v26  ;;  %v532_v18 = vadd.f32 %v531_v47, %v6484_v38 }
  0xed   : > { %v513_v30 = vpop.f32.mrf.mxu0  ;;  %5513 = vpow2.f32 %v4727_v33  ;;  %v686_v2 = vor.u32 1.1754944e-38, %v685_v52  ;;  %vm684_vm7 = vcmp.eq.f32.partialorder %v683_v57, 8.507059e+37 }
  0xee   : > { %v662_v31 = vmul.f32 %v5504_v20, %v661_v25  ;;  %v514_v32 = vadd.f32 %v513_v30, %v6484_v38  ;;  %v4728_v27 = vmul.f32 -1.442695, %v532_v18 }
  0xef   : > { %v562_v39 = vpop.f32.mrf.mxu1 }
  0xf0   : > { %v5508_v35 = vpop.eup %5507  ;;  %v663_v36 = vadd.f32 %v5504_v20, %v662_v31  ;;  %v4721_v37 = vmul.f32 -1.442695, %v514_v32  ;;  %v563_v5 = vadd.f32 %v562_v39, %v6489_v12 }
  0xf1   : > { %v5510_v40 = vpop.eup %5509  ;;  %v6501_v42 = vadd.f32 1.0, %v5508_v35 }
  0xf2   : > { %v675_v44 = vmul.f32 %v5510_v40, %v6493_v21  ;;  %v667_v45 = vsel %vm666_vm2, %v5504_v20, %v663_v36  ;;  %5515 = vpow2.f32 %v4721_v37  ;;  %v5512_v48 = vpop.eup %5511  ;;  %vm680_vm4 = vweird.f32 %v5510_v40 }
  0xf3   : > { %v672_v46 = vsel %vm669_vm3, %v671_v41, %v667_v45  ;;  %5517 = vrcp.f32 %v6501_v42  ;;  %v6510_v54 = vadd.f32 1.0, %v5512_v48  ;;  %v5514_v55 = vpop.eup %5513  ;;  %vm681_vm6 = vmor %vm679_vm5, %vm680_vm4  ;;  %v698_v4 = vand.u32 2147483647, %v6501_v42  ;;  %v533_v19 = vpop.f32.mrf.mxu2 }
  0xf4   : > { %v676_v49 = vsub.f32 1.0, %v675_v44  ;;  %v6506_v50 = vmul.f32 %v5506_v34, %v672_v46  ;;  %5519 = vtanh.f32 %v558_v43  ;;  %v6522_v0 = vadd.f32 1.0, %v5514_v55 }
  0xf5   : > { %v516_v53 = vpop.f32.mrf.mxu0  ;;  %5521 = vrcp.f32 %v6510_v54  ;;  %vm694_vm8 = vweird.f32 %v6501_v42  ;;  %vm6537_vm9 = vcmp.eq.f32.partialorder %v698_v4, 8.507059e+37  ;;  %v700_v16 = vand.u32 2147483648, %v6501_v42 }
  0xf6   : > { %931 = vst [vmem:[%s6512_s16] sm:$0xff] %v6506_v50  ;;  %v677_v56 = vmul.f32 %v5510_v40, %v676_v49  ;;  %v517_v58 = vadd.f32 %v516_v53, %v6484_v38  ;;  %5523 = vtanh.f32 %v561_v51  ;;  %v534_v33 = vadd.f32 %v533_v19, %v6484_v38 }
  0xf7   : > { %v565_v63 = vpop.f32.mrf.mxu1  ;;  %v701_v35 = vor.u32 1.1754944e-38, %v700_v16  ;;  %v576_v45 = vadd.f32 %v6520_v59, %v6489_v12  ;;  %vm784_vm14 = vweird.f32 %v6510_v54  ;;  %v790_v15 = vand.u32 2147483648, %v6510_v54 }
  0xf8   : > { %v5516_v60 = vpop.eup %5515  ;;  %v678_v61 = vadd.f32 %v5510_v40, %v677_v56  ;;  %v4722_v62 = vmul.f32 -1.442695, %v517_v58  ;;  %v566_v13 = vadd.f32 %v565_v63, %v6489_v12  ;;  %v4729_v49 = vmul.f32 -1.442695, %v534_v33 }
  0xf9   : > { %v5518_v1 = vpop.eup %5517  ;;  %v6524_v3 = vadd.f32 1.0, %v5516_v60 }
  0xfa   : > { %v690_v6 = vmul.f32 %v5518_v1, %v6501_v42  ;;  %v682_v7 = vsel %vm681_vm6, %v5510_v40, %v678_v61  ;;  %5525 = vpow2.f32 %v4722_v62  ;;  %v5520_v8 = vpop.eup %5519  ;;  %vm695_vm10 = vweird.f32 %v5518_v1 }
  0xfb   : > { %v687_v9 = vsel %vm684_vm7, %v686_v2, %v682_v7  ;;  %5527 = vrcp.f32 %v6524_v3  ;;  %v6535_v14 = vpop.eup %5521  ;;  %v713_v24 = vand.u32 2147483647, %v6524_v3  ;;  %v715_v25 = vand.u32 2147483648, %v6524_v3  ;;  %vm696_vm11 = vmor %vm694_vm8, %vm695_vm10  ;;  %v6589_v63 = vpop.f32.mrf.mxu2 }
  0xfc   : > { %v691_v10 = vsub.f32 1.0, %v690_v6  ;;  %v6531_v11 = vmul.f32 %v5520_v8, %v687_v9  ;;  %5529 = vrcp.f32 %v6522_v0  ;;  %v5524_v20 = vpop.eup %5523  ;;  %v780_v23 = vmul.f32 %v6535_v14, %v6510_v54 }
  0xfd   : > { %5531 = vtanh.f32 %v563_v5  ;;  %v518_v17 = vpop.f32.mrf.mxu0  ;;  %vm709_vm12 = vweird.f32 %v6524_v3  ;;  %vm6567_vm13 = vcmp.eq.f32.partialorder %v713_v24, 8.507059e+37  ;;  %v716_v48 = vor.u32 1.1754944e-38, %v715_v25 }
  0xfe   : > { %932 = vst [vmem:[%s6512_s16 + $0x8] sm:$0xff] %v6531_v11  ;;  %v692_v21 = vmul.f32 %v5518_v1, %v691_v10  ;;  %v519_v22 = vadd.f32 %v518_v17, %v6484_v38  ;;  %v947_v26 = vpack.c.bf16 %v6531_v11, %v6506_v50  ;;  %5533 = vtanh.f32 %v566_v13 }
  0xff   : > { %v567_v32 = vpop.f32.mrf.mxu1  ;;  %v781_v37 = vsub.f32 1.0, %v780_v23  ;;  %5535 = vpow2.f32 %v4728_v27  ;;  %vm785_vm0 = vweird.f32 %v6535_v14  ;;  %v788_v62 = vand.u32 2147483647, %v6510_v54 }
 0x100   : > { %v5526_v29 = vpop.eup %5525  ;;  %v693_v30 = vadd.f32 %v5518_v1, %v692_v21  ;;  %v4723_v31 = vmul.f32 -1.442695, %v519_v22  ;;  %1123 = vmatmul.bf16.vlgmr.msrb.gmra.mxu2 %v947_v26  ;;  %1172 = vmatmul.bf16.vlgmr.msrb.gmra.mxu3 %v947_v26  ;;  %v568_v53 = vadd.f32 %v567_v32, %v6489_v12  ;;  %vm6597_vm1 = vmor %vm784_vm14, %vm785_vm0  ;;  %v791_v25 = vor.u32 1.1754944e-38, %v790_v15 }
 0x101   : > { %v5528_v34 = vpop.eup %5527  ;;  %v6558_v36 = vadd.f32 1.0, %v5526_v29  ;;  %1221 = vmatmul.bf16.vlgmr.msrb.gmra.mxu0 %v947_v26  ;;  %v782_v55 = vmul.f32 %v6535_v14, %v781_v37  ;;  %vm789_vm5 = vcmp.eq.f32.partialorder %v788_v62, 8.507059e+37 }
 0x102   : > { %v6560_v39 = vpop.eup %5529  ;;  %v705_v40 = vmul.f32 %v5528_v34, %v6524_v3  ;;  %v697_v41 = vsel %vm696_vm11, %v5518_v1, %v693_v30  ;;  %5537 = vpow2.f32 %v4723_v31  ;;  %vm710_vm15 = vweird.f32 %v5528_v34  ;;  %v6591_v1 = vpop.f32.mrf.mxu3 }
 0x103   : > { %v5532_v43 = vpop.eup %5531  ;;  %v702_v42 = vsel %vm6537_vm9, %v701_v35, %v697_v41  ;;  %5539 = vrcp.f32 %v6558_v36  ;;  %v795_v52 = vmul.f32 %v6560_v39, %v6522_v0  ;;  %v728_v60 = vand.u32 2147483647, %v6558_v36  ;;  %vm711_vm2 = vmor %vm709_vm12, %vm710_vm15 }
 0x104   : > { %v706_v46 = vsub.f32 1.0, %v705_v40  ;;  %v6573_v47 = vmul.f32 %v5524_v20, %v702_v42  ;;  %v6580_v56 = vpop.eup %5533  ;;  %v783_v61 = vadd.f32 %v6535_v14, %v782_v55  ;;  %5541 = vtanh.f32 %v576_v45 }
 0x105   : > { %v521_v51 = vpop.f32.mrf.mxu0  ;;  %v5536_v59 = vpop.eup %5535  ;;  %5543 = vpow2.f32 %v4729_v49  ;;  %vm724_vm3 = vweird.f32 %v6558_v36  ;;  %v730_v13 = vand.u32 2147483648, %v6558_v36  ;;  %v796_v18 = vsub.f32 1.0, %v795_v52 }
 0x106   : > { %933 = vst [vmem:[%s6512_s16 + $0x10] sm:$0xff] %v6573_v47  ;;  %v707_v57 = vmul.f32 %v5528_v34, %v706_v46  ;;  %v522_v58 = vadd.f32 %v521_v51, %v6484_v38  ;;  %v6593_v6 = vadd.f32 1.0, %v5536_v59  ;;  %vm6613_vm4 = vcmp.eq.f32.partialorder %v728_v60, 8.507059e+37 }
 0x107   : > { %v570_v7 = vpop.f32.mrf.mxu1  ;;  %v787_v20 = vsel %vm6597_vm1, %v6535_v14, %v783_v61  ;;  %v731_v23 = vor.u32 1.1754944e-38, %v730_v13  ;;  %vm799_vm9 = vweird.f32 %v6522_v0  ;;  %vm800_vm10 = vweird.f32 %v6560_v39 }
 0x108   : > { %v5538_v2 = vpop.eup %5537  ;;  %v708_v4 = vadd.f32 %v5528_v34, %v707_v57  ;;  %v4724_v5 = vmul.f32 -1.442695, %v522_v58  ;;  %v571_v31 = vadd.f32 %v570_v7, %v6489_v12  ;;  %v792_v32 = vsel %vm789_vm5, %v791_v25, %v787_v20  ;;  %vm6679_vm12 = vmor %vm799_vm9, %vm800_vm10 }
 0x109   : > { %v5540_v9 = vpop.eup %5539  ;;  %v6604_v10 = vadd.f32 1.0, %v5538_v2  ;;  %v578_v55 = vadd.f32 %v6552_v28, %v6489_v12  ;;  %v803_v7 = vand.u32 2147483647, %v6522_v0  ;;  %v805_v13 = vand.u32 2147483648, %v6522_v0 }
 0x10a   : > { %v720_v16 = vmul.f32 %v5540_v9, %v6558_v36  ;;  %v712_v17 = vsel %vm711_vm2, %v5528_v34, %v708_v4  ;;  %5545 = vpow2.f32 %v4724_v5  ;;  %v5542_v22 = vpop.eup %5541  ;;  %vm725_vm6 = vweird.f32 %v5540_v9  ;;  %v6633_v35 = vpop.f32.mrf.mxu3 }
 0x10b   : > { %v717_v19 = vsel %vm6567_vm13, %v716_v48, %v712_v17  ;;  %5547 = vrcp.f32 %v6604_v10  ;;  %v5544_v26 = vpop.eup %5543  ;;  %v743_v29 = vand.u32 2147483647, %v6604_v10  ;;  %v797_v34 = vmul.f32 %v6560_v39, %v796_v18  ;;  %vm6642_vm8 = vmor %vm724_vm3, %vm725_vm6  ;;  %v6651_v48 = vpop.f32.mrf.mxu2 }
 0x10c   : > { %v721_v54 = vsub.f32 1.0, %v720_v16  ;;  %v6620_v21 = vmul.f32 %v5532_v43, %v717_v19  ;;  %5549 = vrcp.f32 %v6593_v6  ;;  %v6630_v33 = vadd.f32 1.0, %v5544_v26 }
 0x10d   : > { %5551 = vtanh.f32 %v568_v53  ;;  %v523_v24 = vpop.f32.mrf.mxu0  ;;  %vm739_vm7 = vweird.f32 %v6604_v10  ;;  %v745_v41 = vand.u32 2147483648, %v6604_v10  ;;  %v6637_v42 = vmul.f32 %v5542_v22, %v792_v32 }
 0x10e   : > { %934 = vst [vmem:[%s6512_s16 + $0x18] sm:$0xff] %v6620_v21  ;;  %v722_v27 = vmul.f32 %v5540_v9, %v721_v54  ;;  %v524_v14 = vadd.f32 %v523_v24, %v6484_v38  ;;  %v948_v30 = vpack.c.bf16 %v6620_v21, %v6573_v47  ;;  %5553 = vrcp.f32 %v6630_v33 }
 0x10f   : > { %vm6658_vm11 = vcmp.eq.f32.partialorder %v743_v29, 8.507059e+37  ;;  %939 = vst [vmem:[%s6512_s16 + $0x40] sm:$0xff] %v6637_v42  ;;  %v572_v53 = vpop.f32.mrf.mxu1  ;;  %v798_v60 = vadd.f32 %v6560_v39, %v797_v34  ;;  %v746_v2 = vor.u32 1.1754944e-38, %v745_v41  ;;  %vm6695_vm14 = vcmp.eq.f32.partialorder %v803_v7, 8.507059e+37 }
 0x110   : > { %v5546_v37 = vpop.eup %5545  ;;  %v723_v40 = vadd.f32 %v5540_v9, %v722_v27  ;;  %v4725_v43 = vmul.f32 -1.442695, %v524_v14  ;;  %1128 = vmatmul.bf16.gmra.mxu2 %v948_v30  ;;  %1177 = vmatmul.bf16.gmra.mxu3 %v948_v30  ;;  %v573_v5 = vadd.f32 %v572_v53, %v6489_v12  ;;  %v537_v18 = vadd.f32 %v6589_v63, %v6484_v38 }
 0x111   : > { %v5548_v44 = vpop.eup %5547  ;;  %v6646_v46 = vadd.f32 1.0, %v5546_v37  ;;  %1226 = vmatmul.bf16.gmra.mxu0 %v948_v30  ;;  %v802_v16 = vsel %vm6679_vm12, %v6560_v39, %v798_v60  ;;  %v806_v54 = vor.u32 1.1754944e-38, %v805_v13  ;;  %vm814_vm1 = vweird.f32 %v6593_v6 }
 0x112   : > { %v6653_v49 = vpop.eup %5549  ;;  %v735_v36 = vmul.f32 %v5548_v44, %v6604_v10  ;;  %v727_v51 = vsel %vm6642_vm8, %v5540_v9, %v723_v40  ;;  %5555 = vpow2.f32 %v4725_v43  ;;  %vm740_vm13 = vweird.f32 %v5548_v44  ;;  %v6701_v19 = vpop.f32.mrf.mxu3 }
 0x113   : > { %v5552_v57 = vpop.eup %5551  ;;  %v732_v58 = vsel %vm6613_vm4, %v731_v23, %v727_v51  ;;  %5557 = vrcp.f32 %v6646_v46  ;;  %v810_v59 = vmul.f32 %v6653_v49, %v6593_v6  ;;  %v758_v8 = vand.u32 2147483647, %v6646_v46  ;;  %vm741_vm0 = vmor %vm739_vm7, %vm740_vm13  ;;  %v541_v30 = vpop.f32.mrf.mxu2 }
 0x114   : > { %v736_v61 = vsub.f32 1.0, %v735_v36  ;;  %v6673_v62 = vmul.f32 %v6580_v56, %v732_v58  ;;  %5559 = vtanh.f32 %v571_v31  ;;  %v760_v9 = vand.u32 2147483648, %v6646_v46  ;;  %v6690_v15 = vpop.eup %5553 }
 0x115   : > { %v811_v4 = vsub.f32 1.0, %v810_v59  ;;  %5561 = vtanh.f32 %v578_v55  ;;  %vm754_vm15 = vweird.f32 %v6646_v46  ;;  %v825_v0 = vmul.f32 %v6690_v15, %v6630_v33 }
 0x116   : > { %935 = vst [vmem:[%s6512_s16 + $0x20] sm:$0xff] %v6673_v62  ;;  %v737_v56 = vmul.f32 %v5548_v44, %v736_v61  ;;  %v4730_v63 = vmul.f32 -1.442695, %v537_v18  ;;  %vm815_vm2 = vweird.f32 %v6653_v49  ;;  %vm6715_vm3 = vcmp.eq.f32.partialorder %v758_v8, 8.507059e+37 }
 0x117   : > { %v812_v39 = vmul.f32 %v6653_v49, %v811_v4  ;;  %5563 = vtanh.f32 %v573_v5  ;;  %v761_v29 = vor.u32 1.1754944e-38, %v760_v9  ;;  %v581_v14 = vadd.f32 %v6591_v1, %v6489_v12  ;;  %vm6732_vm4 = vmor %vm814_vm1, %vm815_vm2 }
 0x118   : > { %v5556_v3 = vpop.eup %5555  ;;  %v738_v20 = vadd.f32 %v5548_v44, %v737_v56  ;;  %v826_v34 = vsub.f32 1.0, %v825_v0  ;;  %v807_v37 = vsel %vm6695_vm14, %v806_v54, %v802_v16  ;;  %v818_v43 = vand.u32 2147483647, %v6593_v6 }
 0x119   : > { %v5558_v22 = vpop.eup %5557  ;;  %v6710_v23 = vadd.f32 1.0, %v5556_v3  ;;  %v813_v1 = vadd.f32 %v6653_v49, %v812_v39  ;;  %v820_v55 = vand.u32 2147483648, %v6593_v6  ;;  %v539_v59 = vadd.f32 %v6651_v48, %v6484_v38 }
 0x11a   : > { %v5560_v24 = vpop.eup %5559  ;;  %v750_v25 = vmul.f32 %v5558_v22, %v6646_v46  ;;  %v742_v26 = vsel %vm741_vm0, %v5548_v44, %v738_v20  ;;  %vm755_vm5 = vweird.f32 %v5558_v22  ;;  %vm6748_vm6 = vcmp.eq.f32.partialorder %v818_v43, 8.507059e+37  ;;  %v6766_v48 = vpop.f32.mrf.mxu3 }
 0x11b   : > { %v747_v10 = vsel %vm6658_vm11, %v746_v2, %v742_v26  ;;  %5565 = vrcp.f32 %v6710_v23  ;;  %v5562_v41 = vpop.eup %5561  ;;  %v773_v45 = vand.u32 2147483647, %v6710_v23  ;;  %v817_v52 = vsel %vm6732_vm4, %v6653_v49, %v813_v1  ;;  %vm756_vm7 = vmor %vm754_vm15, %vm755_vm5  ;;  %v543_v54 = vpop.f32.mrf.mxu2 }
 0x11c   : > { %v751_v31 = vsub.f32 1.0, %v750_v25  ;;  %v6724_v32 = vmul.f32 %v5552_v57, %v747_v10  ;;  %5567 = vpow2.f32 %v4730_v63  ;;  %v6741_v36 = vmul.f32 %v5562_v41, %v807_v37 }
 0x11d   : > { %5569 = vtanh.f32 %v581_v14  ;;  %v5564_v57 = vpop.eup %5563  ;;  %v583_v60 = vadd.f32 %v6633_v35, %v6489_v12  ;;  %v827_v61 = vmul.f32 %v6690_v15, %v826_v34  ;;  %v821_v6 = vor.u32 1.1754944e-38, %v820_v55 }
 0x11e   : > { %936 = vst [vmem:[%s6512_s16 + $0x28] sm:$0xff] %v6724_v32  ;;  %v752_v44 = vmul.f32 %v5558_v22, %v751_v31  ;;  %v949_v51 = vpack.c.bf16 %v6724_v32, %v6673_v62  ;;  %vm829_vm8 = vweird.f32 %v6630_v33  ;;  %vm830_vm9 = vweird.f32 %v6690_v15 }
 0x11f   : > { %940 = vst [vmem:[%s6512_s16 + $0x48] sm:$0xff] %v6741_v36  ;;  %v833_v2 = vand.u32 2147483647, %v6630_v33  ;;  %v775_v4 = vand.u32 2147483648, %v6710_v23  ;;  %v4731_v5 = vmul.f32 -1.442695, %v539_v59  ;;  %v822_v56 = vsel %vm6748_vm6, %v821_v6, %v817_v52  ;;  %vm6775_vm11 = vmor %vm829_vm8, %vm830_vm9 }
 0x120   : > { %v753_v58 = vadd.f32 %v5558_v22, %v752_v44  ;;  %1133 = vmatmul.bf16.gmra.mxu2 %v949_v51  ;;  %1182 = vmatmul.bf16.gmra.mxu3 %v949_v51  ;;  %v828_v8 = vadd.f32 %v6690_v15, %v827_v61  ;;  %v835_v20 = vand.u32 2147483648, %v6630_v33  ;;  %v542_v0 = vadd.f32 %v541_v30, %v6484_v38 }
 0x121   : > { %v5566_v49 = vpop.eup %5565  ;;  %1231 = vmatmul.bf16.gmra.mxu0 %v949_v51  ;;  %5571 = vpow2.f32 %v4731_v5  ;;  %vm6781_vm12 = vcmp.eq.f32.partialorder %v833_v2, 8.507059e+37  ;;  %vm769_vm13 = vweird.f32 %v6710_v23  ;;  %v544_v33 = vadd.f32 %v543_v54, %v6484_v38 }
 0x122   : > { %v765_v35 = vmul.f32 %v5566_v49, %v6710_v23  ;;  %v757_v28 = vsel %vm756_vm7, %v5558_v22, %v753_v58  ;;  %v5568_v46 = vpop.eup %5567  ;;  %vm770_vm10 = vweird.f32 %v5566_v49  ;;  %5573 = vtanh.f32 %v583_v60  ;;  %v590_v37 = vpop.f32.mrf.mxu3 }
 0x123   : > { %v762_v7 = vsel %vm6715_vm3, %v761_v29, %v757_v28  ;;  %v655_v17 = vadd.f32 1.0, %v5568_v46  ;;  %v5570_v18 = vpop.eup %5569  ;;  %v832_v63 = vsel %vm6775_vm11, %v6690_v15, %v828_v8  ;;  %v4732_v25 = vmul.f32 -1.442695, %v542_v0  ;;  %vm771_vm14 = vmor %vm769_vm13, %vm770_vm10 }
 0x124   : > { %v766_v13 = vsub.f32 1.0, %v765_v35  ;;  %v6779_v16 = vmul.f32 %v5560_v24, %v762_v7  ;;  %v6789_v22 = vmul.f32 %v5570_v18, %v822_v56  ;;  %v836_v24 = vor.u32 1.1754944e-38, %v835_v20 }
 0x125   : > { %5575 = vrcp.f32 %v655_v17  ;;  %v776_v27 = vor.u32 1.1754944e-38, %v775_v4  ;;  %vm774_vm15 = vcmp.eq.f32.partialorder %v773_v45, 8.507059e+37  ;;  %v586_v15 = vadd.f32 %v6701_v19, %v6489_v12 }
 0x126   : > { %937 = vst [vmem:[%s6512_s16 + $0x30] sm:$0xff] %v6779_v16  ;;  %v767_v39 = vmul.f32 %v5566_v49, %v766_v13  ;;  %v837_v10 = vsel %vm6781_vm12, %v836_v24, %v832_v63  ;;  %5577 = vpow2.f32 %v4732_v25  ;;  %v4733_v30 = vmul.f32 -1.442695, %v544_v33 }
 0x127   : > { %941 = vst [vmem:[%s6512_s16 + $0x50] sm:$0xff] %v6789_v22  ;;  %v5572_v29 = vpop.eup %5571  ;;  %v850_v19 = vand.u32 2147483648, %v655_v17  ;;  %vm844_vm0 = vweird.f32 %v655_v17  ;;  %v848_v52 = vand.u32 2147483647, %v655_v17  ;;  %v588_v55 = vadd.f32 %v6766_v48, %v6489_v12 }
 0x128   : > { %v768_v26 = vadd.f32 %v5566_v49, %v767_v39  ;;  %v5574_v23 = vpop.eup %5573  ;;  %v656_v34 = vadd.f32 1.0, %v5572_v29  ;;  %5579 = vpow2.f32 %v4733_v30  ;;  %v591_v48 = vadd.f32 %v590_v37, %v6489_v12 }
 0x129   : > { %v6805_v1 = vmul.f32 %v5574_v23, %v837_v10  ;;  %v851_v60 = vor.u32 1.1754944e-38, %v850_v19  ;;  %vm849_vm3 = vcmp.eq.f32.partialorder %v848_v52, 8.507059e+37  ;;  %v5323_v52 = vld [vmem:[#allocation8 + $0x38] sm:$0xff] }
 0x12a   : > { %v772_v14 = vsel %vm771_vm14, %v5566_v49, %v768_v26  ;;  %5581 = vrcp.f32 %v656_v34  ;;  %vm859_vm4 = vweird.f32 %v656_v34  ;;  %v865_v4 = vand.u32 2147483648, %v656_v34  ;;  %v592_v5 = vpop.f32.mrf.mxu3  ;;  %1958 = vmatpush.bf16.msrb.mxu1 %v5323_v52 }
 0x12b   : > { %v777_v31 = vsel %vm774_vm15, %v776_v27, %v772_v14  ;;  %v5576_v40 = vpop.eup %5575  ;;  %5583 = vtanh.f32 %v586_v15  ;;  %942 = vst [vmem:[%s6512_s16 + $0x58] sm:$0xff] %v6805_v1  ;;  %v863_v56 = vand.u32 2147483647, %v656_v34  ;;  %v593_v18 = vadd.f32 %v592_v5, %v6489_v12 }
 0x12c   : > { %v6803_v41 = vmul.f32 %v5564_v57, %v777_v31  ;;  %v840_v43 = vmul.f32 %v5576_v40, %v655_v17  ;;  %v5578_v45 = vpop.eup %5577  ;;  %vm845_vm1 = vweird.f32 %v5576_v40  ;;  %v866_v0 = vor.u32 1.1754944e-38, %v865_v4 }
 0x12d   : > { %v657_v53 = vadd.f32 1.0, %v5578_v45  ;;  %vm6815_vm2 = vmor %vm844_vm0, %vm845_vm1  ;;  %vm864_vm7 = vcmp.eq.f32.partialorder %v863_v56, 8.507059e+37  ;;  %v952_v59 = vpack.c.bf16 %v6805_v1, %v6789_v22  ;;  %v5317_v56 = vld [vmem:[#allocation8 + $0x8] sm:$0xff] }
 0x12e   : > { %938 = vst [vmem:[%s6512_s16 + $0x38] sm:$0xff] %v6803_v41  ;;  %v950_v44 = vpack.c.bf16 %v6803_v41, %v6779_v16  ;;  %v841_v51 = vsub.f32 1.0, %v840_v43  ;;  %v5580_v58 = vpop.eup %5579 }
 0x12f   : > { %5585 = vrcp.f32 %v657_v53  ;;  %v658_v6 = vadd.f32 1.0, %v5580_v58  ;;  %v880_v17 = vand.u32 2147483648, %v657_v53  ;;  %vm874_vm8 = vweird.f32 %v657_v53 }
 0x130   : > { %1138 = vmatmul.bf16.gmra.mxu2 %v950_v44  ;;  %1187 = vmatmul.bf16.gmra.mxu3 %v950_v44  ;;  %v842_v57 = vmul.f32 %v5576_v40, %v841_v51  ;;  %v5582_v61 = vpop.eup %5581  ;;  %5587 = vtanh.f32 %v588_v55  ;;  %v878_v25 = vand.u32 2147483647, %v657_v53 }
 0x131   : > { %1236 = vmatmul.bf16.gmra.mxu0 %v950_v44  ;;  %v5584_v2 = vpop.eup %5583  ;;  %v855_v35 = vmul.f32 %v5582_v61, %v656_v34  ;;  %5589 = vrcp.f32 %v658_v6  ;;  %vm860_vm5 = vweird.f32 %v5582_v61  ;;  %v881_v27 = vor.u32 1.1754944e-38, %v880_v17  ;;  %v5316_v17 = vld [vmem:[#allocation8] sm:$0xff] }
 0x132   : > { %v843_v49 = vadd.f32 %v5576_v40, %v842_v57  ;;  %vm6827_vm6 = vmor %vm859_vm4, %vm860_vm5  ;;  %5591 = vtanh.f32 %v591_v48  ;;  %vm889_vm10 = vweird.f32 %v658_v6  ;;  %v895_v14 = vand.u32 2147483648, %v658_v6 }
 0x133   : > { %v856_v46 = vsub.f32 1.0, %v855_v35  ;;  %5593 = vtanh.f32 %v593_v18  ;;  %v893_v31 = vand.u32 2147483647, %v658_v6  ;;  %v951_v34 = vpack.c.bf16 %v6741_v36, %v6637_v42  ;;  %v6075_v35 = vld [vmem:[%s8828_s4] sm:$0x7] }
 0x134   : > { %v847_v28 = vsel %vm6815_vm2, %v5576_v40, %v843_v49  ;;  %vm879_vm13 = vcmp.eq.f32.partialorder %v878_v25, 8.507059e+37  ;;  %v896_v19 = vor.u32 1.1754944e-38, %v895_v14  ;;  %v5321_v49 = vld [vmem:[#allocation8 + $0x28] sm:$0xff]  ;;  %v6863_v48 = vperm.slane %v6075_v35, 1 }
 0x135   : > { %v852_v7 = vsel %vm849_vm3, %v851_v60, %v847_v28  ;;  %v5586_v9 = vpop.eup %5585  ;;  %v857_v13 = vmul.f32 %v5582_v61, %v856_v46  ;;  %vm894_vm15 = vcmp.eq.f32.partialorder %v893_v31, 8.507059e+37  ;;  %v5322_v60 = vld [vmem:[#allocation8 + $0x30] sm:$0xff]  ;;  %v5319_v28 = vld [vmem:[#allocation8 + $0x18] sm:$0xff] }
 0x136   : > { %v6822_v8 = vmul.f32 %v5584_v2, %v852_v7  ;;  %v870_v3 = vmul.f32 %v5586_v9, %v657_v53  ;;  %v5588_v54 = vpop.eup %5587  ;;  %vm875_vm9 = vweird.f32 %v5586_v9  ;;  %1959 = vmatpush.bf16.msrb.mxu1 %v5322_v60  ;;  %v5320_v2 = vld [vmem:[#allocation8 + $0x20] sm:$0xff]  ;;  %v5318_v46 = vld [vmem:[#allocation8 + $0x10] sm:$0xff] }
 0x137   : > { %v858_v39 = vadd.f32 %v5582_v61, %v857_v13  ;;  %v5590_v63 = vpop.eup %5589  ;;  %vm6835_vm11 = vmor %vm874_vm8, %vm875_vm9 }
 0x138   : > { %943 = vst [vmem:[%s6512_s16 + $0x60] sm:$0xff] %v6822_v8  ;;  %v871_v24 = vsub.f32 1.0, %v870_v3  ;;  %v885_v26 = vmul.f32 %v5590_v63, %v658_v6  ;;  %vm890_vm12 = vweird.f32 %v5590_v63  ;;  %v5592_v40 = vpop.eup %5591 }
 0x139   : > { %v862_v33 = vsel %vm6827_vm6, %v5582_v61, %v858_v39  ;;  %vm891_vm14 = vmor %vm889_vm10, %vm890_vm12  ;;  %v5594_v45 = vpop.eup %5593 }
 0x13a   : > { %v867_v10 = vsel %vm864_vm7, %v866_v0, %v862_v33  ;;  %v872_v29 = vmul.f32 %v5586_v9, %v871_v24  ;;  %v886_v15 = vsub.f32 1.0, %v885_v26  ;;  %1960 = vmatpush.bf16.msrb.mxu1 %v5321_v49 }
 0x13b   : > { %v6833_v30 = vmul.f32 %v5588_v54, %v867_v10 }
 0x13c   : > { %v873_v37 = vadd.f32 %v5586_v9, %v872_v29  ;;  %v887_v43 = vmul.f32 %v5590_v63, %v886_v15 }
 0x13d   : > { %944 = vst [vmem:[%s6512_s16 + $0x68] sm:$0xff] %v6833_v30  ;;  %v953_v61 = vpack.c.bf16 %v6833_v30, %v6822_v8 }
 0x13e   : > { %v877_v44 = vsel %vm6835_vm11, %v5586_v9, %v873_v37  ;;  %v888_v42 = vadd.f32 %v5590_v63, %v887_v43  ;;  %1961 = vmatpush.bf16.msrb.mxu1 %v5320_v2 }
 0x13f   : > { %v882_v51 = vsel %vm879_vm13, %v881_v27, %v877_v44 }
 0x140   : > { %1143 = vmatmul.bf16.gmra.mxu2 %v951_v34  ;;  %1192 = vmatmul.bf16.gmra.mxu3 %v951_v34  ;;  %v6846_v53 = vmul.f32 %v5592_v40, %v882_v51  ;;  %v892_v55 = vsel %vm891_vm14, %v5590_v63, %v888_v42 }
 0x141   : > { %1241 = vmatmul.bf16.gmra.mxu0 %v951_v34  ;;  %v897_v57 = vsel %vm894_vm15, %v896_v19, %v892_v55 }
 0x142   : > { %945 = vst [vmem:[%s6512_s16 + $0x70] sm:$0xff] %v6846_v53  ;;  %v6850_v58 = vmul.f32 %v5594_v45, %v897_v57  ;;  %1962 = vmatpush.bf16.msrb.mxu1 %v5319_v28 }
 0x144   : > { %946 = vst [vmem:[%s6512_s16 + $0x78] sm:$0xff] %v6850_v58  ;;  %v954_v6 = vpack.c.bf16 %v6850_v58, %v6846_v53 }
 0x146   : > { %1963 = vmatpush.bf16.msrb.mxu1 %v5318_v46 }
 0x14a   : > { %1964 = vmatpush.bf16.msrb.mxu1 %v5317_v56 }
 0x14e   : > { %1965 = vmatpush.bf16.msrb.mxu1 %v5316_v17 }
 0x150   : > { %1148 = vmatmul.bf16.gmra.mxu2 %v952_v59  ;;  %1197 = vmatmul.bf16.gmra.mxu3 %v952_v59 }
 0x151   : > { %1246 = vmatmul.bf16.gmra.mxu0 %v952_v59 }
 0x160   : > { %1153 = vmatmul.bf16.gmra.mxu2 %v953_v61  ;;  %1202 = vmatmul.bf16.gmra.mxu3 %v953_v61 }
 0x161   : > { %1251 = vmatmul.bf16.gmra.mxu0 %v953_v61 }
 0x170   : > { %1158 = vmatmul.bf16.gmra.mxu2 %v954_v6  ;;  %1207 = vmatmul.bf16.gmra.mxu3 %v954_v6 }
 0x171   : > { %1256 = vmatmul.bf16.gmra.mxu0 %v954_v6 }
 0x183   : > { %v1173_v4 = vpop.f32.mrf.mxu3 }
 0x184   : > { %v1174_v5 = vadd.f32 %v1173_v4, %v6863_v48 }
 0x186   : > { %v4846_v7 = vmul.f32 -1.442695, %v1174_v5 }
 0x188   : > { %5595 = vpow2.f32 %v4846_v7 }
 0x18b   : > { %v1175_v9 = vpop.f32.mrf.mxu3 }
 0x18c   : > { %v1176_v13 = vadd.f32 %v1175_v9, %v6863_v48 }
 0x18e   : > { %v5596_v18 = vpop.eup %5595  ;;  %v4847_v3 = vmul.f32 -1.442695, %v1176_v13 }
 0x18f   : > { %v1614_v20 = vadd.f32 1.0, %v5596_v18 }
 0x191   : > { %5597 = vrcp.f32 %v1614_v20  ;;  %v1641_v44 = vand.u32 2147483648, %v1614_v20  ;;  %vm1635_vm1 = vweird.f32 %v1614_v20  ;;  %v1639_v45 = vand.u32 2147483647, %v1614_v20 }
 0x192   : > { %5599 = vpow2.f32 %v4847_v3 }
 0x193   : > { %v1178_v0 = vpop.f32.mrf.mxu3  ;;  %v1642_v60 = vor.u32 1.1754944e-38, %v1641_v44  ;;  %vm1640_vm4 = vcmp.eq.f32.partialorder %v1639_v45, 8.507059e+37  ;;  %v4998_v45 = vld [vmem:[#allocation7 + $0xb4] sm:$0xf0] }
 0x194   : > { %v1179_v54 = vadd.f32 %v1178_v0, %v6863_v48 }
 0x196   : > { %v4848_v39 = vmul.f32 -1.442695, %v1179_v54 }
 0x197   : > { %v5598_v63 = vpop.eup %5597 }
 0x198   : > { %v5600_v24 = vpop.eup %5599  ;;  %v1631_v25 = vmul.f32 %v5598_v63, %v1614_v20  ;;  %5601 = vpow2.f32 %v4848_v39  ;;  %vm1636_vm0 = vweird.f32 %v5598_v63 }
 0x199   : > { %v1615_v26 = vadd.f32 1.0, %v5600_v24  ;;  %vm1637_vm2 = vmor %vm1635_vm1, %vm1636_vm0 }
 0x19a   : > { %v1632_v33 = vsub.f32 1.0, %v1631_v25 }
 0x19b   : > { %v1180_v27 = vpop.f32.mrf.mxu3  ;;  %5603 = vrcp.f32 %v1615_v26  ;;  %v1656_v42 = vand.u32 2147483648, %v1615_v26  ;;  %v1654_v57 = vand.u32 2147483647, %v1615_v26  ;;  %vm1650_vm5 = vweird.f32 %v1615_v26 }
 0x19c   : > { %v1181_v10 = vadd.f32 %v1180_v27, %v6863_v48  ;;  %v1633_v14 = vmul.f32 %v5598_v63, %v1632_v33 }
 0x19d   : > { %v1657_v35 = vor.u32 1.1754944e-38, %v1656_v42  ;;  %vm1655_vm7 = vcmp.eq.f32.partialorder %v1654_v57, 8.507059e+37 }
 0x19e   : > { %v4849_v29 = vmul.f32 -1.442695, %v1181_v10  ;;  %v5602_v15 = vpop.eup %5601  ;;  %v1634_v40 = vadd.f32 %v5598_v63, %v1633_v14 }
 0x19f   : > { %v6869_v23 = vadd.f32 1.0, %v5602_v15 }
 0x1a0   : > { %5605 = vpow2.f32 %v4849_v29  ;;  %v1638_v52 = vsel %vm1637_vm2, %v5598_v63, %v1634_v40 }
 0x1a1   : > { %v5604_v31 = vpop.eup %5603  ;;  %5607 = vrcp.f32 %v6869_v23  ;;  %v1643_v2 = vsel %vm1640_vm4, %v1642_v60, %v1638_v52  ;;  %v1671_v25 = vand.u32 2147483648, %v6869_v23  ;;  %vm1665_vm9 = vweird.f32 %v6869_v23 }
 0x1a2   : > { %v1646_v34 = vmul.f32 %v5604_v31, %v1615_v26  ;;  %vm1651_vm3 = vweird.f32 %v5604_v31  ;;  %v1870_v9 = vmul.f32 %v1643_v2, %v6506_v50 }
 0x1a3   : > { %v1183_v37 = vpop.f32.mrf.mxu3  ;;  %vm1652_vm6 = vmor %vm1650_vm5, %vm1651_vm3  ;;  %v1672_v15 = vor.u32 1.1754944e-38, %v1671_v25 }
 0x1a4   : > { %v1184_v43 = vadd.f32 %v1183_v37, %v6863_v48  ;;  %v1647_v19 = vsub.f32 1.0, %v1646_v34 }
 0x1a6   : > { %v4850_v51 = vmul.f32 -1.442695, %v1184_v43  ;;  %v1648_v55 = vmul.f32 %v5604_v31, %v1647_v19  ;;  %v5606_v59 = vpop.eup %5605  ;;  %v5345_v19 = vld [vmem:[#allocation7 + $0xac] sm:$0xf] }
 0x1a7   : > { %v5608_v61 = vpop.eup %5607  ;;  %v1617_v49 = vadd.f32 1.0, %v5606_v59 }
 0x1a8   : > { %v1649_v6 = vadd.f32 %v5604_v31, %v1648_v55  ;;  %5609 = vpow2.f32 %v4850_v51  ;;  %v1661_v28 = vmul.f32 %v5608_v61, %v6869_v23  ;;  %vm1666_vm8 = vweird.f32 %v5608_v61 }
 0x1a9   : > { %5611 = vrcp.f32 %v1617_v49  ;;  %vm1667_vm10 = vmor %vm1665_vm9, %vm1666_vm8  ;;  %v1684_v33 = vand.u32 2147483647, %v1617_v49  ;;  %v1686_v27 = vand.u32 2147483648, %v1617_v49  ;;  %vm1680_vm13 = vweird.f32 %v1617_v49 }
 0x1aa   : > { %v1653_v5 = vsel %vm1652_vm6, %v5604_v31, %v1649_v6  ;;  %v1662_v56 = vsub.f32 1.0, %v1661_v28  ;;  %v5001_v55 = vor.u32 %v5345_v19, %v4998_v45 }
 0x1ab   : > { %v1185_v4 = vpop.f32.mrf.mxu3  ;;  %v1658_v7 = vsel %vm1655_vm7, %v1657_v35, %v1653_v5  ;;  %v1687_v44 = vor.u32 1.1754944e-38, %v1686_v27  ;;  %vm1685_vm15 = vcmp.eq.f32.partialorder %v1684_v33, 8.507059e+37  ;;  %v4986_v33 = vld [vmem:[#allocation7 + $0x9c] sm:$0xf0] }
 0x1ac   : > { %v1186_v46 = vadd.f32 %v1185_v4, %v6863_v48  ;;  %v1871_v13 = vmul.f32 %v1658_v7, %v6531_v11  ;;  %v1663_v18 = vmul.f32 %v5608_v61, %v1662_v56  ;;  %v1669_v11 = vand.u32 2147483647, %v6869_v23  ;;  %2337 = vmatpush.bf16.msra.mxu3 %v5001_v55 }
 0x1ae   : > { %v4851_v17 = vmul.f32 -1.442695, %v1186_v46  ;;  %v1886_v3 = vpack.c.bf16 %v1871_v13, %v1870_v9  ;;  %v5610_v20 = vpop.eup %5609  ;;  %v1664_v39 = vadd.f32 %v5608_v61, %v1663_v18  ;;  %vm1670_vm12 = vcmp.eq.f32.partialorder %v1669_v11, 8.507059e+37 }
 0x1af   : > { %v5612_v0 = vpop.eup %5611  ;;  %v6877_v54 = vadd.f32 1.0, %v5610_v20 }
 0x1b0   : > { %1966 = vmatmul.bf16.vlgmr.msrb.gmra.mxu1 %v1886_v3  ;;  %5613 = vpow2.f32 %v4851_v17  ;;  %v1676_v63 = vmul.f32 %v5612_v0, %v1617_v49  ;;  %v1668_v29 = vsel %vm1667_vm10, %v5608_v61, %v1664_v39  ;;  %vm1681_vm11 = vweird.f32 %v5612_v0 }
 0x1b1   : > { %5615 = vrcp.f32 %v6877_v54  ;;  %v1673_v43 = vsel %vm1670_vm12, %v1672_v15, %v1668_v29  ;;  %vm1682_vm14 = vmor %vm1680_vm13, %vm1681_vm11  ;;  %vm1695_vm1 = vweird.f32 %v6877_v54  ;;  %v1699_v56 = vand.u32 2147483647, %v6877_v54 }
 0x1b2   : > { %v1677_v26 = vsub.f32 1.0, %v1676_v63  ;;  %v1872_v59 = vmul.f32 %v1673_v43, %v6573_v47  ;;  %v1701_v47 = vand.u32 2147483648, %v6877_v54 }
 0x1b3   : > { %v1188_v24 = vpop.f32.mrf.mxu3  ;;  %vm1700_vm4 = vcmp.eq.f32.partialorder %v1699_v56, 8.507059e+37  ;;  %v4974_v56 = vld [vmem:[#allocation7 + $0x84] sm:$0xf0] }
 0x1b4   : > { %v1189_v50 = vadd.f32 %v1188_v24, %v6863_v48  ;;  %v1678_v14 = vmul.f32 %v5612_v0, %v1677_v26  ;;  %v5342_v26 = vld [vmem:[#allocation7 + $0x94] sm:$0xf] }
 0x1b6   : > { %v4852_v10 = vmul.f32 -1.442695, %v1189_v50  ;;  %v5614_v31 = vpop.eup %5613  ;;  %v1679_v34 = vadd.f32 %v5612_v0, %v1678_v14  ;;  %v4989_v14 = vor.u32 %v5342_v26, %v4986_v33 }
 0x1b7   : > { %v5616_v37 = vpop.eup %5615  ;;  %v1619_v40 = vadd.f32 1.0, %v5614_v31 }
 0x1b8   : > { %5617 = vpow2.f32 %v4852_v10  ;;  %v1683_v23 = vsel %vm1682_vm14, %v5612_v0, %v1679_v34  ;;  %v1691_v51 = vmul.f32 %v5616_v37, %v6877_v54  ;;  %vm1696_vm0 = vweird.f32 %v5616_v37  ;;  %2338 = vmatpush.bf16.msra.mxu3 %v4989_v14 }
 0x1b9   : > { %5619 = vrcp.f32 %v1619_v40  ;;  %v1688_v52 = vsel %vm1685_vm15, %v1687_v44, %v1683_v23  ;;  %vm1697_vm2 = vmor %vm1695_vm1, %vm1696_vm0  ;;  %v1714_v13 = vand.u32 2147483647, %v1619_v40  ;;  %v1716_v17 = vand.u32 2147483648, %v1619_v40 }
 0x1ba   : > { %v1873_v60 = vmul.f32 %v1688_v52, %v6620_v21  ;;  %v1692_v61 = vsub.f32 1.0, %v1691_v51  ;;  %v1702_v0 = vor.u32 1.1754944e-38, %v1701_v47  ;;  %vm1710_vm5 = vweird.f32 %v1619_v40 }
 0x1bb   : > { %v1190_v42 = vpop.f32.mrf.mxu3  ;;  %v1717_v11 = vor.u32 1.1754944e-38, %v1716_v17  ;;  %vm1715_vm7 = vcmp.eq.f32.partialorder %v1714_v13, 8.507059e+37 }
 0x1bc   : > { %v1191_v57 = vadd.f32 %v1190_v42, %v6863_v48  ;;  %v1887_v6 = vpack.c.bf16 %v1873_v60, %v1872_v59  ;;  %v1693_v2 = vmul.f32 %v5616_v37, %v1692_v61 }
 0x1be   : > { %v4853_v49 = vmul.f32 -1.442695, %v1191_v57  ;;  %v5618_v35 = vpop.eup %5617  ;;  %v1694_v5 = vadd.f32 %v5616_v37, %v1693_v2 }
 0x1bf   : > { %v5620_v28 = vpop.eup %5619  ;;  %v6888_v4 = vadd.f32 1.0, %v5618_v35 }
 0x1c0   : > { %1971 = vmatmul.bf16.gmra.mxu1 %v1887_v6  ;;  %5621 = vpow2.f32 %v4853_v49  ;;  %v1706_v46 = vmul.f32 %v5620_v28, %v1619_v40  ;;  %v1698_v3 = vsel %vm1697_vm2, %v5616_v37, %v1694_v5  ;;  %vm1711_vm3 = vweird.f32 %v5620_v28 }
 0x1c1   : > { %5623 = vrcp.f32 %v6888_v4  ;;  %v1703_v50 = vsel %vm1700_vm4, %v1702_v0, %v1698_v3  ;;  %vm1712_vm6 = vmor %vm1710_vm5, %vm1711_vm3  ;;  %vm1725_vm9 = vweird.f32 %v6888_v4  ;;  %v1729_v55 = vand.u32 2147483647, %v6888_v4 }
 0x1c2   : > { %v1707_v9 = vsub.f32 1.0, %v1706_v46  ;;  %v1874_v31 = vmul.f32 %v1703_v50, %v6673_v62  ;;  %v1731_v62 = vand.u32 2147483648, %v6888_v4 }
 0x1c3   : > { %v1193_v7 = vpop.f32.mrf.mxu3  ;;  %vm1730_vm12 = vcmp.eq.f32.partialorder %v1729_v55, 8.507059e+37  ;;  %v5336_v55 = vld [vmem:[#allocation7 + $0x64] sm:$0xf] }
 0x1c4   : > { %v1194_v21 = vadd.f32 %v1193_v7, %v6863_v48  ;;  %v1708_v20 = vmul.f32 %v5620_v28, %v1707_v9  ;;  %v1732_v2 = vor.u32 1.1754944e-38, %v1731_v62 }
 0x1c6   : > { %v4854_v18 = vmul.f32 -1.442695, %v1194_v21  ;;  %v5622_v39 = vpop.eup %5621  ;;  %v1709_v63 = vadd.f32 %v5620_v28, %v1708_v20  ;;  %v5339_v21 = vld [vmem:[#allocation7 + $0x7c] sm:$0xf] }
 0x1c7   : > { %v5624_v24 = vpop.eup %5623  ;;  %v1621_v25 = vadd.f32 1.0, %v5622_v39 }
 0x1c8   : > { %5625 = vpow2.f32 %v4854_v18  ;;  %v1713_v54 = vsel %vm1712_vm6, %v5620_v28, %v1709_v63  ;;  %v1721_v27 = vmul.f32 %v5624_v24, %v6888_v4  ;;  %vm1726_vm8 = vweird.f32 %v5624_v24  ;;  %v6910_v63 = vpop.f32.mrf.mxu2 }
 0x1c9   : > { %5627 = vrcp.f32 %v1621_v25  ;;  %v1718_v29 = vsel %vm1715_vm7, %v1717_v11, %v1713_v54  ;;  %vm1727_vm10 = vmor %vm1725_vm9, %vm1726_vm8  ;;  %v1744_v59 = vand.u32 2147483647, %v1621_v25  ;;  %v1746_v60 = vand.u32 2147483648, %v1621_v25 }
 0x1ca   : > { %v1875_v34 = vmul.f32 %v1718_v29, %v6724_v32  ;;  %v1722_v37 = vsub.f32 1.0, %v1721_v27  ;;  %vm1740_vm13 = vweird.f32 %v1621_v25  ;;  %v4977_v18 = vor.u32 %v5339_v21, %v4974_v56 }
 0x1cb   : > { %v1195_v10 = vpop.f32.mrf.mxu3  ;;  %v1747_v47 = vor.u32 1.1754944e-38, %v1746_v60  ;;  %vm1745_vm15 = vcmp.eq.f32.partialorder %v1744_v59, 8.507059e+37 }
 0x1cc   : > { %v1196_v15 = vadd.f32 %v1195_v10, %v6863_v48  ;;  %v1888_v43 = vpack.c.bf16 %v1875_v34, %v1874_v31  ;;  %v1723_v44 = vmul.f32 %v5624_v24, %v1722_v37  ;;  %2339 = vmatpush.bf16.msra.mxu3 %v4977_v18  ;;  %v4950_v18 = vld [vmem:[#allocation7 + $0x54] sm:$0xf0] }
 0x1ce   : > { %v4855_v40 = vmul.f32 -1.442695, %v1196_v15  ;;  %v5626_v23 = vpop.eup %5625  ;;  %v1724_v51 = vadd.f32 %v5624_v24, %v1723_v44 }
 0x1cf   : > { %v5628_v19 = vpop.eup %5627  ;;  %v6899_v45 = vadd.f32 1.0, %v5626_v23 }
 0x1d0   : > { %1976 = vmatmul.bf16.gmra.mxu1 %v1888_v43  ;;  %5629 = vpow2.f32 %v4855_v40  ;;  %v1736_v42 = vmul.f32 %v5628_v19, %v1621_v25  ;;  %v1728_v49 = vsel %vm1727_vm10, %v5624_v24, %v1724_v51  ;;  %vm1741_vm11 = vweird.f32 %v5628_v19 }
 0x1d1   : > { %5631 = vrcp.f32 %v6899_v45  ;;  %v1733_v7 = vsel %vm1730_vm12, %v1732_v2, %v1728_v49  ;;  %vm1742_vm14 = vmor %vm1740_vm13, %vm1741_vm11  ;;  %vm1755_vm1 = vweird.f32 %v6899_v45  ;;  %v1759_v29 = vand.u32 2147483647, %v6899_v45  ;;  %v6076_v2 = vld [vmem:[%s6512_s16 + $0x40] sm:$0xff] }
 0x1d2   : > { %v1737_v57 = vsub.f32 1.0, %v1736_v42  ;;  %v1876_v20 = vmul.f32 %v1733_v7, %v6779_v16 }
 0x1d3   : > { %v1198_v52 = vpop.f32.mrf.mxu3  ;;  %vm1760_vm4 = vcmp.eq.f32.partialorder %v1759_v29, 8.507059e+37 }
 0x1d4   : > { %v1199_v32 = vadd.f32 %v1198_v52, %v6863_v48  ;;  %v1738_v6 = vmul.f32 %v5628_v19, %v1737_v57  ;;  %v4962_v57 = vld [vmem:[#allocation7 + $0x6c] sm:$0xf0] }
 0x1d5   : > { %v4965_v49 = vor.u32 %v5336_v55, %v4962_v57 }
 0x1d6   : > { %v4856_v61 = vmul.f32 -1.442695, %v1199_v32  ;;  %v5630_v35 = vpop.eup %5629  ;;  %v1739_v28 = vadd.f32 %v5628_v19, %v1738_v6 }
 0x1d7   : > { %v5632_v5 = vpop.eup %5631  ;;  %v1623_v46 = vadd.f32 1.0, %v5630_v35  ;;  %2340 = vmatpush.bf16.msra.mxu3 %v4965_v49 }
 0x1d8   : > { %5633 = vpow2.f32 %v4856_v61  ;;  %v1743_v4 = vsel %vm1742_vm14, %v5628_v19, %v1739_v28  ;;  %v1751_v9 = vmul.f32 %v5632_v5, %v6899_v45  ;;  %vm1756_vm0 = vweird.f32 %v5632_v5  ;;  %v6925_v19 = vpop.f32.mrf.mxu2 }
 0x1d9   : > { %5635 = vrcp.f32 %v1623_v46  ;;  %v1748_v17 = vsel %vm1745_vm15, %v1747_v47, %v1743_v4  ;;  %vm6919_vm2 = vmor %vm1755_vm1, %vm1756_vm0  ;;  %v1774_v31 = vand.u32 2147483647, %v1623_v46  ;;  %v1776_v34 = vand.u32 2147483648, %v1623_v46 }
 0x1da   : > { %v1877_v0 = vmul.f32 %v1748_v17, %v6803_v41  ;;  %v1752_v39 = vsub.f32 1.0, %v1751_v9  ;;  %v1761_v41 = vand.u32 2147483648, %v6899_v45  ;;  %vm1770_vm5 = vweird.f32 %v1623_v46  ;;  %v5333_v17 = vld [vmem:[#allocation7 + $0x4c] sm:$0xf] }
 0x1db   : > { %v1200_v13 = vpop.f32.mrf.mxu3  ;;  %v1777_v62 = vor.u32 1.1754944e-38, %v1776_v34  ;;  %vm1775_vm7 = vcmp.eq.f32.partialorder %v1774_v31, 8.507059e+37 }
 0x1dc   : > { %v1201_v3 = vadd.f32 %v1200_v13, %v6863_v48  ;;  %v1889_v25 = vpack.c.bf16 %v1877_v0, %v1876_v20  ;;  %v1753_v50 = vmul.f32 %v5632_v5, %v1752_v39  ;;  %v1762_v44 = vor.u32 1.1754944e-38, %v1761_v41  ;;  %v5330_v39 = vld [vmem:[#allocation7 + $0x34] sm:$0xf] }
 0x1dd   : > { %v4953_v0 = vor.u32 %v5333_v17, %v4950_v18  ;;  %v5343_v17 = vld [vmem:[#allocation7 + $0x98] sm:$0xf0] }
 0x1de   : > { %v4857_v24 = vmul.f32 -1.442695, %v1201_v3  ;;  %v5634_v11 = vpop.eup %5633  ;;  %v1754_v33 = vadd.f32 %v5632_v5, %v1753_v50 }
 0x1df   : > { %v5636_v54 = vpop.eup %5635  ;;  %v6912_v26 = vadd.f32 1.0, %v5634_v11  ;;  %2341 = vmatpush.bf16.msra.mxu3 %v4953_v0 }
 0x1e0   : > { %1981 = vmatmul.bf16.gmra.mxu1 %v1889_v25  ;;  %5637 = vpow2.f32 %v4857_v24  ;;  %v1766_v27 = vmul.f32 %v5636_v54, %v1623_v46  ;;  %v1758_v40 = vsel %vm6919_vm2, %v5632_v5, %v1754_v33  ;;  %vm1771_vm3 = vweird.f32 %v5636_v54  ;;  %v6940_v9 = vpop.f32.mrf.mxu2  ;;  %v4938_v24 = vld [vmem:[#allocation7 + $0x3c] sm:$0xf0] }
 0x1e1   : > { %5639 = vrcp.f32 %v6912_v26  ;;  %v1763_v52 = vsel %vm1760_vm4, %v1762_v44, %v1758_v40  ;;  %vm1772_vm6 = vmor %vm1770_vm5, %vm1771_vm3  ;;  %v1791_v20 = vand.u32 2147483648, %v6912_v26  ;;  %vm1785_vm9 = vweird.f32 %v6912_v26 }
 0x1e2   : > { %v1767_v14 = vsub.f32 1.0, %v1766_v27  ;;  %v1878_v35 = vmul.f32 %v6076_v2, %v1763_v52  ;;  %v1789_v50 = vand.u32 2147483647, %v6912_v26 }
 0x1e3   : > { %v1203_v16 = vpop.f32.mrf.mxu3 }
 0x1e4   : > { %v1204_v10 = vadd.f32 %v1203_v16, %v6863_v48  ;;  %v1768_v43 = vmul.f32 %v5636_v54, %v1767_v14  ;;  %v4941_v16 = vor.u32 %v5330_v39, %v4938_v24  ;;  %v1792_v14 = vor.u32 1.1754944e-38, %v1791_v20  ;;  %v4992_v24 = vld [vmem:[#allocation7 + $0x98] sm:$0xf] }
 0x1e5   : > { %vm1790_vm12 = vcmp.eq.f32.partialorder %v1789_v50, 8.507059e+37 }
 0x1e6   : > { %v4858_v37 = vmul.f32 -1.442695, %v1204_v10  ;;  %v5638_v23 = vpop.eup %5637  ;;  %v1769_v51 = vadd.f32 %v5636_v54, %v1768_v43  ;;  %2342 = vmatpush.bf16.msra.mxu3 %v4941_v16 }
 0x1e7   : > { %v6927_v45 = vpop.eup %5639  ;;  %v6929_v42 = vadd.f32 1.0, %v5638_v23  ;;  %v1125_v23 = vadd.f32 %v6910_v63, %v6484_v38 }
 0x1e8   : > { %5641 = vpow2.f32 %v4858_v37  ;;  %v1773_v32 = vsel %vm1772_vm6, %v5636_v54, %v1769_v51  ;;  %v1781_v59 = vmul.f32 %v6927_v45, %v6912_v26  ;;  %vm1786_vm8 = vweird.f32 %v6927_v45 }
 0x1e9   : > { %5643 = vrcp.f32 %v6929_v42  ;;  %v1778_v61 = vsel %vm1775_vm7, %v1777_v62, %v1773_v32  ;;  %vm6950_vm10 = vmor %vm1785_vm9, %vm1786_vm8  ;;  %v1804_v33 = vand.u32 2147483647, %v6929_v42  ;;  %v1806_v27 = vand.u32 2147483648, %v6929_v42 }
 0x1ea   : > { %v1879_v28 = vmul.f32 %v1778_v61, %v6741_v36  ;;  %v1782_v5 = vsub.f32 1.0, %v1781_v59  ;;  %vm1800_vm13 = vweird.f32 %v6929_v42  ;;  %v4830_v49 = vmul.f32 -1.442695, %v1125_v23 }
 0x1eb   : > { %v1205_v60 = vpop.f32.mrf.mxu3  ;;  %v1807_v40 = vor.u32 1.1754944e-38, %v1806_v27  ;;  %vm1805_vm15 = vcmp.eq.f32.partialorder %v1804_v33, 8.507059e+37 }
 0x1ec   : > { %v1206_v6 = vadd.f32 %v1205_v60, %v6863_v48  ;;  %v1890_v7 = vpack.c.bf16 %v1879_v28, %v1878_v35  ;;  %v1783_v47 = vmul.f32 %v6927_v45, %v1782_v5  ;;  %v5327_v35 = vld [vmem:[#allocation7 + $0x1c] sm:$0xf]  ;;  %v4996_v5 = vld [vmem:[#allocation7 + $0xa8] sm:$0xf] }
 0x1ee   : > { %v4859_v46 = vmul.f32 -1.442695, %v1206_v6  ;;  %v5642_v4 = vpop.eup %5641  ;;  %v1784_v13 = vadd.f32 %v6927_v45, %v1783_v47  ;;  %v5004_v47 = vld [vmem:[#allocation7 + $0xb0] sm:$0xf] }
 0x1ef   : > { %v5644_v21 = vpop.eup %5643  ;;  %v6938_v56 = vadd.f32 1.0, %v5642_v4  ;;  %v5347_v4 = vld [vmem:[#allocation7 + $0xb8] sm:$0xf0] }
 0x1f0   : > { %1986 = vmatmul.bf16.gmra.mxu1 %v1890_v7  ;;  %5645 = vpow2.f32 %v4859_v46  ;;  %v1796_v36 = vmul.f32 %v5644_v21, %v6929_v42  ;;  %v1788_v10 = vsel %vm6950_vm10, %v6927_v45, %v1784_v13  ;;  %vm1801_vm11 = vweird.f32 %v5644_v21  ;;  %v6969_v42 = vpop.f32.mrf.mxu2  ;;  %v5346_v46 = vld [vmem:[#allocation7 + $0xb0] sm:$0xf0] }
 0x1f1   : > { %5647 = vrcp.f32 %v6938_v56  ;;  %v1793_v37 = vsel %vm1790_vm12, %v1792_v14, %v1788_v10  ;;  %vm1802_vm14 = vmor %vm1800_vm13, %vm1801_vm11  ;;  %v1819_v2 = vand.u32 2147483647, %v6938_v56  ;;  %v1821_v7 = vand.u32 2147483648, %v6938_v56 }
 0x1f2   : > { %v1797_v11 = vsub.f32 1.0, %v1796_v36  ;;  %v1880_v62 = vmul.f32 %v1793_v37, %v6789_v22  ;;  %vm1815_vm1 = vweird.f32 %v6938_v56  ;;  %v4984_v36 = vld [vmem:[#allocation7 + $0x90] sm:$0xf]  ;;  %v4997_v0 = vor.u32 %v5346_v46, %v4996_v5  ;;  %v4968_v5 = vld [vmem:[#allocation7 + $0x68] sm:$0xf] }
 0x1f3   : > { %v1208_v3 = vpop.f32.mrf.mxu3  ;;  %v5005_v39 = vor.u32 %v5347_v4, %v5004_v47  ;;  %v1822_v54 = vor.u32 1.1754944e-38, %v1821_v7  ;;  %v4985_v33 = vor.u32 %v5343_v17, %v4984_v36  ;;  %vm1820_vm4 = vcmp.eq.f32.partialorder %v1819_v2, 8.507059e+37  ;;  %v5338_v46 = vld [vmem:[#allocation7 + $0x70] sm:$0xf0] }
 0x1f4   : > { %v1209_v25 = vadd.f32 %v1208_v3, %v6863_v48  ;;  %v1798_v29 = vmul.f32 %v5644_v21, %v1797_v11  ;;  %2288 = vmatpush.bf16.msra.mxu2 %v4997_v0 }
 0x1f5   : > { %2386 = vmatpush.bf16.msra.mxu0 %v5005_v39 }
 0x1f6   : > { %v4860_v41 = vmul.f32 -1.442695, %v1209_v25  ;;  %v5646_v26 = vpop.eup %5645  ;;  %v1799_v15 = vadd.f32 %v5644_v21, %v1798_v29  ;;  %v5344_v25 = vld [vmem:[#allocation7 + $0xa0] sm:$0xf0] }
 0x1f7   : > { %v6960_v31 = vpop.eup %5647  ;;  %v6962_v34 = vadd.f32 1.0, %v5646_v26 }
 0x1f8   : > { %5649 = vpow2.f32 %v4860_v41  ;;  %v1803_v43 = vsel %vm1802_vm14, %v5644_v21, %v1799_v15  ;;  %v1811_v44 = vmul.f32 %v6960_v31, %v6938_v56  ;;  %vm1816_vm0 = vweird.f32 %v6960_v31  ;;  %v6993_v50 = vpop.f32.mrf.mxu2  ;;  %2289 = vmatpush.bf16.msra.mxu2 %v4985_v33  ;;  %v4948_v33 = vld [vmem:[#allocation7 + $0x48] sm:$0xf] }
 0x1f9   : > { %5651 = vrcp.f32 %v6962_v34  ;;  %v1808_v45 = vsel %vm1805_vm15, %v1807_v40, %v1803_v43  ;;  %v1127_v21 = vadd.f32 %v6925_v19, %v6484_v38  ;;  %vm6988_vm2 = vmor %vm1815_vm1, %vm1816_vm0  ;;  %v1836_v3 = vand.u32 2147483648, %v6962_v34  ;;  %v7008_v43 = vpop.f32.mrf.mxu0 }
 0x1fa   : > { %v1881_v32 = vmul.f32 %v1808_v45, %v6805_v1  ;;  %v1812_v55 = vsub.f32 1.0, %v1811_v44  ;;  %v4926_v1 = vld [vmem:[#allocation7 + $0x24] sm:$0xf0]  ;;  %v1834_v11 = vand.u32 2147483647, %v6962_v34  ;;  %vm1830_vm5 = vweird.f32 %v6962_v34 }
 0x1fb   : > { %v1210_v51 = vpop.f32.mrf.mxu3  ;;  %v4929_v20 = vor.u32 %v5327_v35, %v4926_v1  ;;  %v4993_v41 = vor.u32 %v5344_v25, %v4992_v24  ;;  %v1837_v26 = vor.u32 1.1754944e-38, %v1836_v3  ;;  %v4960_v35 = vld [vmem:[#allocation7 + $0x60] sm:$0xf]  ;;  %v1132_v24 = vadd.f32 %v6969_v42, %v6484_v38 }
 0x1fc   : > { %v1211_v52 = vadd.f32 %v1210_v51, %v6863_v48  ;;  %v1891_v59 = vpack.c.bf16 %v1881_v32, %v1880_v62  ;;  %v1813_v60 = vmul.f32 %v6960_v31, %v1812_v55  ;;  %vm1835_vm7 = vcmp.eq.f32.partialorder %v1834_v11, 8.507059e+37  ;;  %v4972_v55 = vld [vmem:[#allocation7 + $0x78] sm:$0xf] }
 0x1fd   : > { %2343 = vmatpush.bf16.msra.mxu3 %v4929_v20  ;;  %2387 = vmatpush.bf16.msra.mxu0 %v4993_v41 }
 0x1fe   : > { %v4861_v57 = vmul.f32 -1.442695, %v1211_v52  ;;  %v5650_v61 = vpop.eup %5649  ;;  %v1814_v28 = vadd.f32 %v6960_v31, %v1813_v60  ;;  %v1130_v52 = vadd.f32 %v6940_v9, %v6484_v38  ;;  %v4980_v60 = vld [vmem:[#allocation7 + $0x80] sm:$0xf] }
 0x1ff   : > { %v5652_v63 = vpop.eup %5651  ;;  %v6975_v6 = vadd.f32 1.0, %v5650_v61  ;;  %v5341_v61 = vld [vmem:[#allocation7 + $0x88] sm:$0xf0] }
 0x200   : > { %1991 = vmatmul.bf16.gmra.mxu1 %v1891_v59  ;;  %5653 = vpow2.f32 %v4861_v57  ;;  %v1826_v22 = vmul.f32 %v5652_v63, %v6962_v34  ;;  %v1818_v19 = vsel %vm6988_vm2, %v6960_v31, %v1814_v28  ;;  %vm1831_vm3 = vweird.f32 %v5652_v63  ;;  %v5340_v57 = vld [vmem:[#allocation7 + $0x80] sm:$0xf0]  ;;  %v5337_v28 = vld [vmem:[#allocation7 + $0x68] sm:$0xf0] }
 0x201   : > { %5655 = vrcp.f32 %v6975_v6  ;;  %v1823_v14 = vsel %vm1820_vm4, %v1822_v54, %v1818_v19  ;;  %vm1832_vm6 = vmor %vm1830_vm5, %vm1831_vm3  ;;  %v4831_v31 = vmul.f32 -1.442695, %v1127_v21  ;;  %v4973_v59 = vor.u32 %v5340_v57, %v4972_v55  ;;  %v7032_v18 = vpop.f32.mrf.mxu0 }
 0x202   : > { %5657 = vpow2.f32 %v4830_v49  ;;  %v1827_v13 = vsub.f32 1.0, %v1826_v22  ;;  %v1882_v44 = vmul.f32 %v1823_v14, %v6822_v8  ;;  %v7017_v49 = vpop.f32.mrf.mxu2  ;;  %v4981_v8 = vor.u32 %v5341_v61, %v4980_v60  ;;  %v5335_v14 = vld [vmem:[#allocation7 + $0x58] sm:$0xf0] }
 0x203   : > { %2290 = vmatpush.bf16.msra.mxu2 %v4973_v59  ;;  %v1851_v22 = vand.u32 2147483648, %v6975_v6  ;;  %v4961_v1 = vor.u32 %v5337_v28, %v4960_v35  ;;  %vm1845_vm9 = vweird.f32 %v6975_v6  ;;  %v1849_v47 = vand.u32 2147483647, %v6975_v6 }
 0x204   : > { %v1828_v56 = vmul.f32 %v5652_v63, %v1827_v13  ;;  %2388 = vmatpush.bf16.msra.mxu0 %v4981_v8  ;;  %v4969_v21 = vor.u32 %v5338_v46, %v4968_v5  ;;  %v5324_v8 = vld [vmem:[#allocation7 + $0x4] sm:$0xf]  ;;  %v4924_v13 = vld [vmem:[#allocation7 + $0x18] sm:$0xf] }
 0x205   : > { %v1852_v39 = vor.u32 1.1754944e-38, %v1851_v22  ;;  %vm1850_vm12 = vcmp.eq.f32.partialorder %v1849_v47, 8.507059e+37 }
 0x206   : > { %v5654_v27 = vpop.eup %5653  ;;  %v1829_v16 = vadd.f32 %v5652_v63, %v1828_v56 }
 0x207   : > { %v7000_v10 = vpop.eup %5655  ;;  %v7002_v29 = vadd.f32 1.0, %v5654_v27  ;;  %2291 = vmatpush.bf16.msra.mxu2 %v4961_v1  ;;  %v5334_v27 = vld [vmem:[#allocation7 + $0x50] sm:$0xf0] }
 0x208   : > { %v5658_v15 = vpop.eup %5657  ;;  %v1833_v37 = vsel %vm1832_vm6, %v5652_v63, %v1829_v16  ;;  %v1841_v40 = vmul.f32 %v7000_v10, %v6975_v6  ;;  %v4832_v63 = vmul.f32 -1.442695, %v1130_v52  ;;  %vm1846_vm8 = vweird.f32 %v7000_v10  ;;  %2389 = vmatpush.bf16.msra.mxu0 %v4969_v21  ;;  %v4956_v16 = vld [vmem:[#allocation7 + $0x50] sm:$0xf] }
 0x209   : > { %5659 = vrcp.f32 %v7002_v29  ;;  %v1838_v34 = vsel %vm1835_vm7, %v1837_v26, %v1833_v37  ;;  %v7012_v45 = vadd.f32 1.0, %v5658_v15  ;;  %vm7026_vm10 = vmor %vm1845_vm9, %vm1846_vm8  ;;  %v1864_v36 = vand.u32 2147483647, %v7002_v29 }
 0x20a   : > { %v1883_v23 = vmul.f32 %v1838_v34, %v6833_v30  ;;  %v1842_v51 = vsub.f32 1.0, %v1841_v40  ;;  %5661 = vpow2.f32 %v4831_v31  ;;  %v1866_v17 = vand.u32 2147483648, %v7002_v29  ;;  %v7044_v11 = vpop.f32.mrf.mxu2  ;;  %v4936_v34 = vld [vmem:[#allocation7 + $0x30] sm:$0xf] }
 0x20b   : > { %5663 = vrcp.f32 %v7012_v45  ;;  %vm1860_vm13 = vweird.f32 %v7002_v29  ;;  %vm1865_vm15 = vcmp.eq.f32.partialorder %v1864_v36, 8.507059e+37  ;;  %v4833_v26 = vmul.f32 -1.442695, %v1132_v24  ;;  %v5328_v36 = vld [vmem:[#allocation7 + $0x20] sm:$0xf0] }
 0x20c   : > { %v1892_v62 = vpack.c.bf16 %v1883_v23, %v1882_v44  ;;  %v1843_v32 = vmul.f32 %v7000_v10, %v1842_v51  ;;  %5665 = vpow2.f32 %v4832_v63  ;;  %v1867_v56 = vor.u32 1.1754944e-38, %v1866_v17  ;;  %v5331_v44 = vld [vmem:[#allocation7 + $0x38] sm:$0xf0]  ;;  %v4944_v23 = vld [vmem:[#allocation7 + $0x38] sm:$0xf] }
 0x20d   : > { %v4957_v31 = vor.u32 %v5335_v14, %v4956_v16  ;;  %v4937_v52 = vor.u32 %v5331_v44, %v4936_v34  ;;  %vm1331_vm1 = vweird.f32 %v7012_v45  ;;  %v1337_v46 = vand.u32 2147483648, %v7012_v45  ;;  %v4932_v17 = vld [vmem:[#allocation7 + $0x20] sm:$0xf]  ;;  %v5329_v24 = vld [vmem:[#allocation7 + $0x28] sm:$0xf0] }
 0x20e   : > { %v1844_v2 = vadd.f32 %v7000_v10, %v1843_v32  ;;  %v7051_v32 = vpop.f32.mrf.mxu0  ;;  %v1335_v47 = vand.u32 2147483647, %v7012_v45 }
 0x20f   : > { %v5660_v30 = vpop.eup %5659  ;;  %2390 = vmatpush.bf16.msra.mxu0 %v4957_v31 }
 0x210   : > { %1996 = vmatmul.bf16.gmra.mxu1 %v1892_v62  ;;  %v1856_v9 = vmul.f32 %v5660_v30, %v7002_v29  ;;  %v5662_v7 = vpop.eup %5661  ;;  %v1848_v3 = vsel %vm7026_vm10, %v7000_v10, %v1844_v2  ;;  %vm1861_vm11 = vweird.f32 %v5660_v30  ;;  %v4949_v10 = vor.u32 %v5334_v27, %v4948_v33  ;;  %v5332_v62 = vld [vmem:[#allocation7 + $0x40] sm:$0xf0]  ;;  %v4920_v33 = vld [vmem:[#allocation7 + $0x8] sm:$0xf]  ;;  %v5326_v27 = vld [vmem:[#allocation7 + $0x10] sm:$0xf0] }
 0x211   : > { %v7037_v6 = vpop.eup %5663  ;;  %v7039_v0 = vadd.f32 1.0, %v5662_v7  ;;  %v1853_v19 = vsel %vm1850_vm12, %v1852_v39, %v1848_v3  ;;  %vm1862_vm14 = vmor %vm1860_vm13, %vm1861_vm11  ;;  %v4925_v39 = vor.u32 %v5328_v36, %v4924_v13  ;;  %vm1336_vm3 = vcmp.eq.f32.partialorder %v1335_v47, 8.507059e+37 }
 0x212   : > { %v1857_v4 = vsub.f32 1.0, %v1856_v9  ;;  %v1327_v41 = vmul.f32 %v7037_v6, %v7012_v45  ;;  %v1884_v29 = vmul.f32 %v1853_v19, %v6846_v53  ;;  %v5666_v37 = vpop.eup %5665  ;;  %2292 = vmatpush.bf16.msra.mxu2 %v4949_v10  ;;  %v1135_v53 = vadd.f32 %v6993_v50, %v6484_v38  ;;  %v7060_v60 = vpop.f32.mrf.mxu2  ;;  %v4912_v45 = vld [vmem:[#allocation7] sm:$0xf] }
 0x213   : > { %5667 = vrcp.f32 %v7039_v0  ;;  %v7053_v55 = vadd.f32 1.0, %v5666_v37  ;;  %v1137_v9 = vadd.f32 %v7017_v49, %v6484_v38  ;;  %vm1332_vm0 = vweird.f32 %v7037_v6 }
 0x214   : > { %v1858_v20 = vmul.f32 %v5660_v30, %v1857_v4  ;;  %v1328_v51 = vsub.f32 1.0, %v1327_v41  ;;  %5669 = vpow2.f32 %v4833_v26  ;;  %v4834_v59 = vmul.f32 -1.442695, %v1135_v53  ;;  %vm7077_vm2 = vmor %vm1331_vm1, %vm1332_vm0 }
 0x215   : > { %5671 = vrcp.f32 %v7053_v55  ;;  %v4835_v7 = vmul.f32 -1.442695, %v1137_v9  ;;  %v1223_v4 = vadd.f32 %v7008_v43, %v6489_v12  ;;  %v4921_v14 = vor.u32 %v5326_v27, %v4920_v33 }
 0x216   : > { %v1859_v25 = vadd.f32 %v5660_v30, %v1858_v20  ;;  %2293 = vmatpush.bf16.msra.mxu2 %v4937_v52  ;;  %v1329_v61 = vmul.f32 %v7037_v6, %v1328_v51  ;;  %5673 = vpow2.f32 %v4834_v59  ;;  %v7073_v5 = vpop.f32.mrf.mxu0  ;;  %v1352_v31 = vand.u32 2147483648, %v7039_v0 }
 0x217   : > { %vm1346_vm5 = vweird.f32 %v7039_v0  ;;  %v1350_v34 = vand.u32 2147483647, %v7039_v0  ;;  %v1225_v51 = vadd.f32 %v7032_v18, %v6489_v12  ;;  %v1142_v18 = vadd.f32 %v7060_v60, %v6484_v38 }
 0x218   : > { %v1863_v54 = vsel %vm1862_vm14, %v5660_v30, %v1859_v25  ;;  %v4914_v30 = vld [vmem:[#allocation7 + $0xc] sm:$0xf0]  ;;  %v1330_v35 = vadd.f32 %v7037_v6, %v1329_v61  ;;  %v5325_v25 = vld [vmem:[#allocation7 + $0x8] sm:$0xf0]  ;;  %vm1361_vm9 = vweird.f32 %v7053_v55  ;;  %v1365_v60 = vand.u32 2147483647, %v7053_v55 }
 0x219   : > { %v1868_v42 = vsel %vm1865_vm15, %v1867_v56, %v1863_v54  ;;  %v7057_v57 = vpop.eup %5667  ;;  %v4917_v2 = vor.u32 %v5324_v8, %v4914_v30  ;;  %v1338_v56 = vor.u32 1.1754944e-38, %v1337_v46  ;;  %v4913_v41 = vor.u32 %v5325_v25, %v4912_v45  ;;  %v6077_v8 = vld [vmem:[%s6512_s16] sm:$0xff]  ;;  %v6078_v25 = vld [vmem:[%s6512_s16 + $0x8] sm:$0xff] }
 0x21a   : > { %v1885_v15 = vmul.f32 %v1868_v42, %v6850_v58  ;;  %v4945_v58 = vor.u32 %v5332_v62, %v4944_v23  ;;  %v1342_v63 = vmul.f32 %v7057_v57, %v7039_v0  ;;  %v5670_v50 = vpop.eup %5669  ;;  %v1334_v21 = vsel %vm7077_vm2, %v7037_v6, %v1330_v35  ;;  %v7091_v43 = vpop.f32.mrf.mxu2  ;;  %2294 = vmatpush.bf16.msra.mxu2 %v4925_v39 }
 0x21b   : > { %2344 = vmatpush.bf16.msra.mxu3 %v4917_v2  ;;  %v7069_v22 = vadd.f32 1.0, %v5670_v50  ;;  %v7071_v1 = vpop.eup %5671  ;;  %v4933_v6 = vor.u32 %v5329_v24, %v4932_v17  ;;  %vm1347_vm4 = vweird.f32 %v7057_v57  ;;  %v1140_v42 = vadd.f32 %v7044_v11, %v6484_v38 }
 0x21c   : > { %v1893_v40 = vpack.c.bf16 %v1885_v15, %v1884_v29  ;;  %2391 = vmatpush.bf16.msra.mxu0 %v4945_v58  ;;  %v1343_v28 = vsub.f32 1.0, %v1342_v63  ;;  %v1357_v3 = vmul.f32 %v7071_v1, %v7053_v55  ;;  %v5674_v19 = vpop.eup %5673  ;;  %v1339_v10 = vsel %vm1336_vm3, %v1338_v56, %v1334_v21  ;;  %vm7108_vm6 = vmor %vm1346_vm5, %vm1347_vm4 }
 0x21d   : > { %5675 = vrcp.f32 %v7069_v22  ;;  %v7096_v29 = vadd.f32 1.0, %v5674_v19  ;;  %v4836_v44 = vmul.f32 -1.442695, %v1140_v42  ;;  %v1353_v58 = vor.u32 1.1754944e-38, %v1352_v31 }
 0x21e   : > { %v1344_v20 = vmul.f32 %v7057_v57, %v1343_v28  ;;  %5677 = vpow2.f32 %v4835_v7  ;;  %v1358_v26 = vsub.f32 1.0, %v1357_v3  ;;  %2295 = vmatpush.bf16.msra.mxu2 %v4913_v41  ;;  %v7104_v11 = vpop.f32.mrf.mxu0  ;;  %vm1351_vm7 = vcmp.eq.f32.partialorder %v1350_v34, 8.507059e+37 }
 0x21f   : > { %vm1362_vm8 = vweird.f32 %v7071_v1  ;;  %v1367_v7 = vand.u32 2147483648, %v7053_v55  ;;  %v1228_v13 = vadd.f32 %v7051_v32, %v6489_v12  ;;  %vm1366_vm11 = vcmp.eq.f32.partialorder %v1365_v60, 8.507059e+37 }
 0x220   : > { %2001 = vmatmul.bf16.gmra.mxu1 %v1893_v40  ;;  %2392 = vmatpush.bf16.msra.mxu0 %v4933_v6  ;;  %v1345_v15 = vadd.f32 %v7057_v57, %v1344_v20  ;;  %v2039_v40 = vsub.f32 1.0, %v1339_v10  ;;  %v1359_v52 = vmul.f32 %v7071_v1, %v1358_v26  ;;  %vm7136_vm10 = vmor %vm1361_vm9, %vm1362_vm8  ;;  %vm1376_vm13 = vweird.f32 %v7069_v22 }
 0x221   : > { %v1368_v20 = vor.u32 1.1754944e-38, %v1367_v7  ;;  %v1230_v31 = vadd.f32 %v7073_v5, %v6489_v12  ;;  %vm1391_vm1 = vweird.f32 %v7096_v29  ;;  %v1233_v7 = vadd.f32 %v7104_v11, %v6489_v12 }
 0x222   : > { %v1349_v0 = vsel %vm7108_vm6, %v7057_v57, %v1345_v15  ;;  %v2055_v30 = vmul.f32 %v6077_v8, %v2039_v40  ;;  %v7124_v2 = vpop.f32.mrf.mxu2  ;;  %v1360_v35 = vadd.f32 %v7071_v1, %v1359_v52 }
 0x223   : > { %v7100_v37 = vpop.eup %5675  ;;  %v1354_v50 = vsel %vm1351_vm7, %v1353_v58, %v1349_v0  ;;  %v6079_v0 = vld [vmem:[%s6512_s16 + $0x10] sm:$0xff] }
 0x224   : > { %2393 = vmatpush.bf16.msra.mxu0 %v4921_v14  ;;  %v5678_v62 = vpop.eup %5677  ;;  %v1372_v53 = vmul.f32 %v7100_v37, %v7069_v22  ;;  %v2040_v47 = vsub.f32 1.0, %v1354_v50  ;;  %v1364_v36 = vsel %vm7136_vm10, %v7071_v1, %v1360_v35  ;;  %v1145_v1 = vadd.f32 %v7091_v43, %v6484_v38 }
 0x225   : > { %v7126_v9 = vadd.f32 1.0, %v5678_v62  ;;  %vm1377_vm12 = vweird.f32 %v7100_v37  ;;  %v1382_v14 = vand.u32 2147483648, %v7069_v22  ;;  %v1380_v43 = vand.u32 2147483647, %v7069_v22 }
 0x226   : > { %v1373_v28 = vsub.f32 1.0, %v1372_v53  ;;  %v7148_v55 = vpop.f32.mrf.mxu0  ;;  %v2056_v19 = vmul.f32 %v6078_v25, %v2040_v47  ;;  %v4838_v26 = vmul.f32 -1.442695, %v1145_v1  ;;  %vm7171_vm14 = vmor %vm1376_vm13, %vm1377_vm12 }
 0x227   : > { %v1383_v62 = vor.u32 1.1754944e-38, %v1382_v14  ;;  %vm1381_vm15 = vcmp.eq.f32.partialorder %v1380_v43, 8.507059e+37  ;;  %vm1406_vm5 = vweird.f32 %v7126_v9  ;;  %v1235_v14 = vadd.f32 %v7148_v55, %v6489_v12 }
 0x228   : > { %v1374_v24 = vmul.f32 %v7100_v37, %v1373_v28 }
 0x22a   : > { %v1149_v27 = vpop.f32.mrf.mxu2  ;;  %v1375_v41 = vadd.f32 %v7100_v37, %v1374_v24 }
 0x22b   : > { %v1150_v11 = vadd.f32 %v1149_v27, %v6484_v38 }
 0x22c   : > { %v1379_v23 = vsel %vm7171_vm14, %v7100_v37, %v1375_v41  ;;  %v1410_v41 = vand.u32 2147483647, %v7126_v9 }
 0x22d   : > { %v1967_v54 = vpop.f32.mrf.mxu1  ;;  %v1384_v8 = vsel %vm1381_vm15, %v1383_v62, %v1379_v23 }
 0x22e   : > { %v2007_v16 = vadd.f32 %v1967_v54, %v1223_v4  ;;  %v4837_v4 = vmul.f32 -1.442695, %v1142_v18  ;;  %v1369_v54 = vsel %vm1366_vm11, %v1368_v20, %v1364_v36  ;;  %v7182_v58 = vpop.f32.mrf.mxu0  ;;  %v6080_v20 = vld [vmem:[%s6512_s16 + $0x18] sm:$0xff]  ;;  %vm1411_vm7 = vcmp.eq.f32.partialorder %v1410_v41, 8.507059e+37 }
 0x230   : > { %5679 = vtanh.f32 %v2007_v16 }
 0x231   : > { %5681 = vrcp.f32 %v7096_v29 }
 0x232   : > { %5683 = vpow2.f32 %v4836_v44  ;;  %v1151_v28 = vpop.f32.mrf.mxu2 }
 0x235   : > { %v1969_v59 = vpop.f32.mrf.mxu1 }
 0x236   : > { %v5680_v61 = vpop.eup %5679  ;;  %v2008_v63 = vadd.f32 %v1969_v59, %v1225_v51  ;;  %v1147_v59 = vadd.f32 %v7124_v2, %v6484_v38  ;;  %v2042_v2 = vsub.f32 1.0, %v1384_v8 }
 0x237   : > { %v2071_v57 = vmul.f32 %v5680_v61, %v1339_v10  ;;  %v7131_v49 = vpop.eup %5681  ;;  %v2041_v10 = vsub.f32 1.0, %v1369_v54 }
 0x238   : > { %5685 = vtanh.f32 %v2008_v63  ;;  %v5684_v17 = vpop.eup %5683  ;;  %v1387_v3 = vmul.f32 %v7131_v49, %v7096_v29  ;;  %vm1392_vm0 = vweird.f32 %v7131_v49  ;;  %v4839_v35 = vmul.f32 -1.442695, %v1147_v59 }
 0x239   : > { %v2087_v46 = vadd.f32 %v2071_v57, %v2055_v30  ;;  %5687 = vrcp.f32 %v7126_v9  ;;  %v7154_v6 = vadd.f32 1.0, %v5684_v17  ;;  %v2057_v52 = vmul.f32 %v6079_v0, %v2041_v10  ;;  %vm7202_vm2 = vmor %vm1391_vm1, %vm1392_vm0 }
 0x23a   : > { %5689 = vpow2.f32 %v4837_v4  ;;  %v1388_v33 = vsub.f32 1.0, %v1387_v3 }
 0x23b   : > { %4894 = vst [vmem:[%s6512_s16 + $0x80] sm:$0xff] %v2087_v46  ;;  %vm1421_vm9 = vweird.f32 %v7154_v6 }
 0x23c   : > { %v1389_v51 = vmul.f32 %v7131_v49, %v1388_v33  ;;  %v1412_v33 = vand.u32 2147483648, %v7126_v9 }
 0x23d   : > { %v1972_v39 = vpop.f32.mrf.mxu1 }
 0x23e   : > { %v5686_v45 = vpop.eup %5685  ;;  %v2009_v32 = vadd.f32 %v1972_v39, %v1228_v13  ;;  %v1390_v18 = vadd.f32 %v7131_v49, %v1389_v51  ;;  %v2058_v39 = vmul.f32 %v6080_v20, %v2042_v2  ;;  %v1413_v23 = vor.u32 1.1754944e-38, %v1412_v33  ;;  %v6081_v51 = vld [vmem:[%s6512_s16 + $0x20] sm:$0xff] }
 0x23f   : > { %v2072_v56 = vmul.f32 %v5686_v45, %v1354_v50  ;;  %v7160_v42 = vpop.eup %5687  ;;  %v1397_v50 = vand.u32 2147483648, %v7096_v29  ;;  %v1238_v2 = vadd.f32 %v7182_v58, %v6489_v12 }
 0x240   : > { %5691 = vtanh.f32 %v2009_v32  ;;  %v5690_v34 = vpop.eup %5689  ;;  %v1402_v44 = vmul.f32 %v7160_v42, %v7126_v9  ;;  %v1394_v21 = vsel %vm7202_vm2, %v7131_v49, %v1390_v18  ;;  %v7216_v49 = vpop.f32.mrf.mxu0  ;;  %vm1407_vm4 = vweird.f32 %v7160_v42 }
 0x241   : > { %v7156_v16 = vadd.f32 %v2072_v56, %v2056_v19  ;;  %5693 = vrcp.f32 %v7154_v6  ;;  %v7186_v37 = vadd.f32 1.0, %v5690_v34  ;;  %v1398_v17 = vor.u32 1.1754944e-38, %v1397_v50  ;;  %vm7234_vm6 = vmor %vm1406_vm5, %vm1407_vm4 }
 0x242   : > { %5695 = vpow2.f32 %v4838_v26  ;;  %v1403_v30 = vsub.f32 1.0, %v1402_v44  ;;  %v1152_v44 = vadd.f32 %v1151_v28, %v6484_v38  ;;  %v5355_v28 = vld [vmem:[#allocation8 + $0x38] sm:$0xff] }
 0x243   : > { %4895 = vst [vmem:[%s6512_s16 + $0x88] sm:$0xff] %v7156_v16  ;;  %v2120_v15 = vpack.c.bf16 %v7156_v16, %v2087_v46  ;;  %v1395_v46 = vand.u32 2147483647, %v7096_v29  ;;  %3131 = vmatpush.bf16.msra.mxu1 %v5355_v28  ;;  %vm1436_vm13 = vweird.f32 %v7186_v37  ;;  %v5354_v28 = vld [vmem:[#allocation8 + $0x30] sm:$0xff] }
 0x244   : > { %v1404_v29 = vmul.f32 %v7160_v42, %v1403_v30  ;;  %v1427_v30 = vand.u32 2147483648, %v7154_v6 }
 0x245   : > { %v1974_v22 = vpop.f32.mrf.mxu1  ;;  %2296 = vmatmul.bf16.vlgmr.msra.gmra.mxu2 %v2120_v15  ;;  %2345 = vmatmul.bf16.vlgmr.msra.gmra.mxu3 %v2120_v15  ;;  %vm1396_vm3 = vcmp.eq.f32.partialorder %v1395_v46, 8.507059e+37 }
 0x246   : > { %v5692_v5 = vpop.eup %5691  ;;  %v2010_v53 = vadd.f32 %v1974_v22, %v1230_v31  ;;  %2394 = vmatmul.bf16.vlgmr.msra.gmra.mxu0 %v2120_v15  ;;  %v1399_v25 = vsel %vm1396_vm3, %v1398_v17, %v1394_v21  ;;  %v1405_v1 = vadd.f32 %v7160_v42, %v1404_v29  ;;  %v1154_v31 = vpop.f32.mrf.mxu2 }
 0x247   : > { %v2073_v61 = vmul.f32 %v5692_v5, %v1369_v54  ;;  %v7192_v57 = vpop.eup %5693  ;;  %v4840_v54 = vmul.f32 -1.442695, %v1150_v11  ;;  %v2043_v27 = vsub.f32 1.0, %v1399_v25  ;;  %v1155_v58 = vadd.f32 %v1154_v31, %v6484_v38  ;;  %v6082_v11 = vld [vmem:[%s6512_s16 + $0x28] sm:$0xff]  ;;  %3132 = vmatpush.bf16.msra.mxu1 %v5354_v28 }
 0x248   : > { %5697 = vtanh.f32 %v2010_v53  ;;  %v5696_v60 = vpop.eup %5695  ;;  %v1417_v4 = vmul.f32 %v7192_v57, %v7154_v6  ;;  %v1409_v9 = vsel %vm7234_vm6, %v7160_v42, %v1405_v1  ;;  %vm1422_vm8 = vweird.f32 %v7192_v57  ;;  %v7255_v18 = vpop.f32.mrf.mxu0 }
 0x249   : > { %v7188_v63 = vadd.f32 %v2073_v61, %v2057_v52  ;;  %5699 = vrcp.f32 %v7186_v37  ;;  %v7214_v45 = vadd.f32 1.0, %v5696_v60  ;;  %v2059_v5 = vmul.f32 %v6081_v51, %v2043_v27  ;;  %vm7264_vm10 = vmor %vm1421_vm9, %vm1422_vm8 }
 0x24a   : > { %5701 = vpow2.f32 %v4839_v35  ;;  %v1418_v19 = vsub.f32 1.0, %v1417_v4  ;;  %v1414_v42 = vsel %vm1411_vm7, %v1413_v23, %v1409_v9  ;;  %v1425_v35 = vand.u32 2147483647, %v7154_v6 }
 0x24b   : > { %4896 = vst [vmem:[%s6512_s16 + $0x90] sm:$0xff] %v7188_v63  ;;  %v2044_v50 = vsub.f32 1.0, %v1414_v42  ;;  %v4842_v1 = vmul.f32 -1.442695, %v1155_v58  ;;  %v1440_v27 = vand.u32 2147483647, %v7186_v37  ;;  %vm1451_vm1 = vweird.f32 %v7214_v45 }
 0x24c   : > { %v1419_v55 = vmul.f32 %v7192_v57, %v1418_v19  ;;  %vm1426_vm11 = vcmp.eq.f32.partialorder %v1425_v35, 8.507059e+37  ;;  %v1455_v35 = vand.u32 2147483647, %v7214_v45 }
 0x24d   : > { %v1977_v13 = vpop.f32.mrf.mxu1  ;;  %v2060_v17 = vmul.f32 %v6082_v11, %v2044_v50  ;;  %vm1441_vm15 = vcmp.eq.f32.partialorder %v1440_v27, 8.507059e+37 }
 0x24e   : > { %v5698_v36 = vpop.eup %5697  ;;  %v2011_v3 = vadd.f32 %v1977_v13, %v1233_v7  ;;  %v1420_v59 = vadd.f32 %v7192_v57, %v1419_v55  ;;  %v1428_v13 = vor.u32 1.1754944e-38, %v1427_v30  ;;  %v1457_v30 = vand.u32 2147483648, %v7214_v45 }
 0x24f   : > { %v2074_v24 = vmul.f32 %v5698_v36, %v1384_v8  ;;  %v7222_v56 = vpop.eup %5699  ;;  %v4841_v8 = vmul.f32 -1.442695, %v1152_v44  ;;  %v1156_v36 = vpop.f32.mrf.mxu2  ;;  %v6083_v44 = vld [vmem:[%s6512_s16 + $0x30] sm:$0xff]  ;;  %vm1456_vm3 = vcmp.eq.f32.partialorder %v1455_v35, 8.507059e+37 }
 0x250   : > { %5703 = vtanh.f32 %v2011_v3  ;;  %v5702_v43 = vpop.eup %5701  ;;  %v1432_v15 = vmul.f32 %v7222_v56, %v7186_v37  ;;  %v1424_v60 = vsel %vm7264_vm10, %v7192_v57, %v1420_v59  ;;  %vm1437_vm12 = vweird.f32 %v7222_v56 }
 0x251   : > { %v7218_v32 = vadd.f32 %v2074_v24, %v2058_v39  ;;  %5705 = vrcp.f32 %v7214_v45  ;;  %v7246_v52 = vadd.f32 1.0, %v5702_v43  ;;  %v1429_v39 = vsel %vm1426_vm11, %v1428_v13, %v1424_v60  ;;  %vm7294_vm14 = vmor %vm1436_vm13, %vm1437_vm12  ;;  %v7298_v43 = vpop.f32.mrf.mxu0 }
 0x252   : > { %5707 = vpow2.f32 %v4840_v54  ;;  %v1433_v62 = vsub.f32 1.0, %v1432_v15  ;;  %v1442_v54 = vand.u32 2147483648, %v7186_v37  ;;  %v2045_v33 = vsub.f32 1.0, %v1429_v39 }
 0x253   : > { %4897 = vst [vmem:[%s6512_s16 + $0x98] sm:$0xff] %v7218_v32  ;;  %v2121_v10 = vpack.c.bf16 %v7218_v32, %v7188_v63  ;;  %vm1466_vm5 = vweird.f32 %v7246_v52 }
 0x254   : > { %v1434_v4 = vmul.f32 %v7222_v56, %v1433_v62  ;;  %v1443_v55 = vor.u32 1.1754944e-38, %v1442_v54  ;;  %v2061_v23 = vmul.f32 %v6083_v44, %v2045_v33  ;;  %v1472_v54 = vand.u32 2147483648, %v7246_v52 }
 0x255   : > { %v1979_v40 = vpop.f32.mrf.mxu1  ;;  %2301 = vmatmul.bf16.gmra.mxu2 %v2121_v10  ;;  %2350 = vmatmul.bf16.gmra.mxu3 %v2121_v10 }
 0x256   : > { %v5704_v34 = vpop.eup %5703  ;;  %v2012_v22 = vadd.f32 %v1979_v40, %v1235_v14  ;;  %2399 = vmatmul.bf16.gmra.mxu0 %v2121_v10  ;;  %v1240_v10 = vadd.f32 %v7216_v49, %v6489_v12  ;;  %v1157_v40 = vadd.f32 %v1156_v36, %v6484_v38  ;;  %v1245_v14 = vadd.f32 %v7298_v43, %v6489_v12 }
 0x257   : > { %v2075_v0 = vmul.f32 %v5704_v34, %v1399_v25  ;;  %v7252_v61 = vpop.eup %5705  ;;  %v1435_v25 = vadd.f32 %v7222_v56, %v1434_v4 }
 0x258   : > { %5709 = vtanh.f32 %v2012_v22  ;;  %v5708_v7 = vpop.eup %5707  ;;  %v1447_v47 = vmul.f32 %v7252_v61, %v7214_v45  ;;  %vm1452_vm0 = vweird.f32 %v7252_v61 }
 0x259   : > { %v7248_v53 = vadd.f32 %v2075_v0, %v2059_v5  ;;  %5711 = vrcp.f32 %v7246_v52  ;;  %v7276_v20 = vadd.f32 1.0, %v5708_v7  ;;  %v1439_v37 = vsel %vm7294_vm14, %v7222_v56, %v1435_v25  ;;  %v1159_v0 = vpop.f32.mrf.mxu2  ;;  %vm7324_vm2 = vmor %vm1451_vm1, %vm1452_vm0  ;;  %v1247_v13 = vpop.f32.mrf.mxu0 }
 0x25a   : > { %5713 = vpow2.f32 %v4841_v8  ;;  %v1448_v57 = vsub.f32 1.0, %v1447_v47  ;;  %v1444_v56 = vsel %vm1441_vm15, %v1443_v55, %v1439_v37  ;;  %v4843_v8 = vmul.f32 -1.442695, %v1157_v40 }
 0x25b   : > { %4898 = vst [vmem:[%s6512_s16 + $0xa0] sm:$0xff] %v7248_v53  ;;  %v2046_v50 = vsub.f32 1.0, %v1444_v56  ;;  %v1473_v40 = vor.u32 1.1754944e-38, %v1472_v54  ;;  %vm1481_vm9 = vweird.f32 %v7276_v20  ;;  %v1485_v28 = vand.u32 2147483647, %v7276_v20 }
 0x25c   : > { %v1449_v49 = vmul.f32 %v7252_v61, %v1448_v57  ;;  %v1248_v46 = vadd.f32 %v1247_v13, %v6489_v12 }
 0x25d   : > { %v1982_v6 = vpop.f32.mrf.mxu1  ;;  %vm1486_vm11 = vcmp.eq.f32.partialorder %v1485_v28, 8.507059e+37 }
 0x25e   : > { %v5710_v21 = vpop.eup %5709  ;;  %v2013_v29 = vadd.f32 %v1982_v6, %v1238_v2  ;;  %v1450_v62 = vadd.f32 %v7252_v61, %v1449_v49  ;;  %v1243_v2 = vadd.f32 %v7255_v18, %v6489_v12  ;;  %v1160_v18 = vadd.f32 %v1159_v0, %v6484_v38 }
 0x25f   : > { %v2076_v3 = vmul.f32 %v5710_v21, %v1414_v42  ;;  %v7282_v19 = vpop.eup %5711  ;;  %v1458_v21 = vor.u32 1.1754944e-38, %v1457_v30 }
 0x260   : > { %5715 = vtanh.f32 %v2013_v29  ;;  %v5714_v26 = vpop.eup %5713  ;;  %v1462_v15 = vmul.f32 %v7282_v19, %v7246_v52  ;;  %v1454_v60 = vsel %vm7324_vm2, %v7252_v61, %v1450_v62  ;;  %v6084_v29 = vld [vmem:[%s6512_s16 + $0x38] sm:$0xff]  ;;  %vm1467_vm4 = vweird.f32 %v7282_v19 }
 0x261   : > { %v7278_v24 = vadd.f32 %v2076_v3, %v2060_v17  ;;  %5717 = vrcp.f32 %v7276_v20  ;;  %v7308_v51 = vadd.f32 1.0, %v5714_v26  ;;  %v2062_v36 = vmul.f32 %v6084_v29, %v2046_v50  ;;  %v1161_v33 = vpop.f32.mrf.mxu2  ;;  %vm7354_vm6 = vmor %vm1466_vm5, %vm1467_vm4 }
 0x262   : > { %5719 = vpow2.f32 %v4842_v1  ;;  %v1463_v5 = vsub.f32 1.0, %v1462_v15  ;;  %v1459_v3 = vsel %vm1456_vm3, %v1458_v21, %v1454_v60  ;;  %v4844_v1 = vmul.f32 -1.442695, %v1160_v18 }
 0x263   : > { %4899 = vst [vmem:[%s6512_s16 + $0xa8] sm:$0xff] %v7278_v24  ;;  %v2122_v41 = vpack.c.bf16 %v7278_v24, %v7248_v53  ;;  %v2047_v27 = vsub.f32 1.0, %v1459_v3  ;;  %v1487_v50 = vand.u32 2147483648, %v7276_v20  ;;  %vm1496_vm13 = vweird.f32 %v7308_v51 }
 0x264   : > { %v1464_v6 = vmul.f32 %v7282_v19, %v1463_v5 }
 0x265   : > { %v1984_v31 = vpop.f32.mrf.mxu1  ;;  %2306 = vmatmul.bf16.gmra.mxu2 %v2122_v41  ;;  %2355 = vmatmul.bf16.gmra.mxu3 %v2122_v41  ;;  %v1488_v18 = vor.u32 1.1754944e-38, %v1487_v50  ;;  %v5352_v50 = vld [vmem:[#allocation8 + $0x20] sm:$0xff] }
 0x266   : > { %v5716_v9 = vpop.eup %5715  ;;  %v2014_v34 = vadd.f32 %v1984_v31, %v1240_v10  ;;  %2404 = vmatmul.bf16.gmra.mxu0 %v2122_v41  ;;  %v1465_v57 = vadd.f32 %v7282_v19, %v1464_v6  ;;  %v1470_v41 = vand.u32 2147483647, %v7246_v52 }
 0x267   : > { %v2077_v22 = vmul.f32 %v5716_v9, %v1429_v39  ;;  %v7314_v59 = vpop.eup %5717  ;;  %v1162_v9 = vadd.f32 %v1161_v33, %v6484_v38 }
 0x268   : > { %5721 = vtanh.f32 %v2014_v34  ;;  %v5720_v7 = vpop.eup %5719  ;;  %v1477_v47 = vmul.f32 %v7314_v59, %v7276_v20  ;;  %v1469_v52 = vsel %vm7354_vm6, %v7282_v19, %v1465_v57  ;;  %v6085_v34 = vld [vmem:[%s6512_s16 + $0x40] sm:$0xff]  ;;  %vm1471_vm7 = vcmp.eq.f32.partialorder %v1470_v41, 8.507059e+37 }
 0x269   : > { %v7310_v42 = vadd.f32 %v2077_v22, %v2061_v23  ;;  %5723 = vrcp.f32 %v7308_v51  ;;  %v7336_v17 = vadd.f32 1.0, %v5720_v7  ;;  %v2063_v44 = vmul.f32 %v6085_v34, %v2047_v27 }
 0x26a   : > { %5725 = vpow2.f32 %v4843_v8  ;;  %v1478_v61 = vsub.f32 1.0, %v1477_v47  ;;  %v1474_v19 = vsel %vm1471_vm7, %v1473_v40, %v1469_v52  ;;  %vm1482_vm8 = vweird.f32 %v7314_v59 }
 0x26b   : > { %4900 = vst [vmem:[%s6512_s16 + $0xb0] sm:$0xff] %v7310_v42  ;;  %v4845_v30 = vmul.f32 -1.442695, %v1162_v9  ;;  %v2048_v35 = vsub.f32 1.0, %v1474_v19  ;;  %vm7381_vm10 = vmor %vm1481_vm9, %vm1482_vm8  ;;  %v1500_v27 = vand.u32 2147483647, %v7308_v51  ;;  %vm1511_vm1 = vweird.f32 %v7336_v17 }
 0x26c   : > { %v1479_v43 = vmul.f32 %v7314_v59, %v1478_v61  ;;  %v6087_v9 = vld [vmem:[%s6512_s16 + $0x50] sm:$0xff] }
 0x26d   : > { %v1987_v45 = vpop.f32.mrf.mxu1  ;;  %vm1501_vm15 = vcmp.eq.f32.partialorder %v1500_v27, 8.507059e+37 }
 0x26e   : > { %v5722_v4 = vpop.eup %5721  ;;  %v2015_v58 = vadd.f32 %v1987_v45, %v1243_v2  ;;  %v1480_v62 = vadd.f32 %v7314_v59, %v1479_v43  ;;  %v5353_v2 = vld [vmem:[#allocation8 + $0x28] sm:$0xff] }
 0x26f   : > { %v2078_v11 = vmul.f32 %v5722_v4, %v1444_v56  ;;  %v7342_v25 = vpop.eup %5723  ;;  %v1249_v56 = vpop.f32.mrf.mxu0  ;;  %3133 = vmatpush.bf16.msra.mxu1 %v5353_v2 }
 0x270   : > { %5727 = vtanh.f32 %v2015_v58  ;;  %v5726_v15 = vpop.eup %5725  ;;  %v1492_v37 = vmul.f32 %v7342_v25, %v7308_v51  ;;  %v1484_v45 = vsel %vm7381_vm10, %v7314_v59, %v1480_v62  ;;  %v6086_v58 = vld [vmem:[%s6512_s16 + $0x48] sm:$0xff]  ;;  %vm1497_vm12 = vweird.f32 %v7342_v25 }
 0x271   : > { %v7338_v39 = vadd.f32 %v2078_v11, %v2062_v36  ;;  %5729 = vrcp.f32 %v7336_v17  ;;  %v7366_v22 = vadd.f32 1.0, %v5726_v15  ;;  %v2064_v13 = vmul.f32 %v6086_v58, %v2048_v35  ;;  %vm7409_vm14 = vmor %vm1496_vm13, %vm1497_vm12 }
 0x272   : > { %5731 = vpow2.f32 %v4844_v1  ;;  %v1493_v5 = vsub.f32 1.0, %v1492_v37  ;;  %v1489_v11 = vsel %vm1486_vm11, %v1488_v18, %v1484_v45  ;;  %v1502_v1 = vand.u32 2147483648, %v7308_v51 }
 0x273   : > { %4901 = vst [vmem:[%s6512_s16 + $0xb8] sm:$0xff] %v7338_v39  ;;  %v2123_v10 = vpack.c.bf16 %v7338_v39, %v7310_v42  ;;  %v2049_v33 = vsub.f32 1.0, %v1489_v11  ;;  %3134 = vmatpush.bf16.msra.mxu1 %v5352_v50  ;;  %vm1526_vm5 = vweird.f32 %v7366_v22 }
 0x274   : > { %v1494_v20 = vmul.f32 %v7342_v25, %v1493_v5  ;;  %v1503_v43 = vor.u32 1.1754944e-38, %v1502_v1  ;;  %v1517_v5 = vand.u32 2147483648, %v7336_v17  ;;  %v5351_v1 = vld [vmem:[#allocation8 + $0x18] sm:$0xff] }
 0x275   : > { %v1989_v31 = vpop.f32.mrf.mxu1  ;;  %2311 = vmatmul.bf16.gmra.mxu2 %v2123_v10  ;;  %2360 = vmatmul.bf16.gmra.mxu3 %v2123_v10  ;;  %v2065_v40 = vmul.f32 %v6087_v9, %v2049_v33 }
 0x276   : > { %v5728_v49 = vpop.eup %5727  ;;  %v2016_v55 = vadd.f32 %v1989_v31, %v1245_v14  ;;  %2409 = vmatmul.bf16.gmra.mxu0 %v2123_v10  ;;  %v1495_v59 = vadd.f32 %v7342_v25, %v1494_v20  ;;  %v1250_v10 = vadd.f32 %v1249_v56, %v6489_v12  ;;  %v1518_v45 = vor.u32 1.1754944e-38, %v1517_v5 }
 0x277   : > { %v2079_v23 = vmul.f32 %v5728_v49, %v1459_v3  ;;  %v7372_v8 = vpop.eup %5729  ;;  %v1252_v54 = vpop.f32.mrf.mxu0  ;;  %3135 = vmatpush.bf16.msra.mxu1 %v5351_v1 }
 0x278   : > { %5733 = vtanh.f32 %v2016_v55  ;;  %v5732_v47 = vpop.eup %5731  ;;  %v1507_v60 = vmul.f32 %v7372_v8, %v7336_v17  ;;  %v1499_v51 = vsel %vm7409_vm14, %v7342_v25, %v1495_v59  ;;  %vm1512_vm0 = vweird.f32 %v7372_v8 }
 0x279   : > { %v7368_v0 = vadd.f32 %v2079_v23, %v2063_v44  ;;  %5735 = vrcp.f32 %v7366_v22  ;;  %v7392_v36 = vadd.f32 1.0, %v5732_v47  ;;  %v1504_v44 = vsel %vm1501_vm15, %v1503_v43, %v1499_v51  ;;  %vm1513_vm2 = vmor %vm1511_vm1, %vm1512_vm0 }
 0x27a   : > { %5737 = vpow2.f32 %v4845_v30  ;;  %v1508_v3 = vsub.f32 1.0, %v1507_v60  ;;  %v2050_v62 = vsub.f32 1.0, %v1504_v44  ;;  %v1515_v30 = vand.u32 2147483647, %v7336_v17 }
 0x27b   : > { %4902 = vst [vmem:[%s6512_s16 + $0xc0] sm:$0xff] %v7368_v0  ;;  %v1253_v35 = vadd.f32 %v1252_v54, %v6489_v12  ;;  %vm1541_vm9 = vweird.f32 %v7392_v36 }
 0x27c   : > { %v1509_v52 = vmul.f32 %v7372_v8, %v1508_v3  ;;  %vm1516_vm3 = vcmp.eq.f32.partialorder %v1515_v30, 8.507059e+37  ;;  %v1530_v3 = vand.u32 2147483647, %v7366_v22 }
 0x27d   : > { %v1992_v6 = vpop.f32.mrf.mxu1 }
 0x27e   : > { %v5734_v4 = vpop.eup %5733  ;;  %v2017_v21 = vadd.f32 %v1992_v6, %v1248_v46  ;;  %v6088_v6 = vld [vmem:[%s6512_s16 + $0x58] sm:$0xff]  ;;  %vm1531_vm7 = vcmp.eq.f32.partialorder %v1530_v3, 8.507059e+37  ;;  %v6091_v3 = vld [vmem:[%s6512_s16 + $0x70] sm:$0xff] }
 0x27f   : > { %v2080_v29 = vmul.f32 %v5734_v4, %v1474_v19  ;;  %v7398_v57 = vpop.eup %5735  ;;  %v1510_v19 = vadd.f32 %v7372_v8, %v1509_v52  ;;  %v1254_v28 = vpop.f32.mrf.mxu0  ;;  %v2066_v20 = vmul.f32 %v6088_v6, %v2050_v62 }
 0x280   : > { %5739 = vtanh.f32 %v2017_v21  ;;  %v5738_v26 = vpop.eup %5737  ;;  %v1522_v15 = vmul.f32 %v7398_v57, %v7366_v22  ;;  %vm1527_vm4 = vweird.f32 %v7398_v57  ;;  %v1255_v54 = vadd.f32 %v1254_v28, %v6489_v12  ;;  %v6090_v28 = vld [vmem:[%s6512_s16 + $0x68] sm:$0xff] }
 0x281   : > { %v7394_v61 = vadd.f32 %v2080_v29, %v2064_v13  ;;  %5741 = vrcp.f32 %v7392_v36  ;;  %v7420_v34 = vadd.f32 1.0, %v5738_v26  ;;  %v1514_v46 = vsel %vm1513_vm2, %v7372_v8, %v1510_v19  ;;  %vm7454_vm6 = vmor %vm1526_vm5, %vm1527_vm4 }
 0x282   : > { %v1523_v23 = vsub.f32 1.0, %v1522_v15  ;;  %v1519_v18 = vsel %vm1516_vm3, %v1518_v45, %v1514_v46  ;;  %v1532_v29 = vand.u32 2147483648, %v7366_v22 }
 0x283   : > { %4903 = vst [vmem:[%s6512_s16 + $0xc8] sm:$0xff] %v7394_v61  ;;  %v2124_v41 = vpack.c.bf16 %v7394_v61, %v7368_v0  ;;  %vm1556_vm13 = vweird.f32 %v7420_v34 }
 0x284   : > { %v1524_v47 = vmul.f32 %v7398_v57, %v1523_v23  ;;  %v1533_v26 = vor.u32 1.1754944e-38, %v1532_v29 }
 0x285   : > { %v1994_v37 = vpop.f32.mrf.mxu1  ;;  %2316 = vmatmul.bf16.gmra.mxu2 %v2124_v41  ;;  %2365 = vmatmul.bf16.gmra.mxu3 %v2124_v41 }
 0x286   : > { %v5740_v31 = vpop.eup %5739  ;;  %v2018_v49 = vadd.f32 %v1994_v37, %v1250_v10  ;;  %2414 = vmatmul.bf16.gmra.mxu0 %v2124_v41  ;;  %v1525_v13 = vadd.f32 %v7398_v57, %v1524_v47  ;;  %v6089_v37 = vld [vmem:[%s6512_s16 + $0x60] sm:$0xff] }
 0x287   : > { %v2081_v55 = vmul.f32 %v5740_v31, %v1489_v11  ;;  %v7426_v56 = vpop.eup %5741  ;;  %v2051_v11 = vsub.f32 1.0, %v1519_v18  ;;  %v1257_v51 = vpop.f32.mrf.mxu0 }
 0x288   : > { %5743 = vtanh.f32 %v2018_v49  ;;  %v1537_v2 = vmul.f32 %v7426_v56, %v7392_v36  ;;  %v1529_v41 = vsel %vm7454_vm6, %v7398_v57, %v1525_v13  ;;  %vm1542_vm8 = vweird.f32 %v7426_v56 }
 0x289   : > { %v7422_v25 = vadd.f32 %v2081_v55, %v2065_v40  ;;  %5745 = vrcp.f32 %v7420_v34  ;;  %v2067_v52 = vmul.f32 %v6089_v37, %v2051_v11  ;;  %v1534_v43 = vsel %vm1531_vm7, %v1533_v26, %v1529_v41  ;;  %vm1543_vm10 = vmor %vm1541_vm9, %vm1542_vm8  ;;  %v6092_v41 = vld [vmem:[%s6512_s16 + $0x78] sm:$0xff] }
 0x28a   : > { %v1538_v21 = vsub.f32 1.0, %v1537_v2  ;;  %v1547_v40 = vand.u32 2147483648, %v7392_v36  ;;  %v2052_v55 = vsub.f32 1.0, %v1534_v43  ;;  %v1258_v23 = vadd.f32 %v1257_v51, %v6489_v12 }
 0x28b   : > { %4904 = vst [vmem:[%s6512_s16 + $0xd0] sm:$0xff] %v7422_v25 }
 0x28c   : > { %v1539_v22 = vmul.f32 %v7426_v56, %v1538_v21  ;;  %v1548_v50 = vor.u32 1.1754944e-38, %v1547_v40  ;;  %v2068_v2 = vmul.f32 %v6090_v28, %v2052_v55 }
 0x28d   : > { %v1997_v7 = vpop.f32.mrf.mxu1 }
 0x28e   : > { %v5744_v60 = vpop.eup %5743  ;;  %v2019_v17 = vadd.f32 %v1997_v7, %v1253_v35  ;;  %v1540_v9 = vadd.f32 %v7426_v56, %v1539_v22 }
 0x28f   : > { %v2082_v4 = vmul.f32 %v5744_v60, %v1504_v44  ;;  %v7444_v8 = vpop.eup %5745  ;;  %v1545_v44 = vand.u32 2147483647, %v7392_v36  ;;  %v1259_v47 = vpop.f32.mrf.mxu0 }
 0x290   : > { %5747 = vtanh.f32 %v2019_v17  ;;  %v1552_v27 = vmul.f32 %v7444_v8, %v7420_v34  ;;  %v1544_v19 = vsel %vm1543_vm10, %v7426_v56, %v1540_v9  ;;  %vm1557_vm12 = vweird.f32 %v7444_v8 }
 0x291   : > { %v7440_v58 = vadd.f32 %v2082_v4, %v2066_v20  ;;  %vm1546_vm11 = vcmp.eq.f32.partialorder %v1545_v44, 8.507059e+37  ;;  %v1562_v56 = vand.u32 2147483648, %v7420_v34  ;;  %v1560_v17 = vand.u32 2147483647, %v7420_v34  ;;  %vm7490_vm14 = vmor %vm1556_vm13, %vm1557_vm12 }
 0x292   : > { %v1553_v49 = vsub.f32 1.0, %v1552_v27  ;;  %v1549_v7 = vsel %vm1546_vm11, %v1548_v50, %v1544_v19  ;;  %v1260_v20 = vadd.f32 %v1259_v47, %v6489_v12  ;;  %v5348_v19 = vld [vmem:[#allocation8] sm:$0xff] }
 0x293   : > { %4905 = vst [vmem:[%s6512_s16 + $0xd8] sm:$0xff] %v7440_v58  ;;  %v2125_v59 = vpack.c.bf16 %v7440_v58, %v7422_v25  ;;  %v2053_v45 = vsub.f32 1.0, %v1549_v7  ;;  %v1563_v29 = vor.u32 1.1754944e-38, %v1562_v56  ;;  %vm1561_vm15 = vcmp.eq.f32.partialorder %v1560_v17, 8.507059e+37 }
 0x294   : > { %v1554_v62 = vmul.f32 %v7444_v8, %v1553_v49 }
 0x295   : > { %v1999_v10 = vpop.f32.mrf.mxu1  ;;  %2321 = vmatmul.bf16.gmra.mxu2 %v2125_v59  ;;  %2370 = vmatmul.bf16.gmra.mxu3 %v2125_v59 }
 0x296   : > { %v5748_v14 = vpop.eup %5747  ;;  %v2020_v15 = vadd.f32 %v1999_v10, %v1255_v54  ;;  %2419 = vmatmul.bf16.gmra.mxu0 %v2125_v59  ;;  %v1555_v60 = vadd.f32 %v7444_v8, %v1554_v62  ;;  %v2069_v59 = vmul.f32 %v6091_v3, %v2053_v45 }
 0x297   : > { %v2083_v31 = vmul.f32 %v5748_v14, %v1519_v18  ;;  %v5350_v18 = vld [vmem:[#allocation8 + $0x10] sm:$0xff] }
 0x298   : > { %5749 = vtanh.f32 %v2020_v15  ;;  %v1559_v21 = vsel %vm7490_vm14, %v7444_v8, %v1555_v60  ;;  %3136 = vmatpush.bf16.msra.mxu1 %v5350_v18 }
 0x299   : > { %v7465_v57 = vadd.f32 %v2083_v31, %v2067_v52  ;;  %v1564_v54 = vsel %vm1561_vm15, %v1563_v29, %v1559_v21  ;;  %v5349_v52 = vld [vmem:[#allocation8 + $0x8] sm:$0xff] }
 0x29a   : > { %v2054_v8 = vsub.f32 1.0, %v1564_v54 }
 0x29b   : > { %4906 = vst [vmem:[%s6512_s16 + $0xe0] sm:$0xff] %v7465_v57 }
 0x29c   : > { %v2070_v10 = vmul.f32 %v6092_v41, %v2054_v8  ;;  %3137 = vmatpush.bf16.msra.mxu1 %v5349_v52 }
 0x29d   : > { %v2002_v5 = vpop.f32.mrf.mxu1 }
 0x29e   : > { %v5750_v30 = vpop.eup %5749  ;;  %v2021_v35 = vadd.f32 %v2002_v5, %v1258_v23 }
 0x29f   : > { %v2084_v46 = vmul.f32 %v5750_v30, %v1534_v43 }
 0x2a0   : > { %5751 = vtanh.f32 %v2021_v35  ;;  %3138 = vmatpush.bf16.msra.mxu1 %v5348_v19 }
 0x2a1   : > { %v7478_v36 = vadd.f32 %v2084_v46, %v2068_v2 }
 0x2a3   : > { %4907 = vst [vmem:[%s6512_s16 + $0xe8] sm:$0xff] %v7478_v36  ;;  %v2126_v6 = vpack.c.bf16 %v7478_v36, %v7465_v57 }
 0x2a5   : > { %v2004_v13 = vpop.f32.mrf.mxu1  ;;  %2326 = vmatmul.bf16.gmra.mxu2 %v2126_v6  ;;  %2375 = vmatmul.bf16.gmra.mxu3 %v2126_v6 }
 0x2a6   : > { %v5752_v34 = vpop.eup %5751  ;;  %v2022_v11 = vadd.f32 %v2004_v13, %v1260_v20  ;;  %2424 = vmatmul.bf16.gmra.mxu0 %v2126_v6 }
 0x2a7   : > { %v2085_v1 = vmul.f32 %v5752_v34, %v1549_v7 }
 0x2a8   : > { %5753 = vtanh.f32 %v2022_v11 }
 0x2a9   : > { %v7498_v33 = vadd.f32 %v2085_v1, %v2069_v59 }
 0x2ab   : > { %4908 = vst [vmem:[%s6512_s16 + $0xf0] sm:$0xff] %v7498_v33 }
 0x2ae   : > { %v5754_v27 = vpop.eup %5753 }
 0x2af   : > { %v2086_v22 = vmul.f32 %v5754_v27, %v1564_v54 }
 0x2b1   : > { %v7503_v14 = vadd.f32 %v2086_v22, %v2070_v10 }
 0x2b3   : > { %4909 = vst [vmem:[%s6512_s16 + $0xf8] sm:$0xff] %v7503_v14  ;;  %v2127_v26 = vpack.c.bf16 %v7503_v14, %v7498_v33 }
 0x2b5   : > { %2331 = vmatmul.bf16.gmra.mxu2 %v2127_v26  ;;  %2380 = vmatmul.bf16.gmra.mxu3 %v2127_v26 }
 0x2b6   : > { %2429 = vmatmul.bf16.gmra.mxu0 %v2127_v26 }
 0x2c8   : > { %v2346_v15 = vpop.f32.mrf.mxu3 }
 0x2c9   : > { %v2347_v51 = vadd.f32 %v2346_v15, %v6863_v48 }
 0x2cb   : > { %v5022_v37 = vmul.f32 -1.442695, %v2347_v51 }
 0x2cd   : > { %5755 = vpow2.f32 %v5022_v37 }
 0x2d0   : > { %v2348_v31 = vpop.f32.mrf.mxu3 }
 0x2d1   : > { %v2349_v43 = vadd.f32 %v2348_v31, %v6863_v48  ;;  %v7529_v31 = vld [vmem:[%s6512_s16 + $0x80] sm:$0xff] }
 0x2d3   : > { %v5756_v49 = vpop.eup %5755  ;;  %v5023_v9 = vmul.f32 -1.442695, %v2349_v43 }
 0x2d4   : > { %v2787_v40 = vadd.f32 1.0, %v5756_v49 }
 0x2d6   : > { %5757 = vrcp.f32 %v2787_v40  ;;  %v2814_v20 = vand.u32 2147483648, %v2787_v40  ;;  %vm2808_vm1 = vweird.f32 %v2787_v40  ;;  %v2812_v18 = vand.u32 2147483647, %v2787_v40 }
 0x2d7   : > { %5759 = vpow2.f32 %v5023_v9 }
 0x2d8   : > { %v2351_v55 = vpop.f32.mrf.mxu3  ;;  %v2815_v1 = vor.u32 1.1754944e-38, %v2814_v20  ;;  %vm2813_vm4 = vcmp.eq.f32.partialorder %v2812_v18, 8.507059e+37 }
 0x2d9   : > { %v2352_v44 = vadd.f32 %v2351_v55, %v6863_v48 }
 0x2db   : > { %v5024_v23 = vmul.f32 -1.442695, %v2352_v44 }
 0x2dc   : > { %v5758_v5 = vpop.eup %5757 }
 0x2dd   : > { %v5760_v62 = vpop.eup %5759  ;;  %v2804_v30 = vmul.f32 %v5758_v5, %v2787_v40  ;;  %5761 = vpow2.f32 %v5024_v23  ;;  %vm2809_vm0 = vweird.f32 %v5758_v5 }
 0x2de   : > { %v2788_v50 = vadd.f32 1.0, %v5760_v62  ;;  %vm7517_vm2 = vmor %vm2808_vm1, %vm2809_vm0 }
 0x2df   : > { %v2805_v35 = vsub.f32 1.0, %v2804_v30 }
 0x2e0   : > { %v2353_v28 = vpop.f32.mrf.mxu3  ;;  %5763 = vrcp.f32 %v2788_v50  ;;  %v2829_v34 = vand.u32 2147483648, %v2788_v50  ;;  %v2827_v3 = vand.u32 2147483647, %v2788_v50  ;;  %vm2823_vm5 = vweird.f32 %v2788_v50 }
 0x2e1   : > { %v2354_v2 = vadd.f32 %v2353_v28, %v6863_v48  ;;  %v2806_v46 = vmul.f32 %v5758_v5, %v2805_v35 }
 0x2e2   : > { %v2830_v41 = vor.u32 1.1754944e-38, %v2829_v34  ;;  %vm2828_vm7 = vcmp.eq.f32.partialorder %v2827_v3, 8.507059e+37 }
 0x2e3   : > { %v5762_v7 = vpop.eup %5761  ;;  %v5025_v47 = vmul.f32 -1.442695, %v2354_v2  ;;  %v2807_v45 = vadd.f32 %v5758_v5, %v2806_v46 }
 0x2e4   : > { %v7513_v60 = vadd.f32 1.0, %v5762_v7 }
 0x2e5   : > { %v2811_v59 = vsel %vm7517_vm2, %v5758_v5, %v2807_v45 }
 0x2e6   : > { %v5764_v56 = vpop.eup %5763  ;;  %5765 = vrcp.f32 %v7513_v60  ;;  %v2816_v10 = vsel %vm2813_vm4, %v2815_v1, %v2811_v59  ;;  %vm2838_vm9 = vweird.f32 %v7513_v60  ;;  %v2842_v45 = vand.u32 2147483647, %v7513_v60 }
 0x2e7   : > { %v2819_v17 = vmul.f32 %v5764_v56, %v2788_v50  ;;  %5767 = vpow2.f32 %v5025_v47  ;;  %vm2824_vm3 = vweird.f32 %v5764_v56  ;;  %v3043_v43 = vmul.f32 %v7529_v31, %v2816_v10 }
 0x2e8   : > { %v2356_v6 = vpop.f32.mrf.mxu3  ;;  %vm2825_vm6 = vmor %vm2823_vm5, %vm2824_vm3  ;;  %vm2843_vm14 = vcmp.eq.f32.partialorder %v2842_v45, 8.507059e+37 }
 0x2e9   : > { %v2357_v4 = vadd.f32 %v2356_v6, %v6863_v48  ;;  %v2820_v21 = vsub.f32 1.0, %v2819_v17 }
 0x2eb   : > { %v5026_v29 = vmul.f32 -1.442695, %v2357_v4  ;;  %v2821_v11 = vmul.f32 %v5764_v56, %v2820_v21 }
 0x2ec   : > { %v7523_v54 = vpop.eup %5765 }
 0x2ed   : > { %v2822_v8 = vadd.f32 %v5764_v56, %v2821_v11  ;;  %5769 = vpow2.f32 %v5026_v29  ;;  %v5768_v27 = vpop.eup %5767  ;;  %v2834_v52 = vmul.f32 %v7523_v54, %v7513_v60  ;;  %vm2839_vm8 = vweird.f32 %v7523_v54  ;;  %v5377_v29 = vld [vmem:[#allocation7 + $0xac] sm:$0xf]  ;;  %v5174_v11 = vld [vmem:[#allocation7 + $0xb4] sm:$0xf0] }
 0x2ee   : > { %v2790_v22 = vadd.f32 1.0, %v5768_v27  ;;  %vm7544_vm10 = vmor %vm2838_vm9, %vm2839_vm8  ;;  %v5177_v59 = vor.u32 %v5377_v29, %v5174_v11 }
 0x2ef   : > { %v2826_v15 = vsel %vm2825_vm6, %v5764_v56, %v2822_v8  ;;  %v2835_v23 = vsub.f32 1.0, %v2834_v52 }
 0x2f0   : > { %v2358_v26 = vpop.f32.mrf.mxu3  ;;  %v2831_v37 = vsel %vm2828_vm7, %v2830_v41, %v2826_v15  ;;  %5771 = vrcp.f32 %v2790_v22  ;;  %vm2853_vm11 = vweird.f32 %v2790_v22  ;;  %v2857_v21 = vand.u32 2147483647, %v2790_v22  ;;  %3510 = vmatpush.bf16.msrb.mxu3 %v5177_v59 }
 0x2f1   : > { %v2359_v51 = vadd.f32 %v2358_v26, %v6863_v48  ;;  %v3044_v49 = vmul.f32 %v2831_v37, %v7156_v16  ;;  %v2836_v50 = vmul.f32 %v7523_v54, %v2835_v23  ;;  %v2844_v16 = vand.u32 2147483648, %v7513_v60 }
 0x2f2   : > { %v2859_v34 = vand.u32 2147483648, %v2790_v22  ;;  %vm2858_vm15 = vcmp.eq.f32.partialorder %v2857_v21, 8.507059e+37 }
 0x2f3   : > { %v5770_v9 = vpop.eup %5769  ;;  %v5027_v40 = vmul.f32 -1.442695, %v2359_v51  ;;  %v3059_v55 = vpack.c.bf16 %v3044_v49, %v3043_v43  ;;  %v2837_v2 = vadd.f32 %v7523_v54, %v2836_v50  ;;  %v2845_v20 = vor.u32 1.1754944e-38, %v2844_v16 }
 0x2f4   : > { %v7533_v44 = vadd.f32 1.0, %v5770_v9  ;;  %v2860_v8 = vor.u32 1.1754944e-38, %v2859_v34 }
 0x2f5   : > { %3139 = vmatmul.bf16.vlgmr.msra.gmra.mxu1 %v3059_v55  ;;  %v2841_v6 = vsel %vm7544_vm10, %v7523_v54, %v2837_v2 }
 0x2f6   : > { %5773 = vrcp.f32 %v7533_v44  ;;  %v5772_v19 = vpop.eup %5771  ;;  %v2846_v54 = vsel %vm2843_vm14, %v2845_v20, %v2841_v6  ;;  %vm2868_vm1 = vweird.f32 %v7533_v44  ;;  %v5162_v6 = vld [vmem:[#allocation7 + $0x9c] sm:$0xf0] }
 0x2f7   : > { %5775 = vpow2.f32 %v5027_v40  ;;  %v2849_v62 = vmul.f32 %v5772_v19, %v2790_v22  ;;  %vm2854_vm12 = vweird.f32 %v5772_v19  ;;  %v3045_v15 = vmul.f32 %v2846_v54, %v7188_v63 }
 0x2f8   : > { %v2361_v5 = vpop.f32.mrf.mxu3  ;;  %vm2855_vm13 = vmor %vm2853_vm11, %vm2854_vm12  ;;  %v2874_v63 = vand.u32 2147483648, %v7533_v44 }
 0x2f9   : > { %v2362_v30 = vadd.f32 %v2361_v5, %v6863_v48  ;;  %v2850_v35 = vsub.f32 1.0, %v2849_v62 }
 0x2fa   : > { %v2875_v16 = vor.u32 1.1754944e-38, %v2874_v63 }
 0x2fb   : > { %v5028_v28 = vmul.f32 -1.442695, %v2362_v30  ;;  %v2851_v7 = vmul.f32 %v5772_v19, %v2850_v35 }
 0x2fc   : > { %v7541_v46 = vpop.eup %5773 }
 0x2fd   : > { %v5776_v47 = vpop.eup %5775  ;;  %5777 = vpow2.f32 %v5028_v28  ;;  %v2852_v18 = vadd.f32 %v5772_v19, %v2851_v7  ;;  %v2864_v13 = vmul.f32 %v7541_v46, %v7533_v44  ;;  %vm2869_vm0 = vweird.f32 %v7541_v46 }
 0x2fe   : > { %v7549_v17 = vadd.f32 1.0, %v5776_v47  ;;  %vm7575_vm2 = vmor %vm2868_vm1, %vm2869_vm0 }
 0x2ff   : > { %v2856_v3 = vsel %vm2855_vm13, %v5772_v19, %v2852_v18  ;;  %v2865_v41 = vsub.f32 1.0, %v2864_v13  ;;  %v2872_v19 = vand.u32 2147483647, %v7533_v44 }
 0x300   : > { %v2363_v4 = vpop.f32.mrf.mxu3  ;;  %5779 = vrcp.f32 %v7549_v17  ;;  %v2861_v10 = vsel %vm2858_vm15, %v2860_v8, %v2856_v3  ;;  %vm2883_vm4 = vweird.f32 %v7549_v17  ;;  %v2887_v2 = vand.u32 2147483647, %v7549_v17 }
 0x301   : > { %v2364_v60 = vadd.f32 %v2363_v4, %v6863_v48  ;;  %v3046_v51 = vmul.f32 %v2861_v10, %v7218_v32  ;;  %v2866_v9 = vmul.f32 %v7541_v46, %v2865_v41  ;;  %v2889_v7 = vand.u32 2147483648, %v7549_v17 }
 0x302   : > { %vm2873_vm6 = vcmp.eq.f32.partialorder %v2872_v19, 8.507059e+37  ;;  %vm2888_vm7 = vcmp.eq.f32.partialorder %v2887_v2, 8.507059e+37 }
 0x303   : > { %v5029_v1 = vmul.f32 -1.442695, %v2364_v60  ;;  %v5778_v27 = vpop.eup %5777  ;;  %v3060_v52 = vpack.c.bf16 %v3046_v51, %v3045_v15  ;;  %v2867_v23 = vadd.f32 %v7541_v46, %v2866_v9  ;;  %v2890_v4 = vor.u32 1.1754944e-38, %v2889_v7 }
 0x304   : > { %v7558_v26 = vadd.f32 1.0, %v5778_v27 }
 0x305   : > { %5781 = vpow2.f32 %v5029_v1  ;;  %3144 = vmatmul.bf16.gmra.mxu1 %v3060_v52  ;;  %v2871_v35 = vsel %vm7575_vm2, %v7541_v46, %v2867_v23  ;;  %v5374_v46 = vld [vmem:[#allocation7 + $0x94] sm:$0xf] }
 0x306   : > { %v5780_v22 = vpop.eup %5779  ;;  %5783 = vrcp.f32 %v7558_v26  ;;  %v2876_v20 = vsel %vm2873_vm6, %v2875_v16, %v2871_v35  ;;  %v5165_v18 = vor.u32 %v5374_v46, %v5162_v6  ;;  %v2904_v15 = vand.u32 2147483648, %v7558_v26  ;;  %v7624_v46 = vpop.f32.mrf.mxu2 }
 0x307   : > { %v2879_v37 = vmul.f32 %v5780_v22, %v7549_v17  ;;  %vm2884_vm3 = vweird.f32 %v5780_v22  ;;  %v3047_v17 = vmul.f32 %v2876_v20, %v7248_v53  ;;  %vm2898_vm9 = vweird.f32 %v7558_v26 }
 0x308   : > { %v2366_v43 = vpop.f32.mrf.mxu3  ;;  %vm2885_vm5 = vmor %vm2883_vm4, %vm2884_vm3  ;;  %3511 = vmatpush.bf16.msrb.mxu3 %v5165_v18 }
 0x309   : > { %v2367_v49 = vadd.f32 %v2366_v43, %v6863_v48  ;;  %v2880_v40 = vsub.f32 1.0, %v2879_v37 }
 0x30b   : > { %v5030_v55 = vmul.f32 -1.442695, %v2367_v49  ;;  %v5782_v32 = vpop.eup %5781  ;;  %v2881_v5 = vmul.f32 %v5780_v22, %v2880_v40  ;;  %v2905_v40 = vor.u32 1.1754944e-38, %v2904_v15 }
 0x30c   : > { %v7571_v62 = vpop.eup %5783  ;;  %v7573_v30 = vadd.f32 1.0, %v5782_v32 }
 0x30d   : > { %5785 = vpow2.f32 %v5030_v55  ;;  %v2882_v28 = vadd.f32 %v5780_v22, %v2881_v5  ;;  %v2894_v47 = vmul.f32 %v7571_v62, %v7558_v26  ;;  %vm2899_vm8 = vweird.f32 %v7571_v62  ;;  %v5371_v5 = vld [vmem:[#allocation7 + $0x7c] sm:$0xf] }
 0x30e   : > { %5787 = vrcp.f32 %v7573_v30  ;;  %vm7606_vm10 = vmor %vm2898_vm9, %vm2899_vm8  ;;  %vm2913_vm11 = vweird.f32 %v7573_v30  ;;  %v2917_v55 = vand.u32 2147483647, %v7573_v30  ;;  %v2919_v23 = vand.u32 2147483648, %v7573_v30 }
 0x30f   : > { %v2886_v45 = vsel %vm2885_vm5, %v5780_v22, %v2882_v28  ;;  %v2895_v34 = vsub.f32 1.0, %v2894_v47  ;;  %v2902_v22 = vand.u32 2147483647, %v7558_v26 }
 0x310   : > { %v2368_v44 = vpop.f32.mrf.mxu3  ;;  %v2891_v13 = vsel %vm2888_vm7, %v2890_v4, %v2886_v45  ;;  %v2920_v35 = vor.u32 1.1754944e-38, %v2919_v23  ;;  %vm2918_vm15 = vcmp.eq.f32.partialorder %v2917_v55, 8.507059e+37 }
 0x311   : > { %v2369_v56 = vadd.f32 %v2368_v44, %v6863_v48  ;;  %v3048_v29 = vmul.f32 %v2891_v13, %v7278_v24  ;;  %v2896_v41 = vmul.f32 %v7571_v62, %v2895_v34  ;;  %vm2903_vm14 = vcmp.eq.f32.partialorder %v2902_v22, 8.507059e+37 }
 0x313   : > { %v5031_v21 = vmul.f32 -1.442695, %v2369_v56  ;;  %v5786_v60 = vpop.eup %5785  ;;  %v3061_v1 = vpack.c.bf16 %v3048_v29, %v3047_v17  ;;  %v2897_v53 = vadd.f32 %v7571_v62, %v2896_v41  ;;  %v2298_v41 = vadd.f32 %v7624_v46, %v6484_v38  ;;  %v5114_v46 = vld [vmem:[#allocation7 + $0x3c] sm:$0xf0] }
 0x314   : > { %v5788_v11 = vpop.eup %5787  ;;  %v7591_v3 = vadd.f32 1.0, %v5786_v60 }
 0x315   : > { %v2909_v59 = vmul.f32 %v5788_v11, %v7573_v30  ;;  %5789 = vpow2.f32 %v5031_v21  ;;  %3149 = vmatmul.bf16.gmra.mxu1 %v3061_v1  ;;  %v2901_v9 = vsel %vm7606_vm10, %v7571_v62, %v2897_v53  ;;  %vm2914_vm12 = vweird.f32 %v5788_v11  ;;  %v5150_v62 = vld [vmem:[#allocation7 + $0x84] sm:$0xf0] }
 0x316   : > { %5791 = vrcp.f32 %v7591_v3  ;;  %vm2915_vm13 = vmor %vm2913_vm11, %vm2914_vm12  ;;  %v2906_v50 = vsel %vm2903_vm14, %v2905_v40, %v2901_v9  ;;  %v5153_v28 = vor.u32 %v5371_v5, %v5150_v62  ;;  %v2934_v34 = vand.u32 2147483648, %v7591_v3 }
 0x317   : > { %v2910_v8 = vsub.f32 1.0, %v2909_v59  ;;  %v3049_v30 = vmul.f32 %v2906_v50, %v7310_v42  ;;  %vm2928_vm1 = vweird.f32 %v7591_v3  ;;  %v2932_v29 = vand.u32 2147483647, %v7591_v3 }
 0x318   : > { %v2371_v54 = vpop.f32.mrf.mxu3  ;;  %3512 = vmatpush.bf16.msrb.mxu3 %v5153_v28 }
 0x319   : > { %v2372_v27 = vadd.f32 %v2371_v54, %v6863_v48  ;;  %v2911_v24 = vmul.f32 %v5788_v11, %v2910_v8  ;;  %vm2933_vm6 = vcmp.eq.f32.partialorder %v2932_v29, 8.507059e+37 }
 0x31b   : > { %v5032_v10 = vmul.f32 -1.442695, %v2372_v27  ;;  %v5790_v51 = vpop.eup %5789  ;;  %v2912_v37 = vadd.f32 %v5788_v11, %v2911_v24  ;;  %v2935_v27 = vor.u32 1.1754944e-38, %v2934_v34  ;;  %v7654_v24 = vpop.f32.mrf.mxu2 }
 0x31c   : > { %v7602_v52 = vpop.eup %5791  ;;  %v7604_v43 = vadd.f32 1.0, %v5790_v51 }
 0x31d   : > { %5793 = vpow2.f32 %v5032_v10  ;;  %v2924_v63 = vmul.f32 %v7602_v52, %v7591_v3  ;;  %v2916_v19 = vsel %vm2915_vm13, %v5788_v11, %v2912_v37  ;;  %vm2929_vm0 = vweird.f32 %v7602_v52  ;;  %v5368_v37 = vld [vmem:[#allocation7 + $0x64] sm:$0xf] }
 0x31e   : > { %5795 = vrcp.f32 %v7604_v43  ;;  %v2921_v16 = vsel %vm2918_vm15, %v2920_v35, %v2916_v19  ;;  %vm7639_vm2 = vmor %vm2928_vm1, %vm2929_vm0  ;;  %vm2943_vm3 = vweird.f32 %v7604_v43  ;;  %v2947_v10 = vand.u32 2147483647, %v7604_v43 }
 0x31f   : > { %v2925_v7 = vsub.f32 1.0, %v2924_v63  ;;  %v3050_v47 = vmul.f32 %v2921_v16, %v7338_v39  ;;  %v2949_v53 = vand.u32 2147483648, %v7604_v43 }
 0x320   : > { %v2373_v26 = vpop.f32.mrf.mxu3  ;;  %vm2948_vm7 = vcmp.eq.f32.partialorder %v2947_v10, 8.507059e+37 }
 0x321   : > { %v2374_v32 = vadd.f32 %v2373_v26, %v6863_v48  ;;  %v3062_v20 = vpack.c.bf16 %v3050_v47, %v3049_v30  ;;  %v2926_v13 = vmul.f32 %v7602_v52, %v2925_v7  ;;  %v2950_v9 = vor.u32 1.1754944e-38, %v2949_v53 }
 0x323   : > { %v5033_v44 = vmul.f32 -1.442695, %v2374_v32  ;;  %v5794_v2 = vpop.eup %5793  ;;  %v2927_v39 = vadd.f32 %v7602_v52, %v2926_v13 }
 0x324   : > { %v5796_v56 = vpop.eup %5795  ;;  %v7622_v45 = vadd.f32 1.0, %v5794_v2 }
 0x325   : > { %v2939_v6 = vmul.f32 %v5796_v56, %v7604_v43  ;;  %5797 = vpow2.f32 %v5033_v44  ;;  %3154 = vmatmul.bf16.gmra.mxu1 %v3062_v20  ;;  %v2931_v8 = vsel %vm7639_vm2, %v7602_v52, %v2927_v39  ;;  %vm2944_vm4 = vweird.f32 %v5796_v56  ;;  %v5138_v52 = vld [vmem:[#allocation7 + $0x6c] sm:$0xf0]  ;;  %v5126_v39 = vld [vmem:[#allocation7 + $0x54] sm:$0xf0] }
 0x326   : > { %5799 = vrcp.f32 %v7622_v45  ;;  %vm7648_vm5 = vmor %vm2943_vm3, %vm2944_vm4  ;;  %v2936_v49 = vsel %vm2933_vm6, %v2935_v27, %v2931_v8  ;;  %v5141_v26 = vor.u32 %v5368_v37, %v5138_v52  ;;  %vm2958_vm9 = vweird.f32 %v7622_v45 }
 0x327   : > { %v2940_v18 = vsub.f32 1.0, %v2939_v6  ;;  %v3051_v63 = vmul.f32 %v2936_v49, %v7368_v0  ;;  %v7670_v0 = vpop.f32.mrf.mxu2  ;;  %v2964_v30 = vand.u32 2147483648, %v7622_v45  ;;  %v2962_v6 = vand.u32 2147483647, %v7622_v45 }
 0x328   : > { %v2376_v4 = vpop.f32.mrf.mxu3  ;;  %3513 = vmatpush.bf16.msrb.mxu3 %v5141_v26  ;;  %v5362_v26 = vld [vmem:[#allocation7 + $0x34] sm:$0xf] }
 0x329   : > { %v2377_v21 = vadd.f32 %v2376_v4, %v6863_v48  ;;  %v2941_v60 = vmul.f32 %v5796_v56, %v2940_v18  ;;  %vm2963_vm14 = vcmp.eq.f32.partialorder %v2962_v6, 8.507059e+37 }
 0x32b   : > { %v5034_v42 = vmul.f32 -1.442695, %v2377_v21  ;;  %v5798_v17 = vpop.eup %5797  ;;  %v2942_v11 = vadd.f32 %v5796_v56, %v2941_v60  ;;  %v2965_v60 = vor.u32 1.1754944e-38, %v2964_v30 }
 0x32c   : > { %v7635_v59 = vpop.eup %5799  ;;  %v7637_v1 = vadd.f32 1.0, %v5798_v17 }
 0x32d   : > { %5801 = vpow2.f32 %v5034_v42  ;;  %v2954_v15 = vmul.f32 %v7635_v59, %v7622_v45  ;;  %v2946_v22 = vsel %vm7648_vm5, %v5796_v56, %v2942_v11  ;;  %vm2959_vm8 = vweird.f32 %v7635_v59  ;;  %v5365_v42 = vld [vmem:[#allocation7 + $0x4c] sm:$0xf]  ;;  %v5379_v56 = vld [vmem:[#allocation7 + $0xb8] sm:$0xf0] }
 0x32e   : > { %5803 = vrcp.f32 %v7637_v1  ;;  %v2951_v55 = vsel %vm2948_vm7, %v2950_v9, %v2946_v22  ;;  %vm7675_vm10 = vmor %vm2958_vm9, %vm2959_vm8  ;;  %vm2973_vm11 = vweird.f32 %v7637_v1  ;;  %v2977_v34 = vand.u32 2147483647, %v7637_v1 }
 0x32f   : > { %v2955_v23 = vsub.f32 1.0, %v2954_v15  ;;  %v3052_v32 = vmul.f32 %v2951_v55, %v7394_v61  ;;  %v2979_v17 = vand.u32 2147483648, %v7637_v1  ;;  %v7696_v15 = vpop.f32.mrf.mxu2 }
 0x330   : > { %v2378_v3 = vpop.f32.mrf.mxu3  ;;  %vm2978_vm15 = vcmp.eq.f32.partialorder %v2977_v34, 8.507059e+37 }
 0x331   : > { %v2379_v51 = vadd.f32 %v2378_v3, %v6863_v48  ;;  %v3063_v50 = vpack.c.bf16 %v3052_v32, %v3051_v63  ;;  %v2956_v16 = vmul.f32 %v7635_v59, %v2955_v23  ;;  %v2980_v8 = vor.u32 1.1754944e-38, %v2979_v17  ;;  %v5359_v23 = vld [vmem:[#allocation7 + $0x1c] sm:$0xf]  ;;  %v5102_v63 = vld [vmem:[#allocation7 + $0x24] sm:$0xf0] }
 0x332   : > { %v5129_v3 = vor.u32 %v5365_v42, %v5126_v39  ;;  %v5160_v42 = vld [vmem:[#allocation7 + $0x90] sm:$0xf]  ;;  %v5375_v39 = vld [vmem:[#allocation7 + $0x98] sm:$0xf0]  ;;  %v5376_v17 = vld [vmem:[#allocation7 + $0xa0] sm:$0xf0] }
 0x333   : > { %v5035_v40 = vmul.f32 -1.442695, %v2379_v51  ;;  %v5802_v43 = vpop.eup %5801  ;;  %v2957_v2 = vadd.f32 %v7635_v59, %v2956_v16  ;;  %v5180_v16 = vld [vmem:[#allocation7 + $0xb0] sm:$0xf] }
 0x334   : > { %v5804_v19 = vpop.eup %5803  ;;  %v7663_v5 = vadd.f32 1.0, %v5802_v43  ;;  %3514 = vmatpush.bf16.msrb.mxu3 %v5129_v3  ;;  %v5117_v43 = vor.u32 %v5362_v26, %v5114_v46 }
 0x335   : > { %v2969_v62 = vmul.f32 %v5804_v19, %v7637_v1  ;;  %5805 = vpow2.f32 %v5035_v40  ;;  %3159 = vmatmul.bf16.gmra.mxu1 %v3063_v50  ;;  %v2961_v21 = vsel %vm7675_vm10, %v7635_v59, %v2957_v2  ;;  %vm2974_vm12 = vweird.f32 %v5804_v19  ;;  %v5172_v50 = vld [vmem:[#allocation7 + $0xa8] sm:$0xf] }
 0x336   : > { %5807 = vrcp.f32 %v7663_v5  ;;  %vm2975_vm13 = vmor %vm2973_vm11, %vm2974_vm12  ;;  %v2966_v54 = vsel %vm2963_vm14, %v2965_v60, %v2961_v21  ;;  %v5006_v40 = vmul.f32 -1.442695, %v2298_v41  ;;  %v2994_v32 = vand.u32 2147483648, %v7663_v5 }
 0x337   : > { %v2970_v28 = vsub.f32 1.0, %v2969_v62  ;;  %v3053_v1 = vmul.f32 %v2966_v54, %v7422_v25  ;;  %vm2988_vm2 = vweird.f32 %v7663_v5  ;;  %v2300_v2 = vadd.f32 %v7654_v24, %v6484_v38 }
 0x338   : > { %v2381_v35 = vpop.f32.mrf.mxu3  ;;  %3515 = vmatpush.bf16.msrb.mxu3 %v5117_v43  ;;  %v2995_v60 = vor.u32 1.1754944e-38, %v2994_v32  ;;  %v5161_v54 = vor.u32 %v5375_v39, %v5160_v42  ;;  %v5370_v42 = vld [vmem:[#allocation7 + $0x70] sm:$0xf0] }
 0x339   : > { %v2382_v44 = vadd.f32 %v2381_v35, %v6863_v48  ;;  %v2971_v7 = vmul.f32 %v5804_v19, %v2970_v28  ;;  %v2992_v35 = vand.u32 2147483647, %v7663_v5  ;;  %v5105_v28 = vor.u32 %v5359_v23, %v5102_v63 }
 0x33b   : > { %v5036_v61 = vmul.f32 -1.442695, %v2382_v44  ;;  %v5806_v47 = vpop.eup %5805  ;;  %v2972_v20 = vadd.f32 %v5804_v19, %v2971_v7  ;;  %v5378_v44 = vld [vmem:[#allocation7 + $0xb0] sm:$0xf0]  ;;  %vm2993_vm7 = vcmp.eq.f32.partialorder %v2992_v35, 8.507059e+37 }
 0x33c   : > { %v7680_v4 = vpop.eup %5807  ;;  %v7682_v18 = vadd.f32 1.0, %v5806_v47  ;;  %v5173_v47 = vor.u32 %v5378_v44, %v5172_v50  ;;  %3516 = vmatpush.bf16.msrb.mxu3 %v5105_v28  ;;  %v2305_v44 = vadd.f32 %v7696_v15, %v6484_v38  ;;  %v5372_v7 = vld [vmem:[#allocation7 + $0x80] sm:$0xf0] }
 0x33d   : > { %v2984_v13 = vmul.f32 %v7680_v4, %v7663_v5  ;;  %5809 = vpow2.f32 %v5036_v61  ;;  %v2976_v11 = vsel %vm2975_vm13, %v5804_v19, %v2972_v20  ;;  %vm2989_vm0 = vweird.f32 %v7680_v4 }
 0x33e   : > { %5811 = vrcp.f32 %v7682_v18  ;;  %v2981_v10 = vsel %vm2978_vm15, %v2980_v8, %v2976_v11  ;;  %v3007_v62 = vand.u32 2147483647, %v7682_v18  ;;  %vm7716_vm3 = vmor %vm2988_vm2, %vm2989_vm0  ;;  %vm3003_vm4 = vweird.f32 %v7682_v18  ;;  %3461 = vmatpush.bf16.msrb.mxu2 %v5173_v47 }
 0x33f   : > { %v2985_v59 = vsub.f32 1.0, %v2984_v13  ;;  %v3054_v51 = vmul.f32 %v2981_v10, %v7440_v58  ;;  %v3009_v58 = vand.u32 2147483648, %v7682_v18  ;;  %v5181_v13 = vor.u32 %v5379_v56, %v5180_v16 }
 0x340   : > { %v2383_v45 = vpop.f32.mrf.mxu3  ;;  %vm3008_vm6 = vcmp.eq.f32.partialorder %v3007_v62, 8.507059e+37  ;;  %v5007_v11 = vmul.f32 -1.442695, %v2300_v2  ;;  %v5148_v2 = vld [vmem:[#allocation7 + $0x78] sm:$0xf] }
 0x341   : > { %v2384_v29 = vadd.f32 %v2383_v45, %v6863_v48  ;;  %v2986_v52 = vmul.f32 %v7680_v4, %v2985_v59  ;;  %v3064_v9 = vpack.c.bf16 %v3054_v51, %v3053_v1  ;;  %v3010_v21 = vor.u32 1.1754944e-38, %v3009_v58  ;;  %3559 = vmatpush.bf16.msrb.mxu0 %v5181_v13  ;;  %v5144_v13 = vld [vmem:[#allocation7 + $0x68] sm:$0xf] }
 0x342   : > { %3462 = vmatpush.bf16.msrb.mxu2 %v5161_v54  ;;  %v5149_v56 = vor.u32 %v5372_v7, %v5148_v2  ;;  %v5009_v39 = vmul.f32 -1.442695, %v2305_v44 }
 0x343   : > { %v5037_v27 = vmul.f32 -1.442695, %v2384_v29  ;;  %v5810_v53 = vpop.eup %5809  ;;  %v2987_v25 = vadd.f32 %v7680_v4, %v2986_v52 }
 0x344   : > { %v5812_v22 = vpop.eup %5811  ;;  %v7700_v37 = vadd.f32 1.0, %v5810_v53  ;;  %v7742_v53 = vpop.f32.mrf.mxu0 }
 0x345   : > { %v2999_v49 = vmul.f32 %v5812_v22, %v7682_v18  ;;  %5813 = vpow2.f32 %v5037_v27  ;;  %3164 = vmatmul.bf16.gmra.mxu1 %v3064_v9  ;;  %vm3004_vm1 = vweird.f32 %v5812_v22  ;;  %v2991_v20 = vsel %vm7716_vm3, %v7680_v4, %v2987_v25  ;;  %v7733_v18 = vpop.f32.mrf.mxu2  ;;  %v5168_v4 = vld [vmem:[#allocation7 + $0x98] sm:$0xf] }
 0x346   : > { %5815 = vrcp.f32 %v7700_v37  ;;  %vm7729_vm5 = vmor %vm3003_vm4, %vm3004_vm1  ;;  %v2996_v59 = vsel %vm2993_vm7, %v2995_v60, %v2991_v20  ;;  %v5169_v41 = vor.u32 %v5376_v17, %v5168_v4  ;;  %vm3018_vm10 = vweird.f32 %v7700_v37  ;;  %v5369_v20 = vld [vmem:[#allocation7 + $0x68] sm:$0xf0]  ;;  %3463 = vmatpush.bf16.msrb.mxu2 %v5149_v56  ;;  %v5100_v56 = vld [vmem:[#allocation7 + $0x18] sm:$0xf] }
 0x347   : > { %v3000_v55 = vsub.f32 1.0, %v2999_v49  ;;  %5817 = vpow2.f32 %v5006_v40  ;;  %v3055_v10 = vmul.f32 %v2996_v59, %v7465_v57  ;;  %v3022_v43 = vand.u32 2147483647, %v7700_v37 }
 0x348   : > { %3560 = vmatpush.bf16.msrb.mxu0 %v5169_v41  ;;  %v5145_v4 = vor.u32 %v5370_v42, %v5144_v13  ;;  %v5366_v41 = vld [vmem:[#allocation7 + $0x50] sm:$0xf0]  ;;  %v5088_v13 = vld [vmem:[#allocation7] sm:$0xf]  ;;  %v5357_v42 = vld [vmem:[#allocation7 + $0x8] sm:$0xf0] }
 0x349   : > { %v3001_v19 = vmul.f32 %v5812_v22, %v3000_v55  ;;  %vm3023_vm15 = vcmp.eq.f32.partialorder %v3022_v43, 8.507059e+37 }
 0x34b   : > { %v5814_v61 = vpop.eup %5813  ;;  %v3002_v30 = vadd.f32 %v5812_v22, %v3001_v19 }
 0x34c   : > { %v7721_v5 = vpop.eup %5815  ;;  %v7723_v6 = vadd.f32 1.0, %v5814_v61  ;;  %v7772_v35 = vpop.f32.mrf.mxu0 }
 0x34d   : > { %v3014_v45 = vmul.f32 %v7721_v5, %v7700_v37  ;;  %v3006_v34 = vsel %vm7729_vm5, %v5812_v22, %v3002_v30  ;;  %v5818_v8 = vpop.eup %5817  ;;  %v2303_v22 = vadd.f32 %v7670_v0, %v6484_v38  ;;  %vm3019_vm8 = vweird.f32 %v7721_v5  ;;  %v5156_v30 = vld [vmem:[#allocation7 + $0x80] sm:$0xf] }
 0x34e   : > { %5819 = vrcp.f32 %v7723_v6  ;;  %v3011_v29 = vsel %vm3008_vm6, %v3010_v21, %v3006_v34  ;;  %v7744_v1 = vadd.f32 1.0, %v5818_v8  ;;  %v3039_v40 = vand.u32 2147483648, %v7723_v6  ;;  %vm7760_vm11 = vmor %vm3018_vm10, %vm3019_vm8 }
 0x34f   : > { %v3015_v3 = vsub.f32 1.0, %v3014_v45  ;;  %v3056_v27 = vmul.f32 %v3011_v29, %v7478_v36  ;;  %5821 = vpow2.f32 %v5007_v11  ;;  %v7751_v36 = vpop.f32.mrf.mxu2  ;;  %v5008_v26 = vmul.f32 -1.442695, %v2303_v22 }
 0x350   : > { %5823 = vrcp.f32 %v7744_v1  ;;  %v3024_v0 = vand.u32 2147483648, %v7700_v37  ;;  %v3037_v58 = vand.u32 2147483647, %v7723_v6  ;;  %vm3033_vm12 = vweird.f32 %v7723_v6 }
 0x351   : > { %v3065_v52 = vpack.c.bf16 %v3056_v27, %v3055_v10  ;;  %v3016_v49 = vmul.f32 %v7721_v5, %v3015_v3  ;;  %v3040_v62 = vor.u32 1.1754944e-38, %v3039_v40  ;;  %5825 = vpow2.f32 %v5008_v26  ;;  %v5090_v3 = vld [vmem:[#allocation7 + $0xc] sm:$0xf0]  ;;  %v5363_v26 = vld [vmem:[#allocation7 + $0x38] sm:$0xf0] }
 0x352   : > { %v3025_v37 = vor.u32 1.1754944e-38, %v3024_v0  ;;  %vm3038_vm14 = vcmp.eq.f32.partialorder %v3037_v58, 8.507059e+37  ;;  %v2308_v45 = vadd.f32 %v7733_v18, %v6484_v38  ;;  %v5356_v18 = vld [vmem:[#allocation7 + $0x4] sm:$0xf]  ;;  %v5132_v10 = vld [vmem:[#allocation7 + $0x50] sm:$0xf]  ;;  %vm2504_vm1 = vweird.f32 %v7744_v1 }
 0x353   : > { %v3017_v46 = vadd.f32 %v7721_v5, %v3016_v49  ;;  %v5093_v27 = vor.u32 %v5356_v18, %v5090_v3  ;;  %v5364_v40 = vld [vmem:[#allocation7 + $0x40] sm:$0xf0] }
 0x354   : > { %v5820_v51 = vpop.eup %5819  ;;  %v5010_v54 = vmul.f32 -1.442695, %v2308_v45  ;;  %v7789_v8 = vpop.f32.mrf.mxu0 }
 0x355   : > { %v3029_v9 = vmul.f32 %v5820_v51, %v7723_v6  ;;  %3169 = vmatmul.bf16.gmra.mxu1 %v3065_v52  ;;  %v5822_v55 = vpop.eup %5821  ;;  %vm3034_vm9 = vweird.f32 %v5820_v51  ;;  %v3021_v19 = vsel %vm7760_vm11, %v7721_v5, %v3017_v46  ;;  %v5373_v5 = vld [vmem:[#allocation7 + $0x88] sm:$0xf0]  ;;  %v5136_v6 = vld [vmem:[#allocation7 + $0x60] sm:$0xf]  ;;  %v5120_v46 = vld [vmem:[#allocation7 + $0x38] sm:$0xf]  ;;  %3517 = vmatpush.bf16.msrb.mxu3 %v5093_v27  ;;  %v2398_v27 = vadd.f32 %v7772_v35, %v6489_v12 }
 0x356   : > { %v7765_v32 = vadd.f32 1.0, %v5822_v55  ;;  %vm3035_vm13 = vmor %vm3033_vm12, %vm3034_vm9  ;;  %v7770_v50 = vpop.eup %5823  ;;  %v3026_v61 = vsel %vm3023_vm15, %v3025_v37, %v3021_v19  ;;  %v5157_v15 = vor.u32 %v5373_v5, %v5156_v30  ;;  %v2508_v19 = vand.u32 2147483647, %v7744_v1  ;;  %v5360_v5 = vld [vmem:[#allocation7 + $0x20] sm:$0xf0] }
 0x357   : > { %v3030_v57 = vsub.f32 1.0, %v3029_v9  ;;  %v2500_v24 = vmul.f32 %v7770_v50, %v7744_v1  ;;  %v7780_v21 = vpop.f32.mrf.mxu2  ;;  %v3057_v60 = vmul.f32 %v3026_v61, %v7498_v33  ;;  %v5826_v34 = vpop.eup %5825  ;;  %v5124_v33 = vld [vmem:[#allocation7 + $0x48] sm:$0xf]  ;;  %vm2505_vm0 = vweird.f32 %v7770_v50 }
 0x358   : > { %5827 = vrcp.f32 %v7765_v32  ;;  %3561 = vmatpush.bf16.msrb.mxu0 %v5157_v15  ;;  %v7787_v59 = vadd.f32 1.0, %v5826_v34  ;;  %v5125_v49 = vor.u32 %v5366_v41, %v5124_v33  ;;  %vm7808_vm2 = vmor %vm2504_vm1, %vm2505_vm0  ;;  %vm2509_vm3 = vcmp.eq.f32.partialorder %v2508_v19, 8.507059e+37  ;;  %v5096_v34 = vld [vmem:[#allocation7 + $0x8] sm:$0xf] }
 0x359   : > { %v3031_v25 = vmul.f32 %v5820_v51, %v3030_v57  ;;  %v2501_v29 = vsub.f32 1.0, %v2500_v24  ;;  %5829 = vpow2.f32 %v5009_v39  ;;  %v5112_v57 = vld [vmem:[#allocation7 + $0x30] sm:$0xf]  ;;  %v5101_v15 = vor.u32 %v5360_v5, %v5100_v56 }
 0x35a   : > { %5831 = vrcp.f32 %v7787_v59  ;;  %v5113_v0 = vor.u32 %v5363_v26, %v5112_v57  ;;  %vm2519_vm5 = vweird.f32 %v7765_v32  ;;  %v2523_v3 = vand.u32 2147483647, %v7765_v32 }
 0x35b   : > { %v3032_v63 = vadd.f32 %v5820_v51, %v3031_v25  ;;  %v2502_v52 = vmul.f32 %v7770_v50, %v2501_v29  ;;  %v5121_v25 = vor.u32 %v5364_v40, %v5120_v46  ;;  %5833 = vpow2.f32 %v5010_v54 }
 0x35c   : > { %3562 = vmatpush.bf16.msrb.mxu0 %v5145_v4  ;;  %v5358_v4 = vld [vmem:[#allocation7 + $0x10] sm:$0xf0]  ;;  %v2525_v29 = vand.u32 2147483648, %v7765_v32  ;;  %v5089_v54 = vor.u32 %v5357_v42, %v5088_v13  ;;  %vm2524_vm7 = vcmp.eq.f32.partialorder %v2523_v3, 8.507059e+37  ;;  %vm2534_vm9 = vweird.f32 %v7787_v59 }
 0x35d   : > { %v3036_v28 = vsel %vm3035_vm13, %v5820_v51, %v3032_v63  ;;  %v5367_v51 = vld [vmem:[#allocation7 + $0x58] sm:$0xf0]  ;;  %v2503_v23 = vadd.f32 %v7770_v50, %v2502_v52  ;;  %v2310_v63 = vadd.f32 %v7751_v36, %v6484_v38  ;;  %v7814_v36 = vpop.f32.mrf.mxu0  ;;  %v5097_v33 = vor.u32 %v5358_v4, %v5096_v34 }
 0x35e   : > { %v3041_v16 = vsel %vm3038_vm14, %v3040_v62, %v3036_v28  ;;  %v7785_v11 = vpop.eup %5827  ;;  %v5133_v9 = vor.u32 %v5367_v51, %v5132_v10  ;;  %v2510_v62 = vand.u32 2147483648, %v7744_v1  ;;  %v2396_v28 = vadd.f32 %v7742_v53, %v6489_v12 }
 0x35f   : > { %v3058_v47 = vmul.f32 %v3041_v16, %v7503_v14  ;;  %v5137_v14 = vor.u32 %v5369_v20, %v5136_v6  ;;  %v2515_v22 = vmul.f32 %v7785_v11, %v7765_v32  ;;  %v7795_v55 = vpop.f32.mrf.mxu2  ;;  %v5830_v58 = vpop.eup %5829  ;;  %v2507_v61 = vsel %vm7808_vm2, %v7770_v50, %v2503_v23  ;;  %v5108_v6 = vld [vmem:[#allocation7 + $0x20] sm:$0xf]  ;;  %v5361_v50 = vld [vmem:[#allocation7 + $0x28] sm:$0xf0] }
 0x360   : > { %3563 = vmatpush.bf16.msrb.mxu0 %v5133_v9  ;;  %v7803_v37 = vadd.f32 1.0, %v5830_v58  ;;  %v7812_v16 = vpop.eup %5831  ;;  %v5011_v30 = vmul.f32 -1.442695, %v2310_v63  ;;  %vm2520_vm4 = vweird.f32 %v7785_v11  ;;  %v2526_v52 = vor.u32 1.1754944e-38, %v2525_v29 }
 0x361   : > { %v3066_v17 = vpack.c.bf16 %v3058_v47, %v3057_v60  ;;  %3464 = vmatpush.bf16.msrb.mxu2 %v5137_v14  ;;  %v2516_v43 = vsub.f32 1.0, %v2515_v22  ;;  %v5834_v7 = vpop.eup %5833  ;;  %v2511_v47 = vor.u32 1.1754944e-38, %v2510_v62  ;;  %v2530_v20 = vmul.f32 %v7812_v16, %v7787_v59  ;;  %vm7838_vm6 = vmor %vm2519_vm5, %vm2520_vm4 }
 0x362   : > { %5835 = vrcp.f32 %v7803_v37  ;;  %v7823_v39 = vadd.f32 1.0, %v5834_v7  ;;  %v5109_v14 = vor.u32 %v5361_v50, %v5108_v6  ;;  %v2315_v58 = vadd.f32 %v7795_v55, %v6484_v38 }
 0x363   : > { %v2517_v1 = vmul.f32 %v7785_v11, %v2516_v43  ;;  %v2512_v24 = vsel %vm2509_vm3, %v2511_v47, %v2507_v61  ;;  %v2531_v10 = vsub.f32 1.0, %v2530_v20  ;;  %vm2535_vm8 = vweird.f32 %v7812_v16  ;;  %v6096_v47 = vld [vmem:[%s6512_s16 + $0x98] sm:$0xff] }
 0x364   : > { %3564 = vmatpush.bf16.msrb.mxu0 %v5121_v25  ;;  %v3212_v18 = vsub.f32 1.0, %v2512_v24  ;;  %v5013_v44 = vmul.f32 -1.442695, %v2315_v58  ;;  %v2540_v61 = vand.u32 2147483648, %v7787_v59  ;;  %v2538_v7 = vand.u32 2147483647, %v7787_v59  ;;  %vm7870_vm10 = vmor %vm2534_vm9, %vm2535_vm8 }
 0x365   : > { %3174 = vmatmul.bf16.gmra.mxu1 %v3066_v17  ;;  %3465 = vmatpush.bf16.msrb.mxu2 %v5125_v49  ;;  %v2518_v60 = vadd.f32 %v7785_v11, %v2517_v1  ;;  %v2313_v17 = vadd.f32 %v7780_v21, %v6484_v38  ;;  %v7848_v35 = vpop.f32.mrf.mxu0  ;;  %v2532_v25 = vmul.f32 %v7812_v16, %v2531_v10  ;;  %vm2549_vm13 = vweird.f32 %v7803_v37 }
 0x366   : > { %v3228_v57 = vmul.f32 %v7529_v31, %v3212_v18  ;;  %vm2539_vm11 = vcmp.eq.f32.partialorder %v2538_v7, 8.507059e+37  ;;  %v2403_v18 = vadd.f32 %v7814_v36, %v6489_v12  ;;  %vm2564_vm1 = vweird.f32 %v7823_v39 }
 0x367   : > { %v7825_v45 = vpop.f32.mrf.mxu2  ;;  %v2522_v51 = vsel %vm7838_vm6, %v7785_v11, %v2518_v60  ;;  %v5012_v9 = vmul.f32 -1.442695, %v2313_v17  ;;  %v2533_v62 = vadd.f32 %v7812_v16, %v2532_v25  ;;  %v2555_v17 = vand.u32 2147483648, %v7803_v37 }
 0x368   : > { %3565 = vmatpush.bf16.msrb.mxu0 %v5109_v14  ;;  %v7842_v21 = vpop.eup %5835  ;;  %v2527_v40 = vsel %vm2524_vm7, %v2526_v52, %v2522_v51  ;;  %v2570_v25 = vand.u32 2147483648, %v7823_v39 }
 0x369   : > { %3466 = vmatpush.bf16.msrb.mxu2 %v5113_v0  ;;  %v2545_v11 = vmul.f32 %v7842_v21, %v7803_v37  ;;  %v3213_v31 = vsub.f32 1.0, %v2527_v40  ;;  %v2537_v59 = vsel %vm7870_vm10, %v7812_v16, %v2533_v62  ;;  %vm2550_vm12 = vweird.f32 %v7842_v21 }
 0x36a   : > { %vm7901_vm14 = vmor %vm2549_vm13, %vm2550_vm12  ;;  %v2556_v36 = vor.u32 1.1754944e-38, %v2555_v17 }
 0x36b   : > { %v2546_v19 = vsub.f32 1.0, %v2545_v11 }
 0x36c   : > { %3566 = vmatpush.bf16.msrb.mxu0 %v5097_v33 }
 0x36d   : > { %3467 = vmatpush.bf16.msrb.mxu2 %v5101_v15  ;;  %v7876_v5 = vpop.f32.mrf.mxu0  ;;  %v2541_v15 = vor.u32 1.1754944e-38, %v2540_v61 }
 0x36f   : > { %v2319_v43 = vpop.f32.mrf.mxu2  ;;  %v2542_v60 = vsel %vm2539_vm11, %v2541_v15, %v2537_v59 }
 0x370   : > { %v3214_v29 = vsub.f32 1.0, %v2542_v60  ;;  %v2320_v52 = vadd.f32 %v2319_v43, %v6484_v38 }
 0x371   : > { %3468 = vmatpush.bf16.msrb.mxu2 %v5089_v54  ;;  %v2553_v54 = vand.u32 2147483647, %v7803_v37 }
 0x372   : > { %v3140_v2 = vpop.f32.mrf.mxu1  ;;  %v5015_v58 = vmul.f32 -1.442695, %v2320_v52 }
 0x373   : > { %v3180_v53 = vadd.f32 %v3140_v2, %v2396_v28  ;;  %v6094_v2 = vld [vmem:[%s6512_s16 + $0x88] sm:$0xff]  ;;  %vm2554_vm15 = vcmp.eq.f32.partialorder %v2553_v54, 8.507059e+37 }
 0x374   : > { %v3229_v1 = vmul.f32 %v6094_v2, %v3213_v31 }
 0x375   : > { %5837 = vtanh.f32 %v3180_v53 }
 0x376   : > { %5839 = vpow2.f32 %v5011_v30  ;;  %v2401_v30 = vadd.f32 %v7789_v8, %v6489_v12  ;;  %v2547_v8 = vmul.f32 %v7842_v21, %v2546_v19  ;;  %v2568_v19 = vand.u32 2147483647, %v7823_v39 }
 0x377   : > { %5841 = vrcp.f32 %v7823_v39  ;;  %v2322_v16 = vpop.f32.mrf.mxu2 }
 0x378   : > { %v2548_v34 = vadd.f32 %v7842_v21, %v2547_v8  ;;  %v2323_v7 = vadd.f32 %v2322_v16, %v6484_v38  ;;  %vm2569_vm3 = vcmp.eq.f32.partialorder %v2568_v19, 8.507059e+37 }
 0x37a   : > { %v3142_v22 = vpop.f32.mrf.mxu1  ;;  %v2552_v41 = vsel %vm7901_vm14, %v7842_v21, %v2548_v34 }
 0x37b   : > { %v5838_v32 = vpop.eup %5837  ;;  %v3181_v49 = vadd.f32 %v3142_v22, %v2398_v27 }
 0x37c   : > { %v3244_v26 = vmul.f32 %v5838_v32, %v2512_v24  ;;  %v5840_v46 = vpop.eup %5839  ;;  %v2318_v24 = vadd.f32 %v7825_v45, %v6484_v38  ;;  %v7911_v32 = vpop.f32.mrf.mxu0 }
 0x37d   : > { %5843 = vtanh.f32 %v3181_v49  ;;  %v7857_v23 = vpop.eup %5841  ;;  %v7859_v63 = vadd.f32 1.0, %v5840_v46  ;;  %v6095_v49 = vld [vmem:[%s6512_s16 + $0x90] sm:$0xff]  ;;  %v2557_v46 = vsel %vm2554_vm15, %v2556_v36, %v2552_v41 }
 0x37e   : > { %v3260_v0 = vadd.f32 %v3244_v26, %v3228_v57  ;;  %5845 = vpow2.f32 %v5012_v9  ;;  %v2560_v56 = vmul.f32 %v7857_v23, %v7823_v39  ;;  %v5014_v4 = vmul.f32 -1.442695, %v2318_v24 }
 0x37f   : > { %5847 = vrcp.f32 %v7859_v63  ;;  %v3230_v9 = vmul.f32 %v6095_v49, %v3214_v29  ;;  %vm2565_vm0 = vweird.f32 %v7857_v23  ;;  %v2324_v43 = vpop.f32.mrf.mxu2  ;;  %v3215_v31 = vsub.f32 1.0, %v2557_v46 }
 0x380   : > { %5070 = vst [vmem:[%s6512_s16 + $0x100] sm:$0xff] %v3260_v0  ;;  %5849 = vpow2.f32 %v5013_v44  ;;  %v2561_v14 = vsub.f32 1.0, %v2560_v56  ;;  %vm7931_vm2 = vmor %vm2564_vm1, %vm2565_vm0  ;;  %vm2579_vm5 = vweird.f32 %v7859_v63  ;;  %v2583_v16 = vand.u32 2147483647, %v7859_v63 }
 0x382   : > { %v3145_v20 = vpop.f32.mrf.mxu1  ;;  %v2562_v37 = vmul.f32 %v7857_v23, %v2561_v14  ;;  %vm2584_vm7 = vcmp.eq.f32.partialorder %v2583_v16, 8.507059e+37 }
 0x383   : > { %v5844_v28 = vpop.eup %5843  ;;  %v3182_v50 = vadd.f32 %v3145_v20, %v2401_v30 }
 0x384   : > { %v3245_v55 = vmul.f32 %v5844_v28, %v2527_v40  ;;  %v5846_v53 = vpop.eup %5845  ;;  %v2563_v11 = vadd.f32 %v7857_v23, %v2562_v37  ;;  %v2406_v28 = vadd.f32 %v7848_v35, %v6489_v12  ;;  %v2571_v35 = vor.u32 1.1754944e-38, %v2570_v25  ;;  %v6097_v37 = vld [vmem:[%s6512_s16 + $0xa0] sm:$0xff] }
 0x385   : > { %v7889_v42 = vadd.f32 1.0, %v5846_v53  ;;  %5851 = vtanh.f32 %v3182_v50  ;;  %v7893_v45 = vpop.eup %5847  ;;  %v3231_v53 = vmul.f32 %v6096_v47, %v3215_v31  ;;  %v2411_v31 = vadd.f32 %v7911_v32, %v6489_v12 }
 0x386   : > { %v7878_v6 = vadd.f32 %v3245_v55, %v3229_v1  ;;  %v5850_v33 = vpop.eup %5849  ;;  %v2575_v27 = vmul.f32 %v7893_v45, %v7859_v63  ;;  %v2567_v2 = vsel %vm7931_vm2, %v7857_v23, %v2563_v11  ;;  %v7945_v23 = vpop.f32.mrf.mxu0  ;;  %vm2580_vm4 = vweird.f32 %v7893_v45 }
 0x387   : > { %5853 = vrcp.f32 %v7889_v42  ;;  %v7915_v26 = vadd.f32 1.0, %v5850_v33  ;;  %v2572_v20 = vsel %vm2569_vm3, %v2571_v35, %v2567_v2  ;;  %vm7963_vm6 = vmor %vm2579_vm5, %vm2580_vm4  ;;  %vm2594_vm9 = vweird.f32 %v7889_v42 }
 0x388   : > { %5071 = vst [vmem:[%s6512_s16 + $0x108] sm:$0xff] %v7878_v6  ;;  %v3293_v13 = vpack.c.bf16 %v7878_v6, %v3260_v0  ;;  %5855 = vpow2.f32 %v5014_v4  ;;  %v2576_v21 = vsub.f32 1.0, %v2575_v27  ;;  %v3216_v14 = vsub.f32 1.0, %v2572_v20 }
 0x389   : > { %v2408_v4 = vadd.f32 %v7876_v5, %v6489_v12  ;;  %v2325_v27 = vadd.f32 %v2324_v43, %v6484_v38  ;;  %v5387_v43 = vld [vmem:[#allocation8 + $0x38] sm:$0xff]  ;;  %vm2609_vm13 = vweird.f32 %v7915_v26 }
 0x38a   : > { %3469 = vmatmul.bf16.vlgmr.msrb.gmra.mxu2 %v3293_v13  ;;  %3518 = vmatmul.bf16.vlgmr.msrb.gmra.mxu3 %v3293_v13  ;;  %v3147_v10 = vpop.f32.mrf.mxu1  ;;  %v2577_v39 = vmul.f32 %v7893_v45, %v2576_v21  ;;  %v2600_v21 = vand.u32 2147483648, %v7889_v42 }
 0x38b   : > { %3567 = vmatmul.bf16.vlgmr.msrb.gmra.mxu0 %v3293_v13  ;;  %v5852_v51 = vpop.eup %5851  ;;  %v3183_v22 = vadd.f32 %v3147_v10, %v2403_v18  ;;  %v5016_v13 = vmul.f32 -1.442695, %v2323_v7  ;;  %v2327_v18 = vpop.f32.mrf.mxu2  ;;  %4304 = vmatpush.bf16.msrb.mxu1 %v5387_v43  ;;  %v6098_v7 = vld [vmem:[%s6512_s16 + $0xa8] sm:$0xff]  ;;  %v5386_v43 = vld [vmem:[#allocation8 + $0x30] sm:$0xff] }
 0x38c   : > { %v3246_v57 = vmul.f32 %v5852_v51, %v2542_v60  ;;  %v2578_v15 = vadd.f32 %v7893_v45, %v2577_v39  ;;  %v2585_v60 = vand.u32 2147483648, %v7859_v63  ;;  %v3232_v51 = vmul.f32 %v6097_v37, %v3216_v14 }
 0x38d   : > { %5857 = vtanh.f32 %v3183_v22  ;;  %v7921_v0 = vpop.eup %5853  ;;  %v2328_v32 = vadd.f32 %v2327_v18, %v6484_v38  ;;  %v2613_v14 = vand.u32 2147483647, %v7915_v26 }
 0x38e   : > { %v7917_v40 = vadd.f32 %v3246_v57, %v3230_v9  ;;  %v5856_v62 = vpop.eup %5855  ;;  %5859 = vrcp.f32 %v7915_v26  ;;  %v2590_v61 = vmul.f32 %v7921_v0, %v7889_v42  ;;  %v2582_v63 = vsel %vm7963_vm6, %v7893_v45, %v2578_v15  ;;  %v7984_v11 = vpop.f32.mrf.mxu0 }
 0x38f   : > { %5861 = vpow2.f32 %v5015_v58  ;;  %v7943_v59 = vadd.f32 1.0, %v5856_v62  ;;  %v2586_v41 = vor.u32 1.1754944e-38, %v2585_v60  ;;  %vm2595_vm8 = vweird.f32 %v7921_v0  ;;  %4305 = vmatpush.bf16.msrb.mxu1 %v5386_v43 }
 0x390   : > { %5072 = vst [vmem:[%s6512_s16 + $0x110] sm:$0xff] %v7917_v40  ;;  %v2591_v8 = vsub.f32 1.0, %v2590_v61  ;;  %v2598_v58 = vand.u32 2147483647, %v7889_v42  ;;  %vm7993_vm10 = vmor %vm2594_vm9, %vm2595_vm8  ;;  %v5018_v15 = vmul.f32 -1.442695, %v2328_v32 }
 0x391   : > { %v2587_v45 = vsel %vm2584_vm7, %v2586_v41, %v2582_v63  ;;  %vm2614_vm15 = vcmp.eq.f32.partialorder %v2613_v14, 8.507059e+37  ;;  %vm2624_vm1 = vweird.f32 %v7943_v59 }
 0x392   : > { %v3150_v1 = vpop.f32.mrf.mxu1  ;;  %v2592_v5 = vmul.f32 %v7921_v0, %v2591_v8  ;;  %v3217_v25 = vsub.f32 1.0, %v2587_v45  ;;  %vm2599_vm11 = vcmp.eq.f32.partialorder %v2598_v58, 8.507059e+37  ;;  %v2628_v58 = vand.u32 2147483647, %v7943_v59 }
 0x393   : > { %v5858_v55 = vpop.eup %5857  ;;  %v3184_v30 = vadd.f32 %v3150_v1, %v2406_v28  ;;  %v2601_v1 = vor.u32 1.1754944e-38, %v2600_v21  ;;  %v2630_v21 = vand.u32 2147483648, %v7943_v59 }
 0x394   : > { %v3247_v56 = vmul.f32 %v5858_v55, %v2557_v46  ;;  %v7951_v50 = vpop.eup %5859  ;;  %v2593_v9 = vadd.f32 %v7921_v0, %v2592_v5  ;;  %v5017_v46 = vmul.f32 -1.442695, %v2325_v27  ;;  %v2329_v55 = vpop.f32.mrf.mxu2  ;;  %v3233_v35 = vmul.f32 %v6098_v7, %v3217_v25  ;;  %v6099_v27 = vld [vmem:[%s6512_s16 + $0xb0] sm:$0xff] }
 0x395   : > { %5863 = vtanh.f32 %v3184_v30  ;;  %v5862_v29 = vpop.eup %5861  ;;  %v2605_v54 = vmul.f32 %v7951_v50, %v7915_v26  ;;  %vm2610_vm12 = vweird.f32 %v7951_v50  ;;  %vm2629_vm3 = vcmp.eq.f32.partialorder %v2628_v58, 8.507059e+37 }
 0x396   : > { %v7947_v24 = vadd.f32 %v3247_v56, %v3231_v53  ;;  %5865 = vrcp.f32 %v7943_v59  ;;  %v7975_v22 = vadd.f32 1.0, %v5862_v29  ;;  %v2597_v44 = vsel %vm7993_vm10, %v7921_v0, %v2593_v9  ;;  %vm8023_vm14 = vmor %vm2609_vm13, %vm2610_vm12  ;;  %v8027_v29 = vpop.f32.mrf.mxu0 }
 0x397   : > { %5867 = vpow2.f32 %v5016_v13  ;;  %v2606_v52 = vsub.f32 1.0, %v2605_v54  ;;  %v2602_v53 = vsel %vm2599_vm11, %v2601_v1, %v2597_v44  ;;  %v2615_v13 = vand.u32 2147483648, %v7915_v26 }
 0x398   : > { %5073 = vst [vmem:[%s6512_s16 + $0x118] sm:$0xff] %v7947_v24  ;;  %v3294_v34 = vpack.c.bf16 %v7947_v24, %v7917_v40  ;;  %v3218_v60 = vsub.f32 1.0, %v2602_v53  ;;  %vm2639_vm5 = vweird.f32 %v7975_v22 }
 0x399   : > { %v2607_v61 = vmul.f32 %v7951_v50, %v2606_v52  ;;  %v2616_v5 = vor.u32 1.1754944e-38, %v2615_v13  ;;  %v2645_v13 = vand.u32 2147483648, %v7975_v22 }
 0x39a   : > { %v3152_v3 = vpop.f32.mrf.mxu1  ;;  %3474 = vmatmul.bf16.gmra.mxu2 %v3294_v34  ;;  %3523 = vmatmul.bf16.gmra.mxu3 %v3294_v34  ;;  %v3234_v41 = vmul.f32 %v6099_v27, %v3218_v60 }
 0x39b   : > { %v5864_v33 = vpop.eup %5863  ;;  %v3185_v10 = vadd.f32 %v3152_v3, %v2408_v4  ;;  %3572 = vmatmul.bf16.gmra.mxu0 %v3294_v34  ;;  %v2413_v34 = vadd.f32 %v7945_v23, %v6489_v12  ;;  %v2330_v3 = vadd.f32 %v2329_v55, %v6484_v38  ;;  %v2418_v4 = vadd.f32 %v8027_v29, %v6489_v12 }
 0x39c   : > { %v3248_v36 = vmul.f32 %v5864_v33, %v2572_v20  ;;  %v7981_v57 = vpop.eup %5865  ;;  %v2608_v20 = vadd.f32 %v7951_v50, %v2607_v61 }
 0x39d   : > { %5869 = vtanh.f32 %v3185_v10  ;;  %v5868_v62 = vpop.eup %5867  ;;  %v2620_v28 = vmul.f32 %v7981_v57, %v7943_v59  ;;  %vm2625_vm0 = vweird.f32 %v7981_v57 }
 0x39e   : > { %v7977_v49 = vadd.f32 %v3248_v36, %v3232_v51  ;;  %5871 = vrcp.f32 %v7975_v22  ;;  %v8005_v47 = vadd.f32 1.0, %v5868_v62  ;;  %v2612_v26 = vsel %vm8023_vm14, %v7951_v50, %v2608_v20  ;;  %v2332_v36 = vpop.f32.mrf.mxu2  ;;  %vm8053_vm2 = vmor %vm2624_vm1, %vm2625_vm0  ;;  %v2420_v1 = vpop.f32.mrf.mxu0 }
 0x39f   : > { %5873 = vpow2.f32 %v5017_v46  ;;  %v2621_v0 = vsub.f32 1.0, %v2620_v28  ;;  %v2617_v50 = vsel %vm2614_vm15, %v2616_v5, %v2612_v26  ;;  %v5019_v46 = vmul.f32 -1.442695, %v2330_v3 }
 0x3a0   : > { %5074 = vst [vmem:[%s6512_s16 + $0x120] sm:$0xff] %v7977_v49  ;;  %v3219_v25 = vsub.f32 1.0, %v2617_v50  ;;  %v2646_v3 = vor.u32 1.1754944e-38, %v2645_v13  ;;  %vm2654_vm9 = vweird.f32 %v8005_v47  ;;  %v2658_v43 = vand.u32 2147483647, %v8005_v47 }
 0x3a1   : > { %v2622_v23 = vmul.f32 %v7981_v57, %v2621_v0  ;;  %v2421_v19 = vadd.f32 %v2420_v1, %v6489_v12 }
 0x3a2   : > { %v3155_v42 = vpop.f32.mrf.mxu1  ;;  %vm2659_vm11 = vcmp.eq.f32.partialorder %v2658_v43, 8.507059e+37 }
 0x3a3   : > { %v5870_v2 = vpop.eup %5869  ;;  %v3186_v39 = vadd.f32 %v3155_v42, %v2411_v31  ;;  %v2623_v52 = vadd.f32 %v7981_v57, %v2622_v23  ;;  %v2416_v31 = vadd.f32 %v7984_v11, %v6489_v12  ;;  %v2333_v11 = vadd.f32 %v2332_v36, %v6484_v38 }
 0x3a4   : > { %v3249_v30 = vmul.f32 %v5870_v2, %v2587_v45  ;;  %v8011_v8 = vpop.eup %5871  ;;  %v2631_v2 = vor.u32 1.1754944e-38, %v2630_v21 }
 0x3a5   : > { %5875 = vtanh.f32 %v3186_v39  ;;  %v5874_v17 = vpop.eup %5873  ;;  %v2635_v54 = vmul.f32 %v8011_v8, %v7975_v22  ;;  %v2627_v44 = vsel %vm8053_vm2, %v7981_v57, %v2623_v52  ;;  %v6100_v39 = vld [vmem:[%s6512_s16 + $0xb8] sm:$0xff]  ;;  %vm2640_vm4 = vweird.f32 %v8011_v8 }
 0x3a6   : > { %v8007_v56 = vadd.f32 %v3249_v30, %v3233_v35  ;;  %5877 = vrcp.f32 %v8005_v47  ;;  %v8037_v37 = vadd.f32 1.0, %v5874_v17  ;;  %v3235_v55 = vmul.f32 %v6100_v39, %v3219_v25  ;;  %v2334_v60 = vpop.f32.mrf.mxu2  ;;  %vm8083_vm6 = vmor %vm2639_vm5, %vm2640_vm4 }
 0x3a7   : > { %5879 = vpow2.f32 %v5018_v15  ;;  %v2636_v51 = vsub.f32 1.0, %v2635_v54  ;;  %v2632_v30 = vsel %vm2629_vm3, %v2631_v2, %v2627_v44  ;;  %v5020_v15 = vmul.f32 -1.442695, %v2333_v11 }
 0x3a8   : > { %5075 = vst [vmem:[%s6512_s16 + $0x128] sm:$0xff] %v8007_v56  ;;  %v3295_v16 = vpack.c.bf16 %v8007_v56, %v7977_v49  ;;  %v3220_v14 = vsub.f32 1.0, %v2632_v30  ;;  %v2660_v25 = vand.u32 2147483648, %v8005_v47  ;;  %vm2669_vm13 = vweird.f32 %v8037_v37 }
 0x3a9   : > { %v2637_v42 = vmul.f32 %v8011_v8, %v2636_v51 }
 0x3aa   : > { %v3157_v18 = vpop.f32.mrf.mxu1  ;;  %3479 = vmatmul.bf16.gmra.mxu2 %v3295_v16  ;;  %3528 = vmatmul.bf16.gmra.mxu3 %v3295_v16  ;;  %v2661_v11 = vor.u32 1.1754944e-38, %v2660_v25  ;;  %v5384_v25 = vld [vmem:[#allocation8 + $0x20] sm:$0xff] }
 0x3ab   : > { %v5876_v63 = vpop.eup %5875  ;;  %v3187_v33 = vadd.f32 %v3157_v18, %v2413_v34  ;;  %3577 = vmatmul.bf16.gmra.mxu0 %v3295_v16  ;;  %v2638_v0 = vadd.f32 %v8011_v8, %v2637_v42  ;;  %v2643_v16 = vand.u32 2147483647, %v7975_v22 }
 0x3ac   : > { %v3250_v10 = vmul.f32 %v5876_v63, %v2602_v53  ;;  %v8043_v9 = vpop.eup %5877  ;;  %v2335_v63 = vadd.f32 %v2334_v60, %v6484_v38 }
 0x3ad   : > { %5881 = vtanh.f32 %v3187_v33  ;;  %v5880_v62 = vpop.eup %5879  ;;  %v2650_v28 = vmul.f32 %v8043_v9, %v8005_v47  ;;  %v2642_v22 = vsel %vm8083_vm6, %v8011_v8, %v2638_v0  ;;  %v6101_v33 = vld [vmem:[%s6512_s16 + $0xc0] sm:$0xff]  ;;  %vm2644_vm7 = vcmp.eq.f32.partialorder %v2643_v16, 8.507059e+37 }
 0x3ae   : > { %v8039_v45 = vadd.f32 %v3250_v10, %v3234_v41  ;;  %5883 = vrcp.f32 %v8037_v37  ;;  %v8065_v35 = vadd.f32 1.0, %v5880_v62  ;;  %v3236_v27 = vmul.f32 %v6101_v33, %v3220_v14 }
 0x3af   : > { %5885 = vpow2.f32 %v5019_v46  ;;  %v2651_v57 = vsub.f32 1.0, %v2650_v28  ;;  %v2647_v8 = vsel %vm2644_vm7, %v2646_v3, %v2642_v22  ;;  %vm2655_vm8 = vweird.f32 %v8043_v9 }
 0x3b0   : > { %5076 = vst [vmem:[%s6512_s16 + $0x130] sm:$0xff] %v8039_v45  ;;  %v5021_v21 = vmul.f32 -1.442695, %v2335_v63  ;;  %v3221_v58 = vsub.f32 1.0, %v2647_v8  ;;  %vm8110_vm10 = vmor %vm2654_vm9, %vm2655_vm8  ;;  %v2673_v14 = vand.u32 2147483647, %v8037_v37  ;;  %vm2684_vm1 = vweird.f32 %v8065_v35 }
 0x3b1   : > { %v2652_v29 = vmul.f32 %v8043_v9, %v2651_v57  ;;  %v6103_v63 = vld [vmem:[%s6512_s16 + $0xd0] sm:$0xff] }
 0x3b2   : > { %v3160_v59 = vpop.f32.mrf.mxu1  ;;  %vm2674_vm15 = vcmp.eq.f32.partialorder %v2673_v14, 8.507059e+37 }
 0x3b3   : > { %v5882_v61 = vpop.eup %5881  ;;  %v3188_v32 = vadd.f32 %v3160_v59, %v2416_v31  ;;  %v2653_v52 = vadd.f32 %v8043_v9, %v2652_v29  ;;  %v5385_v31 = vld [vmem:[#allocation8 + $0x28] sm:$0xff] }
 0x3b4   : > { %v3251_v7 = vmul.f32 %v5882_v61, %v2617_v50  ;;  %v8071_v20 = vpop.eup %5883  ;;  %v2422_v50 = vpop.f32.mrf.mxu0  ;;  %4306 = vmatpush.bf16.msrb.mxu1 %v5385_v31 }
 0x3b5   : > { %5887 = vtanh.f32 %v3188_v32  ;;  %v5886_v54 = vpop.eup %5885  ;;  %v2665_v26 = vmul.f32 %v8071_v20, %v8037_v37  ;;  %v2657_v59 = vsel %vm8110_vm10, %v8043_v9, %v2653_v52  ;;  %v6102_v32 = vld [vmem:[%s6512_s16 + $0xc8] sm:$0xff]  ;;  %vm2670_vm12 = vweird.f32 %v8071_v20 }
 0x3b6   : > { %v8067_v53 = vadd.f32 %v3251_v7, %v3235_v55  ;;  %5889 = vrcp.f32 %v8065_v35  ;;  %v8095_v10 = vadd.f32 1.0, %v5886_v54  ;;  %v3237_v1 = vmul.f32 %v6102_v32, %v3221_v58  ;;  %vm8138_vm14 = vmor %vm2669_vm13, %vm2670_vm12 }
 0x3b7   : > { %5891 = vpow2.f32 %v5020_v15  ;;  %v2666_v51 = vsub.f32 1.0, %v2665_v26  ;;  %v2662_v7 = vsel %vm2659_vm11, %v2661_v11, %v2657_v59  ;;  %v2675_v15 = vand.u32 2147483648, %v8037_v37 }
 0x3b8   : > { %5077 = vst [vmem:[%s6512_s16 + $0x138] sm:$0xff] %v8067_v53  ;;  %v3296_v34 = vpack.c.bf16 %v8067_v53, %v8039_v45  ;;  %v3222_v60 = vsub.f32 1.0, %v2662_v7  ;;  %4307 = vmatpush.bf16.msrb.mxu1 %v5384_v25  ;;  %vm2699_vm5 = vweird.f32 %v8095_v10 }
 0x3b9   : > { %v2667_v47 = vmul.f32 %v8071_v20, %v2666_v51  ;;  %v2676_v29 = vor.u32 1.1754944e-38, %v2675_v15  ;;  %v2690_v51 = vand.u32 2147483648, %v8065_v35  ;;  %v5383_v15 = vld [vmem:[#allocation8 + $0x18] sm:$0xff] }
 0x3ba   : > { %v3162_v18 = vpop.f32.mrf.mxu1  ;;  %3484 = vmatmul.bf16.gmra.mxu2 %v3296_v34  ;;  %3533 = vmatmul.bf16.gmra.mxu3 %v3296_v34  ;;  %v3238_v3 = vmul.f32 %v6103_v63, %v3222_v60 }
 0x3bb   : > { %v5888_v23 = vpop.eup %5887  ;;  %v3189_v5 = vadd.f32 %v3162_v18, %v2418_v4  ;;  %3582 = vmatmul.bf16.gmra.mxu0 %v3296_v34  ;;  %v2668_v9 = vadd.f32 %v8071_v20, %v2667_v47  ;;  %v2423_v34 = vadd.f32 %v2422_v50, %v6489_v12  ;;  %v2691_v59 = vor.u32 1.1754944e-38, %v2690_v51 }
 0x3bc   : > { %v3252_v41 = vmul.f32 %v5888_v23, %v2632_v30  ;;  %v8101_v46 = vpop.eup %5889  ;;  %v2425_v13 = vpop.f32.mrf.mxu0  ;;  %4308 = vmatpush.bf16.msrb.mxu1 %v5383_v15 }
 0x3bd   : > { %5893 = vtanh.f32 %v3189_v5  ;;  %v5892_v28 = vpop.eup %5891  ;;  %v2680_v44 = vmul.f32 %v8101_v46, %v8065_v35  ;;  %v2672_v37 = vsel %vm8138_vm14, %v8071_v20, %v2668_v9  ;;  %vm2685_vm0 = vweird.f32 %v8101_v46 }
 0x3be   : > { %v8097_v36 = vadd.f32 %v3252_v41, %v3236_v27  ;;  %5895 = vrcp.f32 %v8095_v10  ;;  %v8121_v55 = vadd.f32 1.0, %v5892_v28  ;;  %v2677_v27 = vsel %vm2674_vm15, %v2676_v29, %v2672_v37  ;;  %vm2686_vm2 = vmor %vm2684_vm1, %vm2685_vm0 }
 0x3bf   : > { %5897 = vpow2.f32 %v5021_v21  ;;  %v2681_v30 = vsub.f32 1.0, %v2680_v44  ;;  %v3223_v52 = vsub.f32 1.0, %v2677_v27  ;;  %v2688_v21 = vand.u32 2147483647, %v8065_v35 }
 0x3c0   : > { %5078 = vst [vmem:[%s6512_s16 + $0x140] sm:$0xff] %v8097_v36  ;;  %v2426_v58 = vadd.f32 %v2425_v13, %v6489_v12  ;;  %vm2714_vm9 = vweird.f32 %v8121_v55 }
 0x3c1   : > { %v2682_v22 = vmul.f32 %v8101_v46, %v2681_v30  ;;  %vm2689_vm3 = vcmp.eq.f32.partialorder %v2688_v21, 8.507059e+37  ;;  %v2703_v30 = vand.u32 2147483647, %v8095_v10 }
 0x3c2   : > { %v3165_v42 = vpop.f32.mrf.mxu1 }
 0x3c3   : > { %v5894_v61 = vpop.eup %5893  ;;  %v3190_v2 = vadd.f32 %v3165_v42, %v2421_v19  ;;  %v6104_v42 = vld [vmem:[%s6512_s16 + $0xd8] sm:$0xff]  ;;  %vm2704_vm7 = vcmp.eq.f32.partialorder %v2703_v30, 8.507059e+37  ;;  %v6107_v30 = vld [vmem:[%s6512_s16 + $0xf0] sm:$0xff] }
 0x3c4   : > { %v3253_v39 = vmul.f32 %v5894_v61, %v2647_v8  ;;  %v8127_v0 = vpop.eup %5895  ;;  %v2683_v8 = vadd.f32 %v8101_v46, %v2682_v22  ;;  %v2427_v43 = vpop.f32.mrf.mxu0  ;;  %v3239_v47 = vmul.f32 %v6104_v42, %v3223_v52 }
 0x3c5   : > { %5899 = vtanh.f32 %v3190_v2  ;;  %v5898_v17 = vpop.eup %5897  ;;  %v2695_v54 = vmul.f32 %v8127_v0, %v8095_v10  ;;  %vm2700_vm4 = vweird.f32 %v8127_v0  ;;  %v2428_v13 = vadd.f32 %v2427_v43, %v6489_v12  ;;  %v6106_v43 = vld [vmem:[%s6512_s16 + $0xe8] sm:$0xff] }
 0x3c6   : > { %v8123_v57 = vadd.f32 %v3253_v39, %v3237_v1  ;;  %5901 = vrcp.f32 %v8121_v55  ;;  %v8149_v33 = vadd.f32 1.0, %v5898_v17  ;;  %v2687_v19 = vsel %vm2686_vm2, %v8101_v46, %v2683_v8  ;;  %vm8183_vm6 = vmor %vm2699_vm5, %vm2700_vm4 }
 0x3c7   : > { %v2696_v41 = vsub.f32 1.0, %v2695_v54  ;;  %v2692_v11 = vsel %vm2689_vm3, %v2691_v59, %v2687_v19  ;;  %v2705_v39 = vand.u32 2147483648, %v8095_v10 }
 0x3c8   : > { %5079 = vst [vmem:[%s6512_s16 + $0x148] sm:$0xff] %v8123_v57  ;;  %v3297_v16 = vpack.c.bf16 %v8123_v57, %v8097_v36  ;;  %vm2729_vm13 = vweird.f32 %v8149_v33  ;;  %v2733_v42 = vand.u32 2147483647, %v8149_v33 }
 0x3c9   : > { %v2697_v28 = vmul.f32 %v8127_v0, %v2696_v41  ;;  %v2706_v17 = vor.u32 1.1754944e-38, %v2705_v39 }
 0x3ca   : > { %v3167_v26 = vpop.f32.mrf.mxu1  ;;  %3489 = vmatmul.bf16.gmra.mxu2 %v3297_v16  ;;  %3538 = vmatmul.bf16.gmra.mxu3 %v3297_v16  ;;  %vm2734_vm15 = vcmp.eq.f32.partialorder %v2733_v42, 8.507059e+37 }
 0x3cb   : > { %v5900_v18 = vpop.eup %5899  ;;  %v3191_v23 = vadd.f32 %v3167_v26, %v2423_v34  ;;  %3587 = vmatmul.bf16.gmra.mxu0 %v3297_v16  ;;  %v2698_v1 = vadd.f32 %v8127_v0, %v2697_v28  ;;  %v6105_v26 = vld [vmem:[%s6512_s16 + $0xe0] sm:$0xff]  ;;  %v5382_v28 = vld [vmem:[#allocation8 + $0x10] sm:$0xff] }
 0x3cc   : > { %v3254_v5 = vmul.f32 %v5900_v18, %v2662_v7  ;;  %v8155_v50 = vpop.eup %5901  ;;  %v3224_v7 = vsub.f32 1.0, %v2692_v11  ;;  %v2430_v37 = vpop.f32.mrf.mxu0  ;;  %4309 = vmatpush.bf16.msrb.mxu1 %v5382_v28 }
 0x3cd   : > { %5903 = vtanh.f32 %v3191_v23  ;;  %v2710_v31 = vmul.f32 %v8155_v50, %v8121_v55  ;;  %v2702_v16 = vsel %vm8183_vm6, %v8127_v0, %v2698_v1  ;;  %vm2715_vm8 = vweird.f32 %v8155_v50 }
 0x3ce   : > { %v8151_v20 = vadd.f32 %v3254_v5, %v3238_v3  ;;  %5905 = vrcp.f32 %v8149_v33  ;;  %v3240_v22 = vmul.f32 %v6105_v26, %v3224_v7  ;;  %v2707_v29 = vsel %vm2704_vm7, %v2706_v17, %v2702_v16  ;;  %vm2716_vm10 = vmor %vm2714_vm9, %vm2715_vm8  ;;  %v5381_v26 = vld [vmem:[#allocation8 + $0x8] sm:$0xff] }
 0x3cf   : > { %v2711_v2 = vsub.f32 1.0, %v2710_v31  ;;  %v2720_v3 = vand.u32 2147483648, %v8121_v55  ;;  %v3225_v5 = vsub.f32 1.0, %v2707_v29  ;;  %v2431_v41 = vadd.f32 %v2430_v37, %v6489_v12 }
 0x3d0   : > { %5080 = vst [vmem:[%s6512_s16 + $0x150] sm:$0xff] %v8151_v20  ;;  %4310 = vmatpush.bf16.msrb.mxu1 %v5381_v26 }
 0x3d1   : > { %v2712_v10 = vmul.f32 %v8155_v50, %v2711_v2  ;;  %v2721_v25 = vor.u32 1.1754944e-38, %v2720_v3  ;;  %v3241_v31 = vmul.f32 %v6106_v43, %v3225_v5  ;;  %v5380_v5 = vld [vmem:[#allocation8] sm:$0xff] }
 0x3d2   : > { %v3170_v62 = vpop.f32.mrf.mxu1 }
 0x3d3   : > { %v5904_v44 = vpop.eup %5903  ;;  %v3192_v35 = vadd.f32 %v3170_v62, %v2426_v58  ;;  %v2713_v63 = vadd.f32 %v8155_v50, %v2712_v10 }
 0x3d4   : > { %v3255_v61 = vmul.f32 %v5904_v44, %v2677_v27  ;;  %v8173_v46 = vpop.eup %5905  ;;  %v2718_v27 = vand.u32 2147483647, %v8121_v55  ;;  %v2432_v55 = vpop.f32.mrf.mxu0  ;;  %4311 = vmatpush.bf16.msrb.mxu1 %v5380_v5 }
 0x3d5   : > { %5907 = vtanh.f32 %v3192_v35  ;;  %v2725_v14 = vmul.f32 %v8173_v46, %v8149_v33  ;;  %v2717_v8 = vsel %vm2716_vm10, %v8155_v50, %v2713_v63  ;;  %vm2730_vm12 = vweird.f32 %v8173_v46 }
 0x3d6   : > { %v8169_v32 = vadd.f32 %v3255_v61, %v3239_v47  ;;  %vm2719_vm11 = vcmp.eq.f32.partialorder %v2718_v27, 8.507059e+37  ;;  %v2735_v50 = vand.u32 2147483648, %v8149_v33  ;;  %v2433_v61 = vadd.f32 %v2432_v55, %v6489_v12  ;;  %vm2731_vm14 = vmor %vm2729_vm13, %vm2730_vm12 }
 0x3d7   : > { %v2726_v23 = vsub.f32 1.0, %v2725_v14  ;;  %v2722_v62 = vsel %vm2719_vm11, %v2721_v25, %v2717_v8  ;;  %v6108_v14 = vld [vmem:[%s6512_s16 + $0xf8] sm:$0xff] }
 0x3d8   : > { %5081 = vst [vmem:[%s6512_s16 + $0x158] sm:$0xff] %v8169_v32  ;;  %v3298_v9 = vpack.c.bf16 %v8169_v32, %v8151_v20  ;;  %v3226_v35 = vsub.f32 1.0, %v2722_v62  ;;  %v2736_v39 = vor.u32 1.1754944e-38, %v2735_v50 }
 0x3d9   : > { %v2727_v52 = vmul.f32 %v8173_v46, %v2726_v23 }
 0x3da   : > { %v3172_v34 = vpop.f32.mrf.mxu1  ;;  %3494 = vmatmul.bf16.gmra.mxu2 %v3298_v9  ;;  %3543 = vmatmul.bf16.gmra.mxu3 %v3298_v9  ;;  %v3242_v33 = vmul.f32 %v6107_v30, %v3226_v35 }
 0x3db   : > { %v5908_v4 = vpop.eup %5907  ;;  %v3193_v54 = vadd.f32 %v3172_v34, %v2428_v13  ;;  %3592 = vmatmul.bf16.gmra.mxu0 %v3298_v9  ;;  %v2728_v59 = vadd.f32 %v8173_v46, %v2727_v52 }
 0x3dc   : > { %v3256_v18 = vmul.f32 %v5908_v4, %v2692_v11 }
 0x3dd   : > { %5909 = vtanh.f32 %v3193_v54  ;;  %v2732_v11 = vsel %vm2731_vm14, %v8173_v46, %v2728_v59 }
 0x3de   : > { %v8194_v0 = vadd.f32 %v3256_v18, %v3240_v22  ;;  %v2737_v15 = vsel %vm2734_vm15, %v2736_v39, %v2732_v11 }
 0x3df   : > { %v3227_v46 = vsub.f32 1.0, %v2737_v15 }
 0x3e0   : > { %5082 = vst [vmem:[%s6512_s16 + $0x160] sm:$0xff] %v8194_v0 }
 0x3e1   : > { %v3243_v16 = vmul.f32 %v6108_v14, %v3227_v46 }
 0x3e2   : > { %v3175_v51 = vpop.f32.mrf.mxu1 }
 0x3e3   : > { %v5910_v21 = vpop.eup %5909  ;;  %v3194_v58 = vadd.f32 %v3175_v51, %v2431_v41 }
 0x3e4   : > { %v3257_v19 = vmul.f32 %v5910_v21, %v2707_v29 }
 0x3e5   : > { %5911 = vtanh.f32 %v3194_v58 }
 0x3e6   : > { %v8207_v44 = vadd.f32 %v3257_v19, %v3241_v31 }
 0x3e8   : > { %5083 = vst [vmem:[%s6512_s16 + $0x168] sm:$0xff] %v8207_v44  ;;  %v3299_v47 = vpack.c.bf16 %v8207_v44, %v8194_v0 }
 0x3ea   : > { %v3177_v2 = vpop.f32.mrf.mxu1  ;;  %3499 = vmatmul.bf16.gmra.mxu2 %v3299_v47  ;;  %3548 = vmatmul.bf16.gmra.mxu3 %v3299_v47 }
 0x3eb   : > { %v5912_v1 = vpop.eup %5911  ;;  %v3195_v7 = vadd.f32 %v3177_v2, %v2433_v61  ;;  %3597 = vmatmul.bf16.gmra.mxu0 %v3299_v47 }
 0x3ec   : > { %v3258_v9 = vmul.f32 %v5912_v1, %v2722_v62 }
 0x3ed   : > { %5913 = vtanh.f32 %v3195_v7 }
 0x3ee   : > { %v8221_v13 = vadd.f32 %v3258_v9, %v3242_v33 }
 0x3f0   : > { %5084 = vst [vmem:[%s6512_s16 + $0x170] sm:$0xff] %v8221_v13 }
 0x3f3   : > { %v5914_v60 = vpop.eup %5913 }
 0x3f4   : > { %v3259_v34 = vmul.f32 %v5914_v60, %v2737_v15 }
 0x3f6   : > { %v8226_v10 = vadd.f32 %v3259_v34, %v3243_v16 }
 0x3f8   : > { %5085 = vst [vmem:[%s6512_s16 + $0x178] sm:$0xff] %v8226_v10  ;;  %v3300_v4 = vpack.c.bf16 %v8226_v10, %v8221_v13 }
 0x3fa   : > { %3504 = vmatmul.bf16.gmra.mxu2 %v3300_v4  ;;  %3553 = vmatmul.bf16.gmra.mxu3 %v3300_v4 }
 0x3fb   : > { %3602 = vmatmul.bf16.gmra.mxu0 %v3300_v4 }
 0x40d   : > { %v3519_v17 = vpop.f32.mrf.mxu3 }
 0x40e   : > { %v3520_v54 = vadd.f32 %v3519_v17, %v6863_v48  ;;  %v8241_v17 = vld [vmem:[%s6512_s16 + $0x100] sm:$0xff] }
 0x410   : > { %v5198_v37 = vmul.f32 -1.442695, %v3520_v54 }
 0x412   : > { %5915 = vpow2.f32 %v5198_v37 }
 0x415   : > { %v3521_v22 = vpop.f32.mrf.mxu3 }
 0x416   : > { %v3522_v18 = vadd.f32 %v3521_v22, %v6863_v48 }
 0x418   : > { %v5916_v29 = vpop.eup %5915  ;;  %v5199_v23 = vmul.f32 -1.442695, %v3522_v18 }
 0x419   : > { %v3960_v63 = vadd.f32 1.0, %v5916_v29 }
 0x41b   : > { %5917 = vrcp.f32 %v3960_v63  ;;  %v3987_v50 = vand.u32 2147483648, %v3960_v63  ;;  %v3985_v35 = vand.u32 2147483647, %v3960_v63  ;;  %vm3981_vm1 = vweird.f32 %v3960_v63 }
 0x41c   : > { %5919 = vpow2.f32 %v5199_v23 }
 0x41d   : > { %v3524_v3 = vpop.f32.mrf.mxu3  ;;  %v3988_v39 = vor.u32 1.1754944e-38, %v3987_v50  ;;  %vm3986_vm4 = vcmp.eq.f32.partialorder %v3985_v35, 8.507059e+37 }
 0x41e   : > { %v3525_v41 = vadd.f32 %v3524_v3, %v6863_v48 }
 0x420   : > { %v5200_v21 = vmul.f32 -1.442695, %v3525_v41 }
 0x421   : > { %v5918_v27 = vpop.eup %5917 }
 0x422   : > { %v5920_v8 = vpop.eup %5919  ;;  %v3977_v51 = vmul.f32 %v5918_v27, %v3960_v63  ;;  %vm3982_vm0 = vweird.f32 %v5918_v27 }
 0x423   : > { %v3961_v52 = vadd.f32 1.0, %v5920_v8  ;;  %vm3983_vm2 = vmor %vm3981_vm1, %vm3982_vm0 }
 0x424   : > { %v3978_v25 = vsub.f32 1.0, %v3977_v51 }
 0x425   : > { %5921 = vrcp.f32 %v3961_v52  ;;  %v3526_v58 = vpop.f32.mrf.mxu3  ;;  %v4002_v61 = vand.u32 2147483648, %v3961_v52  ;;  %v4000_v2 = vand.u32 2147483647, %v3961_v52  ;;  %vm3996_vm5 = vweird.f32 %v3961_v52 }
 0x426   : > { %5923 = vpow2.f32 %v5200_v21  ;;  %v3979_v43 = vmul.f32 %v5918_v27, %v3978_v25  ;;  %v3527_v31 = vadd.f32 %v3526_v58, %v6863_v48 }
 0x427   : > { %v4003_v9 = vor.u32 1.1754944e-38, %v4002_v61  ;;  %vm4001_vm7 = vcmp.eq.f32.partialorder %v4000_v2, 8.507059e+37 }
 0x428   : > { %v5201_v62 = vmul.f32 -1.442695, %v3527_v31  ;;  %v3980_v59 = vadd.f32 %v5918_v27, %v3979_v43 }
 0x42a   : > { %5925 = vpow2.f32 %v5201_v62  ;;  %v3984_v30 = vsel %vm3983_vm2, %v5918_v27, %v3980_v59 }
 0x42b   : > { %v5922_v19 = vpop.eup %5921  ;;  %v3989_v15 = vsel %vm3986_vm4, %v3988_v39, %v3984_v30 }
 0x42c   : > { %v3992_v28 = vmul.f32 %v5922_v19, %v3961_v52  ;;  %v5924_v55 = vpop.eup %5923  ;;  %vm3997_vm3 = vweird.f32 %v5922_v19  ;;  %v4216_v54 = vmul.f32 %v8241_v17, %v3989_v15 }
 0x42d   : > { %v8236_v47 = vadd.f32 1.0, %v5924_v55  ;;  %v3529_v1 = vpop.f32.mrf.mxu3  ;;  %vm3998_vm6 = vmor %vm3996_vm5, %vm3997_vm3 }
 0x42e   : > { %v3993_v42 = vsub.f32 1.0, %v3992_v28  ;;  %v3530_v7 = vadd.f32 %v3529_v1, %v6863_v48 }
 0x42f   : > { %5927 = vrcp.f32 %v8236_v47  ;;  %vm4011_vm9 = vweird.f32 %v8236_v47  ;;  %v4017_v43 = vand.u32 2147483648, %v8236_v47  ;;  %v4015_v62 = vand.u32 2147483647, %v8236_v47 }
 0x430   : > { %v3994_v11 = vmul.f32 %v5922_v19, %v3993_v42  ;;  %v5926_v46 = vpop.eup %5925  ;;  %v5202_v60 = vmul.f32 -1.442695, %v3530_v7 }
 0x431   : > { %v3963_v16 = vadd.f32 1.0, %v5926_v46  ;;  %v4018_v61 = vor.u32 1.1754944e-38, %v4017_v43  ;;  %vm4016_vm14 = vcmp.eq.f32.partialorder %v4015_v62, 8.507059e+37 }
 0x432   : > { %v3995_v33 = vadd.f32 %v5922_v19, %v3994_v11 }
 0x433   : > { %5929 = vrcp.f32 %v3963_v16  ;;  %vm4026_vm11 = vweird.f32 %v3963_v16  ;;  %v4030_v35 = vand.u32 2147483647, %v3963_v16  ;;  %v4032_v11 = vand.u32 2147483648, %v3963_v16 }
 0x434   : > { %v3999_v14 = vsel %vm3998_vm6, %v5922_v19, %v3995_v33  ;;  %5931 = vpow2.f32 %v5202_v60 }
 0x435   : > { %v4004_v34 = vsel %vm4001_vm7, %v4003_v9, %v3999_v14  ;;  %v5928_v4 = vpop.eup %5927  ;;  %v3531_v26 = vpop.f32.mrf.mxu3  ;;  %v4033_v7 = vor.u32 1.1754944e-38, %v4032_v11  ;;  %vm4031_vm15 = vcmp.eq.f32.partialorder %v4030_v35, 8.507059e+37 }
 0x436   : > { %v4217_v37 = vmul.f32 %v4004_v34, %v7878_v6  ;;  %v4007_v18 = vmul.f32 %v5928_v4, %v8236_v47  ;;  %v3532_v29 = vadd.f32 %v3531_v26, %v6863_v48  ;;  %vm4012_vm8 = vweird.f32 %v5928_v4 }
 0x437   : > { %vm8253_vm10 = vmor %vm4011_vm9, %vm4012_vm8 }
 0x438   : > { %v4232_v22 = vpack.c.bf16 %v4217_v37, %v4216_v54  ;;  %v5203_v23 = vmul.f32 -1.442695, %v3532_v29  ;;  %v4008_v3 = vsub.f32 1.0, %v4007_v18 }
 0x439   : > { %v5930_v63 = vpop.eup %5929 }
 0x43a   : > { %4312 = vmatmul.bf16.vlgmr.msrb.gmra.mxu1 %v4232_v22  ;;  %v5932_v5 = vpop.eup %5931  ;;  %v4022_v27 = vmul.f32 %v5930_v63, %v3963_v16  ;;  %5933 = vpow2.f32 %v5203_v23  ;;  %v4009_v52 = vmul.f32 %v5928_v4, %v4008_v3  ;;  %vm4027_vm12 = vweird.f32 %v5930_v63 }
 0x43b   : > { %v8247_v41 = vadd.f32 1.0, %v5932_v5  ;;  %vm4028_vm13 = vmor %vm4026_vm11, %vm4027_vm12 }
 0x43c   : > { %v4023_v8 = vsub.f32 1.0, %v4022_v27  ;;  %v4010_v25 = vadd.f32 %v5928_v4, %v4009_v52 }
 0x43d   : > { %v3534_v51 = vpop.f32.mrf.mxu3  ;;  %5935 = vrcp.f32 %v8247_v41  ;;  %vm4041_vm1 = vweird.f32 %v8247_v41 }
 0x43e   : > { %v3535_v6 = vadd.f32 %v3534_v51, %v6863_v48  ;;  %v4024_v58 = vmul.f32 %v5930_v63, %v4023_v8  ;;  %v4014_v59 = vsel %vm8253_vm10, %v5928_v4, %v4010_v25 }
 0x43f   : > { %v4019_v39 = vsel %vm4016_vm14, %v4018_v61, %v4014_v59 }
 0x440   : > { %v5204_v21 = vmul.f32 -1.442695, %v3535_v6  ;;  %v5934_v31 = vpop.eup %5933  ;;  %v4025_v28 = vadd.f32 %v5930_v63, %v4024_v58  ;;  %v4218_v46 = vmul.f32 %v4019_v39, %v7917_v40 }
 0x441   : > { %v8258_v55 = vadd.f32 1.0, %v5934_v31 }
 0x442   : > { %5937 = vpow2.f32 %v5204_v21  ;;  %v4029_v1 = vsel %vm4028_vm13, %v5930_v63, %v4025_v28  ;;  %v4045_v63 = vand.u32 2147483647, %v8247_v41 }
 0x443   : > { %v5936_v50 = vpop.eup %5935  ;;  %5939 = vrcp.f32 %v8258_v55  ;;  %v4034_v33 = vsel %vm4031_vm15, %v4033_v7, %v4029_v1  ;;  %vm4056_vm3 = vweird.f32 %v8258_v55  ;;  %v4060_v52 = vand.u32 2147483647, %v8258_v55 }
 0x444   : > { %v4037_v2 = vmul.f32 %v5936_v50, %v8247_v41  ;;  %v4219_v60 = vmul.f32 %v4034_v33, %v7947_v24  ;;  %vm4042_vm0 = vweird.f32 %v5936_v50  ;;  %v4047_v24 = vand.u32 2147483648, %v8247_v41 }
 0x445   : > { %v3536_v42 = vpop.f32.mrf.mxu3  ;;  %vm8279_vm2 = vmor %vm4041_vm1, %vm4042_vm0  ;;  %v4062_v21 = vand.u32 2147483648, %v8258_v55  ;;  %vm4046_vm6 = vcmp.eq.f32.partialorder %v4045_v63, 8.507059e+37  ;;  %vm4061_vm7 = vcmp.eq.f32.partialorder %v4060_v52, 8.507059e+37 }
 0x446   : > { %v3537_v47 = vadd.f32 %v3536_v42, %v6863_v48  ;;  %v4038_v15 = vsub.f32 1.0, %v4037_v2  ;;  %v4233_v4 = vpack.c.bf16 %v4219_v60, %v4218_v46  ;;  %v4048_v41 = vor.u32 1.1754944e-38, %v4047_v24 }
 0x447   : > { %v4063_v19 = vor.u32 1.1754944e-38, %v4062_v21 }
 0x448   : > { %v5205_v30 = vmul.f32 -1.442695, %v3537_v47  ;;  %v5938_v9 = vpop.eup %5937  ;;  %v4039_v22 = vmul.f32 %v5936_v50, %v4038_v15 }
 0x449   : > { %v5940_v14 = vpop.eup %5939  ;;  %v8267_v34 = vadd.f32 1.0, %v5938_v9 }
 0x44a   : > { %v4052_v16 = vmul.f32 %v5940_v14, %v8258_v55  ;;  %5941 = vpow2.f32 %v5205_v30  ;;  %4317 = vmatmul.bf16.gmra.mxu1 %v4233_v4  ;;  %v4040_v29 = vadd.f32 %v5936_v50, %v4039_v22  ;;  %vm4057_vm4 = vweird.f32 %v5940_v14 }
 0x44b   : > { %5943 = vrcp.f32 %v8267_v34  ;;  %vm4058_vm5 = vmor %vm4056_vm3, %vm4057_vm4  ;;  %v4077_v33 = vand.u32 2147483648, %v8267_v34  ;;  %vm4071_vm9 = vweird.f32 %v8267_v34  ;;  %v4075_v15 = vand.u32 2147483647, %v8267_v34 }
 0x44c   : > { %v4053_v37 = vsub.f32 1.0, %v4052_v16  ;;  %v4044_v51 = vsel %vm8279_vm2, %v5936_v50, %v4040_v29 }
 0x44d   : > { %v3539_v54 = vpop.f32.mrf.mxu3  ;;  %v4049_v31 = vsel %vm4046_vm6, %v4048_v41, %v4044_v51  ;;  %vm4076_vm14 = vcmp.eq.f32.partialorder %v4075_v15, 8.507059e+37  ;;  %v8327_v41 = vpop.f32.mrf.mxu2 }
 0x44e   : > { %v3540_v26 = vadd.f32 %v3539_v54, %v6863_v48  ;;  %v4054_v40 = vmul.f32 %v5940_v14, %v4053_v37  ;;  %v4220_v35 = vmul.f32 %v4049_v31, %v7977_v49  ;;  %v4078_v54 = vor.u32 1.1754944e-38, %v4077_v33 }
 0x450   : > { %v5206_v18 = vmul.f32 -1.442695, %v3540_v26  ;;  %v5942_v23 = vpop.eup %5941  ;;  %v4055_v3 = vadd.f32 %v5940_v14, %v4054_v40 }
 0x451   : > { %v8275_v5 = vpop.eup %5943  ;;  %v8277_v27 = vadd.f32 1.0, %v5942_v23 }
 0x452   : > { %5945 = vpow2.f32 %v5206_v18  ;;  %v4067_v25 = vmul.f32 %v8275_v5, %v8267_v34  ;;  %v4059_v43 = vsel %vm4058_vm5, %v5940_v14, %v4055_v3  ;;  %vm4072_vm8 = vweird.f32 %v8275_v5 }
 0x453   : > { %5947 = vrcp.f32 %v8277_v27  ;;  %v4064_v28 = vsel %vm4061_vm7, %v4063_v19, %v4059_v43  ;;  %vm8309_vm10 = vmor %vm4071_vm9, %vm4072_vm8  ;;  %vm4086_vm11 = vweird.f32 %v8277_v27  ;;  %v4090_v37 = vand.u32 2147483647, %v8277_v27 }
 0x454   : > { %v4068_v50 = vsub.f32 1.0, %v4067_v25  ;;  %v4221_v42 = vmul.f32 %v4064_v28, %v8007_v56  ;;  %v4092_v26 = vand.u32 2147483648, %v8277_v27 }
 0x455   : > { %v3541_v6 = vpop.f32.mrf.mxu3  ;;  %vm4091_vm15 = vcmp.eq.f32.partialorder %v4090_v37, 8.507059e+37 }
 0x456   : > { %v3542_v58 = vadd.f32 %v3541_v6, %v6863_v48  ;;  %v4234_v2 = vpack.c.bf16 %v4221_v42, %v4220_v35  ;;  %v4069_v7 = vmul.f32 %v8275_v5, %v4068_v50  ;;  %v4093_v24 = vor.u32 1.1754944e-38, %v4092_v26 }
 0x458   : > { %v5207_v62 = vmul.f32 -1.442695, %v3542_v58  ;;  %v5946_v59 = vpop.eup %5945  ;;  %v4070_v49 = vadd.f32 %v8275_v5, %v4069_v7 }
 0x459   : > { %v5948_v61 = vpop.eup %5947  ;;  %v8294_v55 = vadd.f32 1.0, %v5946_v59 }
 0x45a   : > { %v4082_v11 = vmul.f32 %v5948_v61, %v8277_v27  ;;  %5949 = vpow2.f32 %v5207_v62  ;;  %4322 = vmatmul.bf16.gmra.mxu1 %v4234_v2  ;;  %v4074_v4 = vsel %vm8309_vm10, %v8275_v5, %v4070_v49  ;;  %vm4087_vm12 = vweird.f32 %v5948_v61 }
 0x45b   : > { %5951 = vrcp.f32 %v8294_v55  ;;  %vm4088_vm13 = vmor %vm4086_vm11, %vm4087_vm12  ;;  %v4079_v40 = vsel %vm4076_vm14, %v4078_v54, %v4074_v4  ;;  %v4107_v62 = vand.u32 2147483648, %v8294_v55  ;;  %vm4101_vm1 = vweird.f32 %v8294_v55 }
 0x45c   : > { %v4083_v1 = vsub.f32 1.0, %v4082_v11  ;;  %v4222_v8 = vmul.f32 %v4079_v40, %v8039_v45  ;;  %v4105_v59 = vand.u32 2147483647, %v8294_v55 }
 0x45d   : > { %v3544_v47 = vpop.f32.mrf.mxu3  ;;  %v4108_v2 = vor.u32 1.1754944e-38, %v4107_v62 }
 0x45e   : > { %v3545_v39 = vadd.f32 %v3544_v47, %v6863_v48  ;;  %v4084_v56 = vmul.f32 %v5948_v61, %v4083_v1  ;;  %vm4106_vm6 = vcmp.eq.f32.partialorder %v4105_v59, 8.507059e+37 }
 0x460   : > { %v5208_v30 = vmul.f32 -1.442695, %v3545_v39  ;;  %v5950_v9 = vpop.eup %5949  ;;  %v4085_v46 = vadd.f32 %v5948_v61, %v4084_v56  ;;  %v8353_v39 = vpop.f32.mrf.mxu2 }
 0x461   : > { %v8305_v60 = vpop.eup %5951  ;;  %v8307_v14 = vadd.f32 1.0, %v5950_v9 }
 0x462   : > { %5953 = vpow2.f32 %v5208_v30  ;;  %v4097_v22 = vmul.f32 %v8305_v60, %v8294_v55  ;;  %v4089_v29 = vsel %vm4088_vm13, %v5948_v61, %v4085_v46  ;;  %vm4102_vm0 = vweird.f32 %v8305_v60 }
 0x463   : > { %5955 = vrcp.f32 %v8307_v14  ;;  %v4094_v63 = vsel %vm4091_vm15, %v4093_v24, %v4089_v29  ;;  %vm8342_vm2 = vmor %vm4101_vm1, %vm4102_vm0  ;;  %vm4116_vm3 = vweird.f32 %v8307_v14  ;;  %v4120_v47 = vand.u32 2147483647, %v8307_v14 }
 0x464   : > { %v4098_v5 = vsub.f32 1.0, %v4097_v22  ;;  %v4223_v51 = vmul.f32 %v4094_v63, %v8067_v53  ;;  %v4122_v1 = vand.u32 2147483648, %v8307_v14 }
 0x465   : > { %v3546_v34 = vpop.f32.mrf.mxu3  ;;  %vm4121_vm7 = vcmp.eq.f32.partialorder %v4120_v47, 8.507059e+37 }
 0x466   : > { %v3547_v18 = vadd.f32 %v3546_v34, %v6863_v48  ;;  %v4235_v21 = vpack.c.bf16 %v4223_v51, %v4222_v8  ;;  %v4099_v45 = vmul.f32 %v8305_v60, %v4098_v5  ;;  %v4123_v33 = vor.u32 1.1754944e-38, %v4122_v1 }
 0x468   : > { %v5209_v23 = vmul.f32 -1.442695, %v3547_v18  ;;  %v5954_v3 = vpop.eup %5953  ;;  %v4100_v53 = vadd.f32 %v8305_v60, %v4099_v45 }
 0x469   : > { %v5956_v6 = vpop.eup %5955  ;;  %v8325_v27 = vadd.f32 1.0, %v5954_v3  ;;  %v8426_v3 = vpop.f32.mrf.mxu0 }
 0x46a   : > { %v4112_v52 = vmul.f32 %v5956_v6, %v8307_v14  ;;  %5957 = vpow2.f32 %v5209_v23  ;;  %4327 = vmatmul.bf16.gmra.mxu1 %v4235_v21  ;;  %v4104_v11 = vsel %vm8342_vm2, %v8305_v60, %v4100_v53  ;;  %vm4117_vm4 = vweird.f32 %v5956_v6 }
 0x46b   : > { %5959 = vrcp.f32 %v8325_v27  ;;  %vm4118_vm5 = vmor %vm4116_vm3, %vm4117_vm4  ;;  %v4109_v56 = vsel %vm4106_vm6, %v4108_v2, %v4104_v11  ;;  %vm4131_vm9 = vweird.f32 %v8325_v27  ;;  %v4137_v23 = vand.u32 2147483648, %v8325_v27 }
 0x46c   : > { %v4113_v58 = vsub.f32 1.0, %v4112_v52  ;;  %v4224_v16 = vmul.f32 %v4109_v56, %v8097_v36  ;;  %v8367_v36 = vpop.f32.mrf.mxu2  ;;  %v4135_v5 = vand.u32 2147483647, %v8325_v27 }
 0x46d   : > { %v3549_v25 = vpop.f32.mrf.mxu3 }
 0x46e   : > { %v3550_v43 = vadd.f32 %v3549_v25, %v6863_v48  ;;  %v4114_v19 = vmul.f32 %v5956_v6, %v4113_v58  ;;  %v4138_v58 = vor.u32 1.1754944e-38, %v4137_v23  ;;  %vm4136_vm14 = vcmp.eq.f32.partialorder %v4135_v5, 8.507059e+37 }
 0x470   : > { %v5210_v31 = vmul.f32 -1.442695, %v3550_v43  ;;  %v5958_v28 = vpop.eup %5957  ;;  %v4115_v50 = vadd.f32 %v5956_v6, %v4114_v19 }
 0x471   : > { %v8338_v35 = vpop.eup %5959  ;;  %v8340_v42 = vadd.f32 1.0, %v5958_v28 }
 0x472   : > { %5961 = vpow2.f32 %v5210_v31  ;;  %v4127_v7 = vmul.f32 %v8338_v35, %v8325_v27  ;;  %v4119_v49 = vsel %vm4118_vm5, %v5956_v6, %v4115_v50  ;;  %vm4132_vm8 = vweird.f32 %v8338_v35 }
 0x473   : > { %5963 = vrcp.f32 %v8340_v42  ;;  %v4124_v15 = vsel %vm4121_vm7, %v4123_v33, %v4119_v49  ;;  %vm8372_vm10 = vmor %vm4131_vm9, %vm4132_vm8  ;;  %v3471_v6 = vadd.f32 %v8327_v41, %v6484_v38  ;;  %vm4146_vm11 = vweird.f32 %v8340_v42 }
 0x474   : > { %v4128_v60 = vsub.f32 1.0, %v4127_v7  ;;  %v4225_v14 = vmul.f32 %v4124_v15, %v8123_v57  ;;  %v4150_v41 = vand.u32 2147483647, %v8340_v42  ;;  %v4152_v43 = vand.u32 2147483648, %v8340_v42  ;;  %v8393_v61 = vpop.f32.mrf.mxu2 }
 0x475   : > { %v3551_v55 = vpop.f32.mrf.mxu3  ;;  %v5182_v19 = vmul.f32 -1.442695, %v3471_v6  ;;  %v3473_v7 = vadd.f32 %v8353_v39, %v6484_v38 }
 0x476   : > { %v3552_v30 = vadd.f32 %v3551_v55, %v6863_v48  ;;  %v4236_v37 = vpack.c.bf16 %v4225_v14, %v4224_v16  ;;  %v4129_v29 = vmul.f32 %v8338_v35, %v4128_v60  ;;  %v4153_v28 = vor.u32 1.1754944e-38, %v4152_v43 }
 0x477   : > { %vm4151_vm15 = vcmp.eq.f32.partialorder %v4150_v41, 8.507059e+37  ;;  %v5183_v60 = vmul.f32 -1.442695, %v3473_v7 }
 0x478   : > { %v5211_v9 = vmul.f32 -1.442695, %v3552_v30  ;;  %v5962_v46 = vpop.eup %5961  ;;  %v4130_v40 = vadd.f32 %v8338_v35, %v4129_v29 }
 0x479   : > { %v5964_v4 = vpop.eup %5963  ;;  %v8360_v34 = vadd.f32 1.0, %v5962_v46 }
 0x47a   : > { %v4142_v54 = vmul.f32 %v5964_v4, %v8340_v42  ;;  %5965 = vpow2.f32 %v5211_v9  ;;  %4332 = vmatmul.bf16.gmra.mxu1 %v4236_v37  ;;  %v4134_v21 = vsel %vm8372_vm10, %v8338_v35, %v4130_v40  ;;  %vm4147_vm12 = vweird.f32 %v5964_v4 }
 0x47b   : > { %5967 = vrcp.f32 %v8360_v34  ;;  %vm4148_vm13 = vmor %vm4146_vm11, %vm4147_vm12  ;;  %v4139_v62 = vsel %vm4136_vm14, %v4138_v58, %v4134_v21  ;;  %vm4161_vm1 = vweird.f32 %v8360_v34  ;;  %v4165_v56 = vand.u32 2147483647, %v8360_v34 }
 0x47c   : > { %v4143_v22 = vsub.f32 1.0, %v4142_v54  ;;  %v4226_v11 = vmul.f32 %v4139_v62, %v8151_v20  ;;  %v3476_v21 = vadd.f32 %v8367_v36, %v6484_v38 }
 0x47d   : > { %v3554_v26 = vpop.f32.mrf.mxu3  ;;  %vm4166_vm6 = vcmp.eq.f32.partialorder %v4165_v56, 8.507059e+37 }
 0x47e   : > { %v3555_v18 = vadd.f32 %v3554_v26, %v6863_v48  ;;  %v4144_v24 = vmul.f32 %v5964_v4, %v4143_v22  ;;  %v8419_v26 = vpop.f32.mrf.mxu2  ;;  %v5184_v36 = vmul.f32 -1.442695, %v3476_v21 }
 0x480   : > { %v5212_v57 = vmul.f32 -1.442695, %v3555_v18  ;;  %v5966_v63 = vpop.eup %5965  ;;  %v4145_v8 = vadd.f32 %v5964_v4, %v4144_v24 }
 0x481   : > { %v8377_v51 = vpop.eup %5967  ;;  %v8381_v52 = vadd.f32 1.0, %v5966_v63 }
 0x482   : > { %v4157_v25 = vmul.f32 %v8377_v51, %v8360_v34  ;;  %5969 = vpow2.f32 %v5212_v57  ;;  %v4149_v53 = vsel %vm4148_vm13, %v5964_v4, %v4145_v8  ;;  %vm4162_vm0 = vweird.f32 %v8377_v51 }
 0x483   : > { %5971 = vrcp.f32 %v8381_v52  ;;  %v4154_v50 = vsel %vm4151_vm15, %v4153_v28, %v4149_v53  ;;  %v4182_v49 = vand.u32 2147483648, %v8381_v52  ;;  %v4180_v9 = vand.u32 2147483647, %v8381_v52  ;;  %vm8411_vm3 = vmor %vm4161_vm1, %vm4162_vm0 }
 0x484   : > { %v4158_v45 = vsub.f32 1.0, %v4157_v25  ;;  %v4227_v55 = vmul.f32 %v4154_v50, %v8169_v32  ;;  %5973 = vpow2.f32 %v5182_v19  ;;  %v4167_v32 = vand.u32 2147483648, %v8360_v34 }
 0x485   : > { %v3556_v27 = vpop.f32.mrf.mxu3  ;;  %vm4176_vm4 = vweird.f32 %v8381_v52  ;;  %v4183_v37 = vor.u32 1.1754944e-38, %v4182_v49  ;;  %vm4181_vm7 = vcmp.eq.f32.partialorder %v4180_v9, 8.507059e+37 }
 0x486   : > { %v3557_v31 = vadd.f32 %v3556_v27, %v6863_v48  ;;  %v4159_v42 = vmul.f32 %v8377_v51, %v4158_v45  ;;  %v4237_v1 = vpack.c.bf16 %v4227_v55, %v4226_v11  ;;  %v4168_v54 = vor.u32 1.1754944e-38, %v4167_v32  ;;  %v8431_v25 = vpop.f32.mrf.mxu2 }
 0x488   : > { %v5213_v59 = vmul.f32 -1.442695, %v3557_v31  ;;  %v5970_v35 = vpop.eup %5969  ;;  %v4160_v20 = vadd.f32 %v8377_v51, %v4159_v42  ;;  %v3478_v42 = vadd.f32 %v8393_v61, %v6484_v38  ;;  %v3481_v61 = vadd.f32 %v8419_v26, %v6484_v38 }
 0x489   : > { %v5972_v2 = vpop.eup %5971  ;;  %v8398_v48 = vadd.f32 1.0, %v5970_v35 }
 0x48a   : > { %v4172_v47 = vmul.f32 %v5972_v2, %v8381_v52  ;;  %5975 = vpow2.f32 %v5213_v59  ;;  %4337 = vmatmul.bf16.gmra.mxu1 %v4237_v1  ;;  %vm4177_vm2 = vweird.f32 %v5972_v2  ;;  %v5974_v15 = vpop.eup %5973  ;;  %v4164_v16 = vsel %vm8411_vm3, %v8377_v51, %v4160_v20  ;;  %v3570_v59 = vpop.f32.mrf.mxu0 }
 0x48b   : > { %5977 = vrcp.f32 %v8398_v48  ;;  %vm4178_vm5 = vmor %vm4176_vm4, %vm4177_vm2  ;;  %v4169_v29 = vsel %vm4166_vm6, %v4168_v54, %v4164_v16  ;;  %v8423_v23 = vadd.f32 1.0, %v5974_v15  ;;  %vm4191_vm9 = vweird.f32 %v8398_v48 }
 0x48c   : > { %v4173_v30 = vsub.f32 1.0, %v4172_v47  ;;  %v4228_v63 = vmul.f32 %v4169_v29, %v8194_v0  ;;  %v4197_v0 = vand.u32 2147483648, %v8398_v48  ;;  %v4195_v43 = vand.u32 2147483647, %v8398_v48 }
 0x48d   : > { %v5185_v32 = vmul.f32 -1.442695, %v3478_v42  ;;  %vm3677_vm1 = vweird.f32 %v8423_v23 }
 0x48e   : > { %v4174_v33 = vmul.f32 %v5972_v2, %v4173_v30  ;;  %v4198_v50 = vor.u32 1.1754944e-38, %v4197_v0  ;;  %vm4196_vm14 = vcmp.eq.f32.partialorder %v4195_v43, 8.507059e+37  ;;  %v3485_v7 = vpop.f32.mrf.mxu2 }
 0x490   : > { %v5976_v46 = vpop.eup %5975  ;;  %v4175_v14 = vadd.f32 %v5972_v2, %v4174_v33 }
 0x491   : > { %v5978_v4 = vpop.eup %5977  ;;  %v3975_v34 = vadd.f32 1.0, %v5976_v46  ;;  %v5186_v46 = vmul.f32 -1.442695, %v3481_v61 }
 0x492   : > { %v4187_v22 = vmul.f32 %v5978_v4, %v8398_v48  ;;  %v4179_v18 = vsel %vm4178_vm5, %v5972_v2, %v4175_v14  ;;  %vm4192_vm8 = vweird.f32 %v5978_v4  ;;  %v8454_v15 = vpop.f32.mrf.mxu0  ;;  %v3681_v14 = vand.u32 2147483647, %v8423_v23 }
 0x493   : > { %5979 = vrcp.f32 %v3975_v34  ;;  %v4184_v57 = vsel %vm4181_vm7, %v4183_v37, %v4179_v18  ;;  %v4212_v41 = vand.u32 2147483648, %v3975_v34  ;;  %v4210_v31 = vand.u32 2147483647, %v3975_v34  ;;  %vm8438_vm11 = vmor %vm4191_vm9, %vm4192_vm8 }
 0x494   : > { %5981 = vpow2.f32 %v5183_v60  ;;  %v4188_v40 = vsub.f32 1.0, %v4187_v22  ;;  %v4229_v24 = vmul.f32 %v4184_v57, %v8207_v44  ;;  %vm4206_vm12 = vweird.f32 %v3975_v34 }
 0x495   : > { %5983 = vrcp.f32 %v8423_v23  ;;  %v4213_v35 = vor.u32 1.1754944e-38, %v4212_v41  ;;  %vm4211_vm15 = vcmp.eq.f32.partialorder %v4210_v31, 8.507059e+37  ;;  %v3683_v60 = vand.u32 2147483648, %v8423_v23 }
 0x496   : > { %v4238_v5 = vpack.c.bf16 %v4229_v24, %v4228_v63  ;;  %v4189_v8 = vmul.f32 %v5978_v4, %v4188_v40  ;;  %v3487_v16 = vpop.f32.mrf.mxu2  ;;  %v3483_v22 = vadd.f32 %v8431_v25, %v6484_v38  ;;  %vm3682_vm3 = vcmp.eq.f32.partialorder %v3681_v14, 8.507059e+37 }
 0x497   : > { %v3684_v18 = vor.u32 1.1754944e-38, %v3683_v60  ;;  %v3486_v41 = vadd.f32 %v3485_v7, %v6484_v38 }
 0x498   : > { %v4190_v44 = vadd.f32 %v5978_v4, %v4189_v8 }
 0x499   : > { %v5980_v51 = vpop.eup %5979 }
 0x49a   : > { %v5982_v6 = vpop.eup %5981  ;;  %v4202_v52 = vmul.f32 %v5980_v51, %v3975_v34  ;;  %4342 = vmatmul.bf16.gmra.mxu1 %v4238_v5  ;;  %vm4207_vm10 = vweird.f32 %v5980_v51  ;;  %v4194_v62 = vsel %vm8438_vm11, %v5978_v4, %v4190_v44  ;;  %v3569_v34 = vadd.f32 %v8426_v3, %v6489_v12  ;;  %v8471_v40 = vpop.f32.mrf.mxu0 }
 0x49b   : > { %v8433_v58 = vadd.f32 1.0, %v5982_v6  ;;  %v5984_v53 = vpop.eup %5983  ;;  %vm4208_vm13 = vmor %vm4206_vm12, %vm4207_vm10  ;;  %v4199_v2 = vsel %vm4196_vm14, %v4198_v50, %v4194_v62  ;;  %v5187_v3 = vmul.f32 -1.442695, %v3483_v22  ;;  %v5188_v50 = vmul.f32 -1.442695, %v3486_v41  ;;  %v6111_v41 = vld [vmem:[%s6512_s16 + $0x110] sm:$0xff] }
 0x49c   : > { %v4203_v27 = vsub.f32 1.0, %v4202_v52  ;;  %v3673_v11 = vmul.f32 %v5984_v53, %v8423_v23  ;;  %v4230_v30 = vmul.f32 %v4199_v2, %v8221_v13  ;;  %vm3678_vm0 = vweird.f32 %v5984_v53 }
 0x49d   : > { %5985 = vrcp.f32 %v8433_v58  ;;  %vm3679_vm2 = vmor %vm3677_vm1, %vm3678_vm0  ;;  %v3698_v5 = vand.u32 2147483648, %v8433_v58  ;;  %vm3692_vm5 = vweird.f32 %v8433_v58  ;;  %v3571_v52 = vadd.f32 %v3570_v59, %v6489_v12 }
 0x49e   : > { %v4204_v45 = vmul.f32 %v5980_v51, %v4203_v27  ;;  %5987 = vpow2.f32 %v5184_v36  ;;  %v3674_v1 = vsub.f32 1.0, %v3673_v11  ;;  %v3490_v25 = vpop.f32.mrf.mxu2  ;;  %v3488_v2 = vadd.f32 %v3487_v16, %v6484_v38 }
 0x49f   : > { %5989 = vpow2.f32 %v5185_v32  ;;  %v3699_v43 = vor.u32 1.1754944e-38, %v3698_v5  ;;  %v3576_v5 = vadd.f32 %v8471_v40, %v6489_v12 }
 0x4a0   : > { %v4205_v28 = vadd.f32 %v5980_v51, %v4204_v45  ;;  %v3675_v9 = vmul.f32 %v5984_v53, %v3674_v1  ;;  %v6110_v1 = vld [vmem:[%s6512_s16 + $0x108] sm:$0xff] }
 0x4a2   : > { %v4209_v55 = vsel %vm4208_vm13, %v5980_v51, %v4205_v28  ;;  %v3676_v13 = vadd.f32 %v5984_v53, %v3675_v9  ;;  %v3696_v51 = vand.u32 2147483647, %v8433_v58  ;;  %v8491_v59 = vpop.f32.mrf.mxu0  ;;  %v5189_v9 = vmul.f32 -1.442695, %v3488_v2 }
 0x4a3   : > { %v4214_v48 = vsel %vm4211_vm15, %v4213_v35, %v4209_v55  ;;  %v8450_v20 = vpop.eup %5985 }
 0x4a4   : > { %v4231_v47 = vmul.f32 %v4214_v48, %v8226_v10  ;;  %v5988_v56 = vpop.eup %5987  ;;  %v3688_v33 = vmul.f32 %v8450_v20, %v8433_v58  ;;  %v3680_v54 = vsel %vm3679_vm2, %v5984_v53, %v3676_v13  ;;  %vm3693_vm4 = vweird.f32 %v8450_v20 }
 0x4a5   : > { %v8458_v10 = vadd.f32 1.0, %v5988_v56  ;;  %v5990_v4 = vpop.eup %5989  ;;  %v3685_v24 = vsel %vm3682_vm3, %v3684_v18, %v3680_v54  ;;  %vm3694_vm6 = vmor %vm3692_vm5, %vm3693_vm4  ;;  %vm3697_vm7 = vcmp.eq.f32.partialorder %v3696_v51, 8.507059e+37 }
 0x4a6   : > { %v4239_v49 = vpack.c.bf16 %v4231_v47, %v4230_v30  ;;  %v3689_v39 = vsub.f32 1.0, %v3688_v33  ;;  %v8469_v57 = vadd.f32 1.0, %v5990_v4  ;;  %v4385_v8 = vsub.f32 1.0, %v3685_v24  ;;  %v3492_v47 = vpop.f32.mrf.mxu2 }
 0x4a7   : > { %5991 = vrcp.f32 %v8458_v10  ;;  %v3713_v33 = vand.u32 2147483648, %v8458_v10  ;;  %vm3707_vm9 = vweird.f32 %v8458_v10  ;;  %v3711_v61 = vand.u32 2147483647, %v8458_v10 }
 0x4a8   : > { %v3690_v26 = vmul.f32 %v8450_v20, %v3689_v39  ;;  %5993 = vpow2.f32 %v5186_v46  ;;  %v4401_v58 = vmul.f32 %v8241_v17, %v4385_v8  ;;  %v3574_v39 = vadd.f32 %v8454_v15, %v6489_v12 }
 0x4a9   : > { %vm3712_vm11 = vcmp.eq.f32.partialorder %v3711_v61, 8.507059e+37  ;;  %vm3722_vm13 = vweird.f32 %v8469_v57 }
 0x4aa   : > { %4347 = vmatmul.bf16.gmra.mxu1 %v4239_v49  ;;  %v3691_v63 = vadd.f32 %v8450_v20, %v3690_v26  ;;  %v8515_v60 = vpop.f32.mrf.mxu0 }
 0x4ac   : > { %v3695_v27 = vsel %vm3694_vm6, %v8450_v20, %v3691_v63 }
 0x4ad   : > { %v8473_v23 = vpop.eup %5991  ;;  %v3700_v19 = vsel %vm3697_vm7, %v3699_v43, %v3695_v27 }
 0x4ae   : > { %v5994_v6 = vpop.eup %5993  ;;  %v3703_v21 = vmul.f32 %v8473_v23, %v8458_v10  ;;  %v4386_v35 = vsub.f32 1.0, %v3700_v19  ;;  %vm3708_vm8 = vweird.f32 %v8473_v23  ;;  %v3491_v10 = vadd.f32 %v3490_v25, %v6484_v38 }
 0x4af   : > { %v8486_v31 = vadd.f32 1.0, %v5994_v6  ;;  %vm3709_vm10 = vmor %vm3707_vm9, %vm3708_vm8 }
 0x4b0   : > { %v3704_v36 = vsub.f32 1.0, %v3703_v21  ;;  %v4402_v7 = vmul.f32 %v6110_v1, %v4386_v35 }
 0x4b1   : > { %vm3737_vm1 = vweird.f32 %v8486_v31 }
 0x4b2   : > { %v3705_v55 = vmul.f32 %v8473_v23, %v3704_v36 }
 0x4b4   : > { %v3706_v32 = vadd.f32 %v8473_v23, %v3705_v55 }
 0x4b6   : > { %v3710_v16 = vsel %vm3709_vm10, %v8473_v23, %v3706_v32  ;;  %v3728_v23 = vand.u32 2147483648, %v8469_v57 }
 0x4b7   : > { %v4313_v37 = vpop.f32.mrf.mxu1 }
 0x4b8   : > { %v4353_v29 = vadd.f32 %v4313_v37, %v3569_v34  ;;  %v3714_v34 = vor.u32 1.1754944e-38, %v3713_v33  ;;  %v3729_v40 = vor.u32 1.1754944e-38, %v3728_v23  ;;  %v6112_v33 = vld [vmem:[%s6512_s16 + $0x118] sm:$0xff] }
 0x4ba   : > { %5995 = vtanh.f32 %v4353_v29  ;;  %v3715_v37 = vsel %vm3712_vm11, %v3714_v34, %v3710_v16  ;;  %v5190_v29 = vmul.f32 -1.442695, %v3491_v10 }
 0x4bb   : > { %5997 = vrcp.f32 %v8469_v57  ;;  %v4387_v63 = vsub.f32 1.0, %v3715_v37 }
 0x4bc   : > { %5999 = vpow2.f32 %v5187_v3  ;;  %v3726_v3 = vand.u32 2147483647, %v8469_v57 }
 0x4bd   : > { %v4403_v43 = vmul.f32 %v6111_v41, %v4387_v63 }
 0x4be   : > { %vm3727_vm15 = vcmp.eq.f32.partialorder %v3726_v3, 8.507059e+37 }
 0x4bf   : > { %v4315_v44 = vpop.f32.mrf.mxu1 }
 0x4c0   : > { %v5996_v0 = vpop.eup %5995  ;;  %v4354_v45 = vadd.f32 %v4315_v44, %v3571_v52  ;;  %v8542_v44 = vpop.f32.mrf.mxu0 }
 0x4c1   : > { %v4417_v53 = vmul.f32 %v5996_v0, %v3685_v24  ;;  %v8489_v62 = vpop.eup %5997  ;;  %v3495_v24 = vpop.f32.mrf.mxu2  ;;  %v3493_v0 = vadd.f32 %v3492_v47, %v6484_v38  ;;  %v6114_v47 = vld [vmem:[%s6512_s16 + $0x128] sm:$0xff] }
 0x4c2   : > { %6001 = vtanh.f32 %v4354_v45  ;;  %v6000_v11 = vpop.eup %5999  ;;  %v3718_v17 = vmul.f32 %v8489_v62, %v8469_v57  ;;  %vm3723_vm12 = vweird.f32 %v8489_v62 }
 0x4c3   : > { %v4433_v28 = vadd.f32 %v4417_v53, %v4401_v58  ;;  %6003 = vrcp.f32 %v8486_v31  ;;  %v8499_v48 = vadd.f32 1.0, %v6000_v11  ;;  %vm8532_vm14 = vmor %vm3722_vm13, %vm3723_vm12  ;;  %v5191_v35 = vmul.f32 -1.442695, %v3493_v0 }
 0x4c4   : > { %6005 = vpow2.f32 %v5188_v50  ;;  %v3719_v20 = vsub.f32 1.0, %v3718_v17  ;;  %v3743_v50 = vand.u32 2147483648, %v8486_v31  ;;  %v3741_v17 = vand.u32 2147483647, %v8486_v31 }
 0x4c5   : > { %5246 = vst [vmem:[%s6512_s16 + $0x180] sm:$0xff] %v4433_v28  ;;  %6007 = vrcp.f32 %v8499_v48  ;;  %v3758_v34 = vand.u32 2147483648, %v8499_v48  ;;  %vm3752_vm5 = vweird.f32 %v8499_v48 }
 0x4c6   : > { %v3720_v4 = vmul.f32 %v8489_v62, %v3719_v20  ;;  %6009 = vpow2.f32 %v5189_v9  ;;  %v3744_v32 = vor.u32 1.1754944e-38, %v3743_v50  ;;  %vm3742_vm3 = vcmp.eq.f32.partialorder %v3741_v17, 8.507059e+37 }
 0x4c7   : > { %v4318_v14 = vpop.f32.mrf.mxu1 }
 0x4c8   : > { %v6002_v42 = vpop.eup %6001  ;;  %v4355_v54 = vadd.f32 %v4318_v14, %v3574_v39  ;;  %v3721_v22 = vadd.f32 %v8489_v62, %v3720_v4 }
 0x4c9   : > { %v4418_v30 = vmul.f32 %v6002_v42, %v3700_v19  ;;  %v8504_v49 = vpop.eup %6003  ;;  %v3579_v42 = vadd.f32 %v8491_v59, %v6489_v12  ;;  %v3497_v2 = vpop.f32.mrf.mxu2  ;;  %v3496_v59 = vadd.f32 %v3495_v24, %v6484_v38 }
 0x4ca   : > { %v6006_v13 = vpop.eup %6005  ;;  %v3733_v46 = vmul.f32 %v8504_v49, %v8486_v31  ;;  %6011 = vtanh.f32 %v4355_v54  ;;  %v3725_v52 = vsel %vm8532_vm14, %v8489_v62, %v3721_v22  ;;  %vm3738_vm0 = vweird.f32 %v8504_v49 }
 0x4cb   : > { %v4434_v56 = vadd.f32 %v4418_v30, %v4402_v7  ;;  %v8520_v15 = vadd.f32 1.0, %v6006_v13  ;;  %v8524_v18 = vpop.eup %6007  ;;  %v3730_v53 = vsel %vm3727_vm15, %v3729_v40, %v3725_v52  ;;  %vm8559_vm2 = vmor %vm3737_vm1, %vm3738_vm0  ;;  %v5192_v10 = vmul.f32 -1.442695, %v3496_v59 }
 0x4cc   : > { %v3734_v26 = vsub.f32 1.0, %v3733_v46  ;;  %v6010_v51 = vpop.eup %6009  ;;  %v3748_v6 = vmul.f32 %v8524_v18, %v8499_v48  ;;  %v4388_v11 = vsub.f32 1.0, %v3730_v53  ;;  %vm3753_vm4 = vweird.f32 %v8524_v18 }
 0x4cd   : > { %5247 = vst [vmem:[%s6512_s16 + $0x188] sm:$0xff] %v4434_v56  ;;  %6013 = vrcp.f32 %v8520_v15  ;;  %v8546_v58 = vadd.f32 1.0, %v6010_v51  ;;  %vm8586_vm6 = vmor %vm3752_vm5, %vm3753_vm4  ;;  %v3498_v51 = vadd.f32 %v3497_v2, %v6484_v38  ;;  %v3773_v41 = vand.u32 2147483648, %v8520_v15 }
 0x4ce   : > { %v3735_v57 = vmul.f32 %v8504_v49, %v3734_v26  ;;  %6015 = vpow2.f32 %v5190_v29  ;;  %v3749_v36 = vsub.f32 1.0, %v3748_v6  ;;  %v4404_v9 = vmul.f32 %v6112_v33, %v4388_v11  ;;  %v6113_v6 = vld [vmem:[%s6512_s16 + $0x120] sm:$0xff] }
 0x4cf   : > { %v4320_v21 = vpop.f32.mrf.mxu1  ;;  %v3581_v26 = vadd.f32 %v8515_v60, %v6489_v12  ;;  %vm3767_vm9 = vweird.f32 %v8520_v15  ;;  %vm3782_vm13 = vweird.f32 %v8546_v58 }
 0x4d0   : > { %v6012_v25 = vpop.eup %6011  ;;  %v4356_v27 = vadd.f32 %v4320_v21, %v3576_v5  ;;  %v3736_v62 = vadd.f32 %v8504_v49, %v3735_v57  ;;  %v3750_v31 = vmul.f32 %v8524_v18, %v3749_v36  ;;  %v3759_v5 = vor.u32 1.1754944e-38, %v3758_v34 }
 0x4d1   : > { %v4419_v45 = vmul.f32 %v6012_v25, %v3715_v37  ;;  %v3756_v37 = vand.u32 2147483647, %v8499_v48  ;;  %v3500_v60 = vpop.f32.mrf.mxu2  ;;  %v3771_v36 = vand.u32 2147483647, %v8520_v15 }
 0x4d2   : > { %6017 = vtanh.f32 %v4356_v27  ;;  %v3740_v7 = vsel %vm8559_vm2, %v8504_v49, %v3736_v62  ;;  %v8573_v49 = vpop.f32.mrf.mxu0  ;;  %v3751_v14 = vadd.f32 %v8524_v18, %v3750_v31  ;;  %v3584_v62 = vadd.f32 %v8542_v44, %v6489_v12 }
 0x4d3   : > { %v4435_v19 = vadd.f32 %v4419_v45, %v4403_v43  ;;  %v8550_v28 = vpop.eup %6013  ;;  %6019 = vrcp.f32 %v8546_v58  ;;  %v3745_v13 = vsel %vm3742_vm3, %v3744_v32, %v3740_v7  ;;  %vm3757_vm7 = vcmp.eq.f32.partialorder %v3756_v37, 8.507059e+37 }
 0x4d4   : > { %v6016_v55 = vpop.eup %6015  ;;  %v3763_v1 = vmul.f32 %v8550_v28, %v8520_v15  ;;  %6021 = vpow2.f32 %v5191_v35  ;;  %v4389_v54 = vsub.f32 1.0, %v3745_v13  ;;  %v3755_v23 = vsel %vm8586_vm6, %v8524_v18, %v3751_v14 }
 0x4d5   : > { %5248 = vst [vmem:[%s6512_s16 + $0x190] sm:$0xff] %v4435_v19  ;;  %v8571_v39 = vadd.f32 1.0, %v6016_v55  ;;  %v3760_v25 = vsel %vm3757_vm7, %v3759_v5, %v3755_v23  ;;  %vm3768_vm8 = vweird.f32 %v8550_v28  ;;  %v5193_v45 = vmul.f32 -1.442695, %v3498_v51 }
 0x4d6   : > { %v3764_v46 = vsub.f32 1.0, %v3763_v1  ;;  %v4405_v52 = vmul.f32 %v6113_v6, %v4389_v54  ;;  %vm8613_vm10 = vmor %vm3767_vm9, %vm3768_vm8  ;;  %v3774_v44 = vor.u32 1.1754944e-38, %v3773_v41  ;;  %vm3772_vm11 = vcmp.eq.f32.partialorder %v3771_v36, 8.507059e+37 }
 0x4d7   : > { %v4323_v30 = vpop.f32.mrf.mxu1  ;;  %v3803_v6 = vand.u32 2147483648, %v8571_v39  ;;  %vm3797_vm1 = vweird.f32 %v8571_v39 }
 0x4d8   : > { %v6018_v20 = vpop.eup %6017  ;;  %v4357_v56 = vadd.f32 %v4323_v30, %v3579_v42  ;;  %v3765_v48 = vmul.f32 %v8550_v28, %v3764_v46  ;;  %v3501_v42 = vadd.f32 %v3500_v60, %v6484_v38  ;;  %v3586_v46 = vadd.f32 %v8573_v49, %v6489_v12 }
 0x4d9   : > { %v4420_v61 = vmul.f32 %v6018_v20, %v3730_v53  ;;  %v8577_v4 = vpop.eup %6019  ;;  %v4390_v53 = vsub.f32 1.0, %v3760_v25  ;;  %v3502_v31 = vpop.f32.mrf.mxu2 }
 0x4da   : > { %6023 = vtanh.f32 %v4357_v56  ;;  %v6022_v29 = vpop.eup %6021  ;;  %v3778_v24 = vmul.f32 %v8577_v4, %v8546_v58  ;;  %v3766_v27 = vadd.f32 %v8550_v28, %v3765_v48  ;;  %v8605_v43 = vpop.f32.mrf.mxu0  ;;  %vm3783_vm12 = vweird.f32 %v8577_v4 }
 0x4db   : > { %v4436_v16 = vadd.f32 %v4420_v61, %v4404_v9  ;;  %6025 = vrcp.f32 %v8571_v39  ;;  %v8598_v57 = vadd.f32 1.0, %v6022_v29  ;;  %v4406_v1 = vmul.f32 %v6114_v47, %v4390_v53  ;;  %vm8638_vm14 = vmor %vm3782_vm13, %vm3783_vm12 }
 0x4dc   : > { %6027 = vpow2.f32 %v5192_v10  ;;  %v3779_v18 = vsub.f32 1.0, %v3778_v24  ;;  %v3770_v11 = vsel %vm8613_vm10, %v8550_v28, %v3766_v27  ;;  %v5194_v33 = vmul.f32 -1.442695, %v3501_v42  ;;  %v6115_v24 = vld [vmem:[%s6512_s16 + $0x130] sm:$0xff] }
 0x4dd   : > { %5249 = vst [vmem:[%s6512_s16 + $0x198] sm:$0xff] %v4436_v16  ;;  %v3775_v20 = vsel %vm3772_vm11, %v3774_v44, %v3770_v11  ;;  %v3788_v9 = vand.u32 2147483648, %v8546_v58  ;;  %v3503_v29 = vadd.f32 %v3502_v31, %v6484_v38  ;;  %vm3812_vm5 = vweird.f32 %v8598_v57 }
 0x4de   : > { %v3780_v15 = vmul.f32 %v8577_v4, %v3779_v18  ;;  %v4391_v61 = vsub.f32 1.0, %v3775_v20  ;;  %v3816_v31 = vand.u32 2147483647, %v8598_v57 }
 0x4df   : > { %v4325_v63 = vpop.f32.mrf.mxu1  ;;  %v3789_v49 = vor.u32 1.1754944e-38, %v3788_v9 }
 0x4e0   : > { %v6024_v3 = vpop.eup %6023  ;;  %v4358_v8 = vadd.f32 %v4325_v63, %v3581_v26  ;;  %v3781_v32 = vadd.f32 %v8577_v4, %v3780_v15  ;;  %v4407_v23 = vmul.f32 %v6115_v24, %v4391_v61  ;;  %vm3817_vm7 = vcmp.eq.f32.partialorder %v3816_v31, 8.507059e+37 }
 0x4e1   : > { %v4421_v21 = vmul.f32 %v6024_v3, %v3745_v13  ;;  %v8602_v0 = vpop.eup %6025  ;;  %v3786_v13 = vand.u32 2147483647, %v8546_v58  ;;  %v3505_v51 = vpop.f32.mrf.mxu2 }
 0x4e2   : > { %6029 = vtanh.f32 %v4358_v8  ;;  %v6028_v19 = vpop.eup %6027  ;;  %v3793_v35 = vmul.f32 %v8602_v0, %v8571_v39  ;;  %v3590_v10 = vpop.f32.mrf.mxu0  ;;  %v3785_v54 = vsel %vm8638_vm14, %v8577_v4, %v3781_v32  ;;  %vm3798_vm0 = vweird.f32 %v8602_v0 }
 0x4e3   : > { %v4437_v40 = vadd.f32 %v4421_v21, %v4405_v52  ;;  %6031 = vrcp.f32 %v8598_v57  ;;  %v8625_v30 = vadd.f32 1.0, %v6028_v19  ;;  %vm3787_vm15 = vcmp.eq.f32.partialorder %v3786_v13, 8.507059e+37  ;;  %vm8663_vm2 = vmor %vm3797_vm1, %vm3798_vm0 }
 0x4e4   : > { %6033 = vpow2.f32 %v5193_v45  ;;  %v3794_v28 = vsub.f32 1.0, %v3793_v35  ;;  %v3790_v3 = vsel %vm3787_vm15, %v3789_v49, %v3785_v54  ;;  %v5195_v52 = vmul.f32 -1.442695, %v3503_v29  ;;  %v6116_v35 = vld [vmem:[%s6512_s16 + $0x138] sm:$0xff] }
 0x4e5   : > { %5250 = vst [vmem:[%s6512_s16 + $0x1a0] sm:$0xff] %v4437_v40  ;;  %v4392_v21 = vsub.f32 1.0, %v3790_v3  ;;  %v3589_v40 = vadd.f32 %v8605_v43, %v6489_v12  ;;  %v3506_v19 = vadd.f32 %v3505_v51, %v6484_v38  ;;  %v3804_v43 = vor.u32 1.1754944e-38, %v3803_v6 }
 0x4e6   : > { %v3795_v58 = vmul.f32 %v8602_v0, %v3794_v28  ;;  %vm3827_vm9 = vweird.f32 %v8625_v30 }
 0x4e7   : > { %v4328_v17 = vpop.f32.mrf.mxu1  ;;  %v4408_v11 = vmul.f32 %v6116_v35, %v4392_v21  ;;  %v5196_v47 = vmul.f32 -1.442695, %v3506_v19 }
 0x4e8   : > { %v6030_v55 = vpop.eup %6029  ;;  %v4359_v2 = vadd.f32 %v4328_v17, %v3584_v62  ;;  %v3796_v5 = vadd.f32 %v8602_v0, %v3795_v58 }
 0x4e9   : > { %v4422_v7 = vmul.f32 %v6030_v55, %v3760_v25  ;;  %v8629_v56 = vpop.eup %6031  ;;  %v3801_v25 = vand.u32 2147483647, %v8571_v39  ;;  %v3507_v28 = vpop.f32.mrf.mxu2 }
 0x4ea   : > { %6035 = vtanh.f32 %v4359_v2  ;;  %v6034_v14 = vpop.eup %6033  ;;  %v3808_v34 = vmul.f32 %v8629_v56, %v8598_v57  ;;  %v3800_v45 = vsel %vm8663_vm2, %v8602_v0, %v3796_v5  ;;  %v3593_v50 = vpop.f32.mrf.mxu0  ;;  %vm3813_vm4 = vweird.f32 %v8629_v56 }
 0x4eb   : > { %v4438_v59 = vadd.f32 %v4422_v7, %v4406_v1  ;;  %6037 = vrcp.f32 %v8625_v30  ;;  %v8650_v48 = vadd.f32 1.0, %v6034_v14  ;;  %vm3802_vm3 = vcmp.eq.f32.partialorder %v3801_v25, 8.507059e+37  ;;  %vm8687_vm6 = vmor %vm3812_vm5, %vm3813_vm4 }
 0x4ec   : > { %6039 = vpow2.f32 %v5194_v33  ;;  %v3809_v60 = vsub.f32 1.0, %v3808_v34  ;;  %v3805_v55 = vsel %vm3802_vm3, %v3804_v43, %v3800_v45  ;;  %v3818_v1 = vand.u32 2147483648, %v8598_v57 }
 0x4ed   : > { %5251 = vst [vmem:[%s6512_s16 + $0x1a8] sm:$0xff] %v4438_v59  ;;  %v4393_v7 = vsub.f32 1.0, %v3805_v55  ;;  %v3508_v14 = vadd.f32 %v3507_v28, %v6484_v38  ;;  %v3833_v38 = vand.u32 2147483648, %v8625_v30  ;;  %vm3842_vm13 = vweird.f32 %v8650_v48 }
 0x4ee   : > { %v3810_v39 = vmul.f32 %v8629_v56, %v3809_v60  ;;  %v3594_v60 = vadd.f32 %v3593_v50, %v6489_v12 }
 0x4ef   : > { %v4330_v37 = vpop.f32.mrf.mxu1  ;;  %v5197_v24 = vmul.f32 -1.442695, %v3508_v14  ;;  %v3834_v21 = vor.u32 1.1754944e-38, %v3833_v38 }
 0x4f0   : > { %v6036_v26 = vpop.eup %6035  ;;  %v4360_v22 = vadd.f32 %v4330_v37, %v3586_v46  ;;  %v3811_v44 = vadd.f32 %v8629_v56, %v3810_v39  ;;  %v3819_v46 = vor.u32 1.1754944e-38, %v3818_v1  ;;  %v6119_v1 = vld [vmem:[%s6512_s16 + $0x150] sm:$0xff] }
 0x4f1   : > { %v4423_v63 = vmul.f32 %v6036_v26, %v3775_v20  ;;  %v8654_v8 = vpop.eup %6037  ;;  %v3591_v20 = vadd.f32 %v3590_v10, %v6489_v12  ;;  %v6117_v10 = vld [vmem:[%s6512_s16 + $0x140] sm:$0xff] }
 0x4f2   : > { %6041 = vtanh.f32 %v4360_v22  ;;  %v6040_v18 = vpop.eup %6039  ;;  %v3823_v41 = vmul.f32 %v8654_v8, %v8625_v30  ;;  %v3815_v9 = vsel %vm8687_vm6, %v8629_v56, %v3811_v44  ;;  %v4409_v34 = vmul.f32 %v6117_v10, %v4393_v7  ;;  %v3595_v26 = vpop.f32.mrf.mxu0 }
 0x4f3   : > { %v4439_v4 = vadd.f32 %v4423_v63, %v4407_v23  ;;  %6043 = vrcp.f32 %v8650_v48  ;;  %v8675_v15 = vadd.f32 1.0, %v6040_v18  ;;  %v3820_v58 = vsel %vm3817_vm7, %v3819_v46, %v3815_v9 }
 0x4f4   : > { %6045 = vpow2.f32 %v5195_v52  ;;  %v3824_v0 = vsub.f32 1.0, %v3823_v41  ;;  %vm3828_vm8 = vweird.f32 %v8654_v8  ;;  %v4394_v23 = vsub.f32 1.0, %v3820_v58 }
 0x4f5   : > { %5252 = vst [vmem:[%s6512_s16 + $0x1b0] sm:$0xff] %v4439_v4  ;;  %v3831_v63 = vand.u32 2147483647, %v8625_v30  ;;  %vm3829_vm10 = vmor %vm3827_vm9, %vm3828_vm8  ;;  %v6118_v30 = vld [vmem:[%s6512_s16 + $0x148] sm:$0xff]  ;;  %v3596_v50 = vadd.f32 %v3595_v26, %v6489_v12  ;;  %vm3857_vm1 = vweird.f32 %v8675_v15  ;;  %v6120_v26 = vld [vmem:[%s6512_s16 + $0x158] sm:$0xff] }
 0x4f6   : > { %v3825_v57 = vmul.f32 %v8654_v8, %v3824_v0  ;;  %v4410_v18 = vmul.f32 %v6118_v30, %v4394_v23 }
 0x4f7   : > { %v4333_v53 = vpop.f32.mrf.mxu1  ;;  %vm3832_vm11 = vcmp.eq.f32.partialorder %v3831_v63, 8.507059e+37 }
 0x4f8   : > { %v6042_v36 = vpop.eup %6041  ;;  %v4361_v62 = vadd.f32 %v4333_v53, %v3589_v40  ;;  %v3826_v22 = vadd.f32 %v8654_v8, %v3825_v57 }
 0x4f9   : > { %v4424_v17 = vmul.f32 %v6042_v36, %v3790_v3  ;;  %v8679_v2 = vpop.eup %6043  ;;  %v3848_v36 = vand.u32 2147483648, %v8650_v48 }
 0x4fa   : > { %6047 = vtanh.f32 %v4361_v62  ;;  %v6046_v32 = vpop.eup %6045  ;;  %v3838_v33 = vmul.f32 %v8679_v2, %v8650_v48  ;;  %v3830_v5 = vsel %vm3829_vm10, %v8654_v8, %v3826_v22  ;;  %vm3843_vm12 = vweird.f32 %v8679_v2  ;;  %v3598_v19 = vpop.f32.mrf.mxu0 }
 0x4fb   : > { %v4440_v42 = vadd.f32 %v4424_v17, %v4408_v11  ;;  %6049 = vrcp.f32 %v8675_v15  ;;  %v8699_v37 = vadd.f32 1.0, %v6046_v32  ;;  %v3835_v41 = vsel %vm3832_vm11, %v3834_v21, %v3830_v5  ;;  %vm3844_vm14 = vmor %vm3842_vm13, %vm3843_vm12 }
 0x4fc   : > { %6051 = vpow2.f32 %v5196_v47  ;;  %v3839_v56 = vsub.f32 1.0, %v3838_v33  ;;  %v4395_v43 = vsub.f32 1.0, %v3835_v41  ;;  %v3846_v62 = vand.u32 2147483647, %v8650_v48 }
 0x4fd   : > { %5253 = vst [vmem:[%s6512_s16 + $0x1b8] sm:$0xff] %v4440_v42  ;;  %v3849_v44 = vor.u32 1.1754944e-38, %v3848_v36  ;;  %v3863_v33 = vand.u32 2147483648, %v8675_v15  ;;  %v3599_v57 = vadd.f32 %v3598_v19, %v6489_v12  ;;  %v3878_v23 = vand.u32 2147483648, %v8699_v37 }
 0x4fe   : > { %v3840_v6 = vmul.f32 %v8679_v2, %v3839_v56  ;;  %v4411_v48 = vmul.f32 %v6119_v1, %v4395_v43  ;;  %vm3847_vm15 = vcmp.eq.f32.partialorder %v3846_v62, 8.507059e+37  ;;  %vm3872_vm5 = vweird.f32 %v8699_v37 }
 0x4ff   : > { %v4335_v61 = vpop.f32.mrf.mxu1  ;;  %v3879_v21 = vor.u32 1.1754944e-38, %v3878_v23 }
 0x500   : > { %v6048_v13 = vpop.eup %6047  ;;  %v4362_v16 = vadd.f32 %v4335_v61, %v3591_v20  ;;  %v3841_v8 = vadd.f32 %v8679_v2, %v3840_v6  ;;  %v3861_v61 = vand.u32 2147483647, %v8675_v15 }
 0x501   : > { %v4425_v54 = vmul.f32 %v6048_v13, %v3805_v55  ;;  %v8703_v29 = vpop.eup %6049 }
 0x502   : > { %6053 = vtanh.f32 %v4362_v16  ;;  %v6052_v3 = vpop.eup %6051  ;;  %v3853_v4 = vmul.f32 %v8703_v29, %v8675_v15  ;;  %v3845_v17 = vsel %vm3844_vm14, %v8679_v2, %v3841_v8  ;;  %vm3858_vm0 = vweird.f32 %v8703_v29  ;;  %v3600_v13 = vpop.f32.mrf.mxu0 }
 0x503   : > { %v4441_v49 = vadd.f32 %v4425_v54, %v4409_v34  ;;  %6055 = vrcp.f32 %v8699_v37  ;;  %v8716_v27 = vadd.f32 1.0, %v6052_v3  ;;  %v3850_v20 = vsel %vm3847_vm15, %v3849_v44, %v3845_v17  ;;  %vm3859_vm2 = vmor %vm3857_vm1, %vm3858_vm0 }
 0x504   : > { %6057 = vpow2.f32 %v5197_v24  ;;  %v3854_v45 = vsub.f32 1.0, %v3853_v4  ;;  %v4396_v9 = vsub.f32 1.0, %v3850_v20  ;;  %v3864_v54 = vor.u32 1.1754944e-38, %v3863_v33 }
 0x505   : > { %5254 = vst [vmem:[%s6512_s16 + $0x1c0] sm:$0xff] %v4441_v49  ;;  %vm3862_vm3 = vcmp.eq.f32.partialorder %v3861_v61, 8.507059e+37  ;;  %v3876_v3 = vand.u32 2147483647, %v8699_v37  ;;  %vm3887_vm9 = vweird.f32 %v8716_v27  ;;  %v3891_v19 = vand.u32 2147483647, %v8716_v27 }
 0x506   : > { %v3855_v0 = vmul.f32 %v8703_v29, %v3854_v45  ;;  %v4412_v15 = vmul.f32 %v6120_v26, %v4396_v9 }
 0x507   : > { %v4338_v51 = vpop.f32.mrf.mxu1  ;;  %vm3877_vm7 = vcmp.eq.f32.partialorder %v3876_v3, 8.507059e+37  ;;  %vm3892_vm11 = vcmp.eq.f32.partialorder %v3891_v19, 8.507059e+37 }
 0x508   : > { %v6054_v52 = vpop.eup %6053  ;;  %v4363_v25 = vadd.f32 %v4338_v51, %v3594_v60  ;;  %v3856_v32 = vadd.f32 %v8703_v29, %v3855_v0  ;;  %v3601_v60 = vadd.f32 %v3600_v13, %v6489_v12  ;;  %v6122_v0 = vld [vmem:[%s6512_s16 + $0x168] sm:$0xff] }
 0x509   : > { %v4426_v40 = vmul.f32 %v6054_v52, %v3820_v58  ;;  %v8720_v39 = vpop.eup %6055 }
 0x50a   : > { %6059 = vtanh.f32 %v4363_v25  ;;  %v6058_v35 = vpop.eup %6057  ;;  %v3868_v11 = vmul.f32 %v8720_v39, %v8699_v37  ;;  %v3860_v16 = vsel %vm3859_vm2, %v8703_v29, %v3856_v32  ;;  %vm3873_vm4 = vweird.f32 %v8720_v39  ;;  %v3603_v30 = vpop.f32.mrf.mxu0 }
 0x50b   : > { %v4442_v53 = vadd.f32 %v4426_v40, %v4410_v18  ;;  %6061 = vrcp.f32 %v8716_v27  ;;  %v8733_v31 = vadd.f32 1.0, %v6058_v35  ;;  %v3865_v49 = vsel %vm3862_vm3, %v3864_v54, %v3860_v16  ;;  %vm3874_vm6 = vmor %vm3872_vm5, %vm3873_vm4  ;;  %v6121_v18 = vld [vmem:[%s6512_s16 + $0x160] sm:$0xff] }
 0x50c   : > { %v3869_v28 = vsub.f32 1.0, %v3868_v11  ;;  %v4397_v63 = vsub.f32 1.0, %v3865_v49  ;;  %v3604_v43 = vadd.f32 %v3603_v30, %v6489_v12 }
 0x50d   : > { %5255 = vst [vmem:[%s6512_s16 + $0x1c8] sm:$0xff] %v4442_v53  ;;  %vm3902_vm13 = vweird.f32 %v8733_v31 }
 0x50e   : > { %v3870_v10 = vmul.f32 %v8720_v39, %v3869_v28  ;;  %v4413_v40 = vmul.f32 %v6121_v18, %v4397_v63  ;;  %v3906_v28 = vand.u32 2147483647, %v8733_v31 }
 0x50f   : > { %v4340_v55 = vpop.f32.mrf.mxu1 }
 0x510   : > { %v6060_v42 = vpop.eup %6059  ;;  %v4364_v47 = vadd.f32 %v4340_v55, %v3596_v50  ;;  %v3871_v24 = vadd.f32 %v8720_v39, %v3870_v10  ;;  %vm3907_vm15 = vcmp.eq.f32.partialorder %v3906_v28, 8.507059e+37  ;;  %v6124_v10 = vld [vmem:[%s6512_s16 + $0x178] sm:$0xff] }
 0x511   : > { %v4427_v7 = vmul.f32 %v6060_v42, %v3835_v41  ;;  %v8737_v2 = vpop.eup %6061 }
 0x512   : > { %6063 = vtanh.f32 %v4364_v47  ;;  %v3883_v46 = vmul.f32 %v8737_v2, %v8716_v27  ;;  %v3875_v5 = vsel %vm3874_vm6, %v8720_v39, %v3871_v24  ;;  %vm3888_vm8 = vweird.f32 %v8737_v2  ;;  %v3605_v1 = vpop.f32.mrf.mxu0 }
 0x513   : > { %v4443_v59 = vadd.f32 %v4427_v7, %v4411_v48  ;;  %6065 = vrcp.f32 %v8733_v31  ;;  %v3880_v37 = vsel %vm3877_vm7, %v3879_v21, %v3875_v5  ;;  %v3893_v39 = vand.u32 2147483648, %v8716_v27  ;;  %vm3889_vm10 = vmor %vm3887_vm9, %vm3888_vm8 }
 0x514   : > { %v3884_v22 = vsub.f32 1.0, %v3883_v46  ;;  %v4398_v36 = vsub.f32 1.0, %v3880_v37  ;;  %v3908_v7 = vand.u32 2147483648, %v8733_v31 }
 0x515   : > { %5256 = vst [vmem:[%s6512_s16 + $0x1d0] sm:$0xff] %v4443_v59  ;;  %v3894_v17 = vor.u32 1.1754944e-38, %v3893_v39  ;;  %v3606_v59 = vadd.f32 %v3605_v1, %v6489_v12 }
 0x516   : > { %v3885_v6 = vmul.f32 %v8737_v2, %v3884_v22  ;;  %v4414_v42 = vmul.f32 %v6122_v0, %v4398_v36  ;;  %v3909_v9 = vor.u32 1.1754944e-38, %v3908_v7 }
 0x517   : > { %v4343_v14 = vpop.f32.mrf.mxu1 }
 0x518   : > { %v6064_v34 = vpop.eup %6063  ;;  %v4365_v58 = vadd.f32 %v4343_v14, %v3599_v57  ;;  %v3886_v8 = vadd.f32 %v8737_v2, %v3885_v6  ;;  %v6123_v57 = vld [vmem:[%s6512_s16 + $0x170] sm:$0xff] }
 0x519   : > { %v4428_v56 = vmul.f32 %v6064_v34, %v3850_v20  ;;  %v8752_v29 = vpop.eup %6065 }
 0x51a   : > { %6067 = vtanh.f32 %v4365_v58  ;;  %v3898_v4 = vmul.f32 %v8752_v29, %v8733_v31  ;;  %v3890_v62 = vsel %vm3889_vm10, %v8737_v2, %v3886_v8  ;;  %vm3903_vm12 = vweird.f32 %v8752_v29 }
 0x51b   : > { %v4444_v38 = vadd.f32 %v4428_v56, %v4412_v15  ;;  %v3895_v47 = vsel %vm3892_vm11, %v3894_v17, %v3890_v62  ;;  %vm3904_vm14 = vmor %vm3902_vm13, %vm3903_vm12 }
 0x51c   : > { %v3899_v45 = vsub.f32 1.0, %v3898_v4  ;;  %v4399_v20 = vsub.f32 1.0, %v3895_v47 }
 0x51d   : > { %5257 = vst [vmem:[%s6512_s16 + $0x1d8] sm:$0xff] %v4444_v38 }
 0x51e   : > { %v3900_v35 = vmul.f32 %v8752_v29, %v3899_v45  ;;  %v4415_v13 = vmul.f32 %v6123_v57, %v4399_v20 }
 0x51f   : > { %v4345_v51 = vpop.f32.mrf.mxu1 }
 0x520   : > { %v6068_v52 = vpop.eup %6067  ;;  %v4366_v25 = vadd.f32 %v4345_v51, %v3601_v60  ;;  %v3901_v48 = vadd.f32 %v8752_v29, %v3900_v35 }
 0x521   : > { %v4429_v41 = vmul.f32 %v6068_v52, %v3865_v49 }
 0x522   : > { %6069 = vtanh.f32 %v4366_v25  ;;  %v3905_v32 = vsel %vm3904_vm14, %v8752_v29, %v3901_v48 }
 0x523   : > { %v4445_v53 = vadd.f32 %v4429_v41, %v4413_v40  ;;  %v3910_v16 = vsel %vm3907_vm15, %v3909_v9, %v3905_v32 }
 0x524   : > { %v4400_v31 = vsub.f32 1.0, %v3910_v16 }
 0x525   : > { %5258 = vst [vmem:[%s6512_s16 + $0x1e0] sm:$0xff] %v4445_v53 }
 0x526   : > { %v4416_v34 = vmul.f32 %v6124_v10, %v4400_v31 }
 0x527   : > { %v4348_v50 = vpop.f32.mrf.mxu1 }
 0x528   : > { %v6070_v11 = vpop.eup %6069  ;;  %v4367_v55 = vadd.f32 %v4348_v50, %v3604_v43 }
 0x529   : > { %v4430_v44 = vmul.f32 %v6070_v11, %v3880_v37 }
 0x52a   : > { %6071 = vtanh.f32 %v4367_v55 }
 0x52b   : > { %v4446_v27 = vadd.f32 %v4430_v44, %v4414_v42 }
 0x52d   : > { %5259 = vst [vmem:[%s6512_s16 + $0x1e8] sm:$0xff] %v4446_v27 }
 0x52f   : > { %v4350_v2 = vpop.f32.mrf.mxu1 }
 0x530   : > { %v6072_v33 = vpop.eup %6071  ;;  %v4368_v61 = vadd.f32 %v4350_v2, %v3606_v59 }
 0x531   : > { %v4431_v46 = vmul.f32 %v6072_v33, %v3895_v47 }
 0x532   : > { %6073 = vtanh.f32 %v4368_v61 }
 0x533   : > { %v4447_v14 = vadd.f32 %v4431_v46, %v4415_v13 }
 0x535   : > { %5260 = vst [vmem:[%s6512_s16 + $0x1f0] sm:$0xff] %v4447_v14 }
 0x538   : > { %v6074_v12 = vpop.eup %6073 }
 0x539   : > { %v4432_v54 = vmul.f32 %v6074_v12, %v3910_v16 }
 0x53b   : > { %v4448_v58 = vadd.f32 %v4432_v54, %v4416_v34 }
 0x53d   : > { %5261 = vst [vmem:[%s6512_s16 + $0x1f8] sm:$0xff] %v4448_v58 }
 0x53e   : > { %s5388_s13 = sshll.u32 %s6358_s22, 7  ;;  %s4489_s12 = sshll.u32 %s6512_s16, 4  ;;  %s4490_s12 = int_to_ptr.vmem [resolvable:$true] %s4489_s12 }
 0x53f   : > { %s4478_s7 = scalar_lea.hbm %s8829_s5, %s5388_s13  ;;  %s6300_s27 = smov 2048  }
 0x540   : > { %s4491_s8 = sshll.u32 %s4478_s7, 4  ;;  %5419 = sst [smem:[#allocation12]] (%p6422_p3), %s6300_s27  ;;  %s4492_s8 = int_to_ptr.hbm [resolvable:$true] %s4491_s8 }
 0x541   : > { %s6301_s17 = smov 4096   ;;  %s6302_s11 = smov 16  }
 0x542   : > { %5420 = sst [smem:[#allocation12 + $0x1]] (%p6422_p3), %s6301_s17  ;;  %s6303_s22 = smov 128  }
 0x543   : > { %5421 = sst [smem:[#allocation12 + $0x2]] (%p6422_p3), %s6302_s11  ;;  %s6304_s24 = smov 8  }
 0x544   : > { %5422 = sst [smem:[#allocation12 + $0x3]] (%p6422_p3), %s6303_s22  ;;  %s6305_s29 = smov [#allocation11]  }
 0x545   : > { %5423 = sst [smem:[#allocation12 + $0x4]] (%p6422_p3), %s6303_s22  ;;  %s6306_s28 = smov 0  }
 0x546   : > { %5424 = sst [smem:[#allocation12 + $0x5]] (%p6422_p3), %s6304_s24 }
 0x547   : > { %5425 = dma.general (%p6422_p3), %s4490_s12, 8192, %s4492_s8, %s4467_s6, %s6305_s29, [#allocation12], %s6306_s28, 0  }
 0x548 PF: > { %s4519_s16 = sand.u32 1, %s6279_s18   ;;  %p8980_p1 = scmp.ge.s32.totalorder %s6291_s21, 2 }
 0x549   : > { %s4520_s23 = scalar_lea.sflag [#allocation4], %s4519_s16 }
 0x54a   : > { %p5442_p4 = pnand %p8980_p1, %p6372_p6 }
 0x54c   : > { %p5443_p8 = pneg %p5442_p4 }
 0x54e   : > { %6274 = dma.done.wait (%p5443_p8), %s4520_s23, 8192  }
 0x54f   : > { %6276 = vsyncadd (%p5443_p8), %s4520_s23, 4294959104  ;;  %p20_p11 = scmp.ge.s32.totalorder %s6409_s30, 4   ;;  %s8981_s18 = smov %s6283_s19 }
 0x550   : > { %s8982_s19 = smov %s6287_s20  ;;  %s8983_s20 = smov %s6418_s9 }
 0x551   : > { %s8984_s21 = smov %s6409_s30  ;;  %22 = sbr.rel (!%p20_p11) target bundleno = 7 (0x7), region = 105 }
 0x556   :  { %4526 = vsyncpa [#allocation3], 1 }
 0x557   :  { %4528 = vsyncpa [#allocation3 + $0x1], 1 }
 0x558   :  { %4529 = vsyncpa [#allocation6], 1 }
 0x559   :  { %4530 = vsyncpa [#allocation9], 1 }
 0x55a   :  { %4531 = vsyncpa [#allocation4], 1 }
 0x55b   :  { %4533 = vsyncpa [#allocation4 + $0x1], 1 }

// kernel: tpu_custom_call.1
= control target key start
LH: loop header
LB: loop body
LE: loop exit
PB: predicated region body
PF: predicated region fallthrough
CT: control target
= control target key end

     0   :  { %10 = vsyncpa [#allocation3], 0  ;;  %s8824_s0 = inlined_call_operand.hbm [shape: bf16[256,128], index: 0, kind: input, shape index: {}]   ;;  %s8825_s1 = inlined_call_operand.hbm [shape: bf16[128,384], index: 1, kind: input, shape index: {}]   ;;  %s8826_s2 = inlined_call_operand.hbm [shape: bf16[128,384], index: 2, kind: input, shape index: {}]   ;;  %s8827_s3 = inlined_call_operand.hbm [shape: bf16[128,128], index: 3, kind: input, shape index: {}]   ;;  %s8828_s4 = inlined_call_operand.vmem [shape: f32[1,384], index: 4, kind: input, shape index: {}]   ;;  %s8829_s5 = inlined_call_operand.hbm [shape: f32[4,256,128], index: 5, kind: output, shape index: {}]  }
   0x1   :  { %12 = vsyncpa [#allocation3 + $0x1], 0 }
   0x2   :  { %13 = vsyncpa [#allocation6], 0 }
   0x3   :  { %14 = vsyncpa [#allocation9], 0 }
   0x4   :  { %15 = vsyncpa [#allocation4], 0 }
   0x5   :  { %17 = vsyncpa [#allocation4 + $0x1], 0  ;;  %s6337_s18 = smov 0   ;;  %s6339_s19 = smov 0  }
   0x6   :  { %s6341_s20 = smov 0   ;;  %s6343_s21 = smov 0  }
   0x7 LB: > { %s6358_s22 = sadd.s32 4294967295, %s6291_s21   ;;  %s4607_s23 = sadd.s32 4294967294, %s6291_s21   ;;  %s6291_s21 = sphi %s6343_s21, %s8984_s21   ;;  %s6287_s20 = sphi %s6341_s20, %s8983_s20   ;;  %s6283_s19 = sphi %s6339_s19, %s8982_s19   ;;  %s6279_s18 = sphi %s6337_s18, %s8981_s18  }
   0x8   : > { %p43_p0 = scmp.ne.s32.totalorder %s6283_s19, %s6279_s18  ;;  %p44_p1 = scmp.eq.s32.totalorder %s6358_s22, 0 }
   0x9   : > { %p151_p2 = scmp.eq.s32.totalorder %s6358_s22, 1  ;;  %p157_p3 = scmp.eq.s32.totalorder %s4607_s23, 1 }
   0xa   : > { %p6367_p4 = por %p44_p1, %p43_p0  ;;  %p4608_p5 = scmp.ge.s32.totalorder %s6291_s21, 1 }
   0xb   : > { %p6372_p6 = por %p157_p3, %p43_p0  ;;  %p164_p7 = scmp.lt.s32.totalorder %s6291_s21, 3 }
   0xc   : > { %s175_s28 = sshll.u32 %s8825_s1, 4  ;;  %s6293_s30 = smov [#allocation5]   ;;  %s176_s28 = int_to_ptr.hbm [resolvable:$true] %s175_s28 }
   0xd   : > { %p6380_p8 = pnand %p4608_p5, %p164_p7  ;;  %s177_s6 = sshll.u32 %s6293_s30, 4  ;;  %s178_s6 = int_to_ptr.vmem [resolvable:$true] %s177_s6 }
   0xe   : > { %s189_s10 = sshll.u32 %s8826_s2, 4  ;;  %s6294_s11 = smov 192   ;;  %s190_s10 = int_to_ptr.hbm [resolvable:$true] %s189_s10 }
   0xf   : > { %p5427_p9 = pneg %p6380_p8  ;;  %s6295_s12 = smov 12  }
  0x10   : > { %s6296_s13 = smov [#allocation7]   ;;  %s203_s17 = sshll.u32 %s8827_s3, 4  ;;  %s204_s17 = int_to_ptr.hbm [resolvable:$true] %s203_s17 }
  0x11   : > { %p6388_p10 = pnand %p5427_p9, %p44_p1  ;;  %s191_s14 = sshll.u32 %s6296_s13, 4  ;;  %s192_s14 = int_to_ptr.vmem [resolvable:$true] %s191_s14 }
  0x12   : > { %s6297_s23 = smov [#allocation8]   ;;  %s8830_s27 = smov 64  }
  0x13   : > { %5430 = dma.hbm_to_vmem [thread:$0]  (!%p6388_p10), %s176_s28, 3072, %s178_s6, [#allocation6], %s6294_s11, %s6294_s11, %s6295_s12  }
  0x14   : > { %5433 = dma.hbm_to_vmem [thread:$0]  (!%p6388_p10), %s190_s10, 3072, %s192_s14, [#allocation6], %s6294_s11, %s6294_s11, %s6295_s12  }
  0x15   : > { %s205_s26 = sshll.u32 %s6297_s23, 4  ;;  %s6299_s28 = smov 4   ;;  %s206_s26 = int_to_ptr.vmem [resolvable:$true] %s205_s26 }
  0x16   : > { %5436 = dma.hbm_to_vmem [thread:$0]  (!%p6388_p10), %s204_s17, 1024, %s206_s26, [#allocation9], %s8830_s27, %s8830_s27, %s6299_s28  }
  0x17   : > { %s6409_s30 = sadd.s32 1, %s6291_s21   ;;  %s30_s8 = sadd.s32 1, %s6287_s20 }
  0x18   : > { %s27_s6 = ssub.s32 %s6291_s21, %s6409_s30  ;;  %p37_p13 = scmp.ne.s32.totalorder %s6287_s20, %s6283_s19 }
  0x19   : > { %p28_p12 = scmp.eq.s32.totalorder %s27_s6, 0  ;;  %p38_p0 = scmp.eq.s32.totalorder %s6291_s21, 0 }
  0x1a   : > { %p6422_p3 = por %p151_p2, %p37_p13  ;;  %p5448_p5 = scmp.lt.s32.totalorder %s6291_s21, 2 }
  0x1b   : > { %s6418_s9 = scalar_select %p28_p12, %s6287_s20, %s30_s8  }
  0x1c   : > { %s222_s7 = sand.u32 1, %s6287_s20   ;;  %s5267_s11 = sshll.u32 %s6291_s21, 6 }
  0x1d   : > { %p39_p7 = por %p38_p0, %p37_p13  ;;  %s4613_s12 = sshll.u32 %s222_s7, 6 }
  0x1e   : > { %s231_s15 = scalar_lea.hbm %s8824_s0, %s5267_s11  ;;  %s226_s17 = scalar_lea.vmem [#allocation2], %s4613_s12 }
  0x1f   : > { %s232_s16 = sshll.u32 %s231_s15, 4  ;;  %s234_s23 = sshll.u32 %s226_s17, 4  ;;  %s233_s16 = int_to_ptr.hbm [resolvable:$true] %s232_s16  ;;  %s235_s23 = int_to_ptr.vmem [resolvable:$true] %s234_s23 }
  0x20   : > { %p6432_p9 = pnand %p5448_p5, %p39_p7  ;;  %s223_s6 = scalar_lea.sflag [#allocation3], %s222_s7 }
  0x21   : > { %s6215_s8 = sshra.s32 %s233_s16, 4  ;;  %s6222_s12 = scalar_lea.hbm %s8824_s0, 128  ;;  %s6216_s8 = int_to_ptr.hbm [resolvable:$true] %s6215_s8 }
  0x22   : > { %s6217_s27 = scalar_lea.hbm %s6216_s8, 64  ;;  %p6219_p10 = pneg %p6432_p9 }
  0x23   : > { %p6218_p2 = scmp.ne.s32.totalorder %s6216_s8, %s6217_s27  ;;  %p6223_p0 = scmp.lt.s32.totalorder %s6216_s8, %s8824_s0 }
  0x24   : > { %p6224_p5 = scmp.lt.s32.totalorder %s6222_s12, %s6217_s27 }
  0x25   : > { %p6220_p12 = pnand %p6219_p10, %p6218_p2 }
  0x26   : > { %p6225_p7 = por %p6224_p5, %p6223_p0 }
  0x27   : > { %p6221_p13 = pneg %p6220_p12 }
  0x29   : > { %p6226_p11 = pnand %p6225_p7, %p6221_p13 }
  0x2b   : > { %6229 = shalt.err (!%p6226_p11)
}
  0x2c   : > { %s8837_s7 = smov 64   ;;  %246 = sbr.rel (%p6380_p8) target bundleno = 1352 (0x548), region = 40 }
  0x2d   : > { %5440 = dma.hbm_to_vmem [thread:$0]  (!%p6432_p9), %s233_s16, 1024, %s235_s23, %s223_s6, %s8837_s7, %s8837_s7, %s6299_s28  }
  0x2e   : > { %s6452_s17 = sand.u32 (!%p6380_p8), 1, %s6283_s19  }
  0x2f   : > { %s4617_s8 = sshll.u32 (!%p6380_p8), %s6452_s17, 6  ;;  %s249_s27 = scalar_lea.sflag (!%p6380_p8), [#allocation3], %s6452_s17 }
  0x30   : > { %s6456_s11 = scalar_lea.vmem (!%p6380_p8), [#allocation2], %s4617_s8 }
  0x31   : > { %6262 = dma.done.wait (%p6367_p4), %s249_s27, 1024  }
  0x32   : > { %6264 = vsyncadd (%p6367_p4), %s249_s27, 4294966272 }
  0x33   : > { %6266 = dma.done.wait (%p44_p1), [#allocation6], 6144  }
  0x34   : > { %6268 = vsyncadd (%p44_p1), [#allocation6], 4294961152 }
  0x35   : > { %6270 = dma.done.wait (%p44_p1), [#allocation9], 1024  }
  0x36   : > { %6272 = vsyncadd (%p44_p1), [#allocation9], 4294966272  ;;  %v4712_v0 = vld [vmem:[#allocation5 + $0xa8] sm:$0xf]  ;;  %v5290_v1 = vld [vmem:[#allocation5 + $0xb0] sm:$0xf0] }
  0x37   : > { %v4704_v2 = vld [vmem:[#allocation5 + $0x90] sm:$0xf]  ;;  %v4713_v3 = vor.u32 %v5290_v1, %v4712_v0  ;;  %v5288_v4 = vld [vmem:[#allocation5 + $0x98] sm:$0xf0]  ;;  %v4696_v7 = vld [vmem:[#allocation5 + $0x78] sm:$0xf] }
  0x38   : > { %v4716_v5 = vld [vmem:[#allocation5 + $0xb0] sm:$0xf]  ;;  %v4705_v6 = vor.u32 %v5288_v4, %v4704_v2  ;;  %v5291_v8 = vld [vmem:[#allocation5 + $0xb8] sm:$0xf0]  ;;  %v5286_v9 = vld [vmem:[#allocation5 + $0x80] sm:$0xf0] }
  0x39   : > { %497 = vmatpush.bf16.msra.mxu0 %v4713_v3  ;;  %5389 = vmatpush.bf16.msra.mxu2 %v4713_v3  ;;  %v4717_v10 = vor.u32 %v5291_v8, %v4716_v5  ;;  %v4708_v11 = vld [vmem:[#allocation5 + $0x98] sm:$0xf]  ;;  %v5289_v12 = vld [vmem:[#allocation5 + $0xa0] sm:$0xf0]  ;;  %v4697_v14 = vor.u32 %v5286_v9, %v4696_v7  ;;  %v4700_v15 = vld [vmem:[#allocation5 + $0x80] sm:$0xf] }
  0x3a   : > { %v4709_v13 = vor.u32 %v5289_v12, %v4708_v11  ;;  %v5287_v16 = vld [vmem:[#allocation5 + $0x88] sm:$0xf0]  ;;  %v4688_v17 = vld [vmem:[#allocation5 + $0x60] sm:$0xf]  ;;  %v4692_v21 = vld [vmem:[#allocation5 + $0x68] sm:$0xf] }
  0x3b   : > { %546 = vmatpush.bf16.msra.mxu1 %v4717_v10  ;;  %5397 = vmatpush.bf16.msra.mxu3 %v4717_v10  ;;  %v5284_v18 = vld [vmem:[#allocation5 + $0x68] sm:$0xf0]  ;;  %v4701_v19 = vor.u32 %v5287_v16, %v4700_v15  ;;  %v5285_v22 = vld [vmem:[#allocation5 + $0x70] sm:$0xf0]  ;;  %v4680_v23 = vld [vmem:[#allocation5 + $0x48] sm:$0xf] }
  0x3c   : > { %v4689_v20 = vor.u32 %v5284_v18, %v4688_v17  ;;  %v5282_v24 = vld [vmem:[#allocation5 + $0x50] sm:$0xf0]  ;;  %v4693_v25 = vor.u32 %v5285_v22, %v4692_v21  ;;  %v4684_v27 = vld [vmem:[#allocation5 + $0x50] sm:$0xf]  ;;  %v5283_v28 = vld [vmem:[#allocation5 + $0x58] sm:$0xf0] }
  0x3d   : > { %498 = vmatpush.bf16.msra.mxu0 %v4705_v6  ;;  %5390 = vmatpush.bf16.msra.mxu2 %v4705_v6  ;;  %v4681_v26 = vor.u32 %v5282_v24, %v4680_v23  ;;  %v4672_v29 = vld [vmem:[#allocation5 + $0x30] sm:$0xf]  ;;  %v5280_v30 = vld [vmem:[#allocation5 + $0x38] sm:$0xf0]  ;;  %v4685_v31 = vor.u32 %v5283_v28, %v4684_v27  ;;  %v4676_v33 = vld [vmem:[#allocation5 + $0x38] sm:$0xf] }
  0x3e   : > { %v4673_v32 = vor.u32 %v5280_v30, %v4672_v29  ;;  %v5281_v34 = vld [vmem:[#allocation5 + $0x40] sm:$0xf0]  ;;  %v4664_v35 = vld [vmem:[#allocation5 + $0x18] sm:$0xf]  ;;  %v4668_v39 = vld [vmem:[#allocation5 + $0x20] sm:$0xf] }
  0x3f   : > { %547 = vmatpush.bf16.msra.mxu1 %v4709_v13  ;;  %5398 = vmatpush.bf16.msra.mxu3 %v4709_v13  ;;  %v5278_v36 = vld [vmem:[#allocation5 + $0x20] sm:$0xf0]  ;;  %v4677_v37 = vor.u32 %v5281_v34, %v4676_v33  ;;  %v5279_v40 = vld [vmem:[#allocation5 + $0x28] sm:$0xf0]  ;;  %v4656_v41 = vld [vmem:[#allocation5] sm:$0xf] }
  0x40   : > { %v4665_v38 = vor.u32 %v5278_v36, %v4664_v35  ;;  %v5276_v42 = vld [vmem:[#allocation5 + $0x8] sm:$0xf0]  ;;  %v4669_v43 = vor.u32 %v5279_v40, %v4668_v39  ;;  %v4660_v45 = vld [vmem:[#allocation5 + $0x8] sm:$0xf]  ;;  %v5277_v46 = vld [vmem:[#allocation5 + $0x10] sm:$0xf0] }
  0x41   : > { %499 = vmatpush.bf16.msra.mxu0 %v4697_v14  ;;  %5391 = vmatpush.bf16.msra.mxu2 %v4697_v14  ;;  %v4657_v44 = vor.u32 %v5276_v42, %v4656_v41  ;;  %v5268_v47 = vld [vmem:[%s6456_s11] sm:$0xff]  ;;  %v4661_v48 = vor.u32 %v5277_v46, %v4660_v45  ;;  %v5269_v50 = vld [vmem:[%s6456_s11 + $0x8] sm:$0xff]  ;;  %v4822_v53 = vld [vmem:[#allocation7 + $0xb4] sm:$0xf0]  ;;  %s4621_s28 = sshll.u32 %s6452_s17, 9  ;;  %s4467_s6 = scalar_lea.sflag [#allocation4], %s6452_s17 }
  0x42   : > { %v5272_v49 = vld [vmem:[%s6456_s11 + $0x20] sm:$0xff]  ;;  %v5273_v51 = vld [vmem:[%s6456_s11 + $0x28] sm:$0xff]  ;;  %v5310_v54 = vld [vmem:[#allocation7 + $0x94] sm:$0xf]  ;;  %s6512_s16 = scalar_lea.vmem [#allocation10], %s4621_s28 }
  0x43   : > { %548 = vmatpush.bf16.msra.mxu1 %v4701_v19  ;;  %5399 = vmatpush.bf16.msra.mxu3 %v4701_v19  ;;  %v5313_v52 = vld [vmem:[#allocation7 + $0xac] sm:$0xf]  ;;  %v4810_v55 = vld [vmem:[#allocation7 + $0x9c] sm:$0xf0]  ;;  %v5307_v58 = vld [vmem:[#allocation7 + $0x7c] sm:$0xf] }
  0x44   : > { %v4825_v56 = vor.u32 %v5313_v52, %v4822_v53  ;;  %v4813_v57 = vor.u32 %v5310_v54, %v4810_v55  ;;  %v4798_v59 = vld [vmem:[#allocation7 + $0x84] sm:$0xf0]  ;;  %v5270_v61 = vld [vmem:[%s6456_s11 + $0x10] sm:$0xff]  ;;  %v5271_v63 = vld [vmem:[%s6456_s11 + $0x18] sm:$0xff] }
  0x45   : > { %500 = vmatpush.bf16.msra.mxu0 %v4689_v20  ;;  %5392 = vmatpush.bf16.msra.mxu2 %v4689_v20  ;;  %v4801_v60 = vor.u32 %v5307_v58, %v4798_v59  ;;  %v5274_v62 = vld [vmem:[%s6456_s11 + $0x30] sm:$0xff]  ;;  %v5275_v0 = vld [vmem:[%s6456_s11 + $0x38] sm:$0xff]  ;;  %v4820_v1 = vld [vmem:[#allocation7 + $0xa8] sm:$0xf] }
  0x46   : > { %v5314_v2 = vld [vmem:[#allocation7 + $0xb0] sm:$0xf0]  ;;  %v4828_v3 = vld [vmem:[#allocation7 + $0xb0] sm:$0xf]  ;;  %v5315_v5 = vld [vmem:[#allocation7 + $0xb8] sm:$0xf0] }
  0x47   : > { %549 = vmatpush.bf16.msra.mxu1 %v4693_v25  ;;  %5400 = vmatpush.bf16.msra.mxu3 %v4693_v25  ;;  %v4821_v4 = vor.u32 %v5314_v2, %v4820_v1  ;;  %v4829_v6 = vor.u32 %v5315_v5, %v4828_v3  ;;  %v4808_v7 = vld [vmem:[#allocation7 + $0x90] sm:$0xf]  ;;  %v5311_v8 = vld [vmem:[#allocation7 + $0x98] sm:$0xf0]  ;;  %v4816_v9 = vld [vmem:[#allocation7 + $0x98] sm:$0xf] }
  0x48   : > { %v4809_v10 = vor.u32 %v5311_v8, %v4808_v7  ;;  %v5312_v11 = vld [vmem:[#allocation7 + $0xa0] sm:$0xf0]  ;;  %v4796_v13 = vld [vmem:[#allocation7 + $0x78] sm:$0xf]  ;;  %v4804_v15 = vld [vmem:[#allocation7 + $0x80] sm:$0xf] }
  0x49   : > { %501 = vmatpush.bf16.msra.mxu0 %v4681_v26  ;;  %5393 = vmatpush.bf16.msra.mxu2 %v4681_v26  ;;  %v4817_v12 = vor.u32 %v5312_v11, %v4816_v9  ;;  %v5308_v14 = vld [vmem:[#allocation7 + $0x80] sm:$0xf0]  ;;  %v5309_v17 = vld [vmem:[#allocation7 + $0x88] sm:$0xf0]  ;;  %v4786_v20 = vld [vmem:[#allocation7 + $0x6c] sm:$0xf0] }
  0x4a   : > { %v4797_v16 = vor.u32 %v5308_v14, %v4796_v13  ;;  %v4805_v18 = vor.u32 %v5309_v17, %v4804_v15  ;;  %v5304_v19 = vld [vmem:[#allocation7 + $0x64] sm:$0xf]  ;;  %v4784_v21 = vld [vmem:[#allocation7 + $0x60] sm:$0xf]  ;;  %v5305_v23 = vld [vmem:[#allocation7 + $0x68] sm:$0xf0] }
  0x4b   : > { %550 = vmatpush.bf16.msra.mxu1 %v4685_v31  ;;  %5401 = vmatpush.bf16.msra.mxu3 %v4685_v31  ;;  %v4789_v22 = vor.u32 %v5304_v19, %v4786_v20  ;;  %v4792_v24 = vld [vmem:[#allocation7 + $0x68] sm:$0xf]  ;;  %v5306_v25 = vld [vmem:[#allocation7 + $0x70] sm:$0xf0]  ;;  %v4785_v26 = vor.u32 %v5305_v23, %v4784_v21  ;;  %v6481_v28 = vld [vmem:[%s8828_s4] sm:$0x7] }
  0x4c   : > { %v4793_v27 = vor.u32 %v5306_v25, %v4792_v24  ;;  %v5301_v29 = vld [vmem:[#allocation7 + $0x4c] sm:$0xf]  ;;  %v4774_v30 = vld [vmem:[#allocation7 + $0x54] sm:$0xf0]  ;;  %v4772_v31 = vld [vmem:[#allocation7 + $0x48] sm:$0xf] }
  0x4d   : > { %502 = vmatpush.bf16.msra.mxu0 %v4673_v32  ;;  %5394 = vmatpush.bf16.msra.mxu2 %v4673_v32  ;;  %v4777_v32 = vor.u32 %v5301_v29, %v4774_v30  ;;  %v5302_v33 = vld [vmem:[#allocation7 + $0x50] sm:$0xf0]  ;;  %v4780_v34 = vld [vmem:[#allocation7 + $0x50] sm:$0xf]  ;;  %v5303_v35 = vld [vmem:[#allocation7 + $0x58] sm:$0xf0] }
  0x4e   : > { %v4773_v36 = vor.u32 %v5302_v33, %v4772_v31  ;;  %v5298_v39 = vld [vmem:[#allocation7 + $0x34] sm:$0xf]  ;;  %v4762_v40 = vld [vmem:[#allocation7 + $0x3c] sm:$0xf0]  ;;  %v4760_v42 = vld [vmem:[#allocation7 + $0x30] sm:$0xf] }
  0x4f   : > { %551 = vmatpush.bf16.msra.mxu1 %v4677_v37  ;;  %5402 = vmatpush.bf16.msra.mxu3 %v4677_v37  ;;  %v4781_v37 = vor.u32 %v5303_v35, %v4780_v34  ;;  %v4765_v41 = vor.u32 %v5298_v39, %v4762_v40  ;;  %v5300_v46 = vld [vmem:[#allocation7 + $0x40] sm:$0xf0]  ;;  %v4748_v53 = vld [vmem:[#allocation7 + $0x18] sm:$0xf]  ;;  %v4756_v55 = vld [vmem:[#allocation7 + $0x20] sm:$0xf] }
  0x50   : > { %v5296_v54 = vld [vmem:[#allocation7 + $0x20] sm:$0xf0]  ;;  %v5297_v59 = vld [vmem:[#allocation7 + $0x28] sm:$0xf0]  ;;  %v4744_v2 = vld [vmem:[#allocation7 + $0x8] sm:$0xf] }
  0x51   : > { %503 = vmatpush.bf16.msra.mxu0 %v4665_v38  ;;  %5395 = vmatpush.bf16.msra.mxu2 %v4665_v38  ;;  %v6484_v38 = vperm.slane %v6481_v28, 0  ;;  %v4749_v58 = vor.u32 %v5296_v54, %v4748_v53  ;;  %v5293_v1 = vld [vmem:[#allocation7 + $0x8] sm:$0xf0]  ;;  %v5294_v3 = vld [vmem:[#allocation7 + $0x10] sm:$0xf0] }
  0x53   : > { %552 = vmatpush.bf16.msra.mxu1 %v4669_v43  ;;  %5403 = vmatpush.bf16.msra.mxu3 %v4669_v43  ;;  %v5299_v43 = vld [vmem:[#allocation7 + $0x38] sm:$0xf0] }
  0x54   : > { %v4761_v45 = vor.u32 %v5299_v43, %v4760_v42 }
  0x55   : > { %504 = vmatpush.bf16.msra.mxu0 %v4657_v44  ;;  %5396 = vmatpush.bf16.msra.mxu2 %v4657_v44  ;;  %v4768_v44 = vld [vmem:[#allocation7 + $0x38] sm:$0xf] }
  0x57   : > { %553 = vmatpush.bf16.msra.mxu1 %v4661_v48  ;;  %5404 = vmatpush.bf16.msra.mxu3 %v4661_v48  ;;  %v4769_v48 = vor.u32 %v5300_v46, %v4768_v44 }
  0x58   : > { %505 = vmatmul.bf16.vlgmr.msra.gmra.mxu0 %v5268_v47  ;;  %525 = vmatmul.bf16.vlgmr.msra.gmra.mxu2 %v5272_v49 }
  0x59   : > { %1115 = vmatpush.bf16.msrb.mxu2 %v4821_v4  ;;  %1213 = vmatpush.bf16.msrb.mxu0 %v4829_v6  ;;  %v4745_v6 = vor.u32 %v5294_v3, %v4744_v2 }
  0x5a   : > { %554 = vmatmul.bf16.vlgmr.msra.gmra.mxu1 %v5268_v47  ;;  %574 = vmatmul.bf16.vlgmr.msra.gmra.mxu3 %v5272_v49 }
  0x5b   : > { %1164 = vmatpush.bf16.msrb.mxu3 %v4825_v56 }
  0x5d   : > { %1116 = vmatpush.bf16.msrb.mxu2 %v4809_v10  ;;  %1214 = vmatpush.bf16.msrb.mxu0 %v4817_v12  ;;  %v6489_v12 = vperm.slane %v6481_v28, 2 }
  0x5f   : > { %1165 = vmatpush.bf16.msrb.mxu3 %v4813_v57 }
  0x61   : > { %1117 = vmatpush.bf16.msrb.mxu2 %v4797_v16  ;;  %1215 = vmatpush.bf16.msrb.mxu0 %v4805_v18 }
  0x63   : > { %1166 = vmatpush.bf16.msrb.mxu3 %v4801_v60  ;;  %v4757_v60 = vor.u32 %v5297_v59, %v4756_v55 }
  0x65   : > { %1118 = vmatpush.bf16.msrb.mxu2 %v4785_v26  ;;  %1216 = vmatpush.bf16.msrb.mxu0 %v4793_v27 }
  0x67   : > { %1167 = vmatpush.bf16.msrb.mxu3 %v4789_v22 }
  0x68   : > { %510 = vmatmul.bf16.gmra.mxu0 %v5269_v50  ;;  %530 = vmatmul.bf16.gmra.mxu2 %v5273_v51 }
  0x69   : > { %1119 = vmatpush.bf16.msrb.mxu2 %v4773_v36  ;;  %1217 = vmatpush.bf16.msrb.mxu0 %v4781_v37 }
  0x6a   : > { %559 = vmatmul.bf16.gmra.mxu1 %v5269_v50  ;;  %579 = vmatmul.bf16.gmra.mxu3 %v5273_v51  ;;  %v5295_v50 = vld [vmem:[#allocation7 + $0x1c] sm:$0xf]  ;;  %v4750_v51 = vld [vmem:[#allocation7 + $0x24] sm:$0xf0] }
  0x6b   : > { %1168 = vmatpush.bf16.msrb.mxu3 %v4777_v32  ;;  %v4753_v52 = vor.u32 %v5295_v50, %v4750_v51 }
  0x6d   : > { %1120 = vmatpush.bf16.msrb.mxu2 %v4761_v45  ;;  %1218 = vmatpush.bf16.msrb.mxu0 %v4769_v48 }
  0x6f   : > { %1169 = vmatpush.bf16.msrb.mxu3 %v4765_v41 }
  0x71   : > { %1121 = vmatpush.bf16.msrb.mxu2 %v4749_v58  ;;  %1219 = vmatpush.bf16.msrb.mxu0 %v4757_v60 }
  0x73   : > { %1170 = vmatpush.bf16.msrb.mxu3 %v4753_v52 }
  0x75   : > { %1220 = vmatpush.bf16.msrb.mxu0 %v4745_v6 }
  0x78   : > { %515 = vmatmul.bf16.gmra.mxu0 %v5270_v61  ;;  %535 = vmatmul.bf16.gmra.mxu2 %v5274_v62 }
  0x7a   : > { %564 = vmatmul.bf16.gmra.mxu1 %v5270_v61  ;;  %584 = vmatmul.bf16.gmra.mxu3 %v5274_v62  ;;  %v5292_v61 = vld [vmem:[#allocation7 + $0x4] sm:$0xf]  ;;  %v4738_v62 = vld [vmem:[#allocation7 + $0xc] sm:$0xf0] }
  0x88   : > { %520 = vmatmul.bf16.gmra.mxu0 %v5271_v63  ;;  %540 = vmatmul.bf16.gmra.mxu2 %v5275_v0 }
  0x8a   : > { %569 = vmatmul.bf16.gmra.mxu1 %v5271_v63  ;;  %589 = vmatmul.bf16.gmra.mxu3 %v5275_v0  ;;  %v4736_v63 = vld [vmem:[#allocation7] sm:$0xf]  ;;  %v4741_v0 = vor.u32 %v5292_v61, %v4738_v62 }
  0x8b   : > { %v4737_v5 = vor.u32 %v5293_v1, %v4736_v63 }
  0x8c   : > { %1171 = vmatpush.bf16.msrb.mxu3 %v4741_v0 }
  0x8d   : > { %1122 = vmatpush.bf16.msrb.mxu2 %v4737_v5 }
  0xd5   : > { %v506_v47 = vpop.f32.mrf.mxu0 }
  0xd6   : > { %v507_v49 = vadd.f32 %v506_v47, %v6484_v38 }
  0xd7   : > { %v555_v57 = vpop.f32.mrf.mxu1 }
  0xd8   : > { %v4718_v56 = vmul.f32 -1.442695, %v507_v49  ;;  %v556_v14 = vadd.f32 %v555_v57, %v6489_v12 }
  0xda   : > { %5499 = vpow2.f32 %v4718_v56 }
  0xdb   : > { %v526_v13 = vpop.f32.mrf.mxu2 }
  0xdc   : > { %v527_v23 = vadd.f32 %v526_v13, %v6484_v38 }
  0xdd   : > { %v508_v4 = vpop.f32.mrf.mxu0  ;;  %v6520_v59 = vpop.f32.mrf.mxu3 }
  0xde   : > { %v509_v7 = vadd.f32 %v508_v4, %v6484_v38  ;;  %v4726_v26 = vmul.f32 -1.442695, %v527_v23 }
  0xdf   : > { %v557_v10 = vpop.f32.mrf.mxu1 }
  0xe0   : > { %v5500_v8 = vpop.eup %5499  ;;  %v4719_v9 = vmul.f32 -1.442695, %v509_v7  ;;  %v558_v43 = vadd.f32 %v557_v10, %v6489_v12 }
  0xe1   : > { %v643_v11 = vadd.f32 1.0, %v5500_v8 }
  0xe2   : > { %5501 = vpow2.f32 %v4719_v9 }
  0xe3   : > { %5503 = vrcp.f32 %v643_v11  ;;  %v528_v24 = vpop.f32.mrf.mxu2  ;;  %v668_v28 = vand.u32 2147483647, %v643_v11  ;;  %v670_v29 = vand.u32 2147483648, %v643_v11  ;;  %vm664_vm1 = vweird.f32 %v643_v11 }
  0xe4   : > { %5505 = vtanh.f32 %v556_v14  ;;  %v529_v27 = vadd.f32 %v528_v24, %v6484_v38 }
  0xe5   : > { %v511_v15 = vpop.f32.mrf.mxu0  ;;  %v671_v41 = vor.u32 1.1754944e-38, %v670_v29  ;;  %vm669_vm3 = vcmp.eq.f32.partialorder %v668_v28, 8.507059e+37  ;;  %v6552_v28 = vpop.f32.mrf.mxu3 }
  0xe6   : > { %v512_v16 = vadd.f32 %v511_v15, %v6484_v38  ;;  %v4727_v33 = vmul.f32 -1.442695, %v529_v27 }
  0xe7   : > { %v560_v19 = vpop.f32.mrf.mxu1 }
  0xe8   : > { %v5502_v17 = vpop.eup %5501  ;;  %v4720_v18 = vmul.f32 -1.442695, %v512_v16  ;;  %v561_v51 = vadd.f32 %v560_v19, %v6489_v12 }
  0xe9   : > { %v5504_v20 = vpop.eup %5503  ;;  %v6493_v21 = vadd.f32 1.0, %v5502_v17 }
  0xea   : > { %v660_v22 = vmul.f32 %v5504_v20, %v643_v11  ;;  %5507 = vpow2.f32 %v4720_v18  ;;  %vm665_vm0 = vweird.f32 %v5504_v20  ;;  %v5506_v34 = vpop.eup %5505 }
  0xeb   : > { %5509 = vrcp.f32 %v6493_v21  ;;  %vm666_vm2 = vmor %vm664_vm1, %vm665_vm0  ;;  %v531_v47 = vpop.f32.mrf.mxu2  ;;  %v685_v52 = vand.u32 2147483648, %v6493_v21  ;;  %v683_v57 = vand.u32 2147483647, %v6493_v21  ;;  %vm679_vm5 = vweird.f32 %v6493_v21 }
  0xec   : > { %v661_v25 = vsub.f32 1.0, %v660_v22  ;;  %5511 = vpow2.f32 %v4726_v26  ;;  %v532_v18 = vadd.f32 %v531_v47, %v6484_v38 }
  0xed   : > { %v513_v30 = vpop.f32.mrf.mxu0  ;;  %5513 = vpow2.f32 %v4727_v33  ;;  %v686_v2 = vor.u32 1.1754944e-38, %v685_v52  ;;  %vm684_vm7 = vcmp.eq.f32.partialorder %v683_v57, 8.507059e+37 }
  0xee   : > { %v662_v31 = vmul.f32 %v5504_v20, %v661_v25  ;;  %v514_v32 = vadd.f32 %v513_v30, %v6484_v38  ;;  %v4728_v27 = vmul.f32 -1.442695, %v532_v18 }
  0xef   : > { %v562_v39 = vpop.f32.mrf.mxu1 }
  0xf0   : > { %v5508_v35 = vpop.eup %5507  ;;  %v663_v36 = vadd.f32 %v5504_v20, %v662_v31  ;;  %v4721_v37 = vmul.f32 -1.442695, %v514_v32  ;;  %v563_v5 = vadd.f32 %v562_v39, %v6489_v12 }
  0xf1   : > { %v5510_v40 = vpop.eup %5509  ;;  %v6501_v42 = vadd.f32 1.0, %v5508_v35 }
  0xf2   : > { %v675_v44 = vmul.f32 %v5510_v40, %v6493_v21  ;;  %v667_v45 = vsel %vm666_vm2, %v5504_v20, %v663_v36  ;;  %5515 = vpow2.f32 %v4721_v37  ;;  %v5512_v48 = vpop.eup %5511  ;;  %vm680_vm4 = vweird.f32 %v5510_v40 }
  0xf3   : > { %v672_v46 = vsel %vm669_vm3, %v671_v41, %v667_v45  ;;  %5517 = vrcp.f32 %v6501_v42  ;;  %v6510_v54 = vadd.f32 1.0, %v5512_v48  ;;  %v5514_v55 = vpop.eup %5513  ;;  %vm681_vm6 = vmor %vm679_vm5, %vm680_vm4  ;;  %v698_v4 = vand.u32 2147483647, %v6501_v42  ;;  %v533_v19 = vpop.f32.mrf.mxu2 }
  0xf4   : > { %v676_v49 = vsub.f32 1.0, %v675_v44  ;;  %v6506_v50 = vmul.f32 %v5506_v34, %v672_v46  ;;  %5519 = vtanh.f32 %v558_v43  ;;  %v6522_v0 = vadd.f32 1.0, %v5514_v55 }
  0xf5   : > { %v516_v53 = vpop.f32.mrf.mxu0  ;;  %5521 = vrcp.f32 %v6510_v54  ;;  %vm694_vm8 = vweird.f32 %v6501_v42  ;;  %vm6537_vm9 = vcmp.eq.f32.partialorder %v698_v4, 8.507059e+37  ;;  %v700_v16 = vand.u32 2147483648, %v6501_v42 }
  0xf6   : > { %931 = vst [vmem:[%s6512_s16] sm:$0xff] %v6506_v50  ;;  %v677_v56 = vmul.f32 %v5510_v40, %v676_v49  ;;  %v517_v58 = vadd.f32 %v516_v53, %v6484_v38  ;;  %5523 = vtanh.f32 %v561_v51  ;;  %v534_v33 = vadd.f32 %v533_v19, %v6484_v38 }
  0xf7   : > { %v565_v63 = vpop.f32.mrf.mxu1  ;;  %v701_v35 = vor.u32 1.1754944e-38, %v700_v16  ;;  %v576_v45 = vadd.f32 %v6520_v59, %v6489_v12  ;;  %vm784_vm14 = vweird.f32 %v6510_v54  ;;  %v790_v15 = vand.u32 2147483648, %v6510_v54 }
  0xf8   : > { %v5516_v60 = vpop.eup %5515  ;;  %v678_v61 = vadd.f32 %v5510_v40, %v677_v56  ;;  %v4722_v62 = vmul.f32 -1.442695, %v517_v58  ;;  %v566_v13 = vadd.f32 %v565_v63, %v6489_v12  ;;  %v4729_v49 = vmul.f32 -1.442695, %v534_v33 }
  0xf9   : > { %v5518_v1 = vpop.eup %5517  ;;  %v6524_v3 = vadd.f32 1.0, %v5516_v60 }
  0xfa   : > { %v690_v6 = vmul.f32 %v5518_v1, %v6501_v42  ;;  %v682_v7 = vsel %vm681_vm6, %v5510_v40, %v678_v61  ;;  %5525 = vpow2.f32 %v4722_v62  ;;  %v5520_v8 = vpop.eup %5519  ;;  %vm695_vm10 = vweird.f32 %v5518_v1 }
  0xfb   : > { %v687_v9 = vsel %vm684_vm7, %v686_v2, %v682_v7  ;;  %5527 = vrcp.f32 %v6524_v3  ;;  %v6535_v14 = vpop.eup %5521  ;;  %v713_v24 = vand.u32 2147483647, %v6524_v3  ;;  %v715_v25 = vand.u32 2147483648, %v6524_v3  ;;  %vm696_vm11 = vmor %vm694_vm8, %vm695_vm10  ;;  %v6589_v63 = vpop.f32.mrf.mxu2 }
  0xfc   : > { %v691_v10 = vsub.f32 1.0, %v690_v6  ;;  %v6531_v11 = vmul.f32 %v5520_v8, %v687_v9  ;;  %5529 = vrcp.f32 %v6522_v0  ;;  %v5524_v20 = vpop.eup %5523  ;;  %v780_v23 = vmul.f32 %v6535_v14, %v6510_v54 }
  0xfd   : > { %5531 = vtanh.f32 %v563_v5  ;;  %v518_v17 = vpop.f32.mrf.mxu0  ;;  %vm709_vm12 = vweird.f32 %v6524_v3  ;;  %vm6567_vm13 = vcmp.eq.f32.partialorder %v713_v24, 8.507059e+37  ;;  %v716_v48 = vor.u32 1.1754944e-38, %v715_v25 }
  0xfe   : > { %932 = vst [vmem:[%s6512_s16 + $0x8] sm:$0xff] %v6531_v11  ;;  %v692_v21 = vmul.f32 %v5518_v1, %v691_v10  ;;  %v519_v22 = vadd.f32 %v518_v17, %v6484_v38  ;;  %v947_v26 = vpack.c.bf16 %v6531_v11, %v6506_v50  ;;  %5533 = vtanh.f32 %v566_v13 }
  0xff   : > { %v567_v32 = vpop.f32.mrf.mxu1  ;;  %v781_v37 = vsub.f32 1.0, %v780_v23  ;;  %5535 = vpow2.f32 %v4728_v27  ;;  %vm785_vm0 = vweird.f32 %v6535_v14  ;;  %v788_v62 = vand.u32 2147483647, %v6510_v54 }
 0x100   : > { %v5526_v29 = vpop.eup %5525  ;;  %v693_v30 = vadd.f32 %v5518_v1, %v692_v21  ;;  %v4723_v31 = vmul.f32 -1.442695, %v519_v22  ;;  %1123 = vmatmul.bf16.vlgmr.msrb.gmra.mxu2 %v947_v26  ;;  %1172 = vmatmul.bf16.vlgmr.msrb.gmra.mxu3 %v947_v26  ;;  %v568_v53 = vadd.f32 %v567_v32, %v6489_v12  ;;  %vm6597_vm1 = vmor %vm784_vm14, %vm785_vm0  ;;  %v791_v25 = vor.u32 1.1754944e-38, %v790_v15 }
 0x101   : > { %v5528_v34 = vpop.eup %5527  ;;  %v6558_v36 = vadd.f32 1.0, %v5526_v29  ;;  %1221 = vmatmul.bf16.vlgmr.msrb.gmra.mxu0 %v947_v26  ;;  %v782_v55 = vmul.f32 %v6535_v14, %v781_v37  ;;  %vm789_vm5 = vcmp.eq.f32.partialorder %v788_v62, 8.507059e+37 }
 0x102   : > { %v6560_v39 = vpop.eup %5529  ;;  %v705_v40 = vmul.f32 %v5528_v34, %v6524_v3  ;;  %v697_v41 = vsel %vm696_vm11, %v5518_v1, %v693_v30  ;;  %5537 = vpow2.f32 %v4723_v31  ;;  %vm710_vm15 = vweird.f32 %v5528_v34  ;;  %v6591_v1 = vpop.f32.mrf.mxu3 }
 0x103   : > { %v5532_v43 = vpop.eup %5531  ;;  %v702_v42 = vsel %vm6537_vm9, %v701_v35, %v697_v41  ;;  %5539 = vrcp.f32 %v6558_v36  ;;  %v795_v52 = vmul.f32 %v6560_v39, %v6522_v0  ;;  %v728_v60 = vand.u32 2147483647, %v6558_v36  ;;  %vm711_vm2 = vmor %vm709_vm12, %vm710_vm15 }
 0x104   : > { %v706_v46 = vsub.f32 1.0, %v705_v40  ;;  %v6573_v47 = vmul.f32 %v5524_v20, %v702_v42  ;;  %v6580_v56 = vpop.eup %5533  ;;  %v783_v61 = vadd.f32 %v6535_v14, %v782_v55  ;;  %5541 = vtanh.f32 %v576_v45 }
 0x105   : > { %v521_v51 = vpop.f32.mrf.mxu0  ;;  %v5536_v59 = vpop.eup %5535  ;;  %5543 = vpow2.f32 %v4729_v49  ;;  %vm724_vm3 = vweird.f32 %v6558_v36  ;;  %v730_v13 = vand.u32 2147483648, %v6558_v36  ;;  %v796_v18 = vsub.f32 1.0, %v795_v52 }
 0x106   : > { %933 = vst [vmem:[%s6512_s16 + $0x10] sm:$0xff] %v6573_v47  ;;  %v707_v57 = vmul.f32 %v5528_v34, %v706_v46  ;;  %v522_v58 = vadd.f32 %v521_v51, %v6484_v38  ;;  %v6593_v6 = vadd.f32 1.0, %v5536_v59  ;;  %vm6613_vm4 = vcmp.eq.f32.partialorder %v728_v60, 8.507059e+37 }
 0x107   : > { %v570_v7 = vpop.f32.mrf.mxu1  ;;  %v787_v20 = vsel %vm6597_vm1, %v6535_v14, %v783_v61  ;;  %v731_v23 = vor.u32 1.1754944e-38, %v730_v13  ;;  %vm799_vm9 = vweird.f32 %v6522_v0  ;;  %vm800_vm10 = vweird.f32 %v6560_v39 }
 0x108   : > { %v5538_v2 = vpop.eup %5537  ;;  %v708_v4 = vadd.f32 %v5528_v34, %v707_v57  ;;  %v4724_v5 = vmul.f32 -1.442695, %v522_v58  ;;  %v571_v31 = vadd.f32 %v570_v7, %v6489_v12  ;;  %v792_v32 = vsel %vm789_vm5, %v791_v25, %v787_v20  ;;  %vm6679_vm12 = vmor %vm799_vm9, %vm800_vm10 }
 0x109   : > { %v5540_v9 = vpop.eup %5539  ;;  %v6604_v10 = vadd.f32 1.0, %v5538_v2  ;;  %v578_v55 = vadd.f32 %v6552_v28, %v6489_v12  ;;  %v803_v7 = vand.u32 2147483647, %v6522_v0  ;;  %v805_v13 = vand.u32 2147483648, %v6522_v0 }
 0x10a   : > { %v720_v16 = vmul.f32 %v5540_v9, %v6558_v36  ;;  %v712_v17 = vsel %vm711_vm2, %v5528_v34, %v708_v4  ;;  %5545 = vpow2.f32 %v4724_v5  ;;  %v5542_v22 = vpop.eup %5541  ;;  %vm725_vm6 = vweird.f32 %v5540_v9  ;;  %v6633_v35 = vpop.f32.mrf.mxu3 }
 0x10b   : > { %v717_v19 = vsel %vm6567_vm13, %v716_v48, %v712_v17  ;;  %5547 = vrcp.f32 %v6604_v10  ;;  %v5544_v26 = vpop.eup %5543  ;;  %v743_v29 = vand.u32 2147483647, %v6604_v10  ;;  %v797_v34 = vmul.f32 %v6560_v39, %v796_v18  ;;  %vm6642_vm8 = vmor %vm724_vm3, %vm725_vm6  ;;  %v6651_v48 = vpop.f32.mrf.mxu2 }
 0x10c   : > { %v721_v54 = vsub.f32 1.0, %v720_v16  ;;  %v6620_v21 = vmul.f32 %v5532_v43, %v717_v19  ;;  %5549 = vrcp.f32 %v6593_v6  ;;  %v6630_v33 = vadd.f32 1.0, %v5544_v26 }
 0x10d   : > { %5551 = vtanh.f32 %v568_v53  ;;  %v523_v24 = vpop.f32.mrf.mxu0  ;;  %vm739_vm7 = vweird.f32 %v6604_v10  ;;  %v745_v41 = vand.u32 2147483648, %v6604_v10  ;;  %v6637_v42 = vmul.f32 %v5542_v22, %v792_v32 }
 0x10e   : > { %934 = vst [vmem:[%s6512_s16 + $0x18] sm:$0xff] %v6620_v21  ;;  %v722_v27 = vmul.f32 %v5540_v9, %v721_v54  ;;  %v524_v14 = vadd.f32 %v523_v24, %v6484_v38  ;;  %v948_v30 = vpack.c.bf16 %v6620_v21, %v6573_v47  ;;  %5553 = vrcp.f32 %v6630_v33 }
 0x10f   : > { %vm6658_vm11 = vcmp.eq.f32.partialorder %v743_v29, 8.507059e+37  ;;  %939 = vst [vmem:[%s6512_s16 + $0x40] sm:$0xff] %v6637_v42  ;;  %v572_v53 = vpop.f32.mrf.mxu1  ;;  %v798_v60 = vadd.f32 %v6560_v39, %v797_v34  ;;  %v746_v2 = vor.u32 1.1754944e-38, %v745_v41  ;;  %vm6695_vm14 = vcmp.eq.f32.partialorder %v803_v7, 8.507059e+37 }
 0x110   : > { %v5546_v37 = vpop.eup %5545  ;;  %v723_v40 = vadd.f32 %v5540_v9, %v722_v27  ;;  %v4725_v43 = vmul.f32 -1.442695, %v524_v14  ;;  %1128 = vmatmul.bf16.gmra.mxu2 %v948_v30  ;;  %1177 = vmatmul.bf16.gmra.mxu3 %v948_v30  ;;  %v573_v5 = vadd.f32 %v572_v53, %v6489_v12  ;;  %v537_v18 = vadd.f32 %v6589_v63, %v6484_v38 }
 0x111   : > { %v5548_v44 = vpop.eup %5547  ;;  %v6646_v46 = vadd.f32 1.0, %v5546_v37  ;;  %1226 = vmatmul.bf16.gmra.mxu0 %v948_v30  ;;  %v802_v16 = vsel %vm6679_vm12, %v6560_v39, %v798_v60  ;;  %v806_v54 = vor.u32 1.1754944e-38, %v805_v13  ;;  %vm814_vm1 = vweird.f32 %v6593_v6 }
 0x112   : > { %v6653_v49 = vpop.eup %5549  ;;  %v735_v36 = vmul.f32 %v5548_v44, %v6604_v10  ;;  %v727_v51 = vsel %vm6642_vm8, %v5540_v9, %v723_v40  ;;  %5555 = vpow2.f32 %v4725_v43  ;;  %vm740_vm13 = vweird.f32 %v5548_v44  ;;  %v6701_v19 = vpop.f32.mrf.mxu3 }
 0x113   : > { %v5552_v57 = vpop.eup %5551  ;;  %v732_v58 = vsel %vm6613_vm4, %v731_v23, %v727_v51  ;;  %5557 = vrcp.f32 %v6646_v46  ;;  %v810_v59 = vmul.f32 %v6653_v49, %v6593_v6  ;;  %v758_v8 = vand.u32 2147483647, %v6646_v46  ;;  %vm741_vm0 = vmor %vm739_vm7, %vm740_vm13  ;;  %v541_v30 = vpop.f32.mrf.mxu2 }
 0x114   : > { %v736_v61 = vsub.f32 1.0, %v735_v36  ;;  %v6673_v62 = vmul.f32 %v6580_v56, %v732_v58  ;;  %5559 = vtanh.f32 %v571_v31  ;;  %v760_v9 = vand.u32 2147483648, %v6646_v46  ;;  %v6690_v15 = vpop.eup %5553 }
 0x115   : > { %v811_v4 = vsub.f32 1.0, %v810_v59  ;;  %5561 = vtanh.f32 %v578_v55  ;;  %vm754_vm15 = vweird.f32 %v6646_v46  ;;  %v825_v0 = vmul.f32 %v6690_v15, %v6630_v33 }
 0x116   : > { %935 = vst [vmem:[%s6512_s16 + $0x20] sm:$0xff] %v6673_v62  ;;  %v737_v56 = vmul.f32 %v5548_v44, %v736_v61  ;;  %v4730_v63 = vmul.f32 -1.442695, %v537_v18  ;;  %vm815_vm2 = vweird.f32 %v6653_v49  ;;  %vm6715_vm3 = vcmp.eq.f32.partialorder %v758_v8, 8.507059e+37 }
 0x117   : > { %v812_v39 = vmul.f32 %v6653_v49, %v811_v4  ;;  %5563 = vtanh.f32 %v573_v5  ;;  %v761_v29 = vor.u32 1.1754944e-38, %v760_v9  ;;  %v581_v14 = vadd.f32 %v6591_v1, %v6489_v12  ;;  %vm6732_vm4 = vmor %vm814_vm1, %vm815_vm2 }
 0x118   : > { %v5556_v3 = vpop.eup %5555  ;;  %v738_v20 = vadd.f32 %v5548_v44, %v737_v56  ;;  %v826_v34 = vsub.f32 1.0, %v825_v0  ;;  %v807_v37 = vsel %vm6695_vm14, %v806_v54, %v802_v16  ;;  %v818_v43 = vand.u32 2147483647, %v6593_v6 }
 0x119   : > { %v5558_v22 = vpop.eup %5557  ;;  %v6710_v23 = vadd.f32 1.0, %v5556_v3  ;;  %v813_v1 = vadd.f32 %v6653_v49, %v812_v39  ;;  %v820_v55 = vand.u32 2147483648, %v6593_v6  ;;  %v539_v59 = vadd.f32 %v6651_v48, %v6484_v38 }
 0x11a   : > { %v5560_v24 = vpop.eup %5559  ;;  %v750_v25 = vmul.f32 %v5558_v22, %v6646_v46  ;;  %v742_v26 = vsel %vm741_vm0, %v5548_v44, %v738_v20  ;;  %vm755_vm5 = vweird.f32 %v5558_v22  ;;  %vm6748_vm6 = vcmp.eq.f32.partialorder %v818_v43, 8.507059e+37  ;;  %v6766_v48 = vpop.f32.mrf.mxu3 }
 0x11b   : > { %v747_v10 = vsel %vm6658_vm11, %v746_v2, %v742_v26  ;;  %5565 = vrcp.f32 %v6710_v23  ;;  %v5562_v41 = vpop.eup %5561  ;;  %v773_v45 = vand.u32 2147483647, %v6710_v23  ;;  %v817_v52 = vsel %vm6732_vm4, %v6653_v49, %v813_v1  ;;  %vm756_vm7 = vmor %vm754_vm15, %vm755_vm5  ;;  %v543_v54 = vpop.f32.mrf.mxu2 }
 0x11c   : > { %v751_v31 = vsub.f32 1.0, %v750_v25  ;;  %v6724_v32 = vmul.f32 %v5552_v57, %v747_v10  ;;  %5567 = vpow2.f32 %v4730_v63  ;;  %v6741_v36 = vmul.f32 %v5562_v41, %v807_v37 }
 0x11d   : > { %5569 = vtanh.f32 %v581_v14  ;;  %v5564_v57 = vpop.eup %5563  ;;  %v583_v60 = vadd.f32 %v6633_v35, %v6489_v12  ;;  %v827_v61 = vmul.f32 %v6690_v15, %v826_v34  ;;  %v821_v6 = vor.u32 1.1754944e-38, %v820_v55 }
 0x11e   : > { %936 = vst [vmem:[%s6512_s16 + $0x28] sm:$0xff] %v6724_v32  ;;  %v752_v44 = vmul.f32 %v5558_v22, %v751_v31  ;;  %v949_v51 = vpack.c.bf16 %v6724_v32, %v6673_v62  ;;  %vm829_vm8 = vweird.f32 %v6630_v33  ;;  %vm830_vm9 = vweird.f32 %v6690_v15 }
 0x11f   : > { %940 = vst [vmem:[%s6512_s16 + $0x48] sm:$0xff] %v6741_v36  ;;  %v833_v2 = vand.u32 2147483647, %v6630_v33  ;;  %v775_v4 = vand.u32 2147483648, %v6710_v23  ;;  %v4731_v5 = vmul.f32 -1.442695, %v539_v59  ;;  %v822_v56 = vsel %vm6748_vm6, %v821_v6, %v817_v52  ;;  %vm6775_vm11 = vmor %vm829_vm8, %vm830_vm9 }
 0x120   : > { %v753_v58 = vadd.f32 %v5558_v22, %v752_v44  ;;  %1133 = vmatmul.bf16.gmra.mxu2 %v949_v51  ;;  %1182 = vmatmul.bf16.gmra.mxu3 %v949_v51  ;;  %v828_v8 = vadd.f32 %v6690_v15, %v827_v61  ;;  %v835_v20 = vand.u32 2147483648, %v6630_v33  ;;  %v542_v0 = vadd.f32 %v541_v30, %v6484_v38 }
 0x121   : > { %v5566_v49 = vpop.eup %5565  ;;  %1231 = vmatmul.bf16.gmra.mxu0 %v949_v51  ;;  %5571 = vpow2.f32 %v4731_v5  ;;  %vm6781_vm12 = vcmp.eq.f32.partialorder %v833_v2, 8.507059e+37  ;;  %vm769_vm13 = vweird.f32 %v6710_v23  ;;  %v544_v33 = vadd.f32 %v543_v54, %v6484_v38 }
 0x122   : > { %v765_v35 = vmul.f32 %v5566_v49, %v6710_v23  ;;  %v757_v28 = vsel %vm756_vm7, %v5558_v22, %v753_v58  ;;  %v5568_v46 = vpop.eup %5567  ;;  %vm770_vm10 = vweird.f32 %v5566_v49  ;;  %5573 = vtanh.f32 %v583_v60  ;;  %v590_v37 = vpop.f32.mrf.mxu3 }
 0x123   : > { %v762_v7 = vsel %vm6715_vm3, %v761_v29, %v757_v28  ;;  %v655_v17 = vadd.f32 1.0, %v5568_v46  ;;  %v5570_v18 = vpop.eup %5569  ;;  %v832_v63 = vsel %vm6775_vm11, %v6690_v15, %v828_v8  ;;  %v4732_v25 = vmul.f32 -1.442695, %v542_v0  ;;  %vm771_vm14 = vmor %vm769_vm13, %vm770_vm10 }
 0x124   : > { %v766_v13 = vsub.f32 1.0, %v765_v35  ;;  %v6779_v16 = vmul.f32 %v5560_v24, %v762_v7  ;;  %v6789_v22 = vmul.f32 %v5570_v18, %v822_v56  ;;  %v836_v24 = vor.u32 1.1754944e-38, %v835_v20 }
 0x125   : > { %5575 = vrcp.f32 %v655_v17  ;;  %v776_v27 = vor.u32 1.1754944e-38, %v775_v4  ;;  %vm774_vm15 = vcmp.eq.f32.partialorder %v773_v45, 8.507059e+37  ;;  %v586_v15 = vadd.f32 %v6701_v19, %v6489_v12 }
 0x126   : > { %937 = vst [vmem:[%s6512_s16 + $0x30] sm:$0xff] %v6779_v16  ;;  %v767_v39 = vmul.f32 %v5566_v49, %v766_v13  ;;  %v837_v10 = vsel %vm6781_vm12, %v836_v24, %v832_v63  ;;  %5577 = vpow2.f32 %v4732_v25  ;;  %v4733_v30 = vmul.f32 -1.442695, %v544_v33 }
 0x127   : > { %941 = vst [vmem:[%s6512_s16 + $0x50] sm:$0xff] %v6789_v22  ;;  %v5572_v29 = vpop.eup %5571  ;;  %v850_v19 = vand.u32 2147483648, %v655_v17  ;;  %vm844_vm0 = vweird.f32 %v655_v17  ;;  %v848_v52 = vand.u32 2147483647, %v655_v17  ;;  %v588_v55 = vadd.f32 %v6766_v48, %v6489_v12 }
 0x128   : > { %v768_v26 = vadd.f32 %v5566_v49, %v767_v39  ;;  %v5574_v23 = vpop.eup %5573  ;;  %v656_v34 = vadd.f32 1.0, %v5572_v29  ;;  %5579 = vpow2.f32 %v4733_v30  ;;  %v591_v48 = vadd.f32 %v590_v37, %v6489_v12 }
 0x129   : > { %v6805_v1 = vmul.f32 %v5574_v23, %v837_v10  ;;  %v851_v60 = vor.u32 1.1754944e-38, %v850_v19  ;;  %vm849_vm3 = vcmp.eq.f32.partialorder %v848_v52, 8.507059e+37  ;;  %v5323_v52 = vld [vmem:[#allocation8 + $0x38] sm:$0xff] }
 0x12a   : > { %v772_v14 = vsel %vm771_vm14, %v5566_v49, %v768_v26  ;;  %5581 = vrcp.f32 %v656_v34  ;;  %vm859_vm4 = vweird.f32 %v656_v34  ;;  %v865_v4 = vand.u32 2147483648, %v656_v34  ;;  %v592_v5 = vpop.f32.mrf.mxu3  ;;  %1958 = vmatpush.bf16.msrb.mxu1 %v5323_v52 }
 0x12b   : > { %v777_v31 = vsel %vm774_vm15, %v776_v27, %v772_v14  ;;  %v5576_v40 = vpop.eup %5575  ;;  %5583 = vtanh.f32 %v586_v15  ;;  %942 = vst [vmem:[%s6512_s16 + $0x58] sm:$0xff] %v6805_v1  ;;  %v863_v56 = vand.u32 2147483647, %v656_v34  ;;  %v593_v18 = vadd.f32 %v592_v5, %v6489_v12 }
 0x12c   : > { %v6803_v41 = vmul.f32 %v5564_v57, %v777_v31  ;;  %v840_v43 = vmul.f32 %v5576_v40, %v655_v17  ;;  %v5578_v45 = vpop.eup %5577  ;;  %vm845_vm1 = vweird.f32 %v5576_v40  ;;  %v866_v0 = vor.u32 1.1754944e-38, %v865_v4 }
 0x12d   : > { %v657_v53 = vadd.f32 1.0, %v5578_v45  ;;  %vm6815_vm2 = vmor %vm844_vm0, %vm845_vm1  ;;  %vm864_vm7 = vcmp.eq.f32.partialorder %v863_v56, 8.507059e+37  ;;  %v952_v59 = vpack.c.bf16 %v6805_v1, %v6789_v22  ;;  %v5317_v56 = vld [vmem:[#allocation8 + $0x8] sm:$0xff] }
 0x12e   : > { %938 = vst [vmem:[%s6512_s16 + $0x38] sm:$0xff] %v6803_v41  ;;  %v950_v44 = vpack.c.bf16 %v6803_v41, %v6779_v16  ;;  %v841_v51 = vsub.f32 1.0, %v840_v43  ;;  %v5580_v58 = vpop.eup %5579 }
 0x12f   : > { %5585 = vrcp.f32 %v657_v53  ;;  %v658_v6 = vadd.f32 1.0, %v5580_v58  ;;  %v880_v17 = vand.u32 2147483648, %v657_v53  ;;  %vm874_vm8 = vweird.f32 %v657_v53 }
 0x130   : > { %1138 = vmatmul.bf16.gmra.mxu2 %v950_v44  ;;  %1187 = vmatmul.bf16.gmra.mxu3 %v950_v44  ;;  %v842_v57 = vmul.f32 %v5576_v40, %v841_v51  ;;  %v5582_v61 = vpop.eup %5581  ;;  %5587 = vtanh.f32 %v588_v55  ;;  %v878_v25 = vand.u32 2147483647, %v657_v53 }
 0x131   : > { %1236 = vmatmul.bf16.gmra.mxu0 %v950_v44  ;;  %v5584_v2 = vpop.eup %5583  ;;  %v855_v35 = vmul.f32 %v5582_v61, %v656_v34  ;;  %5589 = vrcp.f32 %v658_v6  ;;  %vm860_vm5 = vweird.f32 %v5582_v61  ;;  %v881_v27 = vor.u32 1.1754944e-38, %v880_v17  ;;  %v5316_v17 = vld [vmem:[#allocation8] sm:$0xff] }
 0x132   : > { %v843_v49 = vadd.f32 %v5576_v40, %v842_v57  ;;  %vm6827_vm6 = vmor %vm859_vm4, %vm860_vm5  ;;  %5591 = vtanh.f32 %v591_v48  ;;  %vm889_vm10 = vweird.f32 %v658_v6  ;;  %v895_v14 = vand.u32 2147483648, %v658_v6 }
 0x133   : > { %v856_v46 = vsub.f32 1.0, %v855_v35  ;;  %5593 = vtanh.f32 %v593_v18  ;;  %v893_v31 = vand.u32 2147483647, %v658_v6  ;;  %v951_v34 = vpack.c.bf16 %v6741_v36, %v6637_v42  ;;  %v6075_v35 = vld [vmem:[%s8828_s4] sm:$0x7] }
 0x134   : > { %v847_v28 = vsel %vm6815_vm2, %v5576_v40, %v843_v49  ;;  %vm879_vm13 = vcmp.eq.f32.partialorder %v878_v25, 8.507059e+37  ;;  %v896_v19 = vor.u32 1.1754944e-38, %v895_v14  ;;  %v5321_v49 = vld [vmem:[#allocation8 + $0x28] sm:$0xff]  ;;  %v6863_v48 = vperm.slane %v6075_v35, 1 }
 0x135   : > { %v852_v7 = vsel %vm849_vm3, %v851_v60, %v847_v28  ;;  %v5586_v9 = vpop.eup %5585  ;;  %v857_v13 = vmul.f32 %v5582_v61, %v856_v46  ;;  %vm894_vm15 = vcmp.eq.f32.partialorder %v893_v31, 8.507059e+37  ;;  %v5322_v60 = vld [vmem:[#allocation8 + $0x30] sm:$0xff]  ;;  %v5319_v28 = vld [vmem:[#allocation8 + $0x18] sm:$0xff] }
 0x136   : > { %v6822_v8 = vmul.f32 %v5584_v2, %v852_v7  ;;  %v870_v3 = vmul.f32 %v5586_v9, %v657_v53  ;;  %v5588_v54 = vpop.eup %5587  ;;  %vm875_vm9 = vweird.f32 %v5586_v9  ;;  %1959 = vmatpush.bf16.msrb.mxu1 %v5322_v60  ;;  %v5320_v2 = vld [vmem:[#allocation8 + $0x20] sm:$0xff]  ;;  %v5318_v46 = vld [vmem:[#allocation8 + $0x10] sm:$0xff] }
 0x137   : > { %v858_v39 = vadd.f32 %v5582_v61, %v857_v13  ;;  %v5590_v63 = vpop.eup %5589  ;;  %vm6835_vm11 = vmor %vm874_vm8, %vm875_vm9 }
 0x138   : > { %943 = vst [vmem:[%s6512_s16 + $0x60] sm:$0xff] %v6822_v8  ;;  %v871_v24 = vsub.f32 1.0, %v870_v3  ;;  %v885_v26 = vmul.f32 %v5590_v63, %v658_v6  ;;  %vm890_vm12 = vweird.f32 %v5590_v63  ;;  %v5592_v40 = vpop.eup %5591 }
 0x139   : > { %v862_v33 = vsel %vm6827_vm6, %v5582_v61, %v858_v39  ;;  %vm891_vm14 = vmor %vm889_vm10, %vm890_vm12  ;;  %v5594_v45 = vpop.eup %5593 }
 0x13a   : > { %v867_v10 = vsel %vm864_vm7, %v866_v0, %v862_v33  ;;  %v872_v29 = vmul.f32 %v5586_v9, %v871_v24  ;;  %v886_v15 = vsub.f32 1.0, %v885_v26  ;;  %1960 = vmatpush.bf16.msrb.mxu1 %v5321_v49 }
 0x13b   : > { %v6833_v30 = vmul.f32 %v5588_v54, %v867_v10 }
 0x13c   : > { %v873_v37 = vadd.f32 %v5586_v9, %v872_v29  ;;  %v887_v43 = vmul.f32 %v5590_v63, %v886_v15 }
 0x13d   : > { %944 = vst [vmem:[%s6512_s16 + $0x68] sm:$0xff] %v6833_v30  ;;  %v953_v61 = vpack.c.bf16 %v6833_v30, %v6822_v8 }
 0x13e   : > { %v877_v44 = vsel %vm6835_vm11, %v5586_v9, %v873_v37  ;;  %v888_v42 = vadd.f32 %v5590_v63, %v887_v43  ;;  %1961 = vmatpush.bf16.msrb.mxu1 %v5320_v2 }
 0x13f   : > { %v882_v51 = vsel %vm879_vm13, %v881_v27, %v877_v44 }
 0x140   : > { %1143 = vmatmul.bf16.gmra.mxu2 %v951_v34  ;;  %1192 = vmatmul.bf16.gmra.mxu3 %v951_v34  ;;  %v6846_v53 = vmul.f32 %v5592_v40, %v882_v51  ;;  %v892_v55 = vsel %vm891_vm14, %v5590_v63, %v888_v42 }
 0x141   : > { %1241 = vmatmul.bf16.gmra.mxu0 %v951_v34  ;;  %v897_v57 = vsel %vm894_vm15, %v896_v19, %v892_v55 }
 0x142   : > { %945 = vst [vmem:[%s6512_s16 + $0x70] sm:$0xff] %v6846_v53  ;;  %v6850_v58 = vmul.f32 %v5594_v45, %v897_v57  ;;  %1962 = vmatpush.bf16.msrb.mxu1 %v5319_v28 }
 0x144   : > { %946 = vst [vmem:[%s6512_s16 + $0x78] sm:$0xff] %v6850_v58  ;;  %v954_v6 = vpack.c.bf16 %v6850_v58, %v6846_v53 }
 0x146   : > { %1963 = vmatpush.bf16.msrb.mxu1 %v5318_v46 }
 0x14a   : > { %1964 = vmatpush.bf16.msrb.mxu1 %v5317_v56 }
 0x14e   : > { %1965 = vmatpush.bf16.msrb.mxu1 %v5316_v17 }
 0x150   : > { %1148 = vmatmul.bf16.gmra.mxu2 %v952_v59  ;;  %1197 = vmatmul.bf16.gmra.mxu3 %v952_v59 }
 0x151   : > { %1246 = vmatmul.bf16.gmra.mxu0 %v952_v59 }
 0x160   : > { %1153 = vmatmul.bf16.gmra.mxu2 %v953_v61  ;;  %1202 = vmatmul.bf16.gmra.mxu3 %v953_v61 }
 0x161   : > { %1251 = vmatmul.bf16.gmra.mxu0 %v953_v61 }
 0x170   : > { %1158 = vmatmul.bf16.gmra.mxu2 %v954_v6  ;;  %1207 = vmatmul.bf16.gmra.mxu3 %v954_v6 }
 0x171   : > { %1256 = vmatmul.bf16.gmra.mxu0 %v954_v6 }
 0x183   : > { %v1173_v4 = vpop.f32.mrf.mxu3 }
 0x184   : > { %v1174_v5 = vadd.f32 %v1173_v4, %v6863_v48 }
 0x186   : > { %v4846_v7 = vmul.f32 -1.442695, %v1174_v5 }
 0x188   : > { %5595 = vpow2.f32 %v4846_v7 }
 0x18b   : > { %v1175_v9 = vpop.f32.mrf.mxu3 }
 0x18c   : > { %v1176_v13 = vadd.f32 %v1175_v9, %v6863_v48 }
 0x18e   : > { %v5596_v18 = vpop.eup %5595  ;;  %v4847_v3 = vmul.f32 -1.442695, %v1176_v13 }
 0x18f   : > { %v1614_v20 = vadd.f32 1.0, %v5596_v18 }
 0x191   : > { %5597 = vrcp.f32 %v1614_v20  ;;  %v1641_v44 = vand.u32 2147483648, %v1614_v20  ;;  %vm1635_vm1 = vweird.f32 %v1614_v20  ;;  %v1639_v45 = vand.u32 2147483647, %v1614_v20 }
 0x192   : > { %5599 = vpow2.f32 %v4847_v3 }
 0x193   : > { %v1178_v0 = vpop.f32.mrf.mxu3  ;;  %v1642_v60 = vor.u32 1.1754944e-38, %v1641_v44  ;;  %vm1640_vm4 = vcmp.eq.f32.partialorder %v1639_v45, 8.507059e+37  ;;  %v4998_v45 = vld [vmem:[#allocation7 + $0xb4] sm:$0xf0] }
 0x194   : > { %v1179_v54 = vadd.f32 %v1178_v0, %v6863_v48 }
 0x196   : > { %v4848_v39 = vmul.f32 -1.442695, %v1179_v54 }
 0x197   : > { %v5598_v63 = vpop.eup %5597 }
 0x198   : > { %v5600_v24 = vpop.eup %5599  ;;  %v1631_v25 = vmul.f32 %v5598_v63, %v1614_v20  ;;  %5601 = vpow2.f32 %v4848_v39  ;;  %vm1636_vm0 = vweird.f32 %v5598_v63 }
 0x199   : > { %v1615_v26 = vadd.f32 1.0, %v5600_v24  ;;  %vm1637_vm2 = vmor %vm1635_vm1, %vm1636_vm0 }
 0x19a   : > { %v1632_v33 = vsub.f32 1.0, %v1631_v25 }
 0x19b   : > { %v1180_v27 = vpop.f32.mrf.mxu3  ;;  %5603 = vrcp.f32 %v1615_v26  ;;  %v1656_v42 = vand.u32 2147483648, %v1615_v26  ;;  %v1654_v57 = vand.u32 2147483647, %v1615_v26  ;;  %vm1650_vm5 = vweird.f32 %v1615_v26 }
 0x19c   : > { %v1181_v10 = vadd.f32 %v1180_v27, %v6863_v48  ;;  %v1633_v14 = vmul.f32 %v5598_v63, %v1632_v33 }
 0x19d   : > { %v1657_v35 = vor.u32 1.1754944e-38, %v1656_v42  ;;  %vm1655_vm7 = vcmp.eq.f32.partialorder %v1654_v57, 8.507059e+37 }
 0x19e   : > { %v4849_v29 = vmul.f32 -1.442695, %v1181_v10  ;;  %v5602_v15 = vpop.eup %5601  ;;  %v1634_v40 = vadd.f32 %v5598_v63, %v1633_v14 }
 0x19f   : > { %v6869_v23 = vadd.f32 1.0, %v5602_v15 }
 0x1a0   : > { %5605 = vpow2.f32 %v4849_v29  ;;  %v1638_v52 = vsel %vm1637_vm2, %v5598_v63, %v1634_v40 }
 0x1a1   : > { %v5604_v31 = vpop.eup %5603  ;;  %5607 = vrcp.f32 %v6869_v23  ;;  %v1643_v2 = vsel %vm1640_vm4, %v1642_v60, %v1638_v52  ;;  %v1671_v25 = vand.u32 2147483648, %v6869_v23  ;;  %vm1665_vm9 = vweird.f32 %v6869_v23 }
 0x1a2   : > { %v1646_v34 = vmul.f32 %v5604_v31, %v1615_v26  ;;  %vm1651_vm3 = vweird.f32 %v5604_v31  ;;  %v1870_v9 = vmul.f32 %v1643_v2, %v6506_v50 }
 0x1a3   : > { %v1183_v37 = vpop.f32.mrf.mxu3  ;;  %vm1652_vm6 = vmor %vm1650_vm5, %vm1651_vm3  ;;  %v1672_v15 = vor.u32 1.1754944e-38, %v1671_v25 }
 0x1a4   : > { %v1184_v43 = vadd.f32 %v1183_v37, %v6863_v48  ;;  %v1647_v19 = vsub.f32 1.0, %v1646_v34 }
 0x1a6   : > { %v4850_v51 = vmul.f32 -1.442695, %v1184_v43  ;;  %v1648_v55 = vmul.f32 %v5604_v31, %v1647_v19  ;;  %v5606_v59 = vpop.eup %5605  ;;  %v5345_v19 = vld [vmem:[#allocation7 + $0xac] sm:$0xf] }
 0x1a7   : > { %v5608_v61 = vpop.eup %5607  ;;  %v1617_v49 = vadd.f32 1.0, %v5606_v59 }
 0x1a8   : > { %v1649_v6 = vadd.f32 %v5604_v31, %v1648_v55  ;;  %5609 = vpow2.f32 %v4850_v51  ;;  %v1661_v28 = vmul.f32 %v5608_v61, %v6869_v23  ;;  %vm1666_vm8 = vweird.f32 %v5608_v61 }
 0x1a9   : > { %5611 = vrcp.f32 %v1617_v49  ;;  %vm1667_vm10 = vmor %vm1665_vm9, %vm1666_vm8  ;;  %v1684_v33 = vand.u32 2147483647, %v1617_v49  ;;  %v1686_v27 = vand.u32 2147483648, %v1617_v49  ;;  %vm1680_vm13 = vweird.f32 %v1617_v49 }
 0x1aa   : > { %v1653_v5 = vsel %vm1652_vm6, %v5604_v31, %v1649_v6  ;;  %v1662_v56 = vsub.f32 1.0, %v1661_v28  ;;  %v5001_v55 = vor.u32 %v5345_v19, %v4998_v45 }
 0x1ab   : > { %v1185_v4 = vpop.f32.mrf.mxu3  ;;  %v1658_v7 = vsel %vm1655_vm7, %v1657_v35, %v1653_v5  ;;  %v1687_v44 = vor.u32 1.1754944e-38, %v1686_v27  ;;  %vm1685_vm15 = vcmp.eq.f32.partialorder %v1684_v33, 8.507059e+37  ;;  %v4986_v33 = vld [vmem:[#allocation7 + $0x9c] sm:$0xf0] }
 0x1ac   : > { %v1186_v46 = vadd.f32 %v1185_v4, %v6863_v48  ;;  %v1871_v13 = vmul.f32 %v1658_v7, %v6531_v11  ;;  %v1663_v18 = vmul.f32 %v5608_v61, %v1662_v56  ;;  %v1669_v11 = vand.u32 2147483647, %v6869_v23  ;;  %2337 = vmatpush.bf16.msra.mxu3 %v5001_v55 }
 0x1ae   : > { %v4851_v17 = vmul.f32 -1.442695, %v1186_v46  ;;  %v1886_v3 = vpack.c.bf16 %v1871_v13, %v1870_v9  ;;  %v5610_v20 = vpop.eup %5609  ;;  %v1664_v39 = vadd.f32 %v5608_v61, %v1663_v18  ;;  %vm1670_vm12 = vcmp.eq.f32.partialorder %v1669_v11, 8.507059e+37 }
 0x1af   : > { %v5612_v0 = vpop.eup %5611  ;;  %v6877_v54 = vadd.f32 1.0, %v5610_v20 }
 0x1b0   : > { %1966 = vmatmul.bf16.vlgmr.msrb.gmra.mxu1 %v1886_v3  ;;  %5613 = vpow2.f32 %v4851_v17  ;;  %v1676_v63 = vmul.f32 %v5612_v0, %v1617_v49  ;;  %v1668_v29 = vsel %vm1667_vm10, %v5608_v61, %v1664_v39  ;;  %vm1681_vm11 = vweird.f32 %v5612_v0 }
 0x1b1   : > { %5615 = vrcp.f32 %v6877_v54  ;;  %v1673_v43 = vsel %vm1670_vm12, %v1672_v15, %v1668_v29  ;;  %vm1682_vm14 = vmor %vm1680_vm13, %vm1681_vm11  ;;  %vm1695_vm1 = vweird.f32 %v6877_v54  ;;  %v1699_v56 = vand.u32 2147483647, %v6877_v54 }
 0x1b2   : > { %v1677_v26 = vsub.f32 1.0, %v1676_v63  ;;  %v1872_v59 = vmul.f32 %v1673_v43, %v6573_v47  ;;  %v1701_v47 = vand.u32 2147483648, %v6877_v54 }
 0x1b3   : > { %v1188_v24 = vpop.f32.mrf.mxu3  ;;  %vm1700_vm4 = vcmp.eq.f32.partialorder %v1699_v56, 8.507059e+37  ;;  %v4974_v56 = vld [vmem:[#allocation7 + $0x84] sm:$0xf0] }
 0x1b4   : > { %v1189_v50 = vadd.f32 %v1188_v24, %v6863_v48  ;;  %v1678_v14 = vmul.f32 %v5612_v0, %v1677_v26  ;;  %v5342_v26 = vld [vmem:[#allocation7 + $0x94] sm:$0xf] }
 0x1b6   : > { %v4852_v10 = vmul.f32 -1.442695, %v1189_v50  ;;  %v5614_v31 = vpop.eup %5613  ;;  %v1679_v34 = vadd.f32 %v5612_v0, %v1678_v14  ;;  %v4989_v14 = vor.u32 %v5342_v26, %v4986_v33 }
 0x1b7   : > { %v5616_v37 = vpop.eup %5615  ;;  %v1619_v40 = vadd.f32 1.0, %v5614_v31 }
 0x1b8   : > { %5617 = vpow2.f32 %v4852_v10  ;;  %v1683_v23 = vsel %vm1682_vm14, %v5612_v0, %v1679_v34  ;;  %v1691_v51 = vmul.f32 %v5616_v37, %v6877_v54  ;;  %vm1696_vm0 = vweird.f32 %v5616_v37  ;;  %2338 = vmatpush.bf16.msra.mxu3 %v4989_v14 }
 0x1b9   : > { %5619 = vrcp.f32 %v1619_v40  ;;  %v1688_v52 = vsel %vm1685_vm15, %v1687_v44, %v1683_v23  ;;  %vm1697_vm2 = vmor %vm1695_vm1, %vm1696_vm0  ;;  %v1714_v13 = vand.u32 2147483647, %v1619_v40  ;;  %v1716_v17 = vand.u32 2147483648, %v1619_v40 }
 0x1ba   : > { %v1873_v60 = vmul.f32 %v1688_v52, %v6620_v21  ;;  %v1692_v61 = vsub.f32 1.0, %v1691_v51  ;;  %v1702_v0 = vor.u32 1.1754944e-38, %v1701_v47  ;;  %vm1710_vm5 = vweird.f32 %v1619_v40 }
 0x1bb   : > { %v1190_v42 = vpop.f32.mrf.mxu3  ;;  %v1717_v11 = vor.u32 1.1754944e-38, %v1716_v17  ;;  %vm1715_vm7 = vcmp.eq.f32.partialorder %v1714_v13, 8.507059e+37 }
 0x1bc   : > { %v1191_v57 = vadd.f32 %v1190_v42, %v6863_v48  ;;  %v1887_v6 = vpack.c.bf16 %v1873_v60, %v1872_v59  ;;  %v1693_v2 = vmul.f32 %v5616_v37, %v1692_v61 }
 0x1be   : > { %v4853_v49 = vmul.f32 -1.442695, %v1191_v57  ;;  %v5618_v35 = vpop.eup %5617  ;;  %v1694_v5 = vadd.f32 %v5616_v37, %v1693_v2 }
 0x1bf   : > { %v5620_v28 = vpop.eup %5619  ;;  %v6888_v4 = vadd.f32 1.0, %v5618_v35 }
 0x1c0   : > { %1971 = vmatmul.bf16.gmra.mxu1 %v1887_v6  ;;  %5621 = vpow2.f32 %v4853_v49  ;;  %v1706_v46 = vmul.f32 %v5620_v28, %v1619_v40  ;;  %v1698_v3 = vsel %vm1697_vm2, %v5616_v37, %v1694_v5  ;;  %vm1711_vm3 = vweird.f32 %v5620_v28 }
 0x1c1   : > { %5623 = vrcp.f32 %v6888_v4  ;;  %v1703_v50 = vsel %vm1700_vm4, %v1702_v0, %v1698_v3  ;;  %vm1712_vm6 = vmor %vm1710_vm5, %vm1711_vm3  ;;  %vm1725_vm9 = vweird.f32 %v6888_v4  ;;  %v1729_v55 = vand.u32 2147483647, %v6888_v4 }
 0x1c2   : > { %v1707_v9 = vsub.f32 1.0, %v1706_v46  ;;  %v1874_v31 = vmul.f32 %v1703_v50, %v6673_v62  ;;  %v1731_v62 = vand.u32 2147483648, %v6888_v4 }
 0x1c3   : > { %v1193_v7 = vpop.f32.mrf.mxu3  ;;  %vm1730_vm12 = vcmp.eq.f32.partialorder %v1729_v55, 8.507059e+37  ;;  %v5336_v55 = vld [vmem:[#allocation7 + $0x64] sm:$0xf] }
 0x1c4   : > { %v1194_v21 = vadd.f32 %v1193_v7, %v6863_v48  ;;  %v1708_v20 = vmul.f32 %v5620_v28, %v1707_v9  ;;  %v1732_v2 = vor.u32 1.1754944e-38, %v1731_v62 }
 0x1c6   : > { %v4854_v18 = vmul.f32 -1.442695, %v1194_v21  ;;  %v5622_v39 = vpop.eup %5621  ;;  %v1709_v63 = vadd.f32 %v5620_v28, %v1708_v20  ;;  %v5339_v21 = vld [vmem:[#allocation7 + $0x7c] sm:$0xf] }
 0x1c7   : > { %v5624_v24 = vpop.eup %5623  ;;  %v1621_v25 = vadd.f32 1.0, %v5622_v39 }
 0x1c8   : > { %5625 = vpow2.f32 %v4854_v18  ;;  %v1713_v54 = vsel %vm1712_vm6, %v5620_v28, %v1709_v63  ;;  %v1721_v27 = vmul.f32 %v5624_v24, %v6888_v4  ;;  %vm1726_vm8 = vweird.f32 %v5624_v24  ;;  %v6910_v63 = vpop.f32.mrf.mxu2 }
 0x1c9   : > { %5627 = vrcp.f32 %v1621_v25  ;;  %v1718_v29 = vsel %vm1715_vm7, %v1717_v11, %v1713_v54  ;;  %vm1727_vm10 = vmor %vm1725_vm9, %vm1726_vm8  ;;  %v1744_v59 = vand.u32 2147483647, %v1621_v25  ;;  %v1746_v60 = vand.u32 2147483648, %v1621_v25 }
 0x1ca   : > { %v1875_v34 = vmul.f32 %v1718_v29, %v6724_v32  ;;  %v1722_v37 = vsub.f32 1.0, %v1721_v27  ;;  %vm1740_vm13 = vweird.f32 %v1621_v25  ;;  %v4977_v18 = vor.u32 %v5339_v21, %v4974_v56 }
 0x1cb   : > { %v1195_v10 = vpop.f32.mrf.mxu3  ;;  %v1747_v47 = vor.u32 1.1754944e-38, %v1746_v60  ;;  %vm1745_vm15 = vcmp.eq.f32.partialorder %v1744_v59, 8.507059e+37 }
 0x1cc   : > { %v1196_v15 = vadd.f32 %v1195_v10, %v6863_v48  ;;  %v1888_v43 = vpack.c.bf16 %v1875_v34, %v1874_v31  ;;  %v1723_v44 = vmul.f32 %v5624_v24, %v1722_v37  ;;  %2339 = vmatpush.bf16.msra.mxu3 %v4977_v18  ;;  %v4950_v18 = vld [vmem:[#allocation7 + $0x54] sm:$0xf0] }
 0x1ce   : > { %v4855_v40 = vmul.f32 -1.442695, %v1196_v15  ;;  %v5626_v23 = vpop.eup %5625  ;;  %v1724_v51 = vadd.f32 %v5624_v24, %v1723_v44 }
 0x1cf   : > { %v5628_v19 = vpop.eup %5627  ;;  %v6899_v45 = vadd.f32 1.0, %v5626_v23 }
 0x1d0   : > { %1976 = vmatmul.bf16.gmra.mxu1 %v1888_v43  ;;  %5629 = vpow2.f32 %v4855_v40  ;;  %v1736_v42 = vmul.f32 %v5628_v19, %v1621_v25  ;;  %v1728_v49 = vsel %vm1727_vm10, %v5624_v24, %v1724_v51  ;;  %vm1741_vm11 = vweird.f32 %v5628_v19 }
 0x1d1   : > { %5631 = vrcp.f32 %v6899_v45  ;;  %v1733_v7 = vsel %vm1730_vm12, %v1732_v2, %v1728_v49  ;;  %vm1742_vm14 = vmor %vm1740_vm13, %vm1741_vm11  ;;  %vm1755_vm1 = vweird.f32 %v6899_v45  ;;  %v1759_v29 = vand.u32 2147483647, %v6899_v45  ;;  %v6076_v2 = vld [vmem:[%s6512_s16 + $0x40] sm:$0xff] }
 0x1d2   : > { %v1737_v57 = vsub.f32 1.0, %v1736_v42  ;;  %v1876_v20 = vmul.f32 %v1733_v7, %v6779_v16 }
 0x1d3   : > { %v1198_v52 = vpop.f32.mrf.mxu3  ;;  %vm1760_vm4 = vcmp.eq.f32.partialorder %v1759_v29, 8.507059e+37 }
 0x1d4   : > { %v1199_v32 = vadd.f32 %v1198_v52, %v6863_v48  ;;  %v1738_v6 = vmul.f32 %v5628_v19, %v1737_v57  ;;  %v4962_v57 = vld [vmem:[#allocation7 + $0x6c] sm:$0xf0] }
 0x1d5   : > { %v4965_v49 = vor.u32 %v5336_v55, %v4962_v57 }
 0x1d6   : > { %v4856_v61 = vmul.f32 -1.442695, %v1199_v32  ;;  %v5630_v35 = vpop.eup %5629  ;;  %v1739_v28 = vadd.f32 %v5628_v19, %v1738_v6 }
 0x1d7   : > { %v5632_v5 = vpop.eup %5631  ;;  %v1623_v46 = vadd.f32 1.0, %v5630_v35  ;;  %2340 = vmatpush.bf16.msra.mxu3 %v4965_v49 }
 0x1d8   : > { %5633 = vpow2.f32 %v4856_v61  ;;  %v1743_v4 = vsel %vm1742_vm14, %v5628_v19, %v1739_v28  ;;  %v1751_v9 = vmul.f32 %v5632_v5, %v6899_v45  ;;  %vm1756_vm0 = vweird.f32 %v5632_v5  ;;  %v6925_v19 = vpop.f32.mrf.mxu2 }
 0x1d9   : > { %5635 = vrcp.f32 %v1623_v46  ;;  %v1748_v17 = vsel %vm1745_vm15, %v1747_v47, %v1743_v4  ;;  %vm6919_vm2 = vmor %vm1755_vm1, %vm1756_vm0  ;;  %v1774_v31 = vand.u32 2147483647, %v1623_v46  ;;  %v1776_v34 = vand.u32 2147483648, %v1623_v46 }
 0x1da   : > { %v1877_v0 = vmul.f32 %v1748_v17, %v6803_v41  ;;  %v1752_v39 = vsub.f32 1.0, %v1751_v9  ;;  %v1761_v41 = vand.u32 2147483648, %v6899_v45  ;;  %vm1770_vm5 = vweird.f32 %v1623_v46  ;;  %v5333_v17 = vld [vmem:[#allocation7 + $0x4c] sm:$0xf] }
 0x1db   : > { %v1200_v13 = vpop.f32.mrf.mxu3  ;;  %v1777_v62 = vor.u32 1.1754944e-38, %v1776_v34  ;;  %vm1775_vm7 = vcmp.eq.f32.partialorder %v1774_v31, 8.507059e+37 }
 0x1dc   : > { %v1201_v3 = vadd.f32 %v1200_v13, %v6863_v48  ;;  %v1889_v25 = vpack.c.bf16 %v1877_v0, %v1876_v20  ;;  %v1753_v50 = vmul.f32 %v5632_v5, %v1752_v39  ;;  %v1762_v44 = vor.u32 1.1754944e-38, %v1761_v41  ;;  %v5330_v39 = vld [vmem:[#allocation7 + $0x34] sm:$0xf] }
 0x1dd   : > { %v4953_v0 = vor.u32 %v5333_v17, %v4950_v18  ;;  %v5343_v17 = vld [vmem:[#allocation7 + $0x98] sm:$0xf0] }
 0x1de   : > { %v4857_v24 = vmul.f32 -1.442695, %v1201_v3  ;;  %v5634_v11 = vpop.eup %5633  ;;  %v1754_v33 = vadd.f32 %v5632_v5, %v1753_v50 }
 0x1df   : > { %v5636_v54 = vpop.eup %5635  ;;  %v6912_v26 = vadd.f32 1.0, %v5634_v11  ;;  %2341 = vmatpush.bf16.msra.mxu3 %v4953_v0 }
 0x1e0   : > { %1981 = vmatmul.bf16.gmra.mxu1 %v1889_v25  ;;  %5637 = vpow2.f32 %v4857_v24  ;;  %v1766_v27 = vmul.f32 %v5636_v54, %v1623_v46  ;;  %v1758_v40 = vsel %vm6919_vm2, %v5632_v5, %v1754_v33  ;;  %vm1771_vm3 = vweird.f32 %v5636_v54  ;;  %v6940_v9 = vpop.f32.mrf.mxu2  ;;  %v4938_v24 = vld [vmem:[#allocation7 + $0x3c] sm:$0xf0] }
 0x1e1   : > { %5639 = vrcp.f32 %v6912_v26  ;;  %v1763_v52 = vsel %vm1760_vm4, %v1762_v44, %v1758_v40  ;;  %vm1772_vm6 = vmor %vm1770_vm5, %vm1771_vm3  ;;  %v1791_v20 = vand.u32 2147483648, %v6912_v26  ;;  %vm1785_vm9 = vweird.f32 %v6912_v26 }
 0x1e2   : > { %v1767_v14 = vsub.f32 1.0, %v1766_v27  ;;  %v1878_v35 = vmul.f32 %v6076_v2, %v1763_v52  ;;  %v1789_v50 = vand.u32 2147483647, %v6912_v26 }
 0x1e3   : > { %v1203_v16 = vpop.f32.mrf.mxu3 }
 0x1e4   : > { %v1204_v10 = vadd.f32 %v1203_v16, %v6863_v48  ;;  %v1768_v43 = vmul.f32 %v5636_v54, %v1767_v14  ;;  %v4941_v16 = vor.u32 %v5330_v39, %v4938_v24  ;;  %v1792_v14 = vor.u32 1.1754944e-38, %v1791_v20  ;;  %v4992_v24 = vld [vmem:[#allocation7 + $0x98] sm:$0xf] }
 0x1e5   : > { %vm1790_vm12 = vcmp.eq.f32.partialorder %v1789_v50, 8.507059e+37 }
 0x1e6   : > { %v4858_v37 = vmul.f32 -1.442695, %v1204_v10  ;;  %v5638_v23 = vpop.eup %5637  ;;  %v1769_v51 = vadd.f32 %v5636_v54, %v1768_v43  ;;  %2342 = vmatpush.bf16.msra.mxu3 %v4941_v16 }
 0x1e7   : > { %v6927_v45 = vpop.eup %5639  ;;  %v6929_v42 = vadd.f32 1.0, %v5638_v23  ;;  %v1125_v23 = vadd.f32 %v6910_v63, %v6484_v38 }
 0x1e8   : > { %5641 = vpow2.f32 %v4858_v37  ;;  %v1773_v32 = vsel %vm1772_vm6, %v5636_v54, %v1769_v51  ;;  %v1781_v59 = vmul.f32 %v6927_v45, %v6912_v26  ;;  %vm1786_vm8 = vweird.f32 %v6927_v45 }
 0x1e9   : > { %5643 = vrcp.f32 %v6929_v42  ;;  %v1778_v61 = vsel %vm1775_vm7, %v1777_v62, %v1773_v32  ;;  %vm6950_vm10 = vmor %vm1785_vm9, %vm1786_vm8  ;;  %v1804_v33 = vand.u32 2147483647, %v6929_v42  ;;  %v1806_v27 = vand.u32 2147483648, %v6929_v42 }
 0x1ea   : > { %v1879_v28 = vmul.f32 %v1778_v61, %v6741_v36  ;;  %v1782_v5 = vsub.f32 1.0, %v1781_v59  ;;  %vm1800_vm13 = vweird.f32 %v6929_v42  ;;  %v4830_v49 = vmul.f32 -1.442695, %v1125_v23 }
 0x1eb   : > { %v1205_v60 = vpop.f32.mrf.mxu3  ;;  %v1807_v40 = vor.u32 1.1754944e-38, %v1806_v27  ;;  %vm1805_vm15 = vcmp.eq.f32.partialorder %v1804_v33, 8.507059e+37 }
 0x1ec   : > { %v1206_v6 = vadd.f32 %v1205_v60, %v6863_v48  ;;  %v1890_v7 = vpack.c.bf16 %v1879_v28, %v1878_v35  ;;  %v1783_v47 = vmul.f32 %v6927_v45, %v1782_v5  ;;  %v5327_v35 = vld [vmem:[#allocation7 + $0x1c] sm:$0xf]  ;;  %v4996_v5 = vld [vmem:[#allocation7 + $0xa8] sm:$0xf] }
 0x1ee   : > { %v4859_v46 = vmul.f32 -1.442695, %v1206_v6  ;;  %v5642_v4 = vpop.eup %5641  ;;  %v1784_v13 = vadd.f32 %v6927_v45, %v1783_v47  ;;  %v5004_v47 = vld [vmem:[#allocation7 + $0xb0] sm:$0xf] }
 0x1ef   : > { %v5644_v21 = vpop.eup %5643  ;;  %v6938_v56 = vadd.f32 1.0, %v5642_v4  ;;  %v5347_v4 = vld [vmem:[#allocation7 + $0xb8] sm:$0xf0] }
 0x1f0   : > { %1986 = vmatmul.bf16.gmra.mxu1 %v1890_v7  ;;  %5645 = vpow2.f32 %v4859_v46  ;;  %v1796_v36 = vmul.f32 %v5644_v21, %v6929_v42  ;;  %v1788_v10 = vsel %vm6950_vm10, %v6927_v45, %v1784_v13  ;;  %vm1801_vm11 = vweird.f32 %v5644_v21  ;;  %v6969_v42 = vpop.f32.mrf.mxu2  ;;  %v5346_v46 = vld [vmem:[#allocation7 + $0xb0] sm:$0xf0] }
 0x1f1   : > { %5647 = vrcp.f32 %v6938_v56  ;;  %v1793_v37 = vsel %vm1790_vm12, %v1792_v14, %v1788_v10  ;;  %vm1802_vm14 = vmor %vm1800_vm13, %vm1801_vm11  ;;  %v1819_v2 = vand.u32 2147483647, %v6938_v56  ;;  %v1821_v7 = vand.u32 2147483648, %v6938_v56 }
 0x1f2   : > { %v1797_v11 = vsub.f32 1.0, %v1796_v36  ;;  %v1880_v62 = vmul.f32 %v1793_v37, %v6789_v22  ;;  %vm1815_vm1 = vweird.f32 %v6938_v56  ;;  %v4984_v36 = vld [vmem:[#allocation7 + $0x90] sm:$0xf]  ;;  %v4997_v0 = vor.u32 %v5346_v46, %v4996_v5  ;;  %v4968_v5 = vld [vmem:[#allocation7 + $0x68] sm:$0xf] }
 0x1f3   : > { %v1208_v3 = vpop.f32.mrf.mxu3  ;;  %v5005_v39 = vor.u32 %v5347_v4, %v5004_v47  ;;  %v1822_v54 = vor.u32 1.1754944e-38, %v1821_v7  ;;  %v4985_v33 = vor.u32 %v5343_v17, %v4984_v36  ;;  %vm1820_vm4 = vcmp.eq.f32.partialorder %v1819_v2, 8.507059e+37  ;;  %v5338_v46 = vld [vmem:[#allocation7 + $0x70] sm:$0xf0] }
 0x1f4   : > { %v1209_v25 = vadd.f32 %v1208_v3, %v6863_v48  ;;  %v1798_v29 = vmul.f32 %v5644_v21, %v1797_v11  ;;  %2288 = vmatpush.bf16.msra.mxu2 %v4997_v0 }
 0x1f5   : > { %2386 = vmatpush.bf16.msra.mxu0 %v5005_v39 }
 0x1f6   : > { %v4860_v41 = vmul.f32 -1.442695, %v1209_v25  ;;  %v5646_v26 = vpop.eup %5645  ;;  %v1799_v15 = vadd.f32 %v5644_v21, %v1798_v29  ;;  %v5344_v25 = vld [vmem:[#allocation7 + $0xa0] sm:$0xf0] }
 0x1f7   : > { %v6960_v31 = vpop.eup %5647  ;;  %v6962_v34 = vadd.f32 1.0, %v5646_v26 }
 0x1f8   : > { %5649 = vpow2.f32 %v4860_v41  ;;  %v1803_v43 = vsel %vm1802_vm14, %v5644_v21, %v1799_v15  ;;  %v1811_v44 = vmul.f32 %v6960_v31, %v6938_v56  ;;  %vm1816_vm0 = vweird.f32 %v6960_v31  ;;  %v6993_v50 = vpop.f32.mrf.mxu2  ;;  %2289 = vmatpush.bf16.msra.mxu2 %v4985_v33  ;;  %v4948_v33 = vld [vmem:[#allocation7 + $0x48] sm:$0xf] }
 0x1f9   : > { %5651 = vrcp.f32 %v6962_v34  ;;  %v1808_v45 = vsel %vm1805_vm15, %v1807_v40, %v1803_v43  ;;  %v1127_v21 = vadd.f32 %v6925_v19, %v6484_v38  ;;  %vm6988_vm2 = vmor %vm1815_vm1, %vm1816_vm0  ;;  %v1836_v3 = vand.u32 2147483648, %v6962_v34  ;;  %v7008_v43 = vpop.f32.mrf.mxu0 }
 0x1fa   : > { %v1881_v32 = vmul.f32 %v1808_v45, %v6805_v1  ;;  %v1812_v55 = vsub.f32 1.0, %v1811_v44  ;;  %v4926_v1 = vld [vmem:[#allocation7 + $0x24] sm:$0xf0]  ;;  %v1834_v11 = vand.u32 2147483647, %v6962_v34  ;;  %vm1830_vm5 = vweird.f32 %v6962_v34 }
 0x1fb   : > { %v1210_v51 = vpop.f32.mrf.mxu3  ;;  %v4929_v20 = vor.u32 %v5327_v35, %v4926_v1  ;;  %v4993_v41 = vor.u32 %v5344_v25, %v4992_v24  ;;  %v1837_v26 = vor.u32 1.1754944e-38, %v1836_v3  ;;  %v4960_v35 = vld [vmem:[#allocation7 + $0x60] sm:$0xf]  ;;  %v1132_v24 = vadd.f32 %v6969_v42, %v6484_v38 }
 0x1fc   : > { %v1211_v52 = vadd.f32 %v1210_v51, %v6863_v48  ;;  %v1891_v59 = vpack.c.bf16 %v1881_v32, %v1880_v62  ;;  %v1813_v60 = vmul.f32 %v6960_v31, %v1812_v55  ;;  %vm1835_vm7 = vcmp.eq.f32.partialorder %v1834_v11, 8.507059e+37  ;;  %v4972_v55 = vld [vmem:[#allocation7 + $0x78] sm:$0xf] }
 0x1fd   : > { %2343 = vmatpush.bf16.msra.mxu3 %v4929_v20  ;;  %2387 = vmatpush.bf16.msra.mxu0 %v4993_v41 }
 0x1fe   : > { %v4861_v57 = vmul.f32 -1.442695, %v1211_v52  ;;  %v5650_v61 = vpop.eup %5649  ;;  %v1814_v28 = vadd.f32 %v6960_v31, %v1813_v60  ;;  %v1130_v52 = vadd.f32 %v6940_v9, %v6484_v38  ;;  %v4980_v60 = vld [vmem:[#allocation7 + $0x80] sm:$0xf] }
 0x1ff   : > { %v5652_v63 = vpop.eup %5651  ;;  %v6975_v6 = vadd.f32 1.0, %v5650_v61  ;;  %v5341_v61 = vld [vmem:[#allocation7 + $0x88] sm:$0xf0] }
 0x200   : > { %1991 = vmatmul.bf16.gmra.mxu1 %v1891_v59  ;;  %5653 = vpow2.f32 %v4861_v57  ;;  %v1826_v22 = vmul.f32 %v5652_v63, %v6962_v34  ;;  %v1818_v19 = vsel %vm6988_vm2, %v6960_v31, %v1814_v28  ;;  %vm1831_vm3 = vweird.f32 %v5652_v63  ;;  %v5340_v57 = vld [vmem:[#allocation7 + $0x80] sm:$0xf0]  ;;  %v5337_v28 = vld [vmem:[#allocation7 + $0x68] sm:$0xf0] }
 0x201   : > { %5655 = vrcp.f32 %v6975_v6  ;;  %v1823_v14 = vsel %vm1820_vm4, %v1822_v54, %v1818_v19  ;;  %vm1832_vm6 = vmor %vm1830_vm5, %vm1831_vm3  ;;  %v4831_v31 = vmul.f32 -1.442695, %v1127_v21  ;;  %v4973_v59 = vor.u32 %v5340_v57, %v4972_v55  ;;  %v7032_v18 = vpop.f32.mrf.mxu0 }
 0x202   : > { %5657 = vpow2.f32 %v4830_v49  ;;  %v1827_v13 = vsub.f32 1.0, %v1826_v22  ;;  %v1882_v44 = vmul.f32 %v1823_v14, %v6822_v8  ;;  %v7017_v49 = vpop.f32.mrf.mxu2  ;;  %v4981_v8 = vor.u32 %v5341_v61, %v4980_v60  ;;  %v5335_v14 = vld [vmem:[#allocation7 + $0x58] sm:$0xf0] }
 0x203   : > { %2290 = vmatpush.bf16.msra.mxu2 %v4973_v59  ;;  %v1851_v22 = vand.u32 2147483648, %v6975_v6  ;;  %v4961_v1 = vor.u32 %v5337_v28, %v4960_v35  ;;  %vm1845_vm9 = vweird.f32 %v6975_v6  ;;  %v1849_v47 = vand.u32 2147483647, %v6975_v6 }
 0x204   : > { %v1828_v56 = vmul.f32 %v5652_v63, %v1827_v13  ;;  %2388 = vmatpush.bf16.msra.mxu0 %v4981_v8  ;;  %v4969_v21 = vor.u32 %v5338_v46, %v4968_v5  ;;  %v5324_v8 = vld [vmem:[#allocation7 + $0x4] sm:$0xf]  ;;  %v4924_v13 = vld [vmem:[#allocation7 + $0x18] sm:$0xf] }
 0x205   : > { %v1852_v39 = vor.u32 1.1754944e-38, %v1851_v22  ;;  %vm1850_vm12 = vcmp.eq.f32.partialorder %v1849_v47, 8.507059e+37 }
 0x206   : > { %v5654_v27 = vpop.eup %5653  ;;  %v1829_v16 = vadd.f32 %v5652_v63, %v1828_v56 }
 0x207   : > { %v7000_v10 = vpop.eup %5655  ;;  %v7002_v29 = vadd.f32 1.0, %v5654_v27  ;;  %2291 = vmatpush.bf16.msra.mxu2 %v4961_v1  ;;  %v5334_v27 = vld [vmem:[#allocation7 + $0x50] sm:$0xf0] }
 0x208   : > { %v5658_v15 = vpop.eup %5657  ;;  %v1833_v37 = vsel %vm1832_vm6, %v5652_v63, %v1829_v16  ;;  %v1841_v40 = vmul.f32 %v7000_v10, %v6975_v6  ;;  %v4832_v63 = vmul.f32 -1.442695, %v1130_v52  ;;  %vm1846_vm8 = vweird.f32 %v7000_v10  ;;  %2389 = vmatpush.bf16.msra.mxu0 %v4969_v21  ;;  %v4956_v16 = vld [vmem:[#allocation7 + $0x50] sm:$0xf] }
 0x209   : > { %5659 = vrcp.f32 %v7002_v29  ;;  %v1838_v34 = vsel %vm1835_vm7, %v1837_v26, %v1833_v37  ;;  %v7012_v45 = vadd.f32 1.0, %v5658_v15  ;;  %vm7026_vm10 = vmor %vm1845_vm9, %vm1846_vm8  ;;  %v1864_v36 = vand.u32 2147483647, %v7002_v29 }
 0x20a   : > { %v1883_v23 = vmul.f32 %v1838_v34, %v6833_v30  ;;  %v1842_v51 = vsub.f32 1.0, %v1841_v40  ;;  %5661 = vpow2.f32 %v4831_v31  ;;  %v1866_v17 = vand.u32 2147483648, %v7002_v29  ;;  %v7044_v11 = vpop.f32.mrf.mxu2  ;;  %v4936_v34 = vld [vmem:[#allocation7 + $0x30] sm:$0xf] }
 0x20b   : > { %5663 = vrcp.f32 %v7012_v45  ;;  %vm1860_vm13 = vweird.f32 %v7002_v29  ;;  %vm1865_vm15 = vcmp.eq.f32.partialorder %v1864_v36, 8.507059e+37  ;;  %v4833_v26 = vmul.f32 -1.442695, %v1132_v24  ;;  %v5328_v36 = vld [vmem:[#allocation7 + $0x20] sm:$0xf0] }
 0x20c   : > { %v1892_v62 = vpack.c.bf16 %v1883_v23, %v1882_v44  ;;  %v1843_v32 = vmul.f32 %v7000_v10, %v1842_v51  ;;  %5665 = vpow2.f32 %v4832_v63  ;;  %v1867_v56 = vor.u32 1.1754944e-38, %v1866_v17  ;;  %v5331_v44 = vld [vmem:[#allocation7 + $0x38] sm:$0xf0]  ;;  %v4944_v23 = vld [vmem:[#allocation7 + $0x38] sm:$0xf] }
 0x20d   : > { %v4957_v31 = vor.u32 %v5335_v14, %v4956_v16  ;;  %v4937_v52 = vor.u32 %v5331_v44, %v4936_v34  ;;  %vm1331_vm1 = vweird.f32 %v7012_v45  ;;  %v1337_v46 = vand.u32 2147483648, %v7012_v45  ;;  %v4932_v17 = vld [vmem:[#allocation7 + $0x20] sm:$0xf]  ;;  %v5329_v24 = vld [vmem:[#allocation7 + $0x28] sm:$0xf0] }
 0x20e   : > { %v1844_v2 = vadd.f32 %v7000_v10, %v1843_v32  ;;  %v7051_v32 = vpop.f32.mrf.mxu0  ;;  %v1335_v47 = vand.u32 2147483647, %v7012_v45 }
 0x20f   : > { %v5660_v30 = vpop.eup %5659  ;;  %2390 = vmatpush.bf16.msra.mxu0 %v4957_v31 }
 0x210   : > { %1996 = vmatmul.bf16.gmra.mxu1 %v1892_v62  ;;  %v1856_v9 = vmul.f32 %v5660_v30, %v7002_v29  ;;  %v5662_v7 = vpop.eup %5661  ;;  %v1848_v3 = vsel %vm7026_vm10, %v7000_v10, %v1844_v2  ;;  %vm1861_vm11 = vweird.f32 %v5660_v30  ;;  %v4949_v10 = vor.u32 %v5334_v27, %v4948_v33  ;;  %v5332_v62 = vld [vmem:[#allocation7 + $0x40] sm:$0xf0]  ;;  %v4920_v33 = vld [vmem:[#allocation7 + $0x8] sm:$0xf]  ;;  %v5326_v27 = vld [vmem:[#allocation7 + $0x10] sm:$0xf0] }
 0x211   : > { %v7037_v6 = vpop.eup %5663  ;;  %v7039_v0 = vadd.f32 1.0, %v5662_v7  ;;  %v1853_v19 = vsel %vm1850_vm12, %v1852_v39, %v1848_v3  ;;  %vm1862_vm14 = vmor %vm1860_vm13, %vm1861_vm11  ;;  %v4925_v39 = vor.u32 %v5328_v36, %v4924_v13  ;;  %vm1336_vm3 = vcmp.eq.f32.partialorder %v1335_v47, 8.507059e+37 }
 0x212   : > { %v1857_v4 = vsub.f32 1.0, %v1856_v9  ;;  %v1327_v41 = vmul.f32 %v7037_v6, %v7012_v45  ;;  %v1884_v29 = vmul.f32 %v1853_v19, %v6846_v53  ;;  %v5666_v37 = vpop.eup %5665  ;;  %2292 = vmatpush.bf16.msra.mxu2 %v4949_v10  ;;  %v1135_v53 = vadd.f32 %v6993_v50, %v6484_v38  ;;  %v7060_v60 = vpop.f32.mrf.mxu2  ;;  %v4912_v45 = vld [vmem:[#allocation7] sm:$0xf] }
 0x213   : > { %5667 = vrcp.f32 %v7039_v0  ;;  %v7053_v55 = vadd.f32 1.0, %v5666_v37  ;;  %v1137_v9 = vadd.f32 %v7017_v49, %v6484_v38  ;;  %vm1332_vm0 = vweird.f32 %v7037_v6 }
 0x214   : > { %v1858_v20 = vmul.f32 %v5660_v30, %v1857_v4  ;;  %v1328_v51 = vsub.f32 1.0, %v1327_v41  ;;  %5669 = vpow2.f32 %v4833_v26  ;;  %v4834_v59 = vmul.f32 -1.442695, %v1135_v53  ;;  %vm7077_vm2 = vmor %vm1331_vm1, %vm1332_vm0 }
 0x215   : > { %5671 = vrcp.f32 %v7053_v55  ;;  %v4835_v7 = vmul.f32 -1.442695, %v1137_v9  ;;  %v1223_v4 = vadd.f32 %v7008_v43, %v6489_v12  ;;  %v4921_v14 = vor.u32 %v5326_v27, %v4920_v33 }
 0x216   : > { %v1859_v25 = vadd.f32 %v5660_v30, %v1858_v20  ;;  %2293 = vmatpush.bf16.msra.mxu2 %v4937_v52  ;;  %v1329_v61 = vmul.f32 %v7037_v6, %v1328_v51  ;;  %5673 = vpow2.f32 %v4834_v59  ;;  %v7073_v5 = vpop.f32.mrf.mxu0  ;;  %v1352_v31 = vand.u32 2147483648, %v7039_v0 }
 0x217   : > { %vm1346_vm5 = vweird.f32 %v7039_v0  ;;  %v1350_v34 = vand.u32 2147483647, %v7039_v0  ;;  %v1225_v51 = vadd.f32 %v7032_v18, %v6489_v12  ;;  %v1142_v18 = vadd.f32 %v7060_v60, %v6484_v38 }
 0x218   : > { %v1863_v54 = vsel %vm1862_vm14, %v5660_v30, %v1859_v25  ;;  %v4914_v30 = vld [vmem:[#allocation7 + $0xc] sm:$0xf0]  ;;  %v1330_v35 = vadd.f32 %v7037_v6, %v1329_v61  ;;  %v5325_v25 = vld [vmem:[#allocation7 + $0x8] sm:$0xf0]  ;;  %vm1361_vm9 = vweird.f32 %v7053_v55  ;;  %v1365_v60 = vand.u32 2147483647, %v7053_v55 }
 0x219   : > { %v1868_v42 = vsel %vm1865_vm15, %v1867_v56, %v1863_v54  ;;  %v7057_v57 = vpop.eup %5667  ;;  %v4917_v2 = vor.u32 %v5324_v8, %v4914_v30  ;;  %v1338_v56 = vor.u32 1.1754944e-38, %v1337_v46  ;;  %v4913_v41 = vor.u32 %v5325_v25, %v4912_v45  ;;  %v6077_v8 = vld [vmem:[%s6512_s16] sm:$0xff]  ;;  %v6078_v25 = vld [vmem:[%s6512_s16 + $0x8] sm:$0xff] }
 0x21a   : > { %v1885_v15 = vmul.f32 %v1868_v42, %v6850_v58  ;;  %v4945_v58 = vor.u32 %v5332_v62, %v4944_v23  ;;  %v1342_v63 = vmul.f32 %v7057_v57, %v7039_v0  ;;  %v5670_v50 = vpop.eup %5669  ;;  %v1334_v21 = vsel %vm7077_vm2, %v7037_v6, %v1330_v35  ;;  %v7091_v43 = vpop.f32.mrf.mxu2  ;;  %2294 = vmatpush.bf16.msra.mxu2 %v4925_v39 }
 0x21b   : > { %2344 = vmatpush.bf16.msra.mxu3 %v4917_v2  ;;  %v7069_v22 = vadd.f32 1.0, %v5670_v50  ;;  %v7071_v1 = vpop.eup %5671  ;;  %v4933_v6 = vor.u32 %v5329_v24, %v4932_v17  ;;  %vm1347_vm4 = vweird.f32 %v7057_v57  ;;  %v1140_v42 = vadd.f32 %v7044_v11, %v6484_v38 }
 0x21c   : > { %v1893_v40 = vpack.c.bf16 %v1885_v15, %v1884_v29  ;;  %2391 = vmatpush.bf16.msra.mxu0 %v4945_v58  ;;  %v1343_v28 = vsub.f32 1.0, %v1342_v63  ;;  %v1357_v3 = vmul.f32 %v7071_v1, %v7053_v55  ;;  %v5674_v19 = vpop.eup %5673  ;;  %v1339_v10 = vsel %vm1336_vm3, %v1338_v56, %v1334_v21  ;;  %vm7108_vm6 = vmor %vm1346_vm5, %vm1347_vm4 }
 0x21d   : > { %5675 = vrcp.f32 %v7069_v22  ;;  %v7096_v29 = vadd.f32 1.0, %v5674_v19  ;;  %v4836_v44 = vmul.f32 -1.442695, %v1140_v42  ;;  %v1353_v58 = vor.u32 1.1754944e-38, %v1352_v31 }
 0x21e   : > { %v1344_v20 = vmul.f32 %v7057_v57, %v1343_v28  ;;  %5677 = vpow2.f32 %v4835_v7  ;;  %v1358_v26 = vsub.f32 1.0, %v1357_v3  ;;  %2295 = vmatpush.bf16.msra.mxu2 %v4913_v41  ;;  %v7104_v11 = vpop.f32.mrf.mxu0  ;;  %vm1351_vm7 = vcmp.eq.f32.partialorder %v1350_v34, 8.507059e+37 }
 0x21f   : > { %vm1362_vm8 = vweird.f32 %v7071_v1  ;;  %v1367_v7 = vand.u32 2147483648, %v7053_v55  ;;  %v1228_v13 = vadd.f32 %v7051_v32, %v6489_v12  ;;  %vm1366_vm11 = vcmp.eq.f32.partialorder %v1365_v60, 8.507059e+37 }
 0x220   : > { %2001 = vmatmul.bf16.gmra.mxu1 %v1893_v40  ;;  %2392 = vmatpush.bf16.msra.mxu0 %v4933_v6  ;;  %v1345_v15 = vadd.f32 %v7057_v57, %v1344_v20  ;;  %v2039_v40 = vsub.f32 1.0, %v1339_v10  ;;  %v1359_v52 = vmul.f32 %v7071_v1, %v1358_v26  ;;  %vm7136_vm10 = vmor %vm1361_vm9, %vm1362_vm8  ;;  %vm1376_vm13 = vweird.f32 %v7069_v22 }
 0x221   : > { %v1368_v20 = vor.u32 1.1754944e-38, %v1367_v7  ;;  %v1230_v31 = vadd.f32 %v7073_v5, %v6489_v12  ;;  %vm1391_vm1 = vweird.f32 %v7096_v29  ;;  %v1233_v7 = vadd.f32 %v7104_v11, %v6489_v12 }
 0x222   : > { %v1349_v0 = vsel %vm7108_vm6, %v7057_v57, %v1345_v15  ;;  %v2055_v30 = vmul.f32 %v6077_v8, %v2039_v40  ;;  %v7124_v2 = vpop.f32.mrf.mxu2  ;;  %v1360_v35 = vadd.f32 %v7071_v1, %v1359_v52 }
 0x223   : > { %v7100_v37 = vpop.eup %5675  ;;  %v1354_v50 = vsel %vm1351_vm7, %v1353_v58, %v1349_v0  ;;  %v6079_v0 = vld [vmem:[%s6512_s16 + $0x10] sm:$0xff] }
 0x224   : > { %2393 = vmatpush.bf16.msra.mxu0 %v4921_v14  ;;  %v5678_v62 = vpop.eup %5677  ;;  %v1372_v53 = vmul.f32 %v7100_v37, %v7069_v22  ;;  %v2040_v47 = vsub.f32 1.0, %v1354_v50  ;;  %v1364_v36 = vsel %vm7136_vm10, %v7071_v1, %v1360_v35  ;;  %v1145_v1 = vadd.f32 %v7091_v43, %v6484_v38 }
 0x225   : > { %v7126_v9 = vadd.f32 1.0, %v5678_v62  ;;  %vm1377_vm12 = vweird.f32 %v7100_v37  ;;  %v1382_v14 = vand.u32 2147483648, %v7069_v22  ;;  %v1380_v43 = vand.u32 2147483647, %v7069_v22 }
 0x226   : > { %v1373_v28 = vsub.f32 1.0, %v1372_v53  ;;  %v7148_v55 = vpop.f32.mrf.mxu0  ;;  %v2056_v19 = vmul.f32 %v6078_v25, %v2040_v47  ;;  %v4838_v26 = vmul.f32 -1.442695, %v1145_v1  ;;  %vm7171_vm14 = vmor %vm1376_vm13, %vm1377_vm12 }
 0x227   : > { %v1383_v62 = vor.u32 1.1754944e-38, %v1382_v14  ;;  %vm1381_vm15 = vcmp.eq.f32.partialorder %v1380_v43, 8.507059e+37  ;;  %vm1406_vm5 = vweird.f32 %v7126_v9  ;;  %v1235_v14 = vadd.f32 %v7148_v55, %v6489_v12 }
 0x228   : > { %v1374_v24 = vmul.f32 %v7100_v37, %v1373_v28 }
 0x22a   : > { %v1149_v27 = vpop.f32.mrf.mxu2  ;;  %v1375_v41 = vadd.f32 %v7100_v37, %v1374_v24 }
 0x22b   : > { %v1150_v11 = vadd.f32 %v1149_v27, %v6484_v38 }
 0x22c   : > { %v1379_v23 = vsel %vm7171_vm14, %v7100_v37, %v1375_v41  ;;  %v1410_v41 = vand.u32 2147483647, %v7126_v9 }
 0x22d   : > { %v1967_v54 = vpop.f32.mrf.mxu1  ;;  %v1384_v8 = vsel %vm1381_vm15, %v1383_v62, %v1379_v23 }
 0x22e   : > { %v2007_v16 = vadd.f32 %v1967_v54, %v1223_v4  ;;  %v4837_v4 = vmul.f32 -1.442695, %v1142_v18  ;;  %v1369_v54 = vsel %vm1366_vm11, %v1368_v20, %v1364_v36  ;;  %v7182_v58 = vpop.f32.mrf.mxu0  ;;  %v6080_v20 = vld [vmem:[%s6512_s16 + $0x18] sm:$0xff]  ;;  %vm1411_vm7 = vcmp.eq.f32.partialorder %v1410_v41, 8.507059e+37 }
 0x230   : > { %5679 = vtanh.f32 %v2007_v16 }
 0x231   : > { %5681 = vrcp.f32 %v7096_v29 }
 0x232   : > { %5683 = vpow2.f32 %v4836_v44  ;;  %v1151_v28 = vpop.f32.mrf.mxu2 }
 0x235   : > { %v1969_v59 = vpop.f32.mrf.mxu1 }
 0x236   : > { %v5680_v61 = vpop.eup %5679  ;;  %v2008_v63 = vadd.f32 %v1969_v59, %v1225_v51  ;;  %v1147_v59 = vadd.f32 %v7124_v2, %v6484_v38  ;;  %v2042_v2 = vsub.f32 1.0, %v1384_v8 }
 0x237   : > { %v2071_v57 = vmul.f32 %v5680_v61, %v1339_v10  ;;  %v7131_v49 = vpop.eup %5681  ;;  %v2041_v10 = vsub.f32 1.0, %v1369_v54 }
 0x238   : > { %5685 = vtanh.f32 %v2008_v63  ;;  %v5684_v17 = vpop.eup %5683  ;;  %v1387_v3 = vmul.f32 %v7131_v49, %v7096_v29  ;;  %vm1392_vm0 = vweird.f32 %v7131_v49  ;;  %v4839_v35 = vmul.f32 -1.442695, %v1147_v59 }
 0x239   : > { %v2087_v46 = vadd.f32 %v2071_v57, %v2055_v30  ;;  %5687 = vrcp.f32 %v7126_v9  ;;  %v7154_v6 = vadd.f32 1.0, %v5684_v17  ;;  %v2057_v52 = vmul.f32 %v6079_v0, %v2041_v10  ;;  %vm7202_vm2 = vmor %vm1391_vm1, %vm1392_vm0 }
 0x23a   : > { %5689 = vpow2.f32 %v4837_v4  ;;  %v1388_v33 = vsub.f32 1.0, %v1387_v3 }
 0x23b   : > { %4894 = vst [vmem:[%s6512_s16 + $0x80] sm:$0xff] %v2087_v46  ;;  %vm1421_vm9 = vweird.f32 %v7154_v6 }
 0x23c   : > { %v1389_v51 = vmul.f32 %v7131_v49, %v1388_v33  ;;  %v1412_v33 = vand.u32 2147483648, %v7126_v9 }
 0x23d   : > { %v1972_v39 = vpop.f32.mrf.mxu1 }
 0x23e   : > { %v5686_v45 = vpop.eup %5685  ;;  %v2009_v32 = vadd.f32 %v1972_v39, %v1228_v13  ;;  %v1390_v18 = vadd.f32 %v7131_v49, %v1389_v51  ;;  %v2058_v39 = vmul.f32 %v6080_v20, %v2042_v2  ;;  %v1413_v23 = vor.u32 1.1754944e-38, %v1412_v33  ;;  %v6081_v51 = vld [vmem:[%s6512_s16 + $0x20] sm:$0xff] }
 0x23f   : > { %v2072_v56 = vmul.f32 %v5686_v45, %v1354_v50  ;;  %v7160_v42 = vpop.eup %5687  ;;  %v1397_v50 = vand.u32 2147483648, %v7096_v29  ;;  %v1238_v2 = vadd.f32 %v7182_v58, %v6489_v12 }
 0x240   : > { %5691 = vtanh.f32 %v2009_v32  ;;  %v5690_v34 = vpop.eup %5689  ;;  %v1402_v44 = vmul.f32 %v7160_v42, %v7126_v9  ;;  %v1394_v21 = vsel %vm7202_vm2, %v7131_v49, %v1390_v18  ;;  %v7216_v49 = vpop.f32.mrf.mxu0  ;;  %vm1407_vm4 = vweird.f32 %v7160_v42 }
 0x241   : > { %v7156_v16 = vadd.f32 %v2072_v56, %v2056_v19  ;;  %5693 = vrcp.f32 %v7154_v6  ;;  %v7186_v37 = vadd.f32 1.0, %v5690_v34  ;;  %v1398_v17 = vor.u32 1.1754944e-38, %v1397_v50  ;;  %vm7234_vm6 = vmor %vm1406_vm5, %vm1407_vm4 }
 0x242   : > { %5695 = vpow2.f32 %v4838_v26  ;;  %v1403_v30 = vsub.f32 1.0, %v1402_v44  ;;  %v1152_v44 = vadd.f32 %v1151_v28, %v6484_v38  ;;  %v5355_v28 = vld [vmem:[#allocation8 + $0x38] sm:$0xff] }
 0x243   : > { %4895 = vst [vmem:[%s6512_s16 + $0x88] sm:$0xff] %v7156_v16  ;;  %v2120_v15 = vpack.c.bf16 %v7156_v16, %v2087_v46  ;;  %v1395_v46 = vand.u32 2147483647, %v7096_v29  ;;  %3131 = vmatpush.bf16.msra.mxu1 %v5355_v28  ;;  %vm1436_vm13 = vweird.f32 %v7186_v37  ;;  %v5354_v28 = vld [vmem:[#allocation8 + $0x30] sm:$0xff] }
 0x244   : > { %v1404_v29 = vmul.f32 %v7160_v42, %v1403_v30  ;;  %v1427_v30 = vand.u32 2147483648, %v7154_v6 }
 0x245   : > { %v1974_v22 = vpop.f32.mrf.mxu1  ;;  %2296 = vmatmul.bf16.vlgmr.msra.gmra.mxu2 %v2120_v15  ;;  %2345 = vmatmul.bf16.vlgmr.msra.gmra.mxu3 %v2120_v15  ;;  %vm1396_vm3 = vcmp.eq.f32.partialorder %v1395_v46, 8.507059e+37 }
 0x246   : > { %v5692_v5 = vpop.eup %5691  ;;  %v2010_v53 = vadd.f32 %v1974_v22, %v1230_v31  ;;  %2394 = vmatmul.bf16.vlgmr.msra.gmra.mxu0 %v2120_v15  ;;  %v1399_v25 = vsel %vm1396_vm3, %v1398_v17, %v1394_v21  ;;  %v1405_v1 = vadd.f32 %v7160_v42, %v1404_v29  ;;  %v1154_v31 = vpop.f32.mrf.mxu2 }
 0x247   : > { %v2073_v61 = vmul.f32 %v5692_v5, %v1369_v54  ;;  %v7192_v57 = vpop.eup %5693  ;;  %v4840_v54 = vmul.f32 -1.442695, %v1150_v11  ;;  %v2043_v27 = vsub.f32 1.0, %v1399_v25  ;;  %v1155_v58 = vadd.f32 %v1154_v31, %v6484_v38  ;;  %v6082_v11 = vld [vmem:[%s6512_s16 + $0x28] sm:$0xff]  ;;  %3132 = vmatpush.bf16.msra.mxu1 %v5354_v28 }
 0x248   : > { %5697 = vtanh.f32 %v2010_v53  ;;  %v5696_v60 = vpop.eup %5695  ;;  %v1417_v4 = vmul.f32 %v7192_v57, %v7154_v6  ;;  %v1409_v9 = vsel %vm7234_vm6, %v7160_v42, %v1405_v1  ;;  %vm1422_vm8 = vweird.f32 %v7192_v57  ;;  %v7255_v18 = vpop.f32.mrf.mxu0 }
 0x249   : > { %v7188_v63 = vadd.f32 %v2073_v61, %v2057_v52  ;;  %5699 = vrcp.f32 %v7186_v37  ;;  %v7214_v45 = vadd.f32 1.0, %v5696_v60  ;;  %v2059_v5 = vmul.f32 %v6081_v51, %v2043_v27  ;;  %vm7264_vm10 = vmor %vm1421_vm9, %vm1422_vm8 }
 0x24a   : > { %5701 = vpow2.f32 %v4839_v35  ;;  %v1418_v19 = vsub.f32 1.0, %v1417_v4  ;;  %v1414_v42 = vsel %vm1411_vm7, %v1413_v23, %v1409_v9  ;;  %v1425_v35 = vand.u32 2147483647, %v7154_v6 }
 0x24b   : > { %4896 = vst [vmem:[%s6512_s16 + $0x90] sm:$0xff] %v7188_v63  ;;  %v2044_v50 = vsub.f32 1.0, %v1414_v42  ;;  %v4842_v1 = vmul.f32 -1.442695, %v1155_v58  ;;  %v1440_v27 = vand.u32 2147483647, %v7186_v37  ;;  %vm1451_vm1 = vweird.f32 %v7214_v45 }
 0x24c   : > { %v1419_v55 = vmul.f32 %v7192_v57, %v1418_v19  ;;  %vm1426_vm11 = vcmp.eq.f32.partialorder %v1425_v35, 8.507059e+37  ;;  %v1455_v35 = vand.u32 2147483647, %v7214_v45 }
 0x24d   : > { %v1977_v13 = vpop.f32.mrf.mxu1  ;;  %v2060_v17 = vmul.f32 %v6082_v11, %v2044_v50  ;;  %vm1441_vm15 = vcmp.eq.f32.partialorder %v1440_v27, 8.507059e+37 }
 0x24e   : > { %v5698_v36 = vpop.eup %5697  ;;  %v2011_v3 = vadd.f32 %v1977_v13, %v1233_v7  ;;  %v1420_v59 = vadd.f32 %v7192_v57, %v1419_v55  ;;  %v1428_v13 = vor.u32 1.1754944e-38, %v1427_v30  ;;  %v1457_v30 = vand.u32 2147483648, %v7214_v45 }
 0x24f   : > { %v2074_v24 = vmul.f32 %v5698_v36, %v1384_v8  ;;  %v7222_v56 = vpop.eup %5699  ;;  %v4841_v8 = vmul.f32 -1.442695, %v1152_v44  ;;  %v1156_v36 = vpop.f32.mrf.mxu2  ;;  %v6083_v44 = vld [vmem:[%s6512_s16 + $0x30] sm:$0xff]  ;;  %vm1456_vm3 = vcmp.eq.f32.partialorder %v1455_v35, 8.507059e+37 }
 0x250   : > { %5703 = vtanh.f32 %v2011_v3  ;;  %v5702_v43 = vpop.eup %5701  ;;  %v1432_v15 = vmul.f32 %v7222_v56, %v7186_v37  ;;  %v1424_v60 = vsel %vm7264_vm10, %v7192_v57, %v1420_v59  ;;  %vm1437_vm12 = vweird.f32 %v7222_v56 }
 0x251   : > { %v7218_v32 = vadd.f32 %v2074_v24, %v2058_v39  ;;  %5705 = vrcp.f32 %v7214_v45  ;;  %v7246_v52 = vadd.f32 1.0, %v5702_v43  ;;  %v1429_v39 = vsel %vm1426_vm11, %v1428_v13, %v1424_v60  ;;  %vm7294_vm14 = vmor %vm1436_vm13, %vm1437_vm12  ;;  %v7298_v43 = vpop.f32.mrf.mxu0 }
 0x252   : > { %5707 = vpow2.f32 %v4840_v54  ;;  %v1433_v62 = vsub.f32 1.0, %v1432_v15  ;;  %v1442_v54 = vand.u32 2147483648, %v7186_v37  ;;  %v2045_v33 = vsub.f32 1.0, %v1429_v39 }
 0x253   : > { %4897 = vst [vmem:[%s6512_s16 + $0x98] sm:$0xff] %v7218_v32  ;;  %v2121_v10 = vpack.c.bf16 %v7218_v32, %v7188_v63  ;;  %vm1466_vm5 = vweird.f32 %v7246_v52 }
 0x254   : > { %v1434_v4 = vmul.f32 %v7222_v56, %v1433_v62  ;;  %v1443_v55 = vor.u32 1.1754944e-38, %v1442_v54  ;;  %v2061_v23 = vmul.f32 %v6083_v44, %v2045_v33  ;;  %v1472_v54 = vand.u32 2147483648, %v7246_v52 }
 0x255   : > { %v1979_v40 = vpop.f32.mrf.mxu1  ;;  %2301 = vmatmul.bf16.gmra.mxu2 %v2121_v10  ;;  %2350 = vmatmul.bf16.gmra.mxu3 %v2121_v10 }
 0x256   : > { %v5704_v34 = vpop.eup %5703  ;;  %v2012_v22 = vadd.f32 %v1979_v40, %v1235_v14  ;;  %2399 = vmatmul.bf16.gmra.mxu0 %v2121_v10  ;;  %v1240_v10 = vadd.f32 %v7216_v49, %v6489_v12  ;;  %v1157_v40 = vadd.f32 %v1156_v36, %v6484_v38  ;;  %v1245_v14 = vadd.f32 %v7298_v43, %v6489_v12 }
 0x257   : > { %v2075_v0 = vmul.f32 %v5704_v34, %v1399_v25  ;;  %v7252_v61 = vpop.eup %5705  ;;  %v1435_v25 = vadd.f32 %v7222_v56, %v1434_v4 }
 0x258   : > { %5709 = vtanh.f32 %v2012_v22  ;;  %v5708_v7 = vpop.eup %5707  ;;  %v1447_v47 = vmul.f32 %v7252_v61, %v7214_v45  ;;  %vm1452_vm0 = vweird.f32 %v7252_v61 }
 0x259   : > { %v7248_v53 = vadd.f32 %v2075_v0, %v2059_v5  ;;  %5711 = vrcp.f32 %v7246_v52  ;;  %v7276_v20 = vadd.f32 1.0, %v5708_v7  ;;  %v1439_v37 = vsel %vm7294_vm14, %v7222_v56, %v1435_v25  ;;  %v1159_v0 = vpop.f32.mrf.mxu2  ;;  %vm7324_vm2 = vmor %vm1451_vm1, %vm1452_vm0  ;;  %v1247_v13 = vpop.f32.mrf.mxu0 }
 0x25a   : > { %5713 = vpow2.f32 %v4841_v8  ;;  %v1448_v57 = vsub.f32 1.0, %v1447_v47  ;;  %v1444_v56 = vsel %vm1441_vm15, %v1443_v55, %v1439_v37  ;;  %v4843_v8 = vmul.f32 -1.442695, %v1157_v40 }
 0x25b   : > { %4898 = vst [vmem:[%s6512_s16 + $0xa0] sm:$0xff] %v7248_v53  ;;  %v2046_v50 = vsub.f32 1.0, %v1444_v56  ;;  %v1473_v40 = vor.u32 1.1754944e-38, %v1472_v54  ;;  %vm1481_vm9 = vweird.f32 %v7276_v20  ;;  %v1485_v28 = vand.u32 2147483647, %v7276_v20 }
 0x25c   : > { %v1449_v49 = vmul.f32 %v7252_v61, %v1448_v57  ;;  %v1248_v46 = vadd.f32 %v1247_v13, %v6489_v12 }
 0x25d   : > { %v1982_v6 = vpop.f32.mrf.mxu1  ;;  %vm1486_vm11 = vcmp.eq.f32.partialorder %v1485_v28, 8.507059e+37 }
 0x25e   : > { %v5710_v21 = vpop.eup %5709  ;;  %v2013_v29 = vadd.f32 %v1982_v6, %v1238_v2  ;;  %v1450_v62 = vadd.f32 %v7252_v61, %v1449_v49  ;;  %v1243_v2 = vadd.f32 %v7255_v18, %v6489_v12  ;;  %v1160_v18 = vadd.f32 %v1159_v0, %v6484_v38 }
 0x25f   : > { %v2076_v3 = vmul.f32 %v5710_v21, %v1414_v42  ;;  %v7282_v19 = vpop.eup %5711  ;;  %v1458_v21 = vor.u32 1.1754944e-38, %v1457_v30 }
 0x260   : > { %5715 = vtanh.f32 %v2013_v29  ;;  %v5714_v26 = vpop.eup %5713  ;;  %v1462_v15 = vmul.f32 %v7282_v19, %v7246_v52  ;;  %v1454_v60 = vsel %vm7324_vm2, %v7252_v61, %v1450_v62  ;;  %v6084_v29 = vld [vmem:[%s6512_s16 + $0x38] sm:$0xff]  ;;  %vm1467_vm4 = vweird.f32 %v7282_v19 }
 0x261   : > { %v7278_v24 = vadd.f32 %v2076_v3, %v2060_v17  ;;  %5717 = vrcp.f32 %v7276_v20  ;;  %v7308_v51 = vadd.f32 1.0, %v5714_v26  ;;  %v2062_v36 = vmul.f32 %v6084_v29, %v2046_v50  ;;  %v1161_v33 = vpop.f32.mrf.mxu2  ;;  %vm7354_vm6 = vmor %vm1466_vm5, %vm1467_vm4 }
 0x262   : > { %5719 = vpow2.f32 %v4842_v1  ;;  %v1463_v5 = vsub.f32 1.0, %v1462_v15  ;;  %v1459_v3 = vsel %vm1456_vm3, %v1458_v21, %v1454_v60  ;;  %v4844_v1 = vmul.f32 -1.442695, %v1160_v18 }
 0x263   : > { %4899 = vst [vmem:[%s6512_s16 + $0xa8] sm:$0xff] %v7278_v24  ;;  %v2122_v41 = vpack.c.bf16 %v7278_v24, %v7248_v53  ;;  %v2047_v27 = vsub.f32 1.0, %v1459_v3  ;;  %v1487_v50 = vand.u32 2147483648, %v7276_v20  ;;  %vm1496_vm13 = vweird.f32 %v7308_v51 }
 0x264   : > { %v1464_v6 = vmul.f32 %v7282_v19, %v1463_v5 }
 0x265   : > { %v1984_v31 = vpop.f32.mrf.mxu1  ;;  %2306 = vmatmul.bf16.gmra.mxu2 %v2122_v41  ;;  %2355 = vmatmul.bf16.gmra.mxu3 %v2122_v41  ;;  %v1488_v18 = vor.u32 1.1754944e-38, %v1487_v50  ;;  %v5352_v50 = vld [vmem:[#allocation8 + $0x20] sm:$0xff] }
 0x266   : > { %v5716_v9 = vpop.eup %5715  ;;  %v2014_v34 = vadd.f32 %v1984_v31, %v1240_v10  ;;  %2404 = vmatmul.bf16.gmra.mxu0 %v2122_v41  ;;  %v1465_v57 = vadd.f32 %v7282_v19, %v1464_v6  ;;  %v1470_v41 = vand.u32 2147483647, %v7246_v52 }
 0x267   : > { %v2077_v22 = vmul.f32 %v5716_v9, %v1429_v39  ;;  %v7314_v59 = vpop.eup %5717  ;;  %v1162_v9 = vadd.f32 %v1161_v33, %v6484_v38 }
 0x268   : > { %5721 = vtanh.f32 %v2014_v34  ;;  %v5720_v7 = vpop.eup %5719  ;;  %v1477_v47 = vmul.f32 %v7314_v59, %v7276_v20  ;;  %v1469_v52 = vsel %vm7354_vm6, %v7282_v19, %v1465_v57  ;;  %v6085_v34 = vld [vmem:[%s6512_s16 + $0x40] sm:$0xff]  ;;  %vm1471_vm7 = vcmp.eq.f32.partialorder %v1470_v41, 8.507059e+37 }
 0x269   : > { %v7310_v42 = vadd.f32 %v2077_v22, %v2061_v23  ;;  %5723 = vrcp.f32 %v7308_v51  ;;  %v7336_v17 = vadd.f32 1.0, %v5720_v7  ;;  %v2063_v44 = vmul.f32 %v6085_v34, %v2047_v27 }
 0x26a   : > { %5725 = vpow2.f32 %v4843_v8  ;;  %v1478_v61 = vsub.f32 1.0, %v1477_v47  ;;  %v1474_v19 = vsel %vm1471_vm7, %v1473_v40, %v1469_v52  ;;  %vm1482_vm8 = vweird.f32 %v7314_v59 }
 0x26b   : > { %4900 = vst [vmem:[%s6512_s16 + $0xb0] sm:$0xff] %v7310_v42  ;;  %v4845_v30 = vmul.f32 -1.442695, %v1162_v9  ;;  %v2048_v35 = vsub.f32 1.0, %v1474_v19  ;;  %vm7381_vm10 = vmor %vm1481_vm9, %vm1482_vm8  ;;  %v1500_v27 = vand.u32 2147483647, %v7308_v51  ;;  %vm1511_vm1 = vweird.f32 %v7336_v17 }
 0x26c   : > { %v1479_v43 = vmul.f32 %v7314_v59, %v1478_v61  ;;  %v6087_v9 = vld [vmem:[%s6512_s16 + $0x50] sm:$0xff] }
 0x26d   : > { %v1987_v45 = vpop.f32.mrf.mxu1  ;;  %vm1501_vm15 = vcmp.eq.f32.partialorder %v1500_v27, 8.507059e+37 }
 0x26e   : > { %v5722_v4 = vpop.eup %5721  ;;  %v2015_v58 = vadd.f32 %v1987_v45, %v1243_v2  ;;  %v1480_v62 = vadd.f32 %v7314_v59, %v1479_v43  ;;  %v5353_v2 = vld [vmem:[#allocation8 + $0x28] sm:$0xff] }
 0x26f   : > { %v2078_v11 = vmul.f32 %v5722_v4, %v1444_v56  ;;  %v7342_v25 = vpop.eup %5723  ;;  %v1249_v56 = vpop.f32.mrf.mxu0  ;;  %3133 = vmatpush.bf16.msra.mxu1 %v5353_v2 }
 0x270   : > { %5727 = vtanh.f32 %v2015_v58  ;;  %v5726_v15 = vpop.eup %5725  ;;  %v1492_v37 = vmul.f32 %v7342_v25, %v7308_v51  ;;  %v1484_v45 = vsel %vm7381_vm10, %v7314_v59, %v1480_v62  ;;  %v6086_v58 = vld [vmem:[%s6512_s16 + $0x48] sm:$0xff]  ;;  %vm1497_vm12 = vweird.f32 %v7342_v25 }
 0x271   : > { %v7338_v39 = vadd.f32 %v2078_v11, %v2062_v36  ;;  %5729 = vrcp.f32 %v7336_v17  ;;  %v7366_v22 = vadd.f32 1.0, %v5726_v15  ;;  %v2064_v13 = vmul.f32 %v6086_v58, %v2048_v35  ;;  %vm7409_vm14 = vmor %vm1496_vm13, %vm1497_vm12 }
 0x272   : > { %5731 = vpow2.f32 %v4844_v1  ;;  %v1493_v5 = vsub.f32 1.0, %v1492_v37  ;;  %v1489_v11 = vsel %vm1486_vm11, %v1488_v18, %v1484_v45  ;;  %v1502_v1 = vand.u32 2147483648, %v7308_v51 }
 0x273   : > { %4901 = vst [vmem:[%s6512_s16 + $0xb8] sm:$0xff] %v7338_v39  ;;  %v2123_v10 = vpack.c.bf16 %v7338_v39, %v7310_v42  ;;  %v2049_v33 = vsub.f32 1.0, %v1489_v11  ;;  %3134 = vmatpush.bf16.msra.mxu1 %v5352_v50  ;;  %vm1526_vm5 = vweird.f32 %v7366_v22 }
 0x274   : > { %v1494_v20 = vmul.f32 %v7342_v25, %v1493_v5  ;;  %v1503_v43 = vor.u32 1.1754944e-38, %v1502_v1  ;;  %v1517_v5 = vand.u32 2147483648, %v7336_v17  ;;  %v5351_v1 = vld [vmem:[#allocation8 + $0x18] sm:$0xff] }
 0x275   : > { %v1989_v31 = vpop.f32.mrf.mxu1  ;;  %2311 = vmatmul.bf16.gmra.mxu2 %v2123_v10  ;;  %2360 = vmatmul.bf16.gmra.mxu3 %v2123_v10  ;;  %v2065_v40 = vmul.f32 %v6087_v9, %v2049_v33 }
 0x276   : > { %v5728_v49 = vpop.eup %5727  ;;  %v2016_v55 = vadd.f32 %v1989_v31, %v1245_v14  ;;  %2409 = vmatmul.bf16.gmra.mxu0 %v2123_v10  ;;  %v1495_v59 = vadd.f32 %v7342_v25, %v1494_v20  ;;  %v1250_v10 = vadd.f32 %v1249_v56, %v6489_v12  ;;  %v1518_v45 = vor.u32 1.1754944e-38, %v1517_v5 }
 0x277   : > { %v2079_v23 = vmul.f32 %v5728_v49, %v1459_v3  ;;  %v7372_v8 = vpop.eup %5729  ;;  %v1252_v54 = vpop.f32.mrf.mxu0  ;;  %3135 = vmatpush.bf16.msra.mxu1 %v5351_v1 }
 0x278   : > { %5733 = vtanh.f32 %v2016_v55  ;;  %v5732_v47 = vpop.eup %5731  ;;  %v1507_v60 = vmul.f32 %v7372_v8, %v7336_v17  ;;  %v1499_v51 = vsel %vm7409_vm14, %v7342_v25, %v1495_v59  ;;  %vm1512_vm0 = vweird.f32 %v7372_v8 }
 0x279   : > { %v7368_v0 = vadd.f32 %v2079_v23, %v2063_v44  ;;  %5735 = vrcp.f32 %v7366_v22  ;;  %v7392_v36 = vadd.f32 1.0, %v5732_v47  ;;  %v1504_v44 = vsel %vm1501_vm15, %v1503_v43, %v1499_v51  ;;  %vm1513_vm2 = vmor %vm1511_vm1, %vm1512_vm0 }
 0x27a   : > { %5737 = vpow2.f32 %v4845_v30  ;;  %v1508_v3 = vsub.f32 1.0, %v1507_v60  ;;  %v2050_v62 = vsub.f32 1.0, %v1504_v44  ;;  %v1515_v30 = vand.u32 2147483647, %v7336_v17 }
 0x27b   : > { %4902 = vst [vmem:[%s6512_s16 + $0xc0] sm:$0xff] %v7368_v0  ;;  %v1253_v35 = vadd.f32 %v1252_v54, %v6489_v12  ;;  %vm1541_vm9 = vweird.f32 %v7392_v36 }
 0x27c   : > { %v1509_v52 = vmul.f32 %v7372_v8, %v1508_v3  ;;  %vm1516_vm3 = vcmp.eq.f32.partialorder %v1515_v30, 8.507059e+37  ;;  %v1530_v3 = vand.u32 2147483647, %v7366_v22 }
 0x27d   : > { %v1992_v6 = vpop.f32.mrf.mxu1 }
 0x27e   : > { %v5734_v4 = vpop.eup %5733  ;;  %v2017_v21 = vadd.f32 %v1992_v6, %v1248_v46  ;;  %v6088_v6 = vld [vmem:[%s6512_s16 + $0x58] sm:$0xff]  ;;  %vm1531_vm7 = vcmp.eq.f32.partialorder %v1530_v3, 8.507059e+37  ;;  %v6091_v3 = vld [vmem:[%s6512_s16 + $0x70] sm:$0xff] }
 0x27f   : > { %v2080_v29 = vmul.f32 %v5734_v4, %v1474_v19  ;;  %v7398_v57 = vpop.eup %5735  ;;  %v1510_v19 = vadd.f32 %v7372_v8, %v1509_v52  ;;  %v1254_v28 = vpop.f32.mrf.mxu0  ;;  %v2066_v20 = vmul.f32 %v6088_v6, %v2050_v62 }
 0x280   : > { %5739 = vtanh.f32 %v2017_v21  ;;  %v5738_v26 = vpop.eup %5737  ;;  %v1522_v15 = vmul.f32 %v7398_v57, %v7366_v22  ;;  %vm1527_vm4 = vweird.f32 %v7398_v57  ;;  %v1255_v54 = vadd.f32 %v1254_v28, %v6489_v12  ;;  %v6090_v28 = vld [vmem:[%s6512_s16 + $0x68] sm:$0xff] }
 0x281   : > { %v7394_v61 = vadd.f32 %v2080_v29, %v2064_v13  ;;  %5741 = vrcp.f32 %v7392_v36  ;;  %v7420_v34 = vadd.f32 1.0, %v5738_v26  ;;  %v1514_v46 = vsel %vm1513_vm2, %v7372_v8, %v1510_v19  ;;  %vm7454_vm6 = vmor %vm1526_vm5, %vm1527_vm4 }
 0x282   : > { %v1523_v23 = vsub.f32 1.0, %v1522_v15  ;;  %v1519_v18 = vsel %vm1516_vm3, %v1518_v45, %v1514_v46  ;;  %v1532_v29 = vand.u32 2147483648, %v7366_v22 }
 0x283   : > { %4903 = vst [vmem:[%s6512_s16 + $0xc8] sm:$0xff] %v7394_v61  ;;  %v2124_v41 = vpack.c.bf16 %v7394_v61, %v7368_v0  ;;  %vm1556_vm13 = vweird.f32 %v7420_v34 }
 0x284   : > { %v1524_v47 = vmul.f32 %v7398_v57, %v1523_v23  ;;  %v1533_v26 = vor.u32 1.1754944e-38, %v1532_v29 }
 0x285   : > { %v1994_v37 = vpop.f32.mrf.mxu1  ;;  %2316 = vmatmul.bf16.gmra.mxu2 %v2124_v41  ;;  %2365 = vmatmul.bf16.gmra.mxu3 %v2124_v41 }
 0x286   : > { %v5740_v31 = vpop.eup %5739  ;;  %v2018_v49 = vadd.f32 %v1994_v37, %v1250_v10  ;;  %2414 = vmatmul.bf16.gmra.mxu0 %v2124_v41  ;;  %v1525_v13 = vadd.f32 %v7398_v57, %v1524_v47  ;;  %v6089_v37 = vld [vmem:[%s6512_s16 + $0x60] sm:$0xff] }
 0x287   : > { %v2081_v55 = vmul.f32 %v5740_v31, %v1489_v11  ;;  %v7426_v56 = vpop.eup %5741  ;;  %v2051_v11 = vsub.f32 1.0, %v1519_v18  ;;  %v1257_v51 = vpop.f32.mrf.mxu0 }
 0x288   : > { %5743 = vtanh.f32 %v2018_v49  ;;  %v1537_v2 = vmul.f32 %v7426_v56, %v7392_v36  ;;  %v1529_v41 = vsel %vm7454_vm6, %v7398_v57, %v1525_v13  ;;  %vm1542_vm8 = vweird.f32 %v7426_v56 }
 0x289   : > { %v7422_v25 = vadd.f32 %v2081_v55, %v2065_v40  ;;  %5745 = vrcp.f32 %v7420_v34  ;;  %v2067_v52 = vmul.f32 %v6089_v37, %v2051_v11  ;;  %v1534_v43 = vsel %vm1531_vm7, %v1533_v26, %v1529_v41  ;;  %vm1543_vm10 = vmor %vm1541_vm9, %vm1542_vm8  ;;  %v6092_v41 = vld [vmem:[%s6512_s16 + $0x78] sm:$0xff] }
 0x28a   : > { %v1538_v21 = vsub.f32 1.0, %v1537_v2  ;;  %v1547_v40 = vand.u32 2147483648, %v7392_v36  ;;  %v2052_v55 = vsub.f32 1.0, %v1534_v43  ;;  %v1258_v23 = vadd.f32 %v1257_v51, %v6489_v12 }
 0x28b   : > { %4904 = vst [vmem:[%s6512_s16 + $0xd0] sm:$0xff] %v7422_v25 }
 0x28c   : > { %v1539_v22 = vmul.f32 %v7426_v56, %v1538_v21  ;;  %v1548_v50 = vor.u32 1.1754944e-38, %v1547_v40  ;;  %v2068_v2 = vmul.f32 %v6090_v28, %v2052_v55 }
 0x28d   : > { %v1997_v7 = vpop.f32.mrf.mxu1 }
 0x28e   : > { %v5744_v60 = vpop.eup %5743  ;;  %v2019_v17 = vadd.f32 %v1997_v7, %v1253_v35  ;;  %v1540_v9 = vadd.f32 %v7426_v56, %v1539_v22 }
 0x28f   : > { %v2082_v4 = vmul.f32 %v5744_v60, %v1504_v44  ;;  %v7444_v8 = vpop.eup %5745  ;;  %v1545_v44 = vand.u32 2147483647, %v7392_v36  ;;  %v1259_v47 = vpop.f32.mrf.mxu0 }
 0x290   : > { %5747 = vtanh.f32 %v2019_v17  ;;  %v1552_v27 = vmul.f32 %v7444_v8, %v7420_v34  ;;  %v1544_v19 = vsel %vm1543_vm10, %v7426_v56, %v1540_v9  ;;  %vm1557_vm12 = vweird.f32 %v7444_v8 }
 0x291   : > { %v7440_v58 = vadd.f32 %v2082_v4, %v2066_v20  ;;  %vm1546_vm11 = vcmp.eq.f32.partialorder %v1545_v44, 8.507059e+37  ;;  %v1562_v56 = vand.u32 2147483648, %v7420_v34  ;;  %v1560_v17 = vand.u32 2147483647, %v7420_v34  ;;  %vm7490_vm14 = vmor %vm1556_vm13, %vm1557_vm12 }
 0x292   : > { %v1553_v49 = vsub.f32 1.0, %v1552_v27  ;;  %v1549_v7 = vsel %vm1546_vm11, %v1548_v50, %v1544_v19  ;;  %v1260_v20 = vadd.f32 %v1259_v47, %v6489_v12  ;;  %v5348_v19 = vld [vmem:[#allocation8] sm:$0xff] }
 0x293   : > { %4905 = vst [vmem:[%s6512_s16 + $0xd8] sm:$0xff] %v7440_v58  ;;  %v2125_v59 = vpack.c.bf16 %v7440_v58, %v7422_v25  ;;  %v2053_v45 = vsub.f32 1.0, %v1549_v7  ;;  %v1563_v29 = vor.u32 1.1754944e-38, %v1562_v56  ;;  %vm1561_vm15 = vcmp.eq.f32.partialorder %v1560_v17, 8.507059e+37 }
 0x294   : > { %v1554_v62 = vmul.f32 %v7444_v8, %v1553_v49 }
 0x295   : > { %v1999_v10 = vpop.f32.mrf.mxu1  ;;  %2321 = vmatmul.bf16.gmra.mxu2 %v2125_v59  ;;  %2370 = vmatmul.bf16.gmra.mxu3 %v2125_v59 }
 0x296   : > { %v5748_v14 = vpop.eup %5747  ;;  %v2020_v15 = vadd.f32 %v1999_v10, %v1255_v54  ;;  %2419 = vmatmul.bf16.gmra.mxu0 %v2125_v59  ;;  %v1555_v60 = vadd.f32 %v7444_v8, %v1554_v62  ;;  %v2069_v59 = vmul.f32 %v6091_v3, %v2053_v45 }
 0x297   : > { %v2083_v31 = vmul.f32 %v5748_v14, %v1519_v18  ;;  %v5350_v18 = vld [vmem:[#allocation8 + $0x10] sm:$0xff] }
 0x298   : > { %5749 = vtanh.f32 %v2020_v15  ;;  %v1559_v21 = vsel %vm7490_vm14, %v7444_v8, %v1555_v60  ;;  %3136 = vmatpush.bf16.msra.mxu1 %v5350_v18 }
 0x299   : > { %v7465_v57 = vadd.f32 %v2083_v31, %v2067_v52  ;;  %v1564_v54 = vsel %vm1561_vm15, %v1563_v29, %v1559_v21  ;;  %v5349_v52 = vld [vmem:[#allocation8 + $0x8] sm:$0xff] }
 0x29a   : > { %v2054_v8 = vsub.f32 1.0, %v1564_v54 }
 0x29b   : > { %4906 = vst [vmem:[%s6512_s16 + $0xe0] sm:$0xff] %v7465_v57 }
 0x29c   : > { %v2070_v10 = vmul.f32 %v6092_v41, %v2054_v8  ;;  %3137 = vmatpush.bf16.msra.mxu1 %v5349_v52 }
 0x29d   : > { %v2002_v5 = vpop.f32.mrf.mxu1 }
 0x29e   : > { %v5750_v30 = vpop.eup %5749  ;;  %v2021_v35 = vadd.f32 %v2002_v5, %v1258_v23 }
 0x29f   : > { %v2084_v46 = vmul.f32 %v5750_v30, %v1534_v43 }
 0x2a0   : > { %5751 = vtanh.f32 %v2021_v35  ;;  %3138 = vmatpush.bf16.msra.mxu1 %v5348_v19 }
 0x2a1   : > { %v7478_v36 = vadd.f32 %v2084_v46, %v2068_v2 }
 0x2a3   : > { %4907 = vst [vmem:[%s6512_s16 + $0xe8] sm:$0xff] %v7478_v36  ;;  %v2126_v6 = vpack.c.bf16 %v7478_v36, %v7465_v57 }
 0x2a5   : > { %v2004_v13 = vpop.f32.mrf.mxu1  ;;  %2326 = vmatmul.bf16.gmra.mxu2 %v2126_v6  ;;  %2375 = vmatmul.bf16.gmra.mxu3 %v2126_v6 }
 0x2a6   : > { %v5752_v34 = vpop.eup %5751  ;;  %v2022_v11 = vadd.f32 %v2004_v13, %v1260_v20  ;;  %2424 = vmatmul.bf16.gmra.mxu0 %v2126_v6 }
 0x2a7   : > { %v2085_v1 = vmul.f32 %v5752_v34, %v1549_v7 }
 0x2a8   : > { %5753 = vtanh.f32 %v2022_v11 }
 0x2a9   : > { %v7498_v33 = vadd.f32 %v2085_v1, %v2069_v59 }
 0x2ab   : > { %4908 = vst [vmem:[%s6512_s16 + $0xf0] sm:$0xff] %v7498_v33 }
 0x2ae   : > { %v5754_v27 = vpop.eup %5753 }
 0x2af   : > { %v2086_v22 = vmul.f32 %v5754_v27, %v1564_v54 }
 0x2b1   : > { %v7503_v14 = vadd.f32 %v2086_v22, %v2070_v10 }
 0x2b3   : > { %4909 = vst [vmem:[%s6512_s16 + $0xf8] sm:$0xff] %v7503_v14  ;;  %v2127_v26 = vpack.c.bf16 %v7503_v14, %v7498_v33 }
 0x2b5   : > { %2331 = vmatmul.bf16.gmra.mxu2 %v2127_v26  ;;  %2380 = vmatmul.bf16.gmra.mxu3 %v2127_v26 }
 0x2b6   : > { %2429 = vmatmul.bf16.gmra.mxu0 %v2127_v26 }
 0x2c8   : > { %v2346_v15 = vpop.f32.mrf.mxu3 }
 0x2c9   : > { %v2347_v51 = vadd.f32 %v2346_v15, %v6863_v48 }
 0x2cb   : > { %v5022_v37 = vmul.f32 -1.442695, %v2347_v51 }
 0x2cd   : > { %5755 = vpow2.f32 %v5022_v37 }
 0x2d0   : > { %v2348_v31 = vpop.f32.mrf.mxu3 }
 0x2d1   : > { %v2349_v43 = vadd.f32 %v2348_v31, %v6863_v48  ;;  %v7529_v31 = vld [vmem:[%s6512_s16 + $0x80] sm:$0xff] }
 0x2d3   : > { %v5756_v49 = vpop.eup %5755  ;;  %v5023_v9 = vmul.f32 -1.442695, %v2349_v43 }
 0x2d4   : > { %v2787_v40 = vadd.f32 1.0, %v5756_v49 }
 0x2d6   : > { %5757 = vrcp.f32 %v2787_v40  ;;  %v2814_v20 = vand.u32 2147483648, %v2787_v40  ;;  %vm2808_vm1 = vweird.f32 %v2787_v40  ;;  %v2812_v18 = vand.u32 2147483647, %v2787_v40 }
 0x2d7   : > { %5759 = vpow2.f32 %v5023_v9 }
 0x2d8   : > { %v2351_v55 = vpop.f32.mrf.mxu3  ;;  %v2815_v1 = vor.u32 1.1754944e-38, %v2814_v20  ;;  %vm2813_vm4 = vcmp.eq.f32.partialorder %v2812_v18, 8.507059e+37 }
 0x2d9   : > { %v2352_v44 = vadd.f32 %v2351_v55, %v6863_v48 }
 0x2db   : > { %v5024_v23 = vmul.f32 -1.442695, %v2352_v44 }
 0x2dc   : > { %v5758_v5 = vpop.eup %5757 }
 0x2dd   : > { %v5760_v62 = vpop.eup %5759  ;;  %v2804_v30 = vmul.f32 %v5758_v5, %v2787_v40  ;;  %5761 = vpow2.f32 %v5024_v23  ;;  %vm2809_vm0 = vweird.f32 %v5758_v5 }
 0x2de   : > { %v2788_v50 = vadd.f32 1.0, %v5760_v62  ;;  %vm7517_vm2 = vmor %vm2808_vm1, %vm2809_vm0 }
 0x2df   : > { %v2805_v35 = vsub.f32 1.0, %v2804_v30 }
 0x2e0   : > { %v2353_v28 = vpop.f32.mrf.mxu3  ;;  %5763 = vrcp.f32 %v2788_v50  ;;  %v2829_v34 = vand.u32 2147483648, %v2788_v50  ;;  %v2827_v3 = vand.u32 2147483647, %v2788_v50  ;;  %vm2823_vm5 = vweird.f32 %v2788_v50 }
 0x2e1   : > { %v2354_v2 = vadd.f32 %v2353_v28, %v6863_v48  ;;  %v2806_v46 = vmul.f32 %v5758_v5, %v2805_v35 }
 0x2e2   : > { %v2830_v41 = vor.u32 1.1754944e-38, %v2829_v34  ;;  %vm2828_vm7 = vcmp.eq.f32.partialorder %v2827_v3, 8.507059e+37 }
 0x2e3   : > { %v5762_v7 = vpop.eup %5761  ;;  %v5025_v47 = vmul.f32 -1.442695, %v2354_v2  ;;  %v2807_v45 = vadd.f32 %v5758_v5, %v2806_v46 }
 0x2e4   : > { %v7513_v60 = vadd.f32 1.0, %v5762_v7 }
 0x2e5   : > { %v2811_v59 = vsel %vm7517_vm2, %v5758_v5, %v2807_v45 }
 0x2e6   : > { %v5764_v56 = vpop.eup %5763  ;;  %5765 = vrcp.f32 %v7513_v60  ;;  %v2816_v10 = vsel %vm2813_vm4, %v2815_v1, %v2811_v59  ;;  %vm2838_vm9 = vweird.f32 %v7513_v60  ;;  %v2842_v45 = vand.u32 2147483647, %v7513_v60 }
 0x2e7   : > { %v2819_v17 = vmul.f32 %v5764_v56, %v2788_v50  ;;  %5767 = vpow2.f32 %v5025_v47  ;;  %vm2824_vm3 = vweird.f32 %v5764_v56  ;;  %v3043_v43 = vmul.f32 %v7529_v31, %v2816_v10 }
 0x2e8   : > { %v2356_v6 = vpop.f32.mrf.mxu3  ;;  %vm2825_vm6 = vmor %vm2823_vm5, %vm2824_vm3  ;;  %vm2843_vm14 = vcmp.eq.f32.partialorder %v2842_v45, 8.507059e+37 }
 0x2e9   : > { %v2357_v4 = vadd.f32 %v2356_v6, %v6863_v48  ;;  %v2820_v21 = vsub.f32 1.0, %v2819_v17 }
 0x2eb   : > { %v5026_v29 = vmul.f32 -1.442695, %v2357_v4  ;;  %v2821_v11 = vmul.f32 %v5764_v56, %v2820_v21 }
 0x2ec   : > { %v7523_v54 = vpop.eup %5765 }
 0x2ed   : > { %v2822_v8 = vadd.f32 %v5764_v56, %v2821_v11  ;;  %5769 = vpow2.f32 %v5026_v29  ;;  %v5768_v27 = vpop.eup %5767  ;;  %v2834_v52 = vmul.f32 %v7523_v54, %v7513_v60  ;;  %vm2839_vm8 = vweird.f32 %v7523_v54  ;;  %v5377_v29 = vld [vmem:[#allocation7 + $0xac] sm:$0xf]  ;;  %v5174_v11 = vld [vmem:[#allocation7 + $0xb4] sm:$0xf0] }
 0x2ee   : > { %v2790_v22 = vadd.f32 1.0, %v5768_v27  ;;  %vm7544_vm10 = vmor %vm2838_vm9, %vm2839_vm8  ;;  %v5177_v59 = vor.u32 %v5377_v29, %v5174_v11 }
 0x2ef   : > { %v2826_v15 = vsel %vm2825_vm6, %v5764_v56, %v2822_v8  ;;  %v2835_v23 = vsub.f32 1.0, %v2834_v52 }
 0x2f0   : > { %v2358_v26 = vpop.f32.mrf.mxu3  ;;  %v2831_v37 = vsel %vm2828_vm7, %v2830_v41, %v2826_v15  ;;  %5771 = vrcp.f32 %v2790_v22  ;;  %vm2853_vm11 = vweird.f32 %v2790_v22  ;;  %v2857_v21 = vand.u32 2147483647, %v2790_v22  ;;  %3510 = vmatpush.bf16.msrb.mxu3 %v5177_v59 }
 0x2f1   : > { %v2359_v51 = vadd.f32 %v2358_v26, %v6863_v48  ;;  %v3044_v49 = vmul.f32 %v2831_v37, %v7156_v16  ;;  %v2836_v50 = vmul.f32 %v7523_v54, %v2835_v23  ;;  %v2844_v16 = vand.u32 2147483648, %v7513_v60 }
 0x2f2   : > { %v2859_v34 = vand.u32 2147483648, %v2790_v22  ;;  %vm2858_vm15 = vcmp.eq.f32.partialorder %v2857_v21, 8.507059e+37 }
 0x2f3   : > { %v5770_v9 = vpop.eup %5769  ;;  %v5027_v40 = vmul.f32 -1.442695, %v2359_v51  ;;  %v3059_v55 = vpack.c.bf16 %v3044_v49, %v3043_v43  ;;  %v2837_v2 = vadd.f32 %v7523_v54, %v2836_v50  ;;  %v2845_v20 = vor.u32 1.1754944e-38, %v2844_v16 }
 0x2f4   : > { %v7533_v44 = vadd.f32 1.0, %v5770_v9  ;;  %v2860_v8 = vor.u32 1.1754944e-38, %v2859_v34 }
 0x2f5   : > { %3139 = vmatmul.bf16.vlgmr.msra.gmra.mxu1 %v3059_v55  ;;  %v2841_v6 = vsel %vm7544_vm10, %v7523_v54, %v2837_v2 }
 0x2f6   : > { %5773 = vrcp.f32 %v7533_v44  ;;  %v5772_v19 = vpop.eup %5771  ;;  %v2846_v54 = vsel %vm2843_vm14, %v2845_v20, %v2841_v6  ;;  %vm2868_vm1 = vweird.f32 %v7533_v44  ;;  %v5162_v6 = vld [vmem:[#allocation7 + $0x9c] sm:$0xf0] }
 0x2f7   : > { %5775 = vpow2.f32 %v5027_v40  ;;  %v2849_v62 = vmul.f32 %v5772_v19, %v2790_v22  ;;  %vm2854_vm12 = vweird.f32 %v5772_v19  ;;  %v3045_v15 = vmul.f32 %v2846_v54, %v7188_v63 }
 0x2f8   : > { %v2361_v5 = vpop.f32.mrf.mxu3  ;;  %vm2855_vm13 = vmor %vm2853_vm11, %vm2854_vm12  ;;  %v2874_v63 = vand.u32 2147483648, %v7533_v44 }
 0x2f9   : > { %v2362_v30 = vadd.f32 %v2361_v5, %v6863_v48  ;;  %v2850_v35 = vsub.f32 1.0, %v2849_v62 }
 0x2fa   : > { %v2875_v16 = vor.u32 1.1754944e-38, %v2874_v63 }
 0x2fb   : > { %v5028_v28 = vmul.f32 -1.442695, %v2362_v30  ;;  %v2851_v7 = vmul.f32 %v5772_v19, %v2850_v35 }
 0x2fc   : > { %v7541_v46 = vpop.eup %5773 }
 0x2fd   : > { %v5776_v47 = vpop.eup %5775  ;;  %5777 = vpow2.f32 %v5028_v28  ;;  %v2852_v18 = vadd.f32 %v5772_v19, %v2851_v7  ;;  %v2864_v13 = vmul.f32 %v7541_v46, %v7533_v44  ;;  %vm2869_vm0 = vweird.f32 %v7541_v46 }
 0x2fe   : > { %v7549_v17 = vadd.f32 1.0, %v5776_v47  ;;  %vm7575_vm2 = vmor %vm2868_vm1, %vm2869_vm0 }
 0x2ff   : > { %v2856_v3 = vsel %vm2855_vm13, %v5772_v19, %v2852_v18  ;;  %v2865_v41 = vsub.f32 1.0, %v2864_v13  ;;  %v2872_v19 = vand.u32 2147483647, %v7533_v44 }
 0x300   : > { %v2363_v4 = vpop.f32.mrf.mxu3  ;;  %5779 = vrcp.f32 %v7549_v17  ;;  %v2861_v10 = vsel %vm2858_vm15, %v2860_v8, %v2856_v3  ;;  %vm2883_vm4 = vweird.f32 %v7549_v17  ;;  %v2887_v2 = vand.u32 2147483647, %v7549_v17 }
 0x301   : > { %v2364_v60 = vadd.f32 %v2363_v4, %v6863_v48  ;;  %v3046_v51 = vmul.f32 %v2861_v10, %v7218_v32  ;;  %v2866_v9 = vmul.f32 %v7541_v46, %v2865_v41  ;;  %v2889_v7 = vand.u32 2147483648, %v7549_v17 }
 0x302   : > { %vm2873_vm6 = vcmp.eq.f32.partialorder %v2872_v19, 8.507059e+37  ;;  %vm2888_vm7 = vcmp.eq.f32.partialorder %v2887_v2, 8.507059e+37 }
 0x303   : > { %v5029_v1 = vmul.f32 -1.442695, %v2364_v60  ;;  %v5778_v27 = vpop.eup %5777  ;;  %v3060_v52 = vpack.c.bf16 %v3046_v51, %v3045_v15  ;;  %v2867_v23 = vadd.f32 %v7541_v46, %v2866_v9  ;;  %v2890_v4 = vor.u32 1.1754944e-38, %v2889_v7 }
 0x304   : > { %v7558_v26 = vadd.f32 1.0, %v5778_v27 }
 0x305   : > { %5781 = vpow2.f32 %v5029_v1  ;;  %3144 = vmatmul.bf16.gmra.mxu1 %v3060_v52  ;;  %v2871_v35 = vsel %vm7575_vm2, %v7541_v46, %v2867_v23  ;;  %v5374_v46 = vld [vmem:[#allocation7 + $0x94] sm:$0xf] }
 0x306   : > { %v5780_v22 = vpop.eup %5779  ;;  %5783 = vrcp.f32 %v7558_v26  ;;  %v2876_v20 = vsel %vm2873_vm6, %v2875_v16, %v2871_v35  ;;  %v5165_v18 = vor.u32 %v5374_v46, %v5162_v6  ;;  %v2904_v15 = vand.u32 2147483648, %v7558_v26  ;;  %v7624_v46 = vpop.f32.mrf.mxu2 }
 0x307   : > { %v2879_v37 = vmul.f32 %v5780_v22, %v7549_v17  ;;  %vm2884_vm3 = vweird.f32 %v5780_v22  ;;  %v3047_v17 = vmul.f32 %v2876_v20, %v7248_v53  ;;  %vm2898_vm9 = vweird.f32 %v7558_v26 }
 0x308   : > { %v2366_v43 = vpop.f32.mrf.mxu3  ;;  %vm2885_vm5 = vmor %vm2883_vm4, %vm2884_vm3  ;;  %3511 = vmatpush.bf16.msrb.mxu3 %v5165_v18 }
 0x309   : > { %v2367_v49 = vadd.f32 %v2366_v43, %v6863_v48  ;;  %v2880_v40 = vsub.f32 1.0, %v2879_v37 }
 0x30b   : > { %v5030_v55 = vmul.f32 -1.442695, %v2367_v49  ;;  %v5782_v32 = vpop.eup %5781  ;;  %v2881_v5 = vmul.f32 %v5780_v22, %v2880_v40  ;;  %v2905_v40 = vor.u32 1.1754944e-38, %v2904_v15 }
 0x30c   : > { %v7571_v62 = vpop.eup %5783  ;;  %v7573_v30 = vadd.f32 1.0, %v5782_v32 }
 0x30d   : > { %5785 = vpow2.f32 %v5030_v55  ;;  %v2882_v28 = vadd.f32 %v5780_v22, %v2881_v5  ;;  %v2894_v47 = vmul.f32 %v7571_v62, %v7558_v26  ;;  %vm2899_vm8 = vweird.f32 %v7571_v62  ;;  %v5371_v5 = vld [vmem:[#allocation7 + $0x7c] sm:$0xf] }
 0x30e   : > { %5787 = vrcp.f32 %v7573_v30  ;;  %vm7606_vm10 = vmor %vm2898_vm9, %vm2899_vm8  ;;  %vm2913_vm11 = vweird.f32 %v7573_v30  ;;  %v2917_v55 = vand.u32 2147483647, %v7573_v30  ;;  %v2919_v23 = vand.u32 2147483648, %v7573_v30 }
 0x30f   : > { %v2886_v45 = vsel %vm2885_vm5, %v5780_v22, %v2882_v28  ;;  %v2895_v34 = vsub.f32 1.0, %v2894_v47  ;;  %v2902_v22 = vand.u32 2147483647, %v7558_v26 }
 0x310   : > { %v2368_v44 = vpop.f32.mrf.mxu3  ;;  %v2891_v13 = vsel %vm2888_vm7, %v2890_v4, %v2886_v45  ;;  %v2920_v35 = vor.u32 1.1754944e-38, %v2919_v23  ;;  %vm2918_vm15 = vcmp.eq.f32.partialorder %v2917_v55, 8.507059e+37 }
 0x311   : > { %v2369_v56 = vadd.f32 %v2368_v44, %v6863_v48  ;;  %v3048_v29 = vmul.f32 %v2891_v13, %v7278_v24  ;;  %v2896_v41 = vmul.f32 %v7571_v62, %v2895_v34  ;;  %vm2903_vm14 = vcmp.eq.f32.partialorder %v2902_v22, 8.507059e+37 }
 0x313   : > { %v5031_v21 = vmul.f32 -1.442695, %v2369_v56  ;;  %v5786_v60 = vpop.eup %5785  ;;  %v3061_v1 = vpack.c.bf16 %v3048_v29, %v3047_v17  ;;  %v2897_v53 = vadd.f32 %v7571_v62, %v2896_v41  ;;  %v2298_v41 = vadd.f32 %v7624_v46, %v6484_v38  ;;  %v5114_v46 = vld [vmem:[#allocation7 + $0x3c] sm:$0xf0] }
 0x314   : > { %v5788_v11 = vpop.eup %5787  ;;  %v7591_v3 = vadd.f32 1.0, %v5786_v60 }
 0x315   : > { %v2909_v59 = vmul.f32 %v5788_v11, %v7573_v30  ;;  %5789 = vpow2.f32 %v5031_v21  ;;  %3149 = vmatmul.bf16.gmra.mxu1 %v3061_v1  ;;  %v2901_v9 = vsel %vm7606_vm10, %v7571_v62, %v2897_v53  ;;  %vm2914_vm12 = vweird.f32 %v5788_v11  ;;  %v5150_v62 = vld [vmem:[#allocation7 + $0x84] sm:$0xf0] }
 0x316   : > { %5791 = vrcp.f32 %v7591_v3  ;;  %vm2915_vm13 = vmor %vm2913_vm11, %vm2914_vm12  ;;  %v2906_v50 = vsel %vm2903_vm14, %v2905_v40, %v2901_v9  ;;  %v5153_v28 = vor.u32 %v5371_v5, %v5150_v62  ;;  %v2934_v34 = vand.u32 2147483648, %v7591_v3 }
 0x317   : > { %v2910_v8 = vsub.f32 1.0, %v2909_v59  ;;  %v3049_v30 = vmul.f32 %v2906_v50, %v7310_v42  ;;  %vm2928_vm1 = vweird.f32 %v7591_v3  ;;  %v2932_v29 = vand.u32 2147483647, %v7591_v3 }
 0x318   : > { %v2371_v54 = vpop.f32.mrf.mxu3  ;;  %3512 = vmatpush.bf16.msrb.mxu3 %v5153_v28 }
 0x319   : > { %v2372_v27 = vadd.f32 %v2371_v54, %v6863_v48  ;;  %v2911_v24 = vmul.f32 %v5788_v11, %v2910_v8  ;;  %vm2933_vm6 = vcmp.eq.f32.partialorder %v2932_v29, 8.507059e+37 }
 0x31b   : > { %v5032_v10 = vmul.f32 -1.442695, %v2372_v27  ;;  %v5790_v51 = vpop.eup %5789  ;;  %v2912_v37 = vadd.f32 %v5788_v11, %v2911_v24  ;;  %v2935_v27 = vor.u32 1.1754944e-38, %v2934_v34  ;;  %v7654_v24 = vpop.f32.mrf.mxu2 }
 0x31c   : > { %v7602_v52 = vpop.eup %5791  ;;  %v7604_v43 = vadd.f32 1.0, %v5790_v51 }
 0x31d   : > { %5793 = vpow2.f32 %v5032_v10  ;;  %v2924_v63 = vmul.f32 %v7602_v52, %v7591_v3  ;;  %v2916_v19 = vsel %vm2915_vm13, %v5788_v11, %v2912_v37  ;;  %vm2929_vm0 = vweird.f32 %v7602_v52  ;;  %v5368_v37 = vld [vmem:[#allocation7 + $0x64] sm:$0xf] }
 0x31e   : > { %5795 = vrcp.f32 %v7604_v43  ;;  %v2921_v16 = vsel %vm2918_vm15, %v2920_v35, %v2916_v19  ;;  %vm7639_vm2 = vmor %vm2928_vm1, %vm2929_vm0  ;;  %vm2943_vm3 = vweird.f32 %v7604_v43  ;;  %v2947_v10 = vand.u32 2147483647, %v7604_v43 }
 0x31f   : > { %v2925_v7 = vsub.f32 1.0, %v2924_v63  ;;  %v3050_v47 = vmul.f32 %v2921_v16, %v7338_v39  ;;  %v2949_v53 = vand.u32 2147483648, %v7604_v43 }
 0x320   : > { %v2373_v26 = vpop.f32.mrf.mxu3  ;;  %vm2948_vm7 = vcmp.eq.f32.partialorder %v2947_v10, 8.507059e+37 }
 0x321   : > { %v2374_v32 = vadd.f32 %v2373_v26, %v6863_v48  ;;  %v3062_v20 = vpack.c.bf16 %v3050_v47, %v3049_v30  ;;  %v2926_v13 = vmul.f32 %v7602_v52, %v2925_v7  ;;  %v2950_v9 = vor.u32 1.1754944e-38, %v2949_v53 }
 0x323   : > { %v5033_v44 = vmul.f32 -1.442695, %v2374_v32  ;;  %v5794_v2 = vpop.eup %5793  ;;  %v2927_v39 = vadd.f32 %v7602_v52, %v2926_v13 }
 0x324   : > { %v5796_v56 = vpop.eup %5795  ;;  %v7622_v45 = vadd.f32 1.0, %v5794_v2 }
 0x325   : > { %v2939_v6 = vmul.f32 %v5796_v56, %v7604_v43  ;;  %5797 = vpow2.f32 %v5033_v44  ;;  %3154 = vmatmul.bf16.gmra.mxu1 %v3062_v20  ;;  %v2931_v8 = vsel %vm7639_vm2, %v7602_v52, %v2927_v39  ;;  %vm2944_vm4 = vweird.f32 %v5796_v56  ;;  %v5138_v52 = vld [vmem:[#allocation7 + $0x6c] sm:$0xf0]  ;;  %v5126_v39 = vld [vmem:[#allocation7 + $0x54] sm:$0xf0] }
 0x326   : > { %5799 = vrcp.f32 %v7622_v45  ;;  %vm7648_vm5 = vmor %vm2943_vm3, %vm2944_vm4  ;;  %v2936_v49 = vsel %vm2933_vm6, %v2935_v27, %v2931_v8  ;;  %v5141_v26 = vor.u32 %v5368_v37, %v5138_v52  ;;  %vm2958_vm9 = vweird.f32 %v7622_v45 }
 0x327   : > { %v2940_v18 = vsub.f32 1.0, %v2939_v6  ;;  %v3051_v63 = vmul.f32 %v2936_v49, %v7368_v0  ;;  %v7670_v0 = vpop.f32.mrf.mxu2  ;;  %v2964_v30 = vand.u32 2147483648, %v7622_v45  ;;  %v2962_v6 = vand.u32 2147483647, %v7622_v45 }
 0x328   : > { %v2376_v4 = vpop.f32.mrf.mxu3  ;;  %3513 = vmatpush.bf16.msrb.mxu3 %v5141_v26  ;;  %v5362_v26 = vld [vmem:[#allocation7 + $0x34] sm:$0xf] }
 0x329   : > { %v2377_v21 = vadd.f32 %v2376_v4, %v6863_v48  ;;  %v2941_v60 = vmul.f32 %v5796_v56, %v2940_v18  ;;  %vm2963_vm14 = vcmp.eq.f32.partialorder %v2962_v6, 8.507059e+37 }
 0x32b   : > { %v5034_v42 = vmul.f32 -1.442695, %v2377_v21  ;;  %v5798_v17 = vpop.eup %5797  ;;  %v2942_v11 = vadd.f32 %v5796_v56, %v2941_v60  ;;  %v2965_v60 = vor.u32 1.1754944e-38, %v2964_v30 }
 0x32c   : > { %v7635_v59 = vpop.eup %5799  ;;  %v7637_v1 = vadd.f32 1.0, %v5798_v17 }
 0x32d   : > { %5801 = vpow2.f32 %v5034_v42  ;;  %v2954_v15 = vmul.f32 %v7635_v59, %v7622_v45  ;;  %v2946_v22 = vsel %vm7648_vm5, %v5796_v56, %v2942_v11  ;;  %vm2959_vm8 = vweird.f32 %v7635_v59  ;;  %v5365_v42 = vld [vmem:[#allocation7 + $0x4c] sm:$0xf]  ;;  %v5379_v56 = vld [vmem:[#allocation7 + $0xb8] sm:$0xf0] }
 0x32e   : > { %5803 = vrcp.f32 %v7637_v1  ;;  %v2951_v55 = vsel %vm2948_vm7, %v2950_v9, %v2946_v22  ;;  %vm7675_vm10 = vmor %vm2958_vm9, %vm2959_vm8  ;;  %vm2973_vm11 = vweird.f32 %v7637_v1  ;;  %v2977_v34 = vand.u32 2147483647, %v7637_v1 }
 0x32f   : > { %v2955_v23 = vsub.f32 1.0, %v2954_v15  ;;  %v3052_v32 = vmul.f32 %v2951_v55, %v7394_v61  ;;  %v2979_v17 = vand.u32 2147483648, %v7637_v1  ;;  %v7696_v15 = vpop.f32.mrf.mxu2 }
 0x330   : > { %v2378_v3 = vpop.f32.mrf.mxu3  ;;  %vm2978_vm15 = vcmp.eq.f32.partialorder %v2977_v34, 8.507059e+37 }
 0x331   : > { %v2379_v51 = vadd.f32 %v2378_v3, %v6863_v48  ;;  %v3063_v50 = vpack.c.bf16 %v3052_v32, %v3051_v63  ;;  %v2956_v16 = vmul.f32 %v7635_v59, %v2955_v23  ;;  %v2980_v8 = vor.u32 1.1754944e-38, %v2979_v17  ;;  %v5359_v23 = vld [vmem:[#allocation7 + $0x1c] sm:$0xf]  ;;  %v5102_v63 = vld [vmem:[#allocation7 + $0x24] sm:$0xf0] }
 0x332   : > { %v5129_v3 = vor.u32 %v5365_v42, %v5126_v39  ;;  %v5160_v42 = vld [vmem:[#allocation7 + $0x90] sm:$0xf]  ;;  %v5375_v39 = vld [vmem:[#allocation7 + $0x98] sm:$0xf0]  ;;  %v5376_v17 = vld [vmem:[#allocation7 + $0xa0] sm:$0xf0] }
 0x333   : > { %v5035_v40 = vmul.f32 -1.442695, %v2379_v51  ;;  %v5802_v43 = vpop.eup %5801  ;;  %v2957_v2 = vadd.f32 %v7635_v59, %v2956_v16  ;;  %v5180_v16 = vld [vmem:[#allocation7 + $0xb0] sm:$0xf] }
 0x334   : > { %v5804_v19 = vpop.eup %5803  ;;  %v7663_v5 = vadd.f32 1.0, %v5802_v43  ;;  %3514 = vmatpush.bf16.msrb.mxu3 %v5129_v3  ;;  %v5117_v43 = vor.u32 %v5362_v26, %v5114_v46 }
 0x335   : > { %v2969_v62 = vmul.f32 %v5804_v19, %v7637_v1  ;;  %5805 = vpow2.f32 %v5035_v40  ;;  %3159 = vmatmul.bf16.gmra.mxu1 %v3063_v50  ;;  %v2961_v21 = vsel %vm7675_vm10, %v7635_v59, %v2957_v2  ;;  %vm2974_vm12 = vweird.f32 %v5804_v19  ;;  %v5172_v50 = vld [vmem:[#allocation7 + $0xa8] sm:$0xf] }
 0x336   : > { %5807 = vrcp.f32 %v7663_v5  ;;  %vm2975_vm13 = vmor %vm2973_vm11, %vm2974_vm12  ;;  %v2966_v54 = vsel %vm2963_vm14, %v2965_v60, %v2961_v21  ;;  %v5006_v40 = vmul.f32 -1.442695, %v2298_v41  ;;  %v2994_v32 = vand.u32 2147483648, %v7663_v5 }
 0x337   : > { %v2970_v28 = vsub.f32 1.0, %v2969_v62  ;;  %v3053_v1 = vmul.f32 %v2966_v54, %v7422_v25  ;;  %vm2988_vm2 = vweird.f32 %v7663_v5  ;;  %v2300_v2 = vadd.f32 %v7654_v24, %v6484_v38 }
 0x338   : > { %v2381_v35 = vpop.f32.mrf.mxu3  ;;  %3515 = vmatpush.bf16.msrb.mxu3 %v5117_v43  ;;  %v2995_v60 = vor.u32 1.1754944e-38, %v2994_v32  ;;  %v5161_v54 = vor.u32 %v5375_v39, %v5160_v42  ;;  %v5370_v42 = vld [vmem:[#allocation7 + $0x70] sm:$0xf0] }
 0x339   : > { %v2382_v44 = vadd.f32 %v2381_v35, %v6863_v48  ;;  %v2971_v7 = vmul.f32 %v5804_v19, %v2970_v28  ;;  %v2992_v35 = vand.u32 2147483647, %v7663_v5  ;;  %v5105_v28 = vor.u32 %v5359_v23, %v5102_v63 }
 0x33b   : > { %v5036_v61 = vmul.f32 -1.442695, %v2382_v44  ;;  %v5806_v47 = vpop.eup %5805  ;;  %v2972_v20 = vadd.f32 %v5804_v19, %v2971_v7  ;;  %v5378_v44 = vld [vmem:[#allocation7 + $0xb0] sm:$0xf0]  ;;  %vm2993_vm7 = vcmp.eq.f32.partialorder %v2992_v35, 8.507059e+37 }
 0x33c   : > { %v7680_v4 = vpop.eup %5807  ;;  %v7682_v18 = vadd.f32 1.0, %v5806_v47  ;;  %v5173_v47 = vor.u32 %v5378_v44, %v5172_v50  ;;  %3516 = vmatpush.bf16.msrb.mxu3 %v5105_v28  ;;  %v2305_v44 = vadd.f32 %v7696_v15, %v6484_v38  ;;  %v5372_v7 = vld [vmem:[#allocation7 + $0x80] sm:$0xf0] }
 0x33d   : > { %v2984_v13 = vmul.f32 %v7680_v4, %v7663_v5  ;;  %5809 = vpow2.f32 %v5036_v61  ;;  %v2976_v11 = vsel %vm2975_vm13, %v5804_v19, %v2972_v20  ;;  %vm2989_vm0 = vweird.f32 %v7680_v4 }
 0x33e   : > { %5811 = vrcp.f32 %v7682_v18  ;;  %v2981_v10 = vsel %vm2978_vm15, %v2980_v8, %v2976_v11  ;;  %v3007_v62 = vand.u32 2147483647, %v7682_v18  ;;  %vm7716_vm3 = vmor %vm2988_vm2, %vm2989_vm0  ;;  %vm3003_vm4 = vweird.f32 %v7682_v18  ;;  %3461 = vmatpush.bf16.msrb.mxu2 %v5173_v47 }
 0x33f   : > { %v2985_v59 = vsub.f32 1.0, %v2984_v13  ;;  %v3054_v51 = vmul.f32 %v2981_v10, %v7440_v58  ;;  %v3009_v58 = vand.u32 2147483648, %v7682_v18  ;;  %v5181_v13 = vor.u32 %v5379_v56, %v5180_v16 }
 0x340   : > { %v2383_v45 = vpop.f32.mrf.mxu3  ;;  %vm3008_vm6 = vcmp.eq.f32.partialorder %v3007_v62, 8.507059e+37  ;;  %v5007_v11 = vmul.f32 -1.442695, %v2300_v2  ;;  %v5148_v2 = vld [vmem:[#allocation7 + $0x78] sm:$0xf] }
 0x341   : > { %v2384_v29 = vadd.f32 %v2383_v45, %v6863_v48  ;;  %v2986_v52 = vmul.f32 %v7680_v4, %v2985_v59  ;;  %v3064_v9 = vpack.c.bf16 %v3054_v51, %v3053_v1  ;;  %v3010_v21 = vor.u32 1.1754944e-38, %v3009_v58  ;;  %3559 = vmatpush.bf16.msrb.mxu0 %v5181_v13  ;;  %v5144_v13 = vld [vmem:[#allocation7 + $0x68] sm:$0xf] }
 0x342   : > { %3462 = vmatpush.bf16.msrb.mxu2 %v5161_v54  ;;  %v5149_v56 = vor.u32 %v5372_v7, %v5148_v2  ;;  %v5009_v39 = vmul.f32 -1.442695, %v2305_v44 }
 0x343   : > { %v5037_v27 = vmul.f32 -1.442695, %v2384_v29  ;;  %v5810_v53 = vpop.eup %5809  ;;  %v2987_v25 = vadd.f32 %v7680_v4, %v2986_v52 }
 0x344   : > { %v5812_v22 = vpop.eup %5811  ;;  %v7700_v37 = vadd.f32 1.0, %v5810_v53  ;;  %v7742_v53 = vpop.f32.mrf.mxu0 }
 0x345   : > { %v2999_v49 = vmul.f32 %v5812_v22, %v7682_v18  ;;  %5813 = vpow2.f32 %v5037_v27  ;;  %3164 = vmatmul.bf16.gmra.mxu1 %v3064_v9  ;;  %vm3004_vm1 = vweird.f32 %v5812_v22  ;;  %v2991_v20 = vsel %vm7716_vm3, %v7680_v4, %v2987_v25  ;;  %v7733_v18 = vpop.f32.mrf.mxu2  ;;  %v5168_v4 = vld [vmem:[#allocation7 + $0x98] sm:$0xf] }
 0x346   : > { %5815 = vrcp.f32 %v7700_v37  ;;  %vm7729_vm5 = vmor %vm3003_vm4, %vm3004_vm1  ;;  %v2996_v59 = vsel %vm2993_vm7, %v2995_v60, %v2991_v20  ;;  %v5169_v41 = vor.u32 %v5376_v17, %v5168_v4  ;;  %vm3018_vm10 = vweird.f32 %v7700_v37  ;;  %v5369_v20 = vld [vmem:[#allocation7 + $0x68] sm:$0xf0]  ;;  %3463 = vmatpush.bf16.msrb.mxu2 %v5149_v56  ;;  %v5100_v56 = vld [vmem:[#allocation7 + $0x18] sm:$0xf] }
 0x347   : > { %v3000_v55 = vsub.f32 1.0, %v2999_v49  ;;  %5817 = vpow2.f32 %v5006_v40  ;;  %v3055_v10 = vmul.f32 %v2996_v59, %v7465_v57  ;;  %v3022_v43 = vand.u32 2147483647, %v7700_v37 }
 0x348   : > { %3560 = vmatpush.bf16.msrb.mxu0 %v5169_v41  ;;  %v5145_v4 = vor.u32 %v5370_v42, %v5144_v13  ;;  %v5366_v41 = vld [vmem:[#allocation7 + $0x50] sm:$0xf0]  ;;  %v5088_v13 = vld [vmem:[#allocation7] sm:$0xf]  ;;  %v5357_v42 = vld [vmem:[#allocation7 + $0x8] sm:$0xf0] }
 0x349   : > { %v3001_v19 = vmul.f32 %v5812_v22, %v3000_v55  ;;  %vm3023_vm15 = vcmp.eq.f32.partialorder %v3022_v43, 8.507059e+37 }
 0x34b   : > { %v5814_v61 = vpop.eup %5813  ;;  %v3002_v30 = vadd.f32 %v5812_v22, %v3001_v19 }
 0x34c   : > { %v7721_v5 = vpop.eup %5815  ;;  %v7723_v6 = vadd.f32 1.0, %v5814_v61  ;;  %v7772_v35 = vpop.f32.mrf.mxu0 }
 0x34d   : > { %v3014_v45 = vmul.f32 %v7721_v5, %v7700_v37  ;;  %v3006_v34 = vsel %vm7729_vm5, %v5812_v22, %v3002_v30  ;;  %v5818_v8 = vpop.eup %5817  ;;  %v2303_v22 = vadd.f32 %v7670_v0, %v6484_v38  ;;  %vm3019_vm8 = vweird.f32 %v7721_v5  ;;  %v5156_v30 = vld [vmem:[#allocation7 + $0x80] sm:$0xf] }
 0x34e   : > { %5819 = vrcp.f32 %v7723_v6  ;;  %v3011_v29 = vsel %vm3008_vm6, %v3010_v21, %v3006_v34  ;;  %v7744_v1 = vadd.f32 1.0, %v5818_v8  ;;  %v3039_v40 = vand.u32 2147483648, %v7723_v6  ;;  %vm7760_vm11 = vmor %vm3018_vm10, %vm3019_vm8 }
 0x34f   : > { %v3015_v3 = vsub.f32 1.0, %v3014_v45  ;;  %v3056_v27 = vmul.f32 %v3011_v29, %v7478_v36  ;;  %5821 = vpow2.f32 %v5007_v11  ;;  %v7751_v36 = vpop.f32.mrf.mxu2  ;;  %v5008_v26 = vmul.f32 -1.442695, %v2303_v22 }
 0x350   : > { %5823 = vrcp.f32 %v7744_v1  ;;  %v3024_v0 = vand.u32 2147483648, %v7700_v37  ;;  %v3037_v58 = vand.u32 2147483647, %v7723_v6  ;;  %vm3033_vm12 = vweird.f32 %v7723_v6 }
 0x351   : > { %v3065_v52 = vpack.c.bf16 %v3056_v27, %v3055_v10  ;;  %v3016_v49 = vmul.f32 %v7721_v5, %v3015_v3  ;;  %v3040_v62 = vor.u32 1.1754944e-38, %v3039_v40  ;;  %5825 = vpow2.f32 %v5008_v26  ;;  %v5090_v3 = vld [vmem:[#allocation7 + $0xc] sm:$0xf0]  ;;  %v5363_v26 = vld [vmem:[#allocation7 + $0x38] sm:$0xf0] }
 0x352   : > { %v3025_v37 = vor.u32 1.1754944e-38, %v3024_v0  ;;  %vm3038_vm14 = vcmp.eq.f32.partialorder %v3037_v58, 8.507059e+37  ;;  %v2308_v45 = vadd.f32 %v7733_v18, %v6484_v38  ;;  %v5356_v18 = vld [vmem:[#allocation7 + $0x4] sm:$0xf]  ;;  %v5132_v10 = vld [vmem:[#allocation7 + $0x50] sm:$0xf]  ;;  %vm2504_vm1 = vweird.f32 %v7744_v1 }
 0x353   : > { %v3017_v46 = vadd.f32 %v7721_v5, %v3016_v49  ;;  %v5093_v27 = vor.u32 %v5356_v18, %v5090_v3  ;;  %v5364_v40 = vld [vmem:[#allocation7 + $0x40] sm:$0xf0] }
 0x354   : > { %v5820_v51 = vpop.eup %5819  ;;  %v5010_v54 = vmul.f32 -1.442695, %v2308_v45  ;;  %v7789_v8 = vpop.f32.mrf.mxu0 }
 0x355   : > { %v3029_v9 = vmul.f32 %v5820_v51, %v7723_v6  ;;  %3169 = vmatmul.bf16.gmra.mxu1 %v3065_v52  ;;  %v5822_v55 = vpop.eup %5821  ;;  %vm3034_vm9 = vweird.f32 %v5820_v51  ;;  %v3021_v19 = vsel %vm7760_vm11, %v7721_v5, %v3017_v46  ;;  %v5373_v5 = vld [vmem:[#allocation7 + $0x88] sm:$0xf0]  ;;  %v5136_v6 = vld [vmem:[#allocation7 + $0x60] sm:$0xf]  ;;  %v5120_v46 = vld [vmem:[#allocation7 + $0x38] sm:$0xf]  ;;  %3517 = vmatpush.bf16.msrb.mxu3 %v5093_v27  ;;  %v2398_v27 = vadd.f32 %v7772_v35, %v6489_v12 }
 0x356   : > { %v7765_v32 = vadd.f32 1.0, %v5822_v55  ;;  %vm3035_vm13 = vmor %vm3033_vm12, %vm3034_vm9  ;;  %v7770_v50 = vpop.eup %5823  ;;  %v3026_v61 = vsel %vm3023_vm15, %v3025_v37, %v3021_v19  ;;  %v5157_v15 = vor.u32 %v5373_v5, %v5156_v30  ;;  %v2508_v19 = vand.u32 2147483647, %v7744_v1  ;;  %v5360_v5 = vld [vmem:[#allocation7 + $0x20] sm:$0xf0] }
 0x357   : > { %v3030_v57 = vsub.f32 1.0, %v3029_v9  ;;  %v2500_v24 = vmul.f32 %v7770_v50, %v7744_v1  ;;  %v7780_v21 = vpop.f32.mrf.mxu2  ;;  %v3057_v60 = vmul.f32 %v3026_v61, %v7498_v33  ;;  %v5826_v34 = vpop.eup %5825  ;;  %v5124_v33 = vld [vmem:[#allocation7 + $0x48] sm:$0xf]  ;;  %vm2505_vm0 = vweird.f32 %v7770_v50 }
 0x358   : > { %5827 = vrcp.f32 %v7765_v32  ;;  %3561 = vmatpush.bf16.msrb.mxu0 %v5157_v15  ;;  %v7787_v59 = vadd.f32 1.0, %v5826_v34  ;;  %v5125_v49 = vor.u32 %v5366_v41, %v5124_v33  ;;  %vm7808_vm2 = vmor %vm2504_vm1, %vm2505_vm0  ;;  %vm2509_vm3 = vcmp.eq.f32.partialorder %v2508_v19, 8.507059e+37  ;;  %v5096_v34 = vld [vmem:[#allocation7 + $0x8] sm:$0xf] }
 0x359   : > { %v3031_v25 = vmul.f32 %v5820_v51, %v3030_v57  ;;  %v2501_v29 = vsub.f32 1.0, %v2500_v24  ;;  %5829 = vpow2.f32 %v5009_v39  ;;  %v5112_v57 = vld [vmem:[#allocation7 + $0x30] sm:$0xf]  ;;  %v5101_v15 = vor.u32 %v5360_v5, %v5100_v56 }
 0x35a   : > { %5831 = vrcp.f32 %v7787_v59  ;;  %v5113_v0 = vor.u32 %v5363_v26, %v5112_v57  ;;  %vm2519_vm5 = vweird.f32 %v7765_v32  ;;  %v2523_v3 = vand.u32 2147483647, %v7765_v32 }
 0x35b   : > { %v3032_v63 = vadd.f32 %v5820_v51, %v3031_v25  ;;  %v2502_v52 = vmul.f32 %v7770_v50, %v2501_v29  ;;  %v5121_v25 = vor.u32 %v5364_v40, %v5120_v46  ;;  %5833 = vpow2.f32 %v5010_v54 }
 0x35c   : > { %3562 = vmatpush.bf16.msrb.mxu0 %v5145_v4  ;;  %v5358_v4 = vld [vmem:[#allocation7 + $0x10] sm:$0xf0]  ;;  %v2525_v29 = vand.u32 2147483648, %v7765_v32  ;;  %v5089_v54 = vor.u32 %v5357_v42, %v5088_v13  ;;  %vm2524_vm7 = vcmp.eq.f32.partialorder %v2523_v3, 8.507059e+37  ;;  %vm2534_vm9 = vweird.f32 %v7787_v59 }
 0x35d   : > { %v3036_v28 = vsel %vm3035_vm13, %v5820_v51, %v3032_v63  ;;  %v5367_v51 = vld [vmem:[#allocation7 + $0x58] sm:$0xf0]  ;;  %v2503_v23 = vadd.f32 %v7770_v50, %v2502_v52  ;;  %v2310_v63 = vadd.f32 %v7751_v36, %v6484_v38  ;;  %v7814_v36 = vpop.f32.mrf.mxu0  ;;  %v5097_v33 = vor.u32 %v5358_v4, %v5096_v34 }
 0x35e   : > { %v3041_v16 = vsel %vm3038_vm14, %v3040_v62, %v3036_v28  ;;  %v7785_v11 = vpop.eup %5827  ;;  %v5133_v9 = vor.u32 %v5367_v51, %v5132_v10  ;;  %v2510_v62 = vand.u32 2147483648, %v7744_v1  ;;  %v2396_v28 = vadd.f32 %v7742_v53, %v6489_v12 }
 0x35f   : > { %v3058_v47 = vmul.f32 %v3041_v16, %v7503_v14  ;;  %v5137_v14 = vor.u32 %v5369_v20, %v5136_v6  ;;  %v2515_v22 = vmul.f32 %v7785_v11, %v7765_v32  ;;  %v7795_v55 = vpop.f32.mrf.mxu2  ;;  %v5830_v58 = vpop.eup %5829  ;;  %v2507_v61 = vsel %vm7808_vm2, %v7770_v50, %v2503_v23  ;;  %v5108_v6 = vld [vmem:[#allocation7 + $0x20] sm:$0xf]  ;;  %v5361_v50 = vld [vmem:[#allocation7 + $0x28] sm:$0xf0] }
 0x360   : > { %3563 = vmatpush.bf16.msrb.mxu0 %v5133_v9  ;;  %v7803_v37 = vadd.f32 1.0, %v5830_v58  ;;  %v7812_v16 = vpop.eup %5831  ;;  %v5011_v30 = vmul.f32 -1.442695, %v2310_v63  ;;  %vm2520_vm4 = vweird.f32 %v7785_v11  ;;  %v2526_v52 = vor.u32 1.1754944e-38, %v2525_v29 }
 0x361   : > { %v3066_v17 = vpack.c.bf16 %v3058_v47, %v3057_v60  ;;  %3464 = vmatpush.bf16.msrb.mxu2 %v5137_v14  ;;  %v2516_v43 = vsub.f32 1.0, %v2515_v22  ;;  %v5834_v7 = vpop.eup %5833  ;;  %v2511_v47 = vor.u32 1.1754944e-38, %v2510_v62  ;;  %v2530_v20 = vmul.f32 %v7812_v16, %v7787_v59  ;;  %vm7838_vm6 = vmor %vm2519_vm5, %vm2520_vm4 }
 0x362   : > { %5835 = vrcp.f32 %v7803_v37  ;;  %v7823_v39 = vadd.f32 1.0, %v5834_v7  ;;  %v5109_v14 = vor.u32 %v5361_v50, %v5108_v6  ;;  %v2315_v58 = vadd.f32 %v7795_v55, %v6484_v38 }
 0x363   : > { %v2517_v1 = vmul.f32 %v7785_v11, %v2516_v43  ;;  %v2512_v24 = vsel %vm2509_vm3, %v2511_v47, %v2507_v61  ;;  %v2531_v10 = vsub.f32 1.0, %v2530_v20  ;;  %vm2535_vm8 = vweird.f32 %v7812_v16  ;;  %v6096_v47 = vld [vmem:[%s6512_s16 + $0x98] sm:$0xff] }
 0x364   : > { %3564 = vmatpush.bf16.msrb.mxu0 %v5121_v25  ;;  %v3212_v18 = vsub.f32 1.0, %v2512_v24  ;;  %v5013_v44 = vmul.f32 -1.442695, %v2315_v58  ;;  %v2540_v61 = vand.u32 2147483648, %v7787_v59  ;;  %v2538_v7 = vand.u32 2147483647, %v7787_v59  ;;  %vm7870_vm10 = vmor %vm2534_vm9, %vm2535_vm8 }
 0x365   : > { %3174 = vmatmul.bf16.gmra.mxu1 %v3066_v17  ;;  %3465 = vmatpush.bf16.msrb.mxu2 %v5125_v49  ;;  %v2518_v60 = vadd.f32 %v7785_v11, %v2517_v1  ;;  %v2313_v17 = vadd.f32 %v7780_v21, %v6484_v38  ;;  %v7848_v35 = vpop.f32.mrf.mxu0  ;;  %v2532_v25 = vmul.f32 %v7812_v16, %v2531_v10  ;;  %vm2549_vm13 = vweird.f32 %v7803_v37 }
 0x366   : > { %v3228_v57 = vmul.f32 %v7529_v31, %v3212_v18  ;;  %vm2539_vm11 = vcmp.eq.f32.partialorder %v2538_v7, 8.507059e+37  ;;  %v2403_v18 = vadd.f32 %v7814_v36, %v6489_v12  ;;  %vm2564_vm1 = vweird.f32 %v7823_v39 }
 0x367   : > { %v7825_v45 = vpop.f32.mrf.mxu2  ;;  %v2522_v51 = vsel %vm7838_vm6, %v7785_v11, %v2518_v60  ;;  %v5012_v9 = vmul.f32 -1.442695, %v2313_v17  ;;  %v2533_v62 = vadd.f32 %v7812_v16, %v2532_v25  ;;  %v2555_v17 = vand.u32 2147483648, %v7803_v37 }
 0x368   : > { %3565 = vmatpush.bf16.msrb.mxu0 %v5109_v14  ;;  %v7842_v21 = vpop.eup %5835  ;;  %v2527_v40 = vsel %vm2524_vm7, %v2526_v52, %v2522_v51  ;;  %v2570_v25 = vand.u32 2147483648, %v7823_v39 }
 0x369   : > { %3466 = vmatpush.bf16.msrb.mxu2 %v5113_v0  ;;  %v2545_v11 = vmul.f32 %v7842_v21, %v7803_v37  ;;  %v3213_v31 = vsub.f32 1.0, %v2527_v40  ;;  %v2537_v59 = vsel %vm7870_vm10, %v7812_v16, %v2533_v62  ;;  %vm2550_vm12 = vweird.f32 %v7842_v21 }
 0x36a   : > { %vm7901_vm14 = vmor %vm2549_vm13, %vm2550_vm12  ;;  %v2556_v36 = vor.u32 1.1754944e-38, %v2555_v17 }
 0x36b   : > { %v2546_v19 = vsub.f32 1.0, %v2545_v11 }
 0x36c   : > { %3566 = vmatpush.bf16.msrb.mxu0 %v5097_v33 }
 0x36d   : > { %3467 = vmatpush.bf16.msrb.mxu2 %v5101_v15  ;;  %v7876_v5 = vpop.f32.mrf.mxu0  ;;  %v2541_v15 = vor.u32 1.1754944e-38, %v2540_v61 }
 0x36f   : > { %v2319_v43 = vpop.f32.mrf.mxu2  ;;  %v2542_v60 = vsel %vm2539_vm11, %v2541_v15, %v2537_v59 }
 0x370   : > { %v3214_v29 = vsub.f32 1.0, %v2542_v60  ;;  %v2320_v52 = vadd.f32 %v2319_v43, %v6484_v38 }
 0x371   : > { %3468 = vmatpush.bf16.msrb.mxu2 %v5089_v54  ;;  %v2553_v54 = vand.u32 2147483647, %v7803_v37 }
 0x372   : > { %v3140_v2 = vpop.f32.mrf.mxu1  ;;  %v5015_v58 = vmul.f32 -1.442695, %v2320_v52 }
 0x373   : > { %v3180_v53 = vadd.f32 %v3140_v2, %v2396_v28  ;;  %v6094_v2 = vld [vmem:[%s6512_s16 + $0x88] sm:$0xff]  ;;  %vm2554_vm15 = vcmp.eq.f32.partialorder %v2553_v54, 8.507059e+37 }
 0x374   : > { %v3229_v1 = vmul.f32 %v6094_v2, %v3213_v31 }
 0x375   : > { %5837 = vtanh.f32 %v3180_v53 }
 0x376   : > { %5839 = vpow2.f32 %v5011_v30  ;;  %v2401_v30 = vadd.f32 %v7789_v8, %v6489_v12  ;;  %v2547_v8 = vmul.f32 %v7842_v21, %v2546_v19  ;;  %v2568_v19 = vand.u32 2147483647, %v7823_v39 }
 0x377   : > { %5841 = vrcp.f32 %v7823_v39  ;;  %v2322_v16 = vpop.f32.mrf.mxu2 }
 0x378   : > { %v2548_v34 = vadd.f32 %v7842_v21, %v2547_v8  ;;  %v2323_v7 = vadd.f32 %v2322_v16, %v6484_v38  ;;  %vm2569_vm3 = vcmp.eq.f32.partialorder %v2568_v19, 8.507059e+37 }
 0x37a   : > { %v3142_v22 = vpop.f32.mrf.mxu1  ;;  %v2552_v41 = vsel %vm7901_vm14, %v7842_v21, %v2548_v34 }
 0x37b   : > { %v5838_v32 = vpop.eup %5837  ;;  %v3181_v49 = vadd.f32 %v3142_v22, %v2398_v27 }
 0x37c   : > { %v3244_v26 = vmul.f32 %v5838_v32, %v2512_v24  ;;  %v5840_v46 = vpop.eup %5839  ;;  %v2318_v24 = vadd.f32 %v7825_v45, %v6484_v38  ;;  %v7911_v32 = vpop.f32.mrf.mxu0 }
 0x37d   : > { %5843 = vtanh.f32 %v3181_v49  ;;  %v7857_v23 = vpop.eup %5841  ;;  %v7859_v63 = vadd.f32 1.0, %v5840_v46  ;;  %v6095_v49 = vld [vmem:[%s6512_s16 + $0x90] sm:$0xff]  ;;  %v2557_v46 = vsel %vm2554_vm15, %v2556_v36, %v2552_v41 }
 0x37e   : > { %v3260_v0 = vadd.f32 %v3244_v26, %v3228_v57  ;;  %5845 = vpow2.f32 %v5012_v9  ;;  %v2560_v56 = vmul.f32 %v7857_v23, %v7823_v39  ;;  %v5014_v4 = vmul.f32 -1.442695, %v2318_v24 }
 0x37f   : > { %5847 = vrcp.f32 %v7859_v63  ;;  %v3230_v9 = vmul.f32 %v6095_v49, %v3214_v29  ;;  %vm2565_vm0 = vweird.f32 %v7857_v23  ;;  %v2324_v43 = vpop.f32.mrf.mxu2  ;;  %v3215_v31 = vsub.f32 1.0, %v2557_v46 }
 0x380   : > { %5070 = vst [vmem:[%s6512_s16 + $0x100] sm:$0xff] %v3260_v0  ;;  %5849 = vpow2.f32 %v5013_v44  ;;  %v2561_v14 = vsub.f32 1.0, %v2560_v56  ;;  %vm7931_vm2 = vmor %vm2564_vm1, %vm2565_vm0  ;;  %vm2579_vm5 = vweird.f32 %v7859_v63  ;;  %v2583_v16 = vand.u32 2147483647, %v7859_v63 }
 0x382   : > { %v3145_v20 = vpop.f32.mrf.mxu1  ;;  %v2562_v37 = vmul.f32 %v7857_v23, %v2561_v14  ;;  %vm2584_vm7 = vcmp.eq.f32.partialorder %v2583_v16, 8.507059e+37 }
 0x383   : > { %v5844_v28 = vpop.eup %5843  ;;  %v3182_v50 = vadd.f32 %v3145_v20, %v2401_v30 }
 0x384   : > { %v3245_v55 = vmul.f32 %v5844_v28, %v2527_v40  ;;  %v5846_v53 = vpop.eup %5845  ;;  %v2563_v11 = vadd.f32 %v7857_v23, %v2562_v37  ;;  %v2406_v28 = vadd.f32 %v7848_v35, %v6489_v12  ;;  %v2571_v35 = vor.u32 1.1754944e-38, %v2570_v25  ;;  %v6097_v37 = vld [vmem:[%s6512_s16 + $0xa0] sm:$0xff] }
 0x385   : > { %v7889_v42 = vadd.f32 1.0, %v5846_v53  ;;  %5851 = vtanh.f32 %v3182_v50  ;;  %v7893_v45 = vpop.eup %5847  ;;  %v3231_v53 = vmul.f32 %v6096_v47, %v3215_v31  ;;  %v2411_v31 = vadd.f32 %v7911_v32, %v6489_v12 }
 0x386   : > { %v7878_v6 = vadd.f32 %v3245_v55, %v3229_v1  ;;  %v5850_v33 = vpop.eup %5849  ;;  %v2575_v27 = vmul.f32 %v7893_v45, %v7859_v63  ;;  %v2567_v2 = vsel %vm7931_vm2, %v7857_v23, %v2563_v11  ;;  %v7945_v23 = vpop.f32.mrf.mxu0  ;;  %vm2580_vm4 = vweird.f32 %v7893_v45 }
 0x387   : > { %5853 = vrcp.f32 %v7889_v42  ;;  %v7915_v26 = vadd.f32 1.0, %v5850_v33  ;;  %v2572_v20 = vsel %vm2569_vm3, %v2571_v35, %v2567_v2  ;;  %vm7963_vm6 = vmor %vm2579_vm5, %vm2580_vm4  ;;  %vm2594_vm9 = vweird.f32 %v7889_v42 }
 0x388   : > { %5071 = vst [vmem:[%s6512_s16 + $0x108] sm:$0xff] %v7878_v6  ;;  %v3293_v13 = vpack.c.bf16 %v7878_v6, %v3260_v0  ;;  %5855 = vpow2.f32 %v5014_v4  ;;  %v2576_v21 = vsub.f32 1.0, %v2575_v27  ;;  %v3216_v14 = vsub.f32 1.0, %v2572_v20 }
 0x389   : > { %v2408_v4 = vadd.f32 %v7876_v5, %v6489_v12  ;;  %v2325_v27 = vadd.f32 %v2324_v43, %v6484_v38  ;;  %v5387_v43 = vld [vmem:[#allocation8 + $0x38] sm:$0xff]  ;;  %vm2609_vm13 = vweird.f32 %v7915_v26 }
 0x38a   : > { %3469 = vmatmul.bf16.vlgmr.msrb.gmra.mxu2 %v3293_v13  ;;  %3518 = vmatmul.bf16.vlgmr.msrb.gmra.mxu3 %v3293_v13  ;;  %v3147_v10 = vpop.f32.mrf.mxu1  ;;  %v2577_v39 = vmul.f32 %v7893_v45, %v2576_v21  ;;  %v2600_v21 = vand.u32 2147483648, %v7889_v42 }
 0x38b   : > { %3567 = vmatmul.bf16.vlgmr.msrb.gmra.mxu0 %v3293_v13  ;;  %v5852_v51 = vpop.eup %5851  ;;  %v3183_v22 = vadd.f32 %v3147_v10, %v2403_v18  ;;  %v5016_v13 = vmul.f32 -1.442695, %v2323_v7  ;;  %v2327_v18 = vpop.f32.mrf.mxu2  ;;  %4304 = vmatpush.bf16.msrb.mxu1 %v5387_v43  ;;  %v6098_v7 = vld [vmem:[%s6512_s16 + $0xa8] sm:$0xff]  ;;  %v5386_v43 = vld [vmem:[#allocation8 + $0x30] sm:$0xff] }
 0x38c   : > { %v3246_v57 = vmul.f32 %v5852_v51, %v2542_v60  ;;  %v2578_v15 = vadd.f32 %v7893_v45, %v2577_v39  ;;  %v2585_v60 = vand.u32 2147483648, %v7859_v63  ;;  %v3232_v51 = vmul.f32 %v6097_v37, %v3216_v14 }
 0x38d   : > { %5857 = vtanh.f32 %v3183_v22  ;;  %v7921_v0 = vpop.eup %5853  ;;  %v2328_v32 = vadd.f32 %v2327_v18, %v6484_v38  ;;  %v2613_v14 = vand.u32 2147483647, %v7915_v26 }
 0x38e   : > { %v7917_v40 = vadd.f32 %v3246_v57, %v3230_v9  ;;  %v5856_v62 = vpop.eup %5855  ;;  %5859 = vrcp.f32 %v7915_v26  ;;  %v2590_v61 = vmul.f32 %v7921_v0, %v7889_v42  ;;  %v2582_v63 = vsel %vm7963_vm6, %v7893_v45, %v2578_v15  ;;  %v7984_v11 = vpop.f32.mrf.mxu0 }
 0x38f   : > { %5861 = vpow2.f32 %v5015_v58  ;;  %v7943_v59 = vadd.f32 1.0, %v5856_v62  ;;  %v2586_v41 = vor.u32 1.1754944e-38, %v2585_v60  ;;  %vm2595_vm8 = vweird.f32 %v7921_v0  ;;  %4305 = vmatpush.bf16.msrb.mxu1 %v5386_v43 }
 0x390   : > { %5072 = vst [vmem:[%s6512_s16 + $0x110] sm:$0xff] %v7917_v40  ;;  %v2591_v8 = vsub.f32 1.0, %v2590_v61  ;;  %v2598_v58 = vand.u32 2147483647, %v7889_v42  ;;  %vm7993_vm10 = vmor %vm2594_vm9, %vm2595_vm8  ;;  %v5018_v15 = vmul.f32 -1.442695, %v2328_v32 }
 0x391   : > { %v2587_v45 = vsel %vm2584_vm7, %v2586_v41, %v2582_v63  ;;  %vm2614_vm15 = vcmp.eq.f32.partialorder %v2613_v14, 8.507059e+37  ;;  %vm2624_vm1 = vweird.f32 %v7943_v59 }
 0x392   : > { %v3150_v1 = vpop.f32.mrf.mxu1  ;;  %v2592_v5 = vmul.f32 %v7921_v0, %v2591_v8  ;;  %v3217_v25 = vsub.f32 1.0, %v2587_v45  ;;  %vm2599_vm11 = vcmp.eq.f32.partialorder %v2598_v58, 8.507059e+37  ;;  %v2628_v58 = vand.u32 2147483647, %v7943_v59 }
 0x393   : > { %v5858_v55 = vpop.eup %5857  ;;  %v3184_v30 = vadd.f32 %v3150_v1, %v2406_v28  ;;  %v2601_v1 = vor.u32 1.1754944e-38, %v2600_v21  ;;  %v2630_v21 = vand.u32 2147483648, %v7943_v59 }
 0x394   : > { %v3247_v56 = vmul.f32 %v5858_v55, %v2557_v46  ;;  %v7951_v50 = vpop.eup %5859  ;;  %v2593_v9 = vadd.f32 %v7921_v0, %v2592_v5  ;;  %v5017_v46 = vmul.f32 -1.442695, %v2325_v27  ;;  %v2329_v55 = vpop.f32.mrf.mxu2  ;;  %v3233_v35 = vmul.f32 %v6098_v7, %v3217_v25  ;;  %v6099_v27 = vld [vmem:[%s6512_s16 + $0xb0] sm:$0xff] }
 0x395   : > { %5863 = vtanh.f32 %v3184_v30  ;;  %v5862_v29 = vpop.eup %5861  ;;  %v2605_v54 = vmul.f32 %v7951_v50, %v7915_v26  ;;  %vm2610_vm12 = vweird.f32 %v7951_v50  ;;  %vm2629_vm3 = vcmp.eq.f32.partialorder %v2628_v58, 8.507059e+37 }
 0x396   : > { %v7947_v24 = vadd.f32 %v3247_v56, %v3231_v53  ;;  %5865 = vrcp.f32 %v7943_v59  ;;  %v7975_v22 = vadd.f32 1.0, %v5862_v29  ;;  %v2597_v44 = vsel %vm7993_vm10, %v7921_v0, %v2593_v9  ;;  %vm8023_vm14 = vmor %vm2609_vm13, %vm2610_vm12  ;;  %v8027_v29 = vpop.f32.mrf.mxu0 }
 0x397   : > { %5867 = vpow2.f32 %v5016_v13  ;;  %v2606_v52 = vsub.f32 1.0, %v2605_v54  ;;  %v2602_v53 = vsel %vm2599_vm11, %v2601_v1, %v2597_v44  ;;  %v2615_v13 = vand.u32 2147483648, %v7915_v26 }
 0x398   : > { %5073 = vst [vmem:[%s6512_s16 + $0x118] sm:$0xff] %v7947_v24  ;;  %v3294_v34 = vpack.c.bf16 %v7947_v24, %v7917_v40  ;;  %v3218_v60 = vsub.f32 1.0, %v2602_v53  ;;  %vm2639_vm5 = vweird.f32 %v7975_v22 }
 0x399   : > { %v2607_v61 = vmul.f32 %v7951_v50, %v2606_v52  ;;  %v2616_v5 = vor.u32 1.1754944e-38, %v2615_v13  ;;  %v2645_v13 = vand.u32 2147483648, %v7975_v22 }
 0x39a   : > { %v3152_v3 = vpop.f32.mrf.mxu1  ;;  %3474 = vmatmul.bf16.gmra.mxu2 %v3294_v34  ;;  %3523 = vmatmul.bf16.gmra.mxu3 %v3294_v34  ;;  %v3234_v41 = vmul.f32 %v6099_v27, %v3218_v60 }
 0x39b   : > { %v5864_v33 = vpop.eup %5863  ;;  %v3185_v10 = vadd.f32 %v3152_v3, %v2408_v4  ;;  %3572 = vmatmul.bf16.gmra.mxu0 %v3294_v34  ;;  %v2413_v34 = vadd.f32 %v7945_v23, %v6489_v12  ;;  %v2330_v3 = vadd.f32 %v2329_v55, %v6484_v38  ;;  %v2418_v4 = vadd.f32 %v8027_v29, %v6489_v12 }
 0x39c   : > { %v3248_v36 = vmul.f32 %v5864_v33, %v2572_v20  ;;  %v7981_v57 = vpop.eup %5865  ;;  %v2608_v20 = vadd.f32 %v7951_v50, %v2607_v61 }
 0x39d   : > { %5869 = vtanh.f32 %v3185_v10  ;;  %v5868_v62 = vpop.eup %5867  ;;  %v2620_v28 = vmul.f32 %v7981_v57, %v7943_v59  ;;  %vm2625_vm0 = vweird.f32 %v7981_v57 }
 0x39e   : > { %v7977_v49 = vadd.f32 %v3248_v36, %v3232_v51  ;;  %5871 = vrcp.f32 %v7975_v22  ;;  %v8005_v47 = vadd.f32 1.0, %v5868_v62  ;;  %v2612_v26 = vsel %vm8023_vm14, %v7951_v50, %v2608_v20  ;;  %v2332_v36 = vpop.f32.mrf.mxu2  ;;  %vm8053_vm2 = vmor %vm2624_vm1, %vm2625_vm0  ;;  %v2420_v1 = vpop.f32.mrf.mxu0 }
 0x39f   : > { %5873 = vpow2.f32 %v5017_v46  ;;  %v2621_v0 = vsub.f32 1.0, %v2620_v28  ;;  %v2617_v50 = vsel %vm2614_vm15, %v2616_v5, %v2612_v26  ;;  %v5019_v46 = vmul.f32 -1.442695, %v2330_v3 }
 0x3a0   : > { %5074 = vst [vmem:[%s6512_s16 + $0x120] sm:$0xff] %v7977_v49  ;;  %v3219_v25 = vsub.f32 1.0, %v2617_v50  ;;  %v2646_v3 = vor.u32 1.1754944e-38, %v2645_v13  ;;  %vm2654_vm9 = vweird.f32 %v8005_v47  ;;  %v2658_v43 = vand.u32 2147483647, %v8005_v47 }
 0x3a1   : > { %v2622_v23 = vmul.f32 %v7981_v57, %v2621_v0  ;;  %v2421_v19 = vadd.f32 %v2420_v1, %v6489_v12 }
 0x3a2   : > { %v3155_v42 = vpop.f32.mrf.mxu1  ;;  %vm2659_vm11 = vcmp.eq.f32.partialorder %v2658_v43, 8.507059e+37 }
 0x3a3   : > { %v5870_v2 = vpop.eup %5869  ;;  %v3186_v39 = vadd.f32 %v3155_v42, %v2411_v31  ;;  %v2623_v52 = vadd.f32 %v7981_v57, %v2622_v23  ;;  %v2416_v31 = vadd.f32 %v7984_v11, %v6489_v12  ;;  %v2333_v11 = vadd.f32 %v2332_v36, %v6484_v38 }
 0x3a4   : > { %v3249_v30 = vmul.f32 %v5870_v2, %v2587_v45  ;;  %v8011_v8 = vpop.eup %5871  ;;  %v2631_v2 = vor.u32 1.1754944e-38, %v2630_v21 }
 0x3a5   : > { %5875 = vtanh.f32 %v3186_v39  ;;  %v5874_v17 = vpop.eup %5873  ;;  %v2635_v54 = vmul.f32 %v8011_v8, %v7975_v22  ;;  %v2627_v44 = vsel %vm8053_vm2, %v7981_v57, %v2623_v52  ;;  %v6100_v39 = vld [vmem:[%s6512_s16 + $0xb8] sm:$0xff]  ;;  %vm2640_vm4 = vweird.f32 %v8011_v8 }
 0x3a6   : > { %v8007_v56 = vadd.f32 %v3249_v30, %v3233_v35  ;;  %5877 = vrcp.f32 %v8005_v47  ;;  %v8037_v37 = vadd.f32 1.0, %v5874_v17  ;;  %v3235_v55 = vmul.f32 %v6100_v39, %v3219_v25  ;;  %v2334_v60 = vpop.f32.mrf.mxu2  ;;  %vm8083_vm6 = vmor %vm2639_vm5, %vm2640_vm4 }
 0x3a7   : > { %5879 = vpow2.f32 %v5018_v15  ;;  %v2636_v51 = vsub.f32 1.0, %v2635_v54  ;;  %v2632_v30 = vsel %vm2629_vm3, %v2631_v2, %v2627_v44  ;;  %v5020_v15 = vmul.f32 -1.442695, %v2333_v11 }
 0x3a8   : > { %5075 = vst [vmem:[%s6512_s16 + $0x128] sm:$0xff] %v8007_v56  ;;  %v3295_v16 = vpack.c.bf16 %v8007_v56, %v7977_v49  ;;  %v3220_v14 = vsub.f32 1.0, %v2632_v30  ;;  %v2660_v25 = vand.u32 2147483648, %v8005_v47  ;;  %vm2669_vm13 = vweird.f32 %v8037_v37 }
 0x3a9   : > { %v2637_v42 = vmul.f32 %v8011_v8, %v2636_v51 }
 0x3aa   : > { %v3157_v18 = vpop.f32.mrf.mxu1  ;;  %3479 = vmatmul.bf16.gmra.mxu2 %v3295_v16  ;;  %3528 = vmatmul.bf16.gmra.mxu3 %v3295_v16  ;;  %v2661_v11 = vor.u32 1.1754944e-38, %v2660_v25  ;;  %v5384_v25 = vld [vmem:[#allocation8 + $0x20] sm:$0xff] }
 0x3ab   : > { %v5876_v63 = vpop.eup %5875  ;;  %v3187_v33 = vadd.f32 %v3157_v18, %v2413_v34  ;;  %3577 = vmatmul.bf16.gmra.mxu0 %v3295_v16  ;;  %v2638_v0 = vadd.f32 %v8011_v8, %v2637_v42  ;;  %v2643_v16 = vand.u32 2147483647, %v7975_v22 }
 0x3ac   : > { %v3250_v10 = vmul.f32 %v5876_v63, %v2602_v53  ;;  %v8043_v9 = vpop.eup %5877  ;;  %v2335_v63 = vadd.f32 %v2334_v60, %v6484_v38 }
 0x3ad   : > { %5881 = vtanh.f32 %v3187_v33  ;;  %v5880_v62 = vpop.eup %5879  ;;  %v2650_v28 = vmul.f32 %v8043_v9, %v8005_v47  ;;  %v2642_v22 = vsel %vm8083_vm6, %v8011_v8, %v2638_v0  ;;  %v6101_v33 = vld [vmem:[%s6512_s16 + $0xc0] sm:$0xff]  ;;  %vm2644_vm7 = vcmp.eq.f32.partialorder %v2643_v16, 8.507059e+37 }
 0x3ae   : > { %v8039_v45 = vadd.f32 %v3250_v10, %v3234_v41  ;;  %5883 = vrcp.f32 %v8037_v37  ;;  %v8065_v35 = vadd.f32 1.0, %v5880_v62  ;;  %v3236_v27 = vmul.f32 %v6101_v33, %v3220_v14 }
 0x3af   : > { %5885 = vpow2.f32 %v5019_v46  ;;  %v2651_v57 = vsub.f32 1.0, %v2650_v28  ;;  %v2647_v8 = vsel %vm2644_vm7, %v2646_v3, %v2642_v22  ;;  %vm2655_vm8 = vweird.f32 %v8043_v9 }
 0x3b0   : > { %5076 = vst [vmem:[%s6512_s16 + $0x130] sm:$0xff] %v8039_v45  ;;  %v5021_v21 = vmul.f32 -1.442695, %v2335_v63  ;;  %v3221_v58 = vsub.f32 1.0, %v2647_v8  ;;  %vm8110_vm10 = vmor %vm2654_vm9, %vm2655_vm8  ;;  %v2673_v14 = vand.u32 2147483647, %v8037_v37  ;;  %vm2684_vm1 = vweird.f32 %v8065_v35 }
 0x3b1   : > { %v2652_v29 = vmul.f32 %v8043_v9, %v2651_v57  ;;  %v6103_v63 = vld [vmem:[%s6512_s16 + $0xd0] sm:$0xff] }
 0x3b2   : > { %v3160_v59 = vpop.f32.mrf.mxu1  ;;  %vm2674_vm15 = vcmp.eq.f32.partialorder %v2673_v14, 8.507059e+37 }
 0x3b3   : > { %v5882_v61 = vpop.eup %5881  ;;  %v3188_v32 = vadd.f32 %v3160_v59, %v2416_v31  ;;  %v2653_v52 = vadd.f32 %v8043_v9, %v2652_v29  ;;  %v5385_v31 = vld [vmem:[#allocation8 + $0x28] sm:$0xff] }
 0x3b4   : > { %v3251_v7 = vmul.f32 %v5882_v61, %v2617_v50  ;;  %v8071_v20 = vpop.eup %5883  ;;  %v2422_v50 = vpop.f32.mrf.mxu0  ;;  %4306 = vmatpush.bf16.msrb.mxu1 %v5385_v31 }
 0x3b5   : > { %5887 = vtanh.f32 %v3188_v32  ;;  %v5886_v54 = vpop.eup %5885  ;;  %v2665_v26 = vmul.f32 %v8071_v20, %v8037_v37  ;;  %v2657_v59 = vsel %vm8110_vm10, %v8043_v9, %v2653_v52  ;;  %v6102_v32 = vld [vmem:[%s6512_s16 + $0xc8] sm:$0xff]  ;;  %vm2670_vm12 = vweird.f32 %v8071_v20 }
 0x3b6   : > { %v8067_v53 = vadd.f32 %v3251_v7, %v3235_v55  ;;  %5889 = vrcp.f32 %v8065_v35  ;;  %v8095_v10 = vadd.f32 1.0, %v5886_v54  ;;  %v3237_v1 = vmul.f32 %v6102_v32, %v3221_v58  ;;  %vm8138_vm14 = vmor %vm2669_vm13, %vm2670_vm12 }
 0x3b7   : > { %5891 = vpow2.f32 %v5020_v15  ;;  %v2666_v51 = vsub.f32 1.0, %v2665_v26  ;;  %v2662_v7 = vsel %vm2659_vm11, %v2661_v11, %v2657_v59  ;;  %v2675_v15 = vand.u32 2147483648, %v8037_v37 }
 0x3b8   : > { %5077 = vst [vmem:[%s6512_s16 + $0x138] sm:$0xff] %v8067_v53  ;;  %v3296_v34 = vpack.c.bf16 %v8067_v53, %v8039_v45  ;;  %v3222_v60 = vsub.f32 1.0, %v2662_v7  ;;  %4307 = vmatpush.bf16.msrb.mxu1 %v5384_v25  ;;  %vm2699_vm5 = vweird.f32 %v8095_v10 }
 0x3b9   : > { %v2667_v47 = vmul.f32 %v8071_v20, %v2666_v51  ;;  %v2676_v29 = vor.u32 1.1754944e-38, %v2675_v15  ;;  %v2690_v51 = vand.u32 2147483648, %v8065_v35  ;;  %v5383_v15 = vld [vmem:[#allocation8 + $0x18] sm:$0xff] }
 0x3ba   : > { %v3162_v18 = vpop.f32.mrf.mxu1  ;;  %3484 = vmatmul.bf16.gmra.mxu2 %v3296_v34  ;;  %3533 = vmatmul.bf16.gmra.mxu3 %v3296_v34  ;;  %v3238_v3 = vmul.f32 %v6103_v63, %v3222_v60 }
 0x3bb   : > { %v5888_v23 = vpop.eup %5887  ;;  %v3189_v5 = vadd.f32 %v3162_v18, %v2418_v4  ;;  %3582 = vmatmul.bf16.gmra.mxu0 %v3296_v34  ;;  %v2668_v9 = vadd.f32 %v8071_v20, %v2667_v47  ;;  %v2423_v34 = vadd.f32 %v2422_v50, %v6489_v12  ;;  %v2691_v59 = vor.u32 1.1754944e-38, %v2690_v51 }
 0x3bc   : > { %v3252_v41 = vmul.f32 %v5888_v23, %v2632_v30  ;;  %v8101_v46 = vpop.eup %5889  ;;  %v2425_v13 = vpop.f32.mrf.mxu0  ;;  %4308 = vmatpush.bf16.msrb.mxu1 %v5383_v15 }
 0x3bd   : > { %5893 = vtanh.f32 %v3189_v5  ;;  %v5892_v28 = vpop.eup %5891  ;;  %v2680_v44 = vmul.f32 %v8101_v46, %v8065_v35  ;;  %v2672_v37 = vsel %vm8138_vm14, %v8071_v20, %v2668_v9  ;;  %vm2685_vm0 = vweird.f32 %v8101_v46 }
 0x3be   : > { %v8097_v36 = vadd.f32 %v3252_v41, %v3236_v27  ;;  %5895 = vrcp.f32 %v8095_v10  ;;  %v8121_v55 = vadd.f32 1.0, %v5892_v28  ;;  %v2677_v27 = vsel %vm2674_vm15, %v2676_v29, %v2672_v37  ;;  %vm2686_vm2 = vmor %vm2684_vm1, %vm2685_vm0 }
 0x3bf   : > { %5897 = vpow2.f32 %v5021_v21  ;;  %v2681_v30 = vsub.f32 1.0, %v2680_v44  ;;  %v3223_v52 = vsub.f32 1.0, %v2677_v27  ;;  %v2688_v21 = vand.u32 2147483647, %v8065_v35 }
 0x3c0   : > { %5078 = vst [vmem:[%s6512_s16 + $0x140] sm:$0xff] %v8097_v36  ;;  %v2426_v58 = vadd.f32 %v2425_v13, %v6489_v12  ;;  %vm2714_vm9 = vweird.f32 %v8121_v55 }
 0x3c1   : > { %v2682_v22 = vmul.f32 %v8101_v46, %v2681_v30  ;;  %vm2689_vm3 = vcmp.eq.f32.partialorder %v2688_v21, 8.507059e+37  ;;  %v2703_v30 = vand.u32 2147483647, %v8095_v10 }
 0x3c2   : > { %v3165_v42 = vpop.f32.mrf.mxu1 }
 0x3c3   : > { %v5894_v61 = vpop.eup %5893  ;;  %v3190_v2 = vadd.f32 %v3165_v42, %v2421_v19  ;;  %v6104_v42 = vld [vmem:[%s6512_s16 + $0xd8] sm:$0xff]  ;;  %vm2704_vm7 = vcmp.eq.f32.partialorder %v2703_v30, 8.507059e+37  ;;  %v6107_v30 = vld [vmem:[%s6512_s16 + $0xf0] sm:$0xff] }
 0x3c4   : > { %v3253_v39 = vmul.f32 %v5894_v61, %v2647_v8  ;;  %v8127_v0 = vpop.eup %5895  ;;  %v2683_v8 = vadd.f32 %v8101_v46, %v2682_v22  ;;  %v2427_v43 = vpop.f32.mrf.mxu0  ;;  %v3239_v47 = vmul.f32 %v6104_v42, %v3223_v52 }
 0x3c5   : > { %5899 = vtanh.f32 %v3190_v2  ;;  %v5898_v17 = vpop.eup %5897  ;;  %v2695_v54 = vmul.f32 %v8127_v0, %v8095_v10  ;;  %vm2700_vm4 = vweird.f32 %v8127_v0  ;;  %v2428_v13 = vadd.f32 %v2427_v43, %v6489_v12  ;;  %v6106_v43 = vld [vmem:[%s6512_s16 + $0xe8] sm:$0xff] }
 0x3c6   : > { %v8123_v57 = vadd.f32 %v3253_v39, %v3237_v1  ;;  %5901 = vrcp.f32 %v8121_v55  ;;  %v8149_v33 = vadd.f32 1.0, %v5898_v17  ;;  %v2687_v19 = vsel %vm2686_vm2, %v8101_v46, %v2683_v8  ;;  %vm8183_vm6 = vmor %vm2699_vm5, %vm2700_vm4 }
 0x3c7   : > { %v2696_v41 = vsub.f32 1.0, %v2695_v54  ;;  %v2692_v11 = vsel %vm2689_vm3, %v2691_v59, %v2687_v19  ;;  %v2705_v39 = vand.u32 2147483648, %v8095_v10 }
 0x3c8   : > { %5079 = vst [vmem:[%s6512_s16 + $0x148] sm:$0xff] %v8123_v57  ;;  %v3297_v16 = vpack.c.bf16 %v8123_v57, %v8097_v36  ;;  %vm2729_vm13 = vweird.f32 %v8149_v33  ;;  %v2733_v42 = vand.u32 2147483647, %v8149_v33 }
 0x3c9   : > { %v2697_v28 = vmul.f32 %v8127_v0, %v2696_v41  ;;  %v2706_v17 = vor.u32 1.1754944e-38, %v2705_v39 }
 0x3ca   : > { %v3167_v26 = vpop.f32.mrf.mxu1  ;;  %3489 = vmatmul.bf16.gmra.mxu2 %v3297_v16  ;;  %3538 = vmatmul.bf16.gmra.mxu3 %v3297_v16  ;;  %vm2734_vm15 = vcmp.eq.f32.partialorder %v2733_v42, 8.507059e+37 }
 0x3cb   : > { %v5900_v18 = vpop.eup %5899  ;;  %v3191_v23 = vadd.f32 %v3167_v26, %v2423_v34  ;;  %3587 = vmatmul.bf16.gmra.mxu0 %v3297_v16  ;;  %v2698_v1 = vadd.f32 %v8127_v0, %v2697_v28  ;;  %v6105_v26 = vld [vmem:[%s6512_s16 + $0xe0] sm:$0xff]  ;;  %v5382_v28 = vld [vmem:[#allocation8 + $0x10] sm:$0xff] }
 0x3cc   : > { %v3254_v5 = vmul.f32 %v5900_v18, %v2662_v7  ;;  %v8155_v50 = vpop.eup %5901  ;;  %v3224_v7 = vsub.f32 1.0, %v2692_v11  ;;  %v2430_v37 = vpop.f32.mrf.mxu0  ;;  %4309 = vmatpush.bf16.msrb.mxu1 %v5382_v28 }
 0x3cd   : > { %5903 = vtanh.f32 %v3191_v23  ;;  %v2710_v31 = vmul.f32 %v8155_v50, %v8121_v55  ;;  %v2702_v16 = vsel %vm8183_vm6, %v8127_v0, %v2698_v1  ;;  %vm2715_vm8 = vweird.f32 %v8155_v50 }
 0x3ce   : > { %v8151_v20 = vadd.f32 %v3254_v5, %v3238_v3  ;;  %5905 = vrcp.f32 %v8149_v33  ;;  %v3240_v22 = vmul.f32 %v6105_v26, %v3224_v7  ;;  %v2707_v29 = vsel %vm2704_vm7, %v2706_v17, %v2702_v16  ;;  %vm2716_vm10 = vmor %vm2714_vm9, %vm2715_vm8  ;;  %v5381_v26 = vld [vmem:[#allocation8 + $0x8] sm:$0xff] }
 0x3cf   : > { %v2711_v2 = vsub.f32 1.0, %v2710_v31  ;;  %v2720_v3 = vand.u32 2147483648, %v8121_v55  ;;  %v3225_v5 = vsub.f32 1.0, %v2707_v29  ;;  %v2431_v41 = vadd.f32 %v2430_v37, %v6489_v12 }
 0x3d0   : > { %5080 = vst [vmem:[%s6512_s16 + $0x150] sm:$0xff] %v8151_v20  ;;  %4310 = vmatpush.bf16.msrb.mxu1 %v5381_v26 }
 0x3d1   : > { %v2712_v10 = vmul.f32 %v8155_v50, %v2711_v2  ;;  %v2721_v25 = vor.u32 1.1754944e-38, %v2720_v3  ;;  %v3241_v31 = vmul.f32 %v6106_v43, %v3225_v5  ;;  %v5380_v5 = vld [vmem:[#allocation8] sm:$0xff] }
 0x3d2   : > { %v3170_v62 = vpop.f32.mrf.mxu1 }
 0x3d3   : > { %v5904_v44 = vpop.eup %5903  ;;  %v3192_v35 = vadd.f32 %v3170_v62, %v2426_v58  ;;  %v2713_v63 = vadd.f32 %v8155_v50, %v2712_v10 }
 0x3d4   : > { %v3255_v61 = vmul.f32 %v5904_v44, %v2677_v27  ;;  %v8173_v46 = vpop.eup %5905  ;;  %v2718_v27 = vand.u32 2147483647, %v8121_v55  ;;  %v2432_v55 = vpop.f32.mrf.mxu0  ;;  %4311 = vmatpush.bf16.msrb.mxu1 %v5380_v5 }
 0x3d5   : > { %5907 = vtanh.f32 %v3192_v35  ;;  %v2725_v14 = vmul.f32 %v8173_v46, %v8149_v33  ;;  %v2717_v8 = vsel %vm2716_vm10, %v8155_v50, %v2713_v63  ;;  %vm2730_vm12 = vweird.f32 %v8173_v46 }
 0x3d6   : > { %v8169_v32 = vadd.f32 %v3255_v61, %v3239_v47  ;;  %vm2719_vm11 = vcmp.eq.f32.partialorder %v2718_v27, 8.507059e+37  ;;  %v2735_v50 = vand.u32 2147483648, %v8149_v33  ;;  %v2433_v61 = vadd.f32 %v2432_v55, %v6489_v12  ;;  %vm2731_vm14 = vmor %vm2729_vm13, %vm2730_vm12 }
 0x3d7   : > { %v2726_v23 = vsub.f32 1.0, %v2725_v14  ;;  %v2722_v62 = vsel %vm2719_vm11, %v2721_v25, %v2717_v8  ;;  %v6108_v14 = vld [vmem:[%s6512_s16 + $0xf8] sm:$0xff] }
 0x3d8   : > { %5081 = vst [vmem:[%s6512_s16 + $0x158] sm:$0xff] %v8169_v32  ;;  %v3298_v9 = vpack.c.bf16 %v8169_v32, %v8151_v20  ;;  %v3226_v35 = vsub.f32 1.0, %v2722_v62  ;;  %v2736_v39 = vor.u32 1.1754944e-38, %v2735_v50 }
 0x3d9   : > { %v2727_v52 = vmul.f32 %v8173_v46, %v2726_v23 }
 0x3da   : > { %v3172_v34 = vpop.f32.mrf.mxu1  ;;  %3494 = vmatmul.bf16.gmra.mxu2 %v3298_v9  ;;  %3543 = vmatmul.bf16.gmra.mxu3 %v3298_v9  ;;  %v3242_v33 = vmul.f32 %v6107_v30, %v3226_v35 }
 0x3db   : > { %v5908_v4 = vpop.eup %5907  ;;  %v3193_v54 = vadd.f32 %v3172_v34, %v2428_v13  ;;  %3592 = vmatmul.bf16.gmra.mxu0 %v3298_v9  ;;  %v2728_v59 = vadd.f32 %v8173_v46, %v2727_v52 }
 0x3dc   : > { %v3256_v18 = vmul.f32 %v5908_v4, %v2692_v11 }
 0x3dd   : > { %5909 = vtanh.f32 %v3193_v54  ;;  %v2732_v11 = vsel %vm2731_vm14, %v8173_v46, %v2728_v59 }
 0x3de   : > { %v8194_v0 = vadd.f32 %v3256_v18, %v3240_v22  ;;  %v2737_v15 = vsel %vm2734_vm15, %v2736_v39, %v2732_v11 }
 0x3df   : > { %v3227_v46 = vsub.f32 1.0, %v2737_v15 }
 0x3e0   : > { %5082 = vst [vmem:[%s6512_s16 + $0x160] sm:$0xff] %v8194_v0 }
 0x3e1   : > { %v3243_v16 = vmul.f32 %v6108_v14, %v3227_v46 }
 0x3e2   : > { %v3175_v51 = vpop.f32.mrf.mxu1 }
 0x3e3   : > { %v5910_v21 = vpop.eup %5909  ;;  %v3194_v58 = vadd.f32 %v3175_v51, %v2431_v41 }
 0x3e4   : > { %v3257_v19 = vmul.f32 %v5910_v21, %v2707_v29 }
 0x3e5   : > { %5911 = vtanh.f32 %v3194_v58 }
 0x3e6   : > { %v8207_v44 = vadd.f32 %v3257_v19, %v3241_v31 }
 0x3e8   : > { %5083 = vst [vmem:[%s6512_s16 + $0x168] sm:$0xff] %v8207_v44  ;;  %v3299_v47 = vpack.c.bf16 %v8207_v44, %v8194_v0 }
 0x3ea   : > { %v3177_v2 = vpop.f32.mrf.mxu1  ;;  %3499 = vmatmul.bf16.gmra.mxu2 %v3299_v47  ;;  %3548 = vmatmul.bf16.gmra.mxu3 %v3299_v47 }
 0x3eb   : > { %v5912_v1 = vpop.eup %5911  ;;  %v3195_v7 = vadd.f32 %v3177_v2, %v2433_v61  ;;  %3597 = vmatmul.bf16.gmra.mxu0 %v3299_v47 }
 0x3ec   : > { %v3258_v9 = vmul.f32 %v5912_v1, %v2722_v62 }
 0x3ed   : > { %5913 = vtanh.f32 %v3195_v7 }
 0x3ee   : > { %v8221_v13 = vadd.f32 %v3258_v9, %v3242_v33 }
 0x3f0   : > { %5084 = vst [vmem:[%s6512_s16 + $0x170] sm:$0xff] %v8221_v13 }
 0x3f3   : > { %v5914_v60 = vpop.eup %5913 }
 0x3f4   : > { %v3259_v34 = vmul.f32 %v5914_v60, %v2737_v15 }
 0x3f6   : > { %v8226_v10 = vadd.f32 %v3259_v34, %v3243_v16 }
 0x3f8   : > { %5085 = vst [vmem:[%s6512_s16 + $0x178] sm:$0xff] %v8226_v10  ;;  %v3300_v4 = vpack.c.bf16 %v8226_v10, %v8221_v13 }
 0x3fa   : > { %3504 = vmatmul.bf16.gmra.mxu2 %v3300_v4  ;;  %3553 = vmatmul.bf16.gmra.mxu3 %v3300_v4 }
 0x3fb   : > { %3602 = vmatmul.bf16.gmra.mxu0 %v3300_v4 }
 0x40d   : > { %v3519_v17 = vpop.f32.mrf.mxu3 }
 0x40e   : > { %v3520_v54 = vadd.f32 %v3519_v17, %v6863_v48  ;;  %v8241_v17 = vld [vmem:[%s6512_s16 + $0x100] sm:$0xff] }
 0x410   : > { %v5198_v37 = vmul.f32 -1.442695, %v3520_v54 }
 0x412   : > { %5915 = vpow2.f32 %v5198_v37 }
 0x415   : > { %v3521_v22 = vpop.f32.mrf.mxu3 }
 0x416   : > { %v3522_v18 = vadd.f32 %v3521_v22, %v6863_v48 }
 0x418   : > { %v5916_v29 = vpop.eup %5915  ;;  %v5199_v23 = vmul.f32 -1.442695, %v3522_v18 }
 0x419   : > { %v3960_v63 = vadd.f32 1.0, %v5916_v29 }
 0x41b   : > { %5917 = vrcp.f32 %v3960_v63  ;;  %v3987_v50 = vand.u32 2147483648, %v3960_v63  ;;  %v3985_v35 = vand.u32 2147483647, %v3960_v63  ;;  %vm3981_vm1 = vweird.f32 %v3960_v63 }
 0x41c   : > { %5919 = vpow2.f32 %v5199_v23 }
 0x41d   : > { %v3524_v3 = vpop.f32.mrf.mxu3  ;;  %v3988_v39 = vor.u32 1.1754944e-38, %v3987_v50  ;;  %vm3986_vm4 = vcmp.eq.f32.partialorder %v3985_v35, 8.507059e+37 }
 0x41e   : > { %v3525_v41 = vadd.f32 %v3524_v3, %v6863_v48 }
 0x420   : > { %v5200_v21 = vmul.f32 -1.442695, %v3525_v41 }
 0x421   : > { %v5918_v27 = vpop.eup %5917 }
 0x422   : > { %v5920_v8 = vpop.eup %5919  ;;  %v3977_v51 = vmul.f32 %v5918_v27, %v3960_v63  ;;  %vm3982_vm0 = vweird.f32 %v5918_v27 }
 0x423   : > { %v3961_v52 = vadd.f32 1.0, %v5920_v8  ;;  %vm3983_vm2 = vmor %vm3981_vm1, %vm3982_vm0 }
 0x424   : > { %v3978_v25 = vsub.f32 1.0, %v3977_v51 }
 0x425   : > { %5921 = vrcp.f32 %v3961_v52  ;;  %v3526_v58 = vpop.f32.mrf.mxu3  ;;  %v4002_v61 = vand.u32 2147483648, %v3961_v52  ;;  %v4000_v2 = vand.u32 2147483647, %v3961_v52  ;;  %vm3996_vm5 = vweird.f32 %v3961_v52 }
 0x426   : > { %5923 = vpow2.f32 %v5200_v21  ;;  %v3979_v43 = vmul.f32 %v5918_v27, %v3978_v25  ;;  %v3527_v31 = vadd.f32 %v3526_v58, %v6863_v48 }
 0x427   : > { %v4003_v9 = vor.u32 1.1754944e-38, %v4002_v61  ;;  %vm4001_vm7 = vcmp.eq.f32.partialorder %v4000_v2, 8.507059e+37 }
 0x428   : > { %v5201_v62 = vmul.f32 -1.442695, %v3527_v31  ;;  %v3980_v59 = vadd.f32 %v5918_v27, %v3979_v43 }
 0x42a   : > { %5925 = vpow2.f32 %v5201_v62  ;;  %v3984_v30 = vsel %vm3983_vm2, %v5918_v27, %v3980_v59 }
 0x42b   : > { %v5922_v19 = vpop.eup %5921  ;;  %v3989_v15 = vsel %vm3986_vm4, %v3988_v39, %v3984_v30 }
 0x42c   : > { %v3992_v28 = vmul.f32 %v5922_v19, %v3961_v52  ;;  %v5924_v55 = vpop.eup %5923  ;;  %vm3997_vm3 = vweird.f32 %v5922_v19  ;;  %v4216_v54 = vmul.f32 %v8241_v17, %v3989_v15 }
 0x42d   : > { %v8236_v47 = vadd.f32 1.0, %v5924_v55  ;;  %v3529_v1 = vpop.f32.mrf.mxu3  ;;  %vm3998_vm6 = vmor %vm3996_vm5, %vm3997_vm3 }
 0x42e   : > { %v3993_v42 = vsub.f32 1.0, %v3992_v28  ;;  %v3530_v7 = vadd.f32 %v3529_v1, %v6863_v48 }
 0x42f   : > { %5927 = vrcp.f32 %v8236_v47  ;;  %vm4011_vm9 = vweird.f32 %v8236_v47  ;;  %v4017_v43 = vand.u32 2147483648, %v8236_v47  ;;  %v4015_v62 = vand.u32 2147483647, %v8236_v47 }
 0x430   : > { %v3994_v11 = vmul.f32 %v5922_v19, %v3993_v42  ;;  %v5926_v46 = vpop.eup %5925  ;;  %v5202_v60 = vmul.f32 -1.442695, %v3530_v7 }
 0x431   : > { %v3963_v16 = vadd.f32 1.0, %v5926_v46  ;;  %v4018_v61 = vor.u32 1.1754944e-38, %v4017_v43  ;;  %vm4016_vm14 = vcmp.eq.f32.partialorder %v4015_v62, 8.507059e+37 }
 0x432   : > { %v3995_v33 = vadd.f32 %v5922_v19, %v3994_v11 }
 0x433   : > { %5929 = vrcp.f32 %v3963_v16  ;;  %vm4026_vm11 = vweird.f32 %v3963_v16  ;;  %v4030_v35 = vand.u32 2147483647, %v3963_v16  ;;  %v4032_v11 = vand.u32 2147483648, %v3963_v16 }
 0x434   : > { %v3999_v14 = vsel %vm3998_vm6, %v5922_v19, %v3995_v33  ;;  %5931 = vpow2.f32 %v5202_v60 }
 0x435   : > { %v4004_v34 = vsel %vm4001_vm7, %v4003_v9, %v3999_v14  ;;  %v5928_v4 = vpop.eup %5927  ;;  %v3531_v26 = vpop.f32.mrf.mxu3  ;;  %v4033_v7 = vor.u32 1.1754944e-38, %v4032_v11  ;;  %vm4031_vm15 = vcmp.eq.f32.partialorder %v4030_v35, 8.507059e+37 }
 0x436   : > { %v4217_v37 = vmul.f32 %v4004_v34, %v7878_v6  ;;  %v4007_v18 = vmul.f32 %v5928_v4, %v8236_v47  ;;  %v3532_v29 = vadd.f32 %v3531_v26, %v6863_v48  ;;  %vm4012_vm8 = vweird.f32 %v5928_v4 }
 0x437   : > { %vm8253_vm10 = vmor %vm4011_vm9, %vm4012_vm8 }
 0x438   : > { %v4232_v22 = vpack.c.bf16 %v4217_v37, %v4216_v54  ;;  %v5203_v23 = vmul.f32 -1.442695, %v3532_v29  ;;  %v4008_v3 = vsub.f32 1.0, %v4007_v18 }
 0x439   : > { %v5930_v63 = vpop.eup %5929 }
 0x43a   : > { %4312 = vmatmul.bf16.vlgmr.msrb.gmra.mxu1 %v4232_v22  ;;  %v5932_v5 = vpop.eup %5931  ;;  %v4022_v27 = vmul.f32 %v5930_v63, %v3963_v16  ;;  %5933 = vpow2.f32 %v5203_v23  ;;  %v4009_v52 = vmul.f32 %v5928_v4, %v4008_v3  ;;  %vm4027_vm12 = vweird.f32 %v5930_v63 }
 0x43b   : > { %v8247_v41 = vadd.f32 1.0, %v5932_v5  ;;  %vm4028_vm13 = vmor %vm4026_vm11, %vm4027_vm12 }
 0x43c   : > { %v4023_v8 = vsub.f32 1.0, %v4022_v27  ;;  %v4010_v25 = vadd.f32 %v5928_v4, %v4009_v52 }
 0x43d   : > { %v3534_v51 = vpop.f32.mrf.mxu3  ;;  %5935 = vrcp.f32 %v8247_v41  ;;  %vm4041_vm1 = vweird.f32 %v8247_v41 }
 0x43e   : > { %v3535_v6 = vadd.f32 %v3534_v51, %v6863_v48  ;;  %v4024_v58 = vmul.f32 %v5930_v63, %v4023_v8  ;;  %v4014_v59 = vsel %vm8253_vm10, %v5928_v4, %v4010_v25 }
 0x43f   : > { %v4019_v39 = vsel %vm4016_vm14, %v4018_v61, %v4014_v59 }
 0x440   : > { %v5204_v21 = vmul.f32 -1.442695, %v3535_v6  ;;  %v5934_v31 = vpop.eup %5933  ;;  %v4025_v28 = vadd.f32 %v5930_v63, %v4024_v58  ;;  %v4218_v46 = vmul.f32 %v4019_v39, %v7917_v40 }
 0x441   : > { %v8258_v55 = vadd.f32 1.0, %v5934_v31 }
 0x442   : > { %5937 = vpow2.f32 %v5204_v21  ;;  %v4029_v1 = vsel %vm4028_vm13, %v5930_v63, %v4025_v28  ;;  %v4045_v63 = vand.u32 2147483647, %v8247_v41 }
 0x443   : > { %v5936_v50 = vpop.eup %5935  ;;  %5939 = vrcp.f32 %v8258_v55  ;;  %v4034_v33 = vsel %vm4031_vm15, %v4033_v7, %v4029_v1  ;;  %vm4056_vm3 = vweird.f32 %v8258_v55  ;;  %v4060_v52 = vand.u32 2147483647, %v8258_v55 }
 0x444   : > { %v4037_v2 = vmul.f32 %v5936_v50, %v8247_v41  ;;  %v4219_v60 = vmul.f32 %v4034_v33, %v7947_v24  ;;  %vm4042_vm0 = vweird.f32 %v5936_v50  ;;  %v4047_v24 = vand.u32 2147483648, %v8247_v41 }
 0x445   : > { %v3536_v42 = vpop.f32.mrf.mxu3  ;;  %vm8279_vm2 = vmor %vm4041_vm1, %vm4042_vm0  ;;  %v4062_v21 = vand.u32 2147483648, %v8258_v55  ;;  %vm4046_vm6 = vcmp.eq.f32.partialorder %v4045_v63, 8.507059e+37  ;;  %vm4061_vm7 = vcmp.eq.f32.partialorder %v4060_v52, 8.507059e+37 }
 0x446   : > { %v3537_v47 = vadd.f32 %v3536_v42, %v6863_v48  ;;  %v4038_v15 = vsub.f32 1.0, %v4037_v2  ;;  %v4233_v4 = vpack.c.bf16 %v4219_v60, %v4218_v46  ;;  %v4048_v41 = vor.u32 1.1754944e-38, %v4047_v24 }
 0x447   : > { %v4063_v19 = vor.u32 1.1754944e-38, %v4062_v21 }
 0x448   : > { %v5205_v30 = vmul.f32 -1.442695, %v3537_v47  ;;  %v5938_v9 = vpop.eup %5937  ;;  %v4039_v22 = vmul.f32 %v5936_v50, %v4038_v15 }
 0x449   : > { %v5940_v14 = vpop.eup %5939  ;;  %v8267_v34 = vadd.f32 1.0, %v5938_v9 }
 0x44a   : > { %v4052_v16 = vmul.f32 %v5940_v14, %v8258_v55  ;;  %5941 = vpow2.f32 %v5205_v30  ;;  %4317 = vmatmul.bf16.gmra.mxu1 %v4233_v4  ;;  %v4040_v29 = vadd.f32 %v5936_v50, %v4039_v22  ;;  %vm4057_vm4 = vweird.f32 %v5940_v14 }
 0x44b   : > { %5943 = vrcp.f32 %v8267_v34  ;;  %vm4058_vm5 = vmor %vm4056_vm3, %vm4057_vm4  ;;  %v4077_v33 = vand.u32 2147483648, %v8267_v34  ;;  %vm4071_vm9 = vweird.f32 %v8267_v34  ;;  %v4075_v15 = vand.u32 2147483647, %v8267_v34 }
 0x44c   : > { %v4053_v37 = vsub.f32 1.0, %v4052_v16  ;;  %v4044_v51 = vsel %vm8279_vm2, %v5936_v50, %v4040_v29 }
 0x44d   : > { %v3539_v54 = vpop.f32.mrf.mxu3  ;;  %v4049_v31 = vsel %vm4046_vm6, %v4048_v41, %v4044_v51  ;;  %vm4076_vm14 = vcmp.eq.f32.partialorder %v4075_v15, 8.507059e+37  ;;  %v8327_v41 = vpop.f32.mrf.mxu2 }
 0x44e   : > { %v3540_v26 = vadd.f32 %v3539_v54, %v6863_v48  ;;  %v4054_v40 = vmul.f32 %v5940_v14, %v4053_v37  ;;  %v4220_v35 = vmul.f32 %v4049_v31, %v7977_v49  ;;  %v4078_v54 = vor.u32 1.1754944e-38, %v4077_v33 }
 0x450   : > { %v5206_v18 = vmul.f32 -1.442695, %v3540_v26  ;;  %v5942_v23 = vpop.eup %5941  ;;  %v4055_v3 = vadd.f32 %v5940_v14, %v4054_v40 }
 0x451   : > { %v8275_v5 = vpop.eup %5943  ;;  %v8277_v27 = vadd.f32 1.0, %v5942_v23 }
 0x452   : > { %5945 = vpow2.f32 %v5206_v18  ;;  %v4067_v25 = vmul.f32 %v8275_v5, %v8267_v34  ;;  %v4059_v43 = vsel %vm4058_vm5, %v5940_v14, %v4055_v3  ;;  %vm4072_vm8 = vweird.f32 %v8275_v5 }
 0x453   : > { %5947 = vrcp.f32 %v8277_v27  ;;  %v4064_v28 = vsel %vm4061_vm7, %v4063_v19, %v4059_v43  ;;  %vm8309_vm10 = vmor %vm4071_vm9, %vm4072_vm8  ;;  %vm4086_vm11 = vweird.f32 %v8277_v27  ;;  %v4090_v37 = vand.u32 2147483647, %v8277_v27 }
 0x454   : > { %v4068_v50 = vsub.f32 1.0, %v4067_v25  ;;  %v4221_v42 = vmul.f32 %v4064_v28, %v8007_v56  ;;  %v4092_v26 = vand.u32 2147483648, %v8277_v27 }
 0x455   : > { %v3541_v6 = vpop.f32.mrf.mxu3  ;;  %vm4091_vm15 = vcmp.eq.f32.partialorder %v4090_v37, 8.507059e+37 }
 0x456   : > { %v3542_v58 = vadd.f32 %v3541_v6, %v6863_v48  ;;  %v4234_v2 = vpack.c.bf16 %v4221_v42, %v4220_v35  ;;  %v4069_v7 = vmul.f32 %v8275_v5, %v4068_v50  ;;  %v4093_v24 = vor.u32 1.1754944e-38, %v4092_v26 }
 0x458   : > { %v5207_v62 = vmul.f32 -1.442695, %v3542_v58  ;;  %v5946_v59 = vpop.eup %5945  ;;  %v4070_v49 = vadd.f32 %v8275_v5, %v4069_v7 }
 0x459   : > { %v5948_v61 = vpop.eup %5947  ;;  %v8294_v55 = vadd.f32 1.0, %v5946_v59 }
 0x45a   : > { %v4082_v11 = vmul.f32 %v5948_v61, %v8277_v27  ;;  %5949 = vpow2.f32 %v5207_v62  ;;  %4322 = vmatmul.bf16.gmra.mxu1 %v4234_v2  ;;  %v4074_v4 = vsel %vm8309_vm10, %v8275_v5, %v4070_v49  ;;  %vm4087_vm12 = vweird.f32 %v5948_v61 }
 0x45b   : > { %5951 = vrcp.f32 %v8294_v55  ;;  %vm4088_vm13 = vmor %vm4086_vm11, %vm4087_vm12  ;;  %v4079_v40 = vsel %vm4076_vm14, %v4078_v54, %v4074_v4  ;;  %v4107_v62 = vand.u32 2147483648, %v8294_v55  ;;  %vm4101_vm1 = vweird.f32 %v8294_v55 }
 0x45c   : > { %v4083_v1 = vsub.f32 1.0, %v4082_v11  ;;  %v4222_v8 = vmul.f32 %v4079_v40, %v8039_v45  ;;  %v4105_v59 = vand.u32 2147483647, %v8294_v55 }
 0x45d   : > { %v3544_v47 = vpop.f32.mrf.mxu3  ;;  %v4108_v2 = vor.u32 1.1754944e-38, %v4107_v62 }
 0x45e   : > { %v3545_v39 = vadd.f32 %v3544_v47, %v6863_v48  ;;  %v4084_v56 = vmul.f32 %v5948_v61, %v4083_v1  ;;  %vm4106_vm6 = vcmp.eq.f32.partialorder %v4105_v59, 8.507059e+37 }
 0x460   : > { %v5208_v30 = vmul.f32 -1.442695, %v3545_v39  ;;  %v5950_v9 = vpop.eup %5949  ;;  %v4085_v46 = vadd.f32 %v5948_v61, %v4084_v56  ;;  %v8353_v39 = vpop.f32.mrf.mxu2 }
 0x461   : > { %v8305_v60 = vpop.eup %5951  ;;  %v8307_v14 = vadd.f32 1.0, %v5950_v9 }
 0x462   : > { %5953 = vpow2.f32 %v5208_v30  ;;  %v4097_v22 = vmul.f32 %v8305_v60, %v8294_v55  ;;  %v4089_v29 = vsel %vm4088_vm13, %v5948_v61, %v4085_v46  ;;  %vm4102_vm0 = vweird.f32 %v8305_v60 }
 0x463   : > { %5955 = vrcp.f32 %v8307_v14  ;;  %v4094_v63 = vsel %vm4091_vm15, %v4093_v24, %v4089_v29  ;;  %vm8342_vm2 = vmor %vm4101_vm1, %vm4102_vm0  ;;  %vm4116_vm3 = vweird.f32 %v8307_v14  ;;  %v4120_v47 = vand.u32 2147483647, %v8307_v14 }
 0x464   : > { %v4098_v5 = vsub.f32 1.0, %v4097_v22  ;;  %v4223_v51 = vmul.f32 %v4094_v63, %v8067_v53  ;;  %v4122_v1 = vand.u32 2147483648, %v8307_v14 }
 0x465   : > { %v3546_v34 = vpop.f32.mrf.mxu3  ;;  %vm4121_vm7 = vcmp.eq.f32.partialorder %v4120_v47, 8.507059e+37 }
 0x466   : > { %v3547_v18 = vadd.f32 %v3546_v34, %v6863_v48  ;;  %v4235_v21 = vpack.c.bf16 %v4223_v51, %v4222_v8  ;;  %v4099_v45 = vmul.f32 %v8305_v60, %v4098_v5  ;;  %v4123_v33 = vor.u32 1.1754944e-38, %v4122_v1 }
 0x468   : > { %v5209_v23 = vmul.f32 -1.442695, %v3547_v18  ;;  %v5954_v3 = vpop.eup %5953  ;;  %v4100_v53 = vadd.f32 %v8305_v60, %v4099_v45 }
 0x469   : > { %v5956_v6 = vpop.eup %5955  ;;  %v8325_v27 = vadd.f32 1.0, %v5954_v3  ;;  %v8426_v3 = vpop.f32.mrf.mxu0 }
 0x46a   : > { %v4112_v52 = vmul.f32 %v5956_v6, %v8307_v14  ;;  %5957 = vpow2.f32 %v5209_v23  ;;  %4327 = vmatmul.bf16.gmra.mxu1 %v4235_v21  ;;  %v4104_v11 = vsel %vm8342_vm2, %v8305_v60, %v4100_v53  ;;  %vm4117_vm4 = vweird.f32 %v5956_v6 }
 0x46b   : > { %5959 = vrcp.f32 %v8325_v27  ;;  %vm4118_vm5 = vmor %vm4116_vm3, %vm4117_vm4  ;;  %v4109_v56 = vsel %vm4106_vm6, %v4108_v2, %v4104_v11  ;;  %vm4131_vm9 = vweird.f32 %v8325_v27  ;;  %v4137_v23 = vand.u32 2147483648, %v8325_v27 }
 0x46c   : > { %v4113_v58 = vsub.f32 1.0, %v4112_v52  ;;  %v4224_v16 = vmul.f32 %v4109_v56, %v8097_v36  ;;  %v8367_v36 = vpop.f32.mrf.mxu2  ;;  %v4135_v5 = vand.u32 2147483647, %v8325_v27 }
 0x46d   : > { %v3549_v25 = vpop.f32.mrf.mxu3 }
 0x46e   : > { %v3550_v43 = vadd.f32 %v3549_v25, %v6863_v48  ;;  %v4114_v19 = vmul.f32 %v5956_v6, %v4113_v58  ;;  %v4138_v58 = vor.u32 1.1754944e-38, %v4137_v23  ;;  %vm4136_vm14 = vcmp.eq.f32.partialorder %v4135_v5, 8.507059e+37 }
 0x470   : > { %v5210_v31 = vmul.f32 -1.442695, %v3550_v43  ;;  %v5958_v28 = vpop.eup %5957  ;;  %v4115_v50 = vadd.f32 %v5956_v6, %v4114_v19 }
 0x471   : > { %v8338_v35 = vpop.eup %5959  ;;  %v8340_v42 = vadd.f32 1.0, %v5958_v28 }
 0x472   : > { %5961 = vpow2.f32 %v5210_v31  ;;  %v4127_v7 = vmul.f32 %v8338_v35, %v8325_v27  ;;  %v4119_v49 = vsel %vm4118_vm5, %v5956_v6, %v4115_v50  ;;  %vm4132_vm8 = vweird.f32 %v8338_v35 }
 0x473   : > { %5963 = vrcp.f32 %v8340_v42  ;;  %v4124_v15 = vsel %vm4121_vm7, %v4123_v33, %v4119_v49  ;;  %vm8372_vm10 = vmor %vm4131_vm9, %vm4132_vm8  ;;  %v3471_v6 = vadd.f32 %v8327_v41, %v6484_v38  ;;  %vm4146_vm11 = vweird.f32 %v8340_v42 }
 0x474   : > { %v4128_v60 = vsub.f32 1.0, %v4127_v7  ;;  %v4225_v14 = vmul.f32 %v4124_v15, %v8123_v57  ;;  %v4150_v41 = vand.u32 2147483647, %v8340_v42  ;;  %v4152_v43 = vand.u32 2147483648, %v8340_v42  ;;  %v8393_v61 = vpop.f32.mrf.mxu2 }
 0x475   : > { %v3551_v55 = vpop.f32.mrf.mxu3  ;;  %v5182_v19 = vmul.f32 -1.442695, %v3471_v6  ;;  %v3473_v7 = vadd.f32 %v8353_v39, %v6484_v38 }
 0x476   : > { %v3552_v30 = vadd.f32 %v3551_v55, %v6863_v48  ;;  %v4236_v37 = vpack.c.bf16 %v4225_v14, %v4224_v16  ;;  %v4129_v29 = vmul.f32 %v8338_v35, %v4128_v60  ;;  %v4153_v28 = vor.u32 1.1754944e-38, %v4152_v43 }
 0x477   : > { %vm4151_vm15 = vcmp.eq.f32.partialorder %v4150_v41, 8.507059e+37  ;;  %v5183_v60 = vmul.f32 -1.442695, %v3473_v7 }
 0x478   : > { %v5211_v9 = vmul.f32 -1.442695, %v3552_v30  ;;  %v5962_v46 = vpop.eup %5961  ;;  %v4130_v40 = vadd.f32 %v8338_v35, %v4129_v29 }
 0x479   : > { %v5964_v4 = vpop.eup %5963  ;;  %v8360_v34 = vadd.f32 1.0, %v5962_v46 }
 0x47a   : > { %v4142_v54 = vmul.f32 %v5964_v4, %v8340_v42  ;;  %5965 = vpow2.f32 %v5211_v9  ;;  %4332 = vmatmul.bf16.gmra.mxu1 %v4236_v37  ;;  %v4134_v21 = vsel %vm8372_vm10, %v8338_v35, %v4130_v40  ;;  %vm4147_vm12 = vweird.f32 %v5964_v4 }
 0x47b   : > { %5967 = vrcp.f32 %v8360_v34  ;;  %vm4148_vm13 = vmor %vm4146_vm11, %vm4147_vm12  ;;  %v4139_v62 = vsel %vm4136_vm14, %v4138_v58, %v4134_v21  ;;  %vm4161_vm1 = vweird.f32 %v8360_v34  ;;  %v4165_v56 = vand.u32 2147483647, %v8360_v34 }
 0x47c   : > { %v4143_v22 = vsub.f32 1.0, %v4142_v54  ;;  %v4226_v11 = vmul.f32 %v4139_v62, %v8151_v20  ;;  %v3476_v21 = vadd.f32 %v8367_v36, %v6484_v38 }
 0x47d   : > { %v3554_v26 = vpop.f32.mrf.mxu3  ;;  %vm4166_vm6 = vcmp.eq.f32.partialorder %v4165_v56, 8.507059e+37 }
 0x47e   : > { %v3555_v18 = vadd.f32 %v3554_v26, %v6863_v48  ;;  %v4144_v24 = vmul.f32 %v5964_v4, %v4143_v22  ;;  %v8419_v26 = vpop.f32.mrf.mxu2  ;;  %v5184_v36 = vmul.f32 -1.442695, %v3476_v21 }
 0x480   : > { %v5212_v57 = vmul.f32 -1.442695, %v3555_v18  ;;  %v5966_v63 = vpop.eup %5965  ;;  %v4145_v8 = vadd.f32 %v5964_v4, %v4144_v24 }
 0x481   : > { %v8377_v51 = vpop.eup %5967  ;;  %v8381_v52 = vadd.f32 1.0, %v5966_v63 }
 0x482   : > { %v4157_v25 = vmul.f32 %v8377_v51, %v8360_v34  ;;  %5969 = vpow2.f32 %v5212_v57  ;;  %v4149_v53 = vsel %vm4148_vm13, %v5964_v4, %v4145_v8  ;;  %vm4162_vm0 = vweird.f32 %v8377_v51 }
 0x483   : > { %5971 = vrcp.f32 %v8381_v52  ;;  %v4154_v50 = vsel %vm4151_vm15, %v4153_v28, %v4149_v53  ;;  %v4182_v49 = vand.u32 2147483648, %v8381_v52  ;;  %v4180_v9 = vand.u32 2147483647, %v8381_v52  ;;  %vm8411_vm3 = vmor %vm4161_vm1, %vm4162_vm0 }
 0x484   : > { %v4158_v45 = vsub.f32 1.0, %v4157_v25  ;;  %v4227_v55 = vmul.f32 %v4154_v50, %v8169_v32  ;;  %5973 = vpow2.f32 %v5182_v19  ;;  %v4167_v32 = vand.u32 2147483648, %v8360_v34 }
 0x485   : > { %v3556_v27 = vpop.f32.mrf.mxu3  ;;  %vm4176_vm4 = vweird.f32 %v8381_v52  ;;  %v4183_v37 = vor.u32 1.1754944e-38, %v4182_v49  ;;  %vm4181_vm7 = vcmp.eq.f32.partialorder %v4180_v9, 8.507059e+37 }
 0x486   : > { %v3557_v31 = vadd.f32 %v3556_v27, %v6863_v48  ;;  %v4159_v42 = vmul.f32 %v8377_v51, %v4158_v45  ;;  %v4237_v1 = vpack.c.bf16 %v4227_v55, %v4226_v11  ;;  %v4168_v54 = vor.u32 1.1754944e-38, %v4167_v32  ;;  %v8431_v25 = vpop.f32.mrf.mxu2 }
 0x488   : > { %v5213_v59 = vmul.f32 -1.442695, %v3557_v31  ;;  %v5970_v35 = vpop.eup %5969  ;;  %v4160_v20 = vadd.f32 %v8377_v51, %v4159_v42  ;;  %v3478_v42 = vadd.f32 %v8393_v61, %v6484_v38  ;;  %v3481_v61 = vadd.f32 %v8419_v26, %v6484_v38 }
 0x489   : > { %v5972_v2 = vpop.eup %5971  ;;  %v8398_v48 = vadd.f32 1.0, %v5970_v35 }
 0x48a   : > { %v4172_v47 = vmul.f32 %v5972_v2, %v8381_v52  ;;  %5975 = vpow2.f32 %v5213_v59  ;;  %4337 = vmatmul.bf16.gmra.mxu1 %v4237_v1  ;;  %vm4177_vm2 = vweird.f32 %v5972_v2  ;;  %v5974_v15 = vpop.eup %5973  ;;  %v4164_v16 = vsel %vm8411_vm3, %v8377_v51, %v4160_v20  ;;  %v3570_v59 = vpop.f32.mrf.mxu0 }
 0x48b   : > { %5977 = vrcp.f32 %v8398_v48  ;;  %vm4178_vm5 = vmor %vm4176_vm4, %vm4177_vm2  ;;  %v4169_v29 = vsel %vm4166_vm6, %v4168_v54, %v4164_v16  ;;  %v8423_v23 = vadd.f32 1.0, %v5974_v15  ;;  %vm4191_vm9 = vweird.f32 %v8398_v48 }
 0x48c   : > { %v4173_v30 = vsub.f32 1.0, %v4172_v47  ;;  %v4228_v63 = vmul.f32 %v4169_v29, %v8194_v0  ;;  %v4197_v0 = vand.u32 2147483648, %v8398_v48  ;;  %v4195_v43 = vand.u32 2147483647, %v8398_v48 }
 0x48d   : > { %v5185_v32 = vmul.f32 -1.442695, %v3478_v42  ;;  %vm3677_vm1 = vweird.f32 %v8423_v23 }
 0x48e   : > { %v4174_v33 = vmul.f32 %v5972_v2, %v4173_v30  ;;  %v4198_v50 = vor.u32 1.1754944e-38, %v4197_v0  ;;  %vm4196_vm14 = vcmp.eq.f32.partialorder %v4195_v43, 8.507059e+37  ;;  %v3485_v7 = vpop.f32.mrf.mxu2 }
 0x490   : > { %v5976_v46 = vpop.eup %5975  ;;  %v4175_v14 = vadd.f32 %v5972_v2, %v4174_v33 }
 0x491   : > { %v5978_v4 = vpop.eup %5977  ;;  %v3975_v34 = vadd.f32 1.0, %v5976_v46  ;;  %v5186_v46 = vmul.f32 -1.442695, %v3481_v61 }
 0x492   : > { %v4187_v22 = vmul.f32 %v5978_v4, %v8398_v48  ;;  %v4179_v18 = vsel %vm4178_vm5, %v5972_v2, %v4175_v14  ;;  %vm4192_vm8 = vweird.f32 %v5978_v4  ;;  %v8454_v15 = vpop.f32.mrf.mxu0  ;;  %v3681_v14 = vand.u32 2147483647, %v8423_v23 }
 0x493   : > { %5979 = vrcp.f32 %v3975_v34  ;;  %v4184_v57 = vsel %vm4181_vm7, %v4183_v37, %v4179_v18  ;;  %v4212_v41 = vand.u32 2147483648, %v3975_v34  ;;  %v4210_v31 = vand.u32 2147483647, %v3975_v34  ;;  %vm8438_vm11 = vmor %vm4191_vm9, %vm4192_vm8 }
 0x494   : > { %5981 = vpow2.f32 %v5183_v60  ;;  %v4188_v40 = vsub.f32 1.0, %v4187_v22  ;;  %v4229_v24 = vmul.f32 %v4184_v57, %v8207_v44  ;;  %vm4206_vm12 = vweird.f32 %v3975_v34 }
 0x495   : > { %5983 = vrcp.f32 %v8423_v23  ;;  %v4213_v35 = vor.u32 1.1754944e-38, %v4212_v41  ;;  %vm4211_vm15 = vcmp.eq.f32.partialorder %v4210_v31, 8.507059e+37  ;;  %v3683_v60 = vand.u32 2147483648, %v8423_v23 }
 0x496   : > { %v4238_v5 = vpack.c.bf16 %v4229_v24, %v4228_v63  ;;  %v4189_v8 = vmul.f32 %v5978_v4, %v4188_v40  ;;  %v3487_v16 = vpop.f32.mrf.mxu2  ;;  %v3483_v22 = vadd.f32 %v8431_v25, %v6484_v38  ;;  %vm3682_vm3 = vcmp.eq.f32.partialorder %v3681_v14, 8.507059e+37 }
 0x497   : > { %v3684_v18 = vor.u32 1.1754944e-38, %v3683_v60  ;;  %v3486_v41 = vadd.f32 %v3485_v7, %v6484_v38 }
 0x498   : > { %v4190_v44 = vadd.f32 %v5978_v4, %v4189_v8 }
 0x499   : > { %v5980_v51 = vpop.eup %5979 }
 0x49a   : > { %v5982_v6 = vpop.eup %5981  ;;  %v4202_v52 = vmul.f32 %v5980_v51, %v3975_v34  ;;  %4342 = vmatmul.bf16.gmra.mxu1 %v4238_v5  ;;  %vm4207_vm10 = vweird.f32 %v5980_v51  ;;  %v4194_v62 = vsel %vm8438_vm11, %v5978_v4, %v4190_v44  ;;  %v3569_v34 = vadd.f32 %v8426_v3, %v6489_v12  ;;  %v8471_v40 = vpop.f32.mrf.mxu0 }
 0x49b   : > { %v8433_v58 = vadd.f32 1.0, %v5982_v6  ;;  %v5984_v53 = vpop.eup %5983  ;;  %vm4208_vm13 = vmor %vm4206_vm12, %vm4207_vm10  ;;  %v4199_v2 = vsel %vm4196_vm14, %v4198_v50, %v4194_v62  ;;  %v5187_v3 = vmul.f32 -1.442695, %v3483_v22  ;;  %v5188_v50 = vmul.f32 -1.442695, %v3486_v41  ;;  %v6111_v41 = vld [vmem:[%s6512_s16 + $0x110] sm:$0xff] }
 0x49c   : > { %v4203_v27 = vsub.f32 1.0, %v4202_v52  ;;  %v3673_v11 = vmul.f32 %v5984_v53, %v8423_v23  ;;  %v4230_v30 = vmul.f32 %v4199_v2, %v8221_v13  ;;  %vm3678_vm0 = vweird.f32 %v5984_v53 }
 0x49d   : > { %5985 = vrcp.f32 %v8433_v58  ;;  %vm3679_vm2 = vmor %vm3677_vm1, %vm3678_vm0  ;;  %v3698_v5 = vand.u32 2147483648, %v8433_v58  ;;  %vm3692_vm5 = vweird.f32 %v8433_v58  ;;  %v3571_v52 = vadd.f32 %v3570_v59, %v6489_v12 }
 0x49e   : > { %v4204_v45 = vmul.f32 %v5980_v51, %v4203_v27  ;;  %5987 = vpow2.f32 %v5184_v36  ;;  %v3674_v1 = vsub.f32 1.0, %v3673_v11  ;;  %v3490_v25 = vpop.f32.mrf.mxu2  ;;  %v3488_v2 = vadd.f32 %v3487_v16, %v6484_v38 }
 0x49f   : > { %5989 = vpow2.f32 %v5185_v32  ;;  %v3699_v43 = vor.u32 1.1754944e-38, %v3698_v5  ;;  %v3576_v5 = vadd.f32 %v8471_v40, %v6489_v12 }
 0x4a0   : > { %v4205_v28 = vadd.f32 %v5980_v51, %v4204_v45  ;;  %v3675_v9 = vmul.f32 %v5984_v53, %v3674_v1  ;;  %v6110_v1 = vld [vmem:[%s6512_s16 + $0x108] sm:$0xff] }
 0x4a2   : > { %v4209_v55 = vsel %vm4208_vm13, %v5980_v51, %v4205_v28  ;;  %v3676_v13 = vadd.f32 %v5984_v53, %v3675_v9  ;;  %v3696_v51 = vand.u32 2147483647, %v8433_v58  ;;  %v8491_v59 = vpop.f32.mrf.mxu0  ;;  %v5189_v9 = vmul.f32 -1.442695, %v3488_v2 }
 0x4a3   : > { %v4214_v48 = vsel %vm4211_vm15, %v4213_v35, %v4209_v55  ;;  %v8450_v20 = vpop.eup %5985 }
 0x4a4   : > { %v4231_v47 = vmul.f32 %v4214_v48, %v8226_v10  ;;  %v5988_v56 = vpop.eup %5987  ;;  %v3688_v33 = vmul.f32 %v8450_v20, %v8433_v58  ;;  %v3680_v54 = vsel %vm3679_vm2, %v5984_v53, %v3676_v13  ;;  %vm3693_vm4 = vweird.f32 %v8450_v20 }
 0x4a5   : > { %v8458_v10 = vadd.f32 1.0, %v5988_v56  ;;  %v5990_v4 = vpop.eup %5989  ;;  %v3685_v24 = vsel %vm3682_vm3, %v3684_v18, %v3680_v54  ;;  %vm3694_vm6 = vmor %vm3692_vm5, %vm3693_vm4  ;;  %vm3697_vm7 = vcmp.eq.f32.partialorder %v3696_v51, 8.507059e+37 }
 0x4a6   : > { %v4239_v49 = vpack.c.bf16 %v4231_v47, %v4230_v30  ;;  %v3689_v39 = vsub.f32 1.0, %v3688_v33  ;;  %v8469_v57 = vadd.f32 1.0, %v5990_v4  ;;  %v4385_v8 = vsub.f32 1.0, %v3685_v24  ;;  %v3492_v47 = vpop.f32.mrf.mxu2 }
 0x4a7   : > { %5991 = vrcp.f32 %v8458_v10  ;;  %v3713_v33 = vand.u32 2147483648, %v8458_v10  ;;  %vm3707_vm9 = vweird.f32 %v8458_v10  ;;  %v3711_v61 = vand.u32 2147483647, %v8458_v10 }
 0x4a8   : > { %v3690_v26 = vmul.f32 %v8450_v20, %v3689_v39  ;;  %5993 = vpow2.f32 %v5186_v46  ;;  %v4401_v58 = vmul.f32 %v8241_v17, %v4385_v8  ;;  %v3574_v39 = vadd.f32 %v8454_v15, %v6489_v12 }
 0x4a9   : > { %vm3712_vm11 = vcmp.eq.f32.partialorder %v3711_v61, 8.507059e+37  ;;  %vm3722_vm13 = vweird.f32 %v8469_v57 }
 0x4aa   : > { %4347 = vmatmul.bf16.gmra.mxu1 %v4239_v49  ;;  %v3691_v63 = vadd.f32 %v8450_v20, %v3690_v26  ;;  %v8515_v60 = vpop.f32.mrf.mxu0 }
 0x4ac   : > { %v3695_v27 = vsel %vm3694_vm6, %v8450_v20, %v3691_v63 }
 0x4ad   : > { %v8473_v23 = vpop.eup %5991  ;;  %v3700_v19 = vsel %vm3697_vm7, %v3699_v43, %v3695_v27 }
 0x4ae   : > { %v5994_v6 = vpop.eup %5993  ;;  %v3703_v21 = vmul.f32 %v8473_v23, %v8458_v10  ;;  %v4386_v35 = vsub.f32 1.0, %v3700_v19  ;;  %vm3708_vm8 = vweird.f32 %v8473_v23  ;;  %v3491_v10 = vadd.f32 %v3490_v25, %v6484_v38 }
 0x4af   : > { %v8486_v31 = vadd.f32 1.0, %v5994_v6  ;;  %vm3709_vm10 = vmor %vm3707_vm9, %vm3708_vm8 }
 0x4b0   : > { %v3704_v36 = vsub.f32 1.0, %v3703_v21  ;;  %v4402_v7 = vmul.f32 %v6110_v1, %v4386_v35 }
 0x4b1   : > { %vm3737_vm1 = vweird.f32 %v8486_v31 }
 0x4b2   : > { %v3705_v55 = vmul.f32 %v8473_v23, %v3704_v36 }
 0x4b4   : > { %v3706_v32 = vadd.f32 %v8473_v23, %v3705_v55 }
 0x4b6   : > { %v3710_v16 = vsel %vm3709_vm10, %v8473_v23, %v3706_v32  ;;  %v3728_v23 = vand.u32 2147483648, %v8469_v57 }
 0x4b7   : > { %v4313_v37 = vpop.f32.mrf.mxu1 }
 0x4b8   : > { %v4353_v29 = vadd.f32 %v4313_v37, %v3569_v34  ;;  %v3714_v34 = vor.u32 1.1754944e-38, %v3713_v33  ;;  %v3729_v40 = vor.u32 1.1754944e-38, %v3728_v23  ;;  %v6112_v33 = vld [vmem:[%s6512_s16 + $0x118] sm:$0xff] }
 0x4ba   : > { %5995 = vtanh.f32 %v4353_v29  ;;  %v3715_v37 = vsel %vm3712_vm11, %v3714_v34, %v3710_v16  ;;  %v5190_v29 = vmul.f32 -1.442695, %v3491_v10 }
 0x4bb   : > { %5997 = vrcp.f32 %v8469_v57  ;;  %v4387_v63 = vsub.f32 1.0, %v3715_v37 }
 0x4bc   : > { %5999 = vpow2.f32 %v5187_v3  ;;  %v3726_v3 = vand.u32 2147483647, %v8469_v57 }
 0x4bd   : > { %v4403_v43 = vmul.f32 %v6111_v41, %v4387_v63 }
 0x4be   : > { %vm3727_vm15 = vcmp.eq.f32.partialorder %v3726_v3, 8.507059e+37 }
 0x4bf   : > { %v4315_v44 = vpop.f32.mrf.mxu1 }
 0x4c0   : > { %v5996_v0 = vpop.eup %5995  ;;  %v4354_v45 = vadd.f32 %v4315_v44, %v3571_v52  ;;  %v8542_v44 = vpop.f32.mrf.mxu0 }
 0x4c1   : > { %v4417_v53 = vmul.f32 %v5996_v0, %v3685_v24  ;;  %v8489_v62 = vpop.eup %5997  ;;  %v3495_v24 = vpop.f32.mrf.mxu2  ;;  %v3493_v0 = vadd.f32 %v3492_v47, %v6484_v38  ;;  %v6114_v47 = vld [vmem:[%s6512_s16 + $0x128] sm:$0xff] }
 0x4c2   : > { %6001 = vtanh.f32 %v4354_v45  ;;  %v6000_v11 = vpop.eup %5999  ;;  %v3718_v17 = vmul.f32 %v8489_v62, %v8469_v57  ;;  %vm3723_vm12 = vweird.f32 %v8489_v62 }
 0x4c3   : > { %v4433_v28 = vadd.f32 %v4417_v53, %v4401_v58  ;;  %6003 = vrcp.f32 %v8486_v31  ;;  %v8499_v48 = vadd.f32 1.0, %v6000_v11  ;;  %vm8532_vm14 = vmor %vm3722_vm13, %vm3723_vm12  ;;  %v5191_v35 = vmul.f32 -1.442695, %v3493_v0 }
 0x4c4   : > { %6005 = vpow2.f32 %v5188_v50  ;;  %v3719_v20 = vsub.f32 1.0, %v3718_v17  ;;  %v3743_v50 = vand.u32 2147483648, %v8486_v31  ;;  %v3741_v17 = vand.u32 2147483647, %v8486_v31 }
 0x4c5   : > { %5246 = vst [vmem:[%s6512_s16 + $0x180] sm:$0xff] %v4433_v28  ;;  %6007 = vrcp.f32 %v8499_v48  ;;  %v3758_v34 = vand.u32 2147483648, %v8499_v48  ;;  %vm3752_vm5 = vweird.f32 %v8499_v48 }
 0x4c6   : > { %v3720_v4 = vmul.f32 %v8489_v62, %v3719_v20  ;;  %6009 = vpow2.f32 %v5189_v9  ;;  %v3744_v32 = vor.u32 1.1754944e-38, %v3743_v50  ;;  %vm3742_vm3 = vcmp.eq.f32.partialorder %v3741_v17, 8.507059e+37 }
 0x4c7   : > { %v4318_v14 = vpop.f32.mrf.mxu1 }
 0x4c8   : > { %v6002_v42 = vpop.eup %6001  ;;  %v4355_v54 = vadd.f32 %v4318_v14, %v3574_v39  ;;  %v3721_v22 = vadd.f32 %v8489_v62, %v3720_v4 }
 0x4c9   : > { %v4418_v30 = vmul.f32 %v6002_v42, %v3700_v19  ;;  %v8504_v49 = vpop.eup %6003  ;;  %v3579_v42 = vadd.f32 %v8491_v59, %v6489_v12  ;;  %v3497_v2 = vpop.f32.mrf.mxu2  ;;  %v3496_v59 = vadd.f32 %v3495_v24, %v6484_v38 }
 0x4ca   : > { %v6006_v13 = vpop.eup %6005  ;;  %v3733_v46 = vmul.f32 %v8504_v49, %v8486_v31  ;;  %6011 = vtanh.f32 %v4355_v54  ;;  %v3725_v52 = vsel %vm8532_vm14, %v8489_v62, %v3721_v22  ;;  %vm3738_vm0 = vweird.f32 %v8504_v49 }
 0x4cb   : > { %v4434_v56 = vadd.f32 %v4418_v30, %v4402_v7  ;;  %v8520_v15 = vadd.f32 1.0, %v6006_v13  ;;  %v8524_v18 = vpop.eup %6007  ;;  %v3730_v53 = vsel %vm3727_vm15, %v3729_v40, %v3725_v52  ;;  %vm8559_vm2 = vmor %vm3737_vm1, %vm3738_vm0  ;;  %v5192_v10 = vmul.f32 -1.442695, %v3496_v59 }
 0x4cc   : > { %v3734_v26 = vsub.f32 1.0, %v3733_v46  ;;  %v6010_v51 = vpop.eup %6009  ;;  %v3748_v6 = vmul.f32 %v8524_v18, %v8499_v48  ;;  %v4388_v11 = vsub.f32 1.0, %v3730_v53  ;;  %vm3753_vm4 = vweird.f32 %v8524_v18 }
 0x4cd   : > { %5247 = vst [vmem:[%s6512_s16 + $0x188] sm:$0xff] %v4434_v56  ;;  %6013 = vrcp.f32 %v8520_v15  ;;  %v8546_v58 = vadd.f32 1.0, %v6010_v51  ;;  %vm8586_vm6 = vmor %vm3752_vm5, %vm3753_vm4  ;;  %v3498_v51 = vadd.f32 %v3497_v2, %v6484_v38  ;;  %v3773_v41 = vand.u32 2147483648, %v8520_v15 }
 0x4ce   : > { %v3735_v57 = vmul.f32 %v8504_v49, %v3734_v26  ;;  %6015 = vpow2.f32 %v5190_v29  ;;  %v3749_v36 = vsub.f32 1.0, %v3748_v6  ;;  %v4404_v9 = vmul.f32 %v6112_v33, %v4388_v11  ;;  %v6113_v6 = vld [vmem:[%s6512_s16 + $0x120] sm:$0xff] }
 0x4cf   : > { %v4320_v21 = vpop.f32.mrf.mxu1  ;;  %v3581_v26 = vadd.f32 %v8515_v60, %v6489_v12  ;;  %vm3767_vm9 = vweird.f32 %v8520_v15  ;;  %vm3782_vm13 = vweird.f32 %v8546_v58 }
 0x4d0   : > { %v6012_v25 = vpop.eup %6011  ;;  %v4356_v27 = vadd.f32 %v4320_v21, %v3576_v5  ;;  %v3736_v62 = vadd.f32 %v8504_v49, %v3735_v57  ;;  %v3750_v31 = vmul.f32 %v8524_v18, %v3749_v36  ;;  %v3759_v5 = vor.u32 1.1754944e-38, %v3758_v34 }
 0x4d1   : > { %v4419_v45 = vmul.f32 %v6012_v25, %v3715_v37  ;;  %v3756_v37 = vand.u32 2147483647, %v8499_v48  ;;  %v3500_v60 = vpop.f32.mrf.mxu2  ;;  %v3771_v36 = vand.u32 2147483647, %v8520_v15 }
 0x4d2   : > { %6017 = vtanh.f32 %v4356_v27  ;;  %v3740_v7 = vsel %vm8559_vm2, %v8504_v49, %v3736_v62  ;;  %v8573_v49 = vpop.f32.mrf.mxu0  ;;  %v3751_v14 = vadd.f32 %v8524_v18, %v3750_v31  ;;  %v3584_v62 = vadd.f32 %v8542_v44, %v6489_v12 }
 0x4d3   : > { %v4435_v19 = vadd.f32 %v4419_v45, %v4403_v43  ;;  %v8550_v28 = vpop.eup %6013  ;;  %6019 = vrcp.f32 %v8546_v58  ;;  %v3745_v13 = vsel %vm3742_vm3, %v3744_v32, %v3740_v7  ;;  %vm3757_vm7 = vcmp.eq.f32.partialorder %v3756_v37, 8.507059e+37 }
 0x4d4   : > { %v6016_v55 = vpop.eup %6015  ;;  %v3763_v1 = vmul.f32 %v8550_v28, %v8520_v15  ;;  %6021 = vpow2.f32 %v5191_v35  ;;  %v4389_v54 = vsub.f32 1.0, %v3745_v13  ;;  %v3755_v23 = vsel %vm8586_vm6, %v8524_v18, %v3751_v14 }
 0x4d5   : > { %5248 = vst [vmem:[%s6512_s16 + $0x190] sm:$0xff] %v4435_v19  ;;  %v8571_v39 = vadd.f32 1.0, %v6016_v55  ;;  %v3760_v25 = vsel %vm3757_vm7, %v3759_v5, %v3755_v23  ;;  %vm3768_vm8 = vweird.f32 %v8550_v28  ;;  %v5193_v45 = vmul.f32 -1.442695, %v3498_v51 }
 0x4d6   : > { %v3764_v46 = vsub.f32 1.0, %v3763_v1  ;;  %v4405_v52 = vmul.f32 %v6113_v6, %v4389_v54  ;;  %vm8613_vm10 = vmor %vm3767_vm9, %vm3768_vm8  ;;  %v3774_v44 = vor.u32 1.1754944e-38, %v3773_v41  ;;  %vm3772_vm11 = vcmp.eq.f32.partialorder %v3771_v36, 8.507059e+37 }
 0x4d7   : > { %v4323_v30 = vpop.f32.mrf.mxu1  ;;  %v3803_v6 = vand.u32 2147483648, %v8571_v39  ;;  %vm3797_vm1 = vweird.f32 %v8571_v39 }
 0x4d8   : > { %v6018_v20 = vpop.eup %6017  ;;  %v4357_v56 = vadd.f32 %v4323_v30, %v3579_v42  ;;  %v3765_v48 = vmul.f32 %v8550_v28, %v3764_v46  ;;  %v3501_v42 = vadd.f32 %v3500_v60, %v6484_v38  ;;  %v3586_v46 = vadd.f32 %v8573_v49, %v6489_v12 }
 0x4d9   : > { %v4420_v61 = vmul.f32 %v6018_v20, %v3730_v53  ;;  %v8577_v4 = vpop.eup %6019  ;;  %v4390_v53 = vsub.f32 1.0, %v3760_v25  ;;  %v3502_v31 = vpop.f32.mrf.mxu2 }
 0x4da   : > { %6023 = vtanh.f32 %v4357_v56  ;;  %v6022_v29 = vpop.eup %6021  ;;  %v3778_v24 = vmul.f32 %v8577_v4, %v8546_v58  ;;  %v3766_v27 = vadd.f32 %v8550_v28, %v3765_v48  ;;  %v8605_v43 = vpop.f32.mrf.mxu0  ;;  %vm3783_vm12 = vweird.f32 %v8577_v4 }
 0x4db   : > { %v4436_v16 = vadd.f32 %v4420_v61, %v4404_v9  ;;  %6025 = vrcp.f32 %v8571_v39  ;;  %v8598_v57 = vadd.f32 1.0, %v6022_v29  ;;  %v4406_v1 = vmul.f32 %v6114_v47, %v4390_v53  ;;  %vm8638_vm14 = vmor %vm3782_vm13, %vm3783_vm12 }
 0x4dc   : > { %6027 = vpow2.f32 %v5192_v10  ;;  %v3779_v18 = vsub.f32 1.0, %v3778_v24  ;;  %v3770_v11 = vsel %vm8613_vm10, %v8550_v28, %v3766_v27  ;;  %v5194_v33 = vmul.f32 -1.442695, %v3501_v42  ;;  %v6115_v24 = vld [vmem:[%s6512_s16 + $0x130] sm:$0xff] }
 0x4dd   : > { %5249 = vst [vmem:[%s6512_s16 + $0x198] sm:$0xff] %v4436_v16  ;;  %v3775_v20 = vsel %vm3772_vm11, %v3774_v44, %v3770_v11  ;;  %v3788_v9 = vand.u32 2147483648, %v8546_v58  ;;  %v3503_v29 = vadd.f32 %v3502_v31, %v6484_v38  ;;  %vm3812_vm5 = vweird.f32 %v8598_v57 }
 0x4de   : > { %v3780_v15 = vmul.f32 %v8577_v4, %v3779_v18  ;;  %v4391_v61 = vsub.f32 1.0, %v3775_v20  ;;  %v3816_v31 = vand.u32 2147483647, %v8598_v57 }
 0x4df   : > { %v4325_v63 = vpop.f32.mrf.mxu1  ;;  %v3789_v49 = vor.u32 1.1754944e-38, %v3788_v9 }
 0x4e0   : > { %v6024_v3 = vpop.eup %6023  ;;  %v4358_v8 = vadd.f32 %v4325_v63, %v3581_v26  ;;  %v3781_v32 = vadd.f32 %v8577_v4, %v3780_v15  ;;  %v4407_v23 = vmul.f32 %v6115_v24, %v4391_v61  ;;  %vm3817_vm7 = vcmp.eq.f32.partialorder %v3816_v31, 8.507059e+37 }
 0x4e1   : > { %v4421_v21 = vmul.f32 %v6024_v3, %v3745_v13  ;;  %v8602_v0 = vpop.eup %6025  ;;  %v3786_v13 = vand.u32 2147483647, %v8546_v58  ;;  %v3505_v51 = vpop.f32.mrf.mxu2 }
 0x4e2   : > { %6029 = vtanh.f32 %v4358_v8  ;;  %v6028_v19 = vpop.eup %6027  ;;  %v3793_v35 = vmul.f32 %v8602_v0, %v8571_v39  ;;  %v3590_v10 = vpop.f32.mrf.mxu0  ;;  %v3785_v54 = vsel %vm8638_vm14, %v8577_v4, %v3781_v32  ;;  %vm3798_vm0 = vweird.f32 %v8602_v0 }
 0x4e3   : > { %v4437_v40 = vadd.f32 %v4421_v21, %v4405_v52  ;;  %6031 = vrcp.f32 %v8598_v57  ;;  %v8625_v30 = vadd.f32 1.0, %v6028_v19  ;;  %vm3787_vm15 = vcmp.eq.f32.partialorder %v3786_v13, 8.507059e+37  ;;  %vm8663_vm2 = vmor %vm3797_vm1, %vm3798_vm0 }
 0x4e4   : > { %6033 = vpow2.f32 %v5193_v45  ;;  %v3794_v28 = vsub.f32 1.0, %v3793_v35  ;;  %v3790_v3 = vsel %vm3787_vm15, %v3789_v49, %v3785_v54  ;;  %v5195_v52 = vmul.f32 -1.442695, %v3503_v29  ;;  %v6116_v35 = vld [vmem:[%s6512_s16 + $0x138] sm:$0xff] }
 0x4e5   : > { %5250 = vst [vmem:[%s6512_s16 + $0x1a0] sm:$0xff] %v4437_v40  ;;  %v4392_v21 = vsub.f32 1.0, %v3790_v3  ;;  %v3589_v40 = vadd.f32 %v8605_v43, %v6489_v12  ;;  %v3506_v19 = vadd.f32 %v3505_v51, %v6484_v38  ;;  %v3804_v43 = vor.u32 1.1754944e-38, %v3803_v6 }
 0x4e6   : > { %v3795_v58 = vmul.f32 %v8602_v0, %v3794_v28  ;;  %vm3827_vm9 = vweird.f32 %v8625_v30 }
 0x4e7   : > { %v4328_v17 = vpop.f32.mrf.mxu1  ;;  %v4408_v11 = vmul.f32 %v6116_v35, %v4392_v21  ;;  %v5196_v47 = vmul.f32 -1.442695, %v3506_v19 }
 0x4e8   : > { %v6030_v55 = vpop.eup %6029  ;;  %v4359_v2 = vadd.f32 %v4328_v17, %v3584_v62  ;;  %v3796_v5 = vadd.f32 %v8602_v0, %v3795_v58 }
 0x4e9   : > { %v4422_v7 = vmul.f32 %v6030_v55, %v3760_v25  ;;  %v8629_v56 = vpop.eup %6031  ;;  %v3801_v25 = vand.u32 2147483647, %v8571_v39  ;;  %v3507_v28 = vpop.f32.mrf.mxu2 }
 0x4ea   : > { %6035 = vtanh.f32 %v4359_v2  ;;  %v6034_v14 = vpop.eup %6033  ;;  %v3808_v34 = vmul.f32 %v8629_v56, %v8598_v57  ;;  %v3800_v45 = vsel %vm8663_vm2, %v8602_v0, %v3796_v5  ;;  %v3593_v50 = vpop.f32.mrf.mxu0  ;;  %vm3813_vm4 = vweird.f32 %v8629_v56 }
 0x4eb   : > { %v4438_v59 = vadd.f32 %v4422_v7, %v4406_v1  ;;  %6037 = vrcp.f32 %v8625_v30  ;;  %v8650_v48 = vadd.f32 1.0, %v6034_v14  ;;  %vm3802_vm3 = vcmp.eq.f32.partialorder %v3801_v25, 8.507059e+37  ;;  %vm8687_vm6 = vmor %vm3812_vm5, %vm3813_vm4 }
 0x4ec   : > { %6039 = vpow2.f32 %v5194_v33  ;;  %v3809_v60 = vsub.f32 1.0, %v3808_v34  ;;  %v3805_v55 = vsel %vm3802_vm3, %v3804_v43, %v3800_v45  ;;  %v3818_v1 = vand.u32 2147483648, %v8598_v57 }
 0x4ed   : > { %5251 = vst [vmem:[%s6512_s16 + $0x1a8] sm:$0xff] %v4438_v59  ;;  %v4393_v7 = vsub.f32 1.0, %v3805_v55  ;;  %v3508_v14 = vadd.f32 %v3507_v28, %v6484_v38  ;;  %v3833_v38 = vand.u32 2147483648, %v8625_v30  ;;  %vm3842_vm13 = vweird.f32 %v8650_v48 }
 0x4ee   : > { %v3810_v39 = vmul.f32 %v8629_v56, %v3809_v60  ;;  %v3594_v60 = vadd.f32 %v3593_v50, %v6489_v12 }
 0x4ef   : > { %v4330_v37 = vpop.f32.mrf.mxu1  ;;  %v5197_v24 = vmul.f32 -1.442695, %v3508_v14  ;;  %v3834_v21 = vor.u32 1.1754944e-38, %v3833_v38 }
 0x4f0   : > { %v6036_v26 = vpop.eup %6035  ;;  %v4360_v22 = vadd.f32 %v4330_v37, %v3586_v46  ;;  %v3811_v44 = vadd.f32 %v8629_v56, %v3810_v39  ;;  %v3819_v46 = vor.u32 1.1754944e-38, %v3818_v1  ;;  %v6119_v1 = vld [vmem:[%s6512_s16 + $0x150] sm:$0xff] }
 0x4f1   : > { %v4423_v63 = vmul.f32 %v6036_v26, %v3775_v20  ;;  %v8654_v8 = vpop.eup %6037  ;;  %v3591_v20 = vadd.f32 %v3590_v10, %v6489_v12  ;;  %v6117_v10 = vld [vmem:[%s6512_s16 + $0x140] sm:$0xff] }
 0x4f2   : > { %6041 = vtanh.f32 %v4360_v22  ;;  %v6040_v18 = vpop.eup %6039  ;;  %v3823_v41 = vmul.f32 %v8654_v8, %v8625_v30  ;;  %v3815_v9 = vsel %vm8687_vm6, %v8629_v56, %v3811_v44  ;;  %v4409_v34 = vmul.f32 %v6117_v10, %v4393_v7  ;;  %v3595_v26 = vpop.f32.mrf.mxu0 }
 0x4f3   : > { %v4439_v4 = vadd.f32 %v4423_v63, %v4407_v23  ;;  %6043 = vrcp.f32 %v8650_v48  ;;  %v8675_v15 = vadd.f32 1.0, %v6040_v18  ;;  %v3820_v58 = vsel %vm3817_vm7, %v3819_v46, %v3815_v9 }
 0x4f4   : > { %6045 = vpow2.f32 %v5195_v52  ;;  %v3824_v0 = vsub.f32 1.0, %v3823_v41  ;;  %vm3828_vm8 = vweird.f32 %v8654_v8  ;;  %v4394_v23 = vsub.f32 1.0, %v3820_v58 }
 0x4f5   : > { %5252 = vst [vmem:[%s6512_s16 + $0x1b0] sm:$0xff] %v4439_v4  ;;  %v3831_v63 = vand.u32 2147483647, %v8625_v30  ;;  %vm3829_vm10 = vmor %vm3827_vm9, %vm3828_vm8  ;;  %v6118_v30 = vld [vmem:[%s6512_s16 + $0x148] sm:$0xff]  ;;  %v3596_v50 = vadd.f32 %v3595_v26, %v6489_v12  ;;  %vm3857_vm1 = vweird.f32 %v8675_v15  ;;  %v6120_v26 = vld [vmem:[%s6512_s16 + $0x158] sm:$0xff] }
 0x4f6   : > { %v3825_v57 = vmul.f32 %v8654_v8, %v3824_v0  ;;  %v4410_v18 = vmul.f32 %v6118_v30, %v4394_v23 }
 0x4f7   : > { %v4333_v53 = vpop.f32.mrf.mxu1  ;;  %vm3832_vm11 = vcmp.eq.f32.partialorder %v3831_v63, 8.507059e+37 }
 0x4f8   : > { %v6042_v36 = vpop.eup %6041  ;;  %v4361_v62 = vadd.f32 %v4333_v53, %v3589_v40  ;;  %v3826_v22 = vadd.f32 %v8654_v8, %v3825_v57 }
 0x4f9   : > { %v4424_v17 = vmul.f32 %v6042_v36, %v3790_v3  ;;  %v8679_v2 = vpop.eup %6043  ;;  %v3848_v36 = vand.u32 2147483648, %v8650_v48 }
 0x4fa   : > { %6047 = vtanh.f32 %v4361_v62  ;;  %v6046_v32 = vpop.eup %6045  ;;  %v3838_v33 = vmul.f32 %v8679_v2, %v8650_v48  ;;  %v3830_v5 = vsel %vm3829_vm10, %v8654_v8, %v3826_v22  ;;  %vm3843_vm12 = vweird.f32 %v8679_v2  ;;  %v3598_v19 = vpop.f32.mrf.mxu0 }
 0x4fb   : > { %v4440_v42 = vadd.f32 %v4424_v17, %v4408_v11  ;;  %6049 = vrcp.f32 %v8675_v15  ;;  %v8699_v37 = vadd.f32 1.0, %v6046_v32  ;;  %v3835_v41 = vsel %vm3832_vm11, %v3834_v21, %v3830_v5  ;;  %vm3844_vm14 = vmor %vm3842_vm13, %vm3843_vm12 }
 0x4fc   : > { %6051 = vpow2.f32 %v5196_v47  ;;  %v3839_v56 = vsub.f32 1.0, %v3838_v33  ;;  %v4395_v43 = vsub.f32 1.0, %v3835_v41  ;;  %v3846_v62 = vand.u32 2147483647, %v8650_v48 }
 0x4fd   : > { %5253 = vst [vmem:[%s6512_s16 + $0x1b8] sm:$0xff] %v4440_v42  ;;  %v3849_v44 = vor.u32 1.1754944e-38, %v3848_v36  ;;  %v3863_v33 = vand.u32 2147483648, %v8675_v15  ;;  %v3599_v57 = vadd.f32 %v3598_v19, %v6489_v12  ;;  %v3878_v23 = vand.u32 2147483648, %v8699_v37 }
 0x4fe   : > { %v3840_v6 = vmul.f32 %v8679_v2, %v3839_v56  ;;  %v4411_v48 = vmul.f32 %v6119_v1, %v4395_v43  ;;  %vm3847_vm15 = vcmp.eq.f32.partialorder %v3846_v62, 8.507059e+37  ;;  %vm3872_vm5 = vweird.f32 %v8699_v37 }
 0x4ff   : > { %v4335_v61 = vpop.f32.mrf.mxu1  ;;  %v3879_v21 = vor.u32 1.1754944e-38, %v3878_v23 }
 0x500   : > { %v6048_v13 = vpop.eup %6047  ;;  %v4362_v16 = vadd.f32 %v4335_v61, %v3591_v20  ;;  %v3841_v8 = vadd.f32 %v8679_v2, %v3840_v6  ;;  %v3861_v61 = vand.u32 2147483647, %v8675_v15 }
 0x501   : > { %v4425_v54 = vmul.f32 %v6048_v13, %v3805_v55  ;;  %v8703_v29 = vpop.eup %6049 }
 0x502   : > { %6053 = vtanh.f32 %v4362_v16  ;;  %v6052_v3 = vpop.eup %6051  ;;  %v3853_v4 = vmul.f32 %v8703_v29, %v8675_v15  ;;  %v3845_v17 = vsel %vm3844_vm14, %v8679_v2, %v3841_v8  ;;  %vm3858_vm0 = vweird.f32 %v8703_v29  ;;  %v3600_v13 = vpop.f32.mrf.mxu0 }
 0x503   : > { %v4441_v49 = vadd.f32 %v4425_v54, %v4409_v34  ;;  %6055 = vrcp.f32 %v8699_v37  ;;  %v8716_v27 = vadd.f32 1.0, %v6052_v3  ;;  %v3850_v20 = vsel %vm3847_vm15, %v3849_v44, %v3845_v17  ;;  %vm3859_vm2 = vmor %vm3857_vm1, %vm3858_vm0 }
 0x504   : > { %6057 = vpow2.f32 %v5197_v24  ;;  %v3854_v45 = vsub.f32 1.0, %v3853_v4  ;;  %v4396_v9 = vsub.f32 1.0, %v3850_v20  ;;  %v3864_v54 = vor.u32 1.1754944e-38, %v3863_v33 }
 0x505   : > { %5254 = vst [vmem:[%s6512_s16 + $0x1c0] sm:$0xff] %v4441_v49  ;;  %vm3862_vm3 = vcmp.eq.f32.partialorder %v3861_v61, 8.507059e+37  ;;  %v3876_v3 = vand.u32 2147483647, %v8699_v37  ;;  %vm3887_vm9 = vweird.f32 %v8716_v27  ;;  %v3891_v19 = vand.u32 2147483647, %v8716_v27 }
 0x506   : > { %v3855_v0 = vmul.f32 %v8703_v29, %v3854_v45  ;;  %v4412_v15 = vmul.f32 %v6120_v26, %v4396_v9 }
 0x507   : > { %v4338_v51 = vpop.f32.mrf.mxu1  ;;  %vm3877_vm7 = vcmp.eq.f32.partialorder %v3876_v3, 8.507059e+37  ;;  %vm3892_vm11 = vcmp.eq.f32.partialorder %v3891_v19, 8.507059e+37 }
 0x508   : > { %v6054_v52 = vpop.eup %6053  ;;  %v4363_v25 = vadd.f32 %v4338_v51, %v3594_v60  ;;  %v3856_v32 = vadd.f32 %v8703_v29, %v3855_v0  ;;  %v3601_v60 = vadd.f32 %v3600_v13, %v6489_v12  ;;  %v6122_v0 = vld [vmem:[%s6512_s16 + $0x168] sm:$0xff] }
 0x509   : > { %v4426_v40 = vmul.f32 %v6054_v52, %v3820_v58  ;;  %v8720_v39 = vpop.eup %6055 }
 0x50a   : > { %6059 = vtanh.f32 %v4363_v25  ;;  %v6058_v35 = vpop.eup %6057  ;;  %v3868_v11 = vmul.f32 %v8720_v39, %v8699_v37  ;;  %v3860_v16 = vsel %vm3859_vm2, %v8703_v29, %v3856_v32  ;;  %vm3873_vm4 = vweird.f32 %v8720_v39  ;;  %v3603_v30 = vpop.f32.mrf.mxu0 }
 0x50b   : > { %v4442_v53 = vadd.f32 %v4426_v40, %v4410_v18  ;;  %6061 = vrcp.f32 %v8716_v27  ;;  %v8733_v31 = vadd.f32 1.0, %v6058_v35  ;;  %v3865_v49 = vsel %vm3862_vm3, %v3864_v54, %v3860_v16  ;;  %vm3874_vm6 = vmor %vm3872_vm5, %vm3873_vm4  ;;  %v6121_v18 = vld [vmem:[%s6512_s16 + $0x160] sm:$0xff] }
 0x50c   : > { %v3869_v28 = vsub.f32 1.0, %v3868_v11  ;;  %v4397_v63 = vsub.f32 1.0, %v3865_v49  ;;  %v3604_v43 = vadd.f32 %v3603_v30, %v6489_v12 }
 0x50d   : > { %5255 = vst [vmem:[%s6512_s16 + $0x1c8] sm:$0xff] %v4442_v53  ;;  %vm3902_vm13 = vweird.f32 %v8733_v31 }
 0x50e   : > { %v3870_v10 = vmul.f32 %v8720_v39, %v3869_v28  ;;  %v4413_v40 = vmul.f32 %v6121_v18, %v4397_v63  ;;  %v3906_v28 = vand.u32 2147483647, %v8733_v31 }
 0x50f   : > { %v4340_v55 = vpop.f32.mrf.mxu1 }
 0x510   : > { %v6060_v42 = vpop.eup %6059  ;;  %v4364_v47 = vadd.f32 %v4340_v55, %v3596_v50  ;;  %v3871_v24 = vadd.f32 %v8720_v39, %v3870_v10  ;;  %vm3907_vm15 = vcmp.eq.f32.partialorder %v3906_v28, 8.507059e+37  ;;  %v6124_v10 = vld [vmem:[%s6512_s16 + $0x178] sm:$0xff] }
 0x511   : > { %v4427_v7 = vmul.f32 %v6060_v42, %v3835_v41  ;;  %v8737_v2 = vpop.eup %6061 }
 0x512   : > { %6063 = vtanh.f32 %v4364_v47  ;;  %v3883_v46 = vmul.f32 %v8737_v2, %v8716_v27  ;;  %v3875_v5 = vsel %vm3874_vm6, %v8720_v39, %v3871_v24  ;;  %vm3888_vm8 = vweird.f32 %v8737_v2  ;;  %v3605_v1 = vpop.f32.mrf.mxu0 }
 0x513   : > { %v4443_v59 = vadd.f32 %v4427_v7, %v4411_v48  ;;  %6065 = vrcp.f32 %v8733_v31  ;;  %v3880_v37 = vsel %vm3877_vm7, %v3879_v21, %v3875_v5  ;;  %v3893_v39 = vand.u32 2147483648, %v8716_v27  ;;  %vm3889_vm10 = vmor %vm3887_vm9, %vm3888_vm8 }
 0x514   : > { %v3884_v22 = vsub.f32 1.0, %v3883_v46  ;;  %v4398_v36 = vsub.f32 1.0, %v3880_v37  ;;  %v3908_v7 = vand.u32 2147483648, %v8733_v31 }
 0x515   : > { %5256 = vst [vmem:[%s6512_s16 + $0x1d0] sm:$0xff] %v4443_v59  ;;  %v3894_v17 = vor.u32 1.1754944e-38, %v3893_v39  ;;  %v3606_v59 = vadd.f32 %v3605_v1, %v6489_v12 }
 0x516   : > { %v3885_v6 = vmul.f32 %v8737_v2, %v3884_v22  ;;  %v4414_v42 = vmul.f32 %v6122_v0, %v4398_v36  ;;  %v3909_v9 = vor.u32 1.1754944e-38, %v3908_v7 }
 0x517   : > { %v4343_v14 = vpop.f32.mrf.mxu1 }
 0x518   : > { %v6064_v34 = vpop.eup %6063  ;;  %v4365_v58 = vadd.f32 %v4343_v14, %v3599_v57  ;;  %v3886_v8 = vadd.f32 %v8737_v2, %v3885_v6  ;;  %v6123_v57 = vld [vmem:[%s6512_s16 + $0x170] sm:$0xff] }
 0x519   : > { %v4428_v56 = vmul.f32 %v6064_v34, %v3850_v20  ;;  %v8752_v29 = vpop.eup %6065 }
 0x51a   : > { %6067 = vtanh.f32 %v4365_v58  ;;  %v3898_v4 = vmul.f32 %v8752_v29, %v8733_v31  ;;  %v3890_v62 = vsel %vm3889_vm10, %v8737_v2, %v3886_v8  ;;  %vm3903_vm12 = vweird.f32 %v8752_v29 }
 0x51b   : > { %v4444_v38 = vadd.f32 %v4428_v56, %v4412_v15  ;;  %v3895_v47 = vsel %vm3892_vm11, %v3894_v17, %v3890_v62  ;;  %vm3904_vm14 = vmor %vm3902_vm13, %vm3903_vm12 }
 0x51c   : > { %v3899_v45 = vsub.f32 1.0, %v3898_v4  ;;  %v4399_v20 = vsub.f32 1.0, %v3895_v47 }
 0x51d   : > { %5257 = vst [vmem:[%s6512_s16 + $0x1d8] sm:$0xff] %v4444_v38 }
 0x51e   : > { %v3900_v35 = vmul.f32 %v8752_v29, %v3899_v45  ;;  %v4415_v13 = vmul.f32 %v6123_v57, %v4399_v20 }
 0x51f   : > { %v4345_v51 = vpop.f32.mrf.mxu1 }
 0x520   : > { %v6068_v52 = vpop.eup %6067  ;;  %v4366_v25 = vadd.f32 %v4345_v51, %v3601_v60  ;;  %v3901_v48 = vadd.f32 %v8752_v29, %v3900_v35 }
 0x521   : > { %v4429_v41 = vmul.f32 %v6068_v52, %v3865_v49 }
 0x522   : > { %6069 = vtanh.f32 %v4366_v25  ;;  %v3905_v32 = vsel %vm3904_vm14, %v8752_v29, %v3901_v48 }
 0x523   : > { %v4445_v53 = vadd.f32 %v4429_v41, %v4413_v40  ;;  %v3910_v16 = vsel %vm3907_vm15, %v3909_v9, %v3905_v32 }
 0x524   : > { %v4400_v31 = vsub.f32 1.0, %v3910_v16 }
 0x525   : > { %5258 = vst [vmem:[%s6512_s16 + $0x1e0] sm:$0xff] %v4445_v53 }
 0x526   : > { %v4416_v34 = vmul.f32 %v6124_v10, %v4400_v31 }
 0x527   : > { %v4348_v50 = vpop.f32.mrf.mxu1 }
 0x528   : > { %v6070_v11 = vpop.eup %6069  ;;  %v4367_v55 = vadd.f32 %v4348_v50, %v3604_v43 }
 0x529   : > { %v4430_v44 = vmul.f32 %v6070_v11, %v3880_v37 }
 0x52a   : > { %6071 = vtanh.f32 %v4367_v55 }
 0x52b   : > { %v4446_v27 = vadd.f32 %v4430_v44, %v4414_v42 }
 0x52d   : > { %5259 = vst [vmem:[%s6512_s16 + $0x1e8] sm:$0xff] %v4446_v27 }
 0x52f   : > { %v4350_v2 = vpop.f32.mrf.mxu1 }
 0x530   : > { %v6072_v33 = vpop.eup %6071  ;;  %v4368_v61 = vadd.f32 %v4350_v2, %v3606_v59 }
 0x531   : > { %v4431_v46 = vmul.f32 %v6072_v33, %v3895_v47 }
 0x532   : > { %6073 = vtanh.f32 %v4368_v61 }
 0x533   : > { %v4447_v14 = vadd.f32 %v4431_v46, %v4415_v13 }
 0x535   : > { %5260 = vst [vmem:[%s6512_s16 + $0x1f0] sm:$0xff] %v4447_v14 }
 0x538   : > { %v6074_v12 = vpop.eup %6073 }
 0x539   : > { %v4432_v54 = vmul.f32 %v6074_v12, %v3910_v16 }
 0x53b   : > { %v4448_v58 = vadd.f32 %v4432_v54, %v4416_v34 }
 0x53d   : > { %5261 = vst [vmem:[%s6512_s16 + $0x1f8] sm:$0xff] %v4448_v58 }
 0x53e   : > { %s5388_s13 = sshll.u32 %s6358_s22, 7  ;;  %s4489_s12 = sshll.u32 %s6512_s16, 4  ;;  %s4490_s12 = int_to_ptr.vmem [resolvable:$true] %s4489_s12 }
 0x53f   : > { %s4478_s7 = scalar_lea.hbm %s8829_s5, %s5388_s13  ;;  %s6300_s27 = smov 2048  }
 0x540   : > { %s4491_s8 = sshll.u32 %s4478_s7, 4  ;;  %5419 = sst [smem:[#allocation12]] (%p6422_p3), %s6300_s27  ;;  %s4492_s8 = int_to_ptr.hbm [resolvable:$true] %s4491_s8 }
 0x541   : > { %s6301_s17 = smov 4096   ;;  %s6302_s11 = smov 16  }
 0x542   : > { %5420 = sst [smem:[#allocation12 + $0x1]] (%p6422_p3), %s6301_s17  ;;  %s6303_s22 = smov 128  }
 0x543   : > { %5421 = sst [smem:[#allocation12 + $0x2]] (%p6422_p3), %s6302_s11  ;;  %s6304_s24 = smov 8  }
 0x544   : > { %5422 = sst [smem:[#allocation12 + $0x3]] (%p6422_p3), %s6303_s22  ;;  %s6305_s29 = smov [#allocation11]  }
 0x545   : > { %5423 = sst [smem:[#allocation12 + $0x4]] (%p6422_p3), %s6303_s22  ;;  %s6306_s28 = smov 0  }
 0x546   : > { %5424 = sst [smem:[#allocation12 + $0x5]] (%p6422_p3), %s6304_s24 }
 0x547   : > { %5425 = dma.general (%p6422_p3), %s4490_s12, 8192, %s4492_s8, %s4467_s6, %s6305_s29, [#allocation12], %s6306_s28, 0  }
 0x548 PF: > { %s4519_s16 = sand.u32 1, %s6279_s18   ;;  %p8980_p1 = scmp.ge.s32.totalorder %s6291_s21, 2 }
 0x549   : > { %s4520_s23 = scalar_lea.sflag [#allocation4], %s4519_s16 }
 0x54a   : > { %p5442_p4 = pnand %p8980_p1, %p6372_p6 }
 0x54c   : > { %p5443_p8 = pneg %p5442_p4 }
 0x54e   : > { %6274 = dma.done.wait (%p5443_p8), %s4520_s23, 8192  }
 0x54f   : > { %6276 = vsyncadd (%p5443_p8), %s4520_s23, 4294959104  ;;  %p20_p11 = scmp.ge.s32.totalorder %s6409_s30, 4   ;;  %s8981_s18 = smov %s6283_s19 }
 0x550   : > { %s8982_s19 = smov %s6287_s20  ;;  %s8983_s20 = smov %s6418_s9 }
 0x551   : > { %s8984_s21 = smov %s6409_s30  ;;  %22 = sbr.rel (!%p20_p11) target bundleno = 7 (0x7), region = 105 }
 0x556   :  { %4526 = vsyncpa [#allocation3], 1 }
 0x557   :  { %4528 = vsyncpa [#allocation3 + $0x1], 1 }
 0x558   :  { %4529 = vsyncpa [#allocation6], 1 }
 0x559   :  { %4530 = vsyncpa [#allocation9], 1 }
 0x55a   :  { %4531 = vsyncpa [#allocation4], 1 }
 0x55b   :  { %4533 = vsyncpa [#allocation4 + $0x1], 1 }

</bundles_post_ra>
